<compile_context>
chip_gen: v5e
topology: v5e:2x2
jax: 0.10.0
libtpu: 0.0.40
codegen_flags: <defaults>
</compile_context>

<pallas_src>
import jax
import jax.numpy as jnp
from jax import lax
from jax.experimental import pallas as pl
from jax.experimental.pallas import tpu as pltpu


# ----------------------------------------------------------------------------
# Fused multi-layer LSTM encoder kernel (grid axis = encoder index).
# Internal layout: time-major flattened (T*Bp, feat) with Bp a multiple of 8.
# Only the final hidden state of the last layer (the latent) is written out.
# ----------------------------------------------------------------------------
def _make_encoder_kernel(num_layers, hidden, batch_pad):
    E, L, Bp = hidden, num_layers, batch_pad

    def kernel(x_ref, w_ih0_ref, w_ihr_ref, w_hh_ref, b_ref, latent_ref, seq_scr):
        TB = x_ref.shape[1]
        T = TB // Bp
        h = jnp.zeros((Bp, E), jnp.float32)
        for l in range(L):
            if l == 0:
                seq_in = x_ref[0]                  # (T*Bp, Fp)
                w_ih = w_ih0_ref[0]                # (Fp, 4E)
            else:
                seq_in = seq_scr[...]              # (T*Bp, E)
                w_ih = w_ihr_ref[0, l - 1]         # (E, 4E)
            w_hh = w_hh_ref[0, l]                  # (E, 4E)
            b = b_ref[0, l]                        # (1, 4E)

            # Hoisted input projection: one matmul per layer, bias folded in once.
            gx = jnp.dot(seq_in, w_ih, preferred_element_type=jnp.float32) + b

            h = jnp.zeros((Bp, E), jnp.float32)
            c = jnp.zeros((Bp, E), jnp.float32)
            for t in range(T):                     # fully unrolled (static T)
                g = gx[t * Bp:(t + 1) * Bp, :] + jnp.dot(
                    h, w_hh, preferred_element_type=jnp.float32)
                i_g = jax.nn.sigmoid(g[:, 0 * E:1 * E])
                f_g = jax.nn.sigmoid(g[:, 1 * E:2 * E])
                g_g = jnp.tanh(g[:, 2 * E:3 * E])
                o_g = jax.nn.sigmoid(g[:, 3 * E:4 * E])
                c = f_g * c + i_g * g_g
                h = o_g * jnp.tanh(c)
                if l < L - 1:                      # last layer only needs final h
                    seq_scr[t * Bp:(t + 1) * Bp, :] = h
        latent_ref[0] = h                          # == hidden[-1] of the stack

    return kernel


def encoders_pallas(x_stacked, w_ih0, w_ihr, w_hh, b, *, num_layers, hidden, batch_pad):
    """x_stacked: (N, T*Bp, Fp) time-major-flattened inputs for N independent encoders."""
    N, TB, Fp = x_stacked.shape
    E, L, Bp = hidden, num_layers, batch_pad
    Lr = w_ihr.shape[1]
    kernel = _make_encoder_kernel(L, E, Bp)
    return pl.pallas_call(
        kernel,
        out_shape=jax.ShapeDtypeStruct((N, Bp, E), jnp.float32),
        grid_spec=pltpu.PrefetchScalarGridSpec(
            num_scalar_prefetch=0,
            grid=(N,),
            in_specs=[
                pl.BlockSpec((1, TB, Fp), lambda e: (e, 0, 0)),
                pl.BlockSpec((1, Fp, 4 * E), lambda e: (e, 0, 0)),
                pl.BlockSpec((1, Lr, E, 4 * E), lambda e: (e, 0, 0, 0)),
                pl.BlockSpec((1, L, E, 4 * E), lambda e: (e, 0, 0, 0)),
                pl.BlockSpec((1, L, 1, 4 * E), lambda e: (e, 0, 0, 0)),
            ],
            out_specs=pl.BlockSpec((1, Bp, E), lambda e: (e, 0, 0)),
            scratch_shapes=[pltpu.VMEM((TB, E), jnp.float32)],
        ),
        compiler_params=pltpu.CompilerParams(
            dimension_semantics=("parallel",)),    # independent encoders -> both TCs on v7x
    )(x_stacked, w_ih0, w_ihr, w_hh, b)


# ----------------------------------------------------------------------------
# Fused decoder kernel: all LSTM layers + output Linear in a single call.
# Inter-layer sequences stay in VMEM scratch; only (T*Bp, Op) y is stored.
# ----------------------------------------------------------------------------
def _make_decoder_kernel(num_layers, hidden, batch_pad):
    D, L, Bp = hidden, num_layers, batch_pad

    def kernel(x_ref, w_ih_ref, w_hh_ref, b_ref, w_out_ref, b_out_ref, y_ref, seq_scr):
        TB = x_ref.shape[0]
        T = TB // Bp
        for l in range(L):
            seq_in = x_ref[...] if l == 0 else seq_scr[...]   # (T*Bp, D)
            w_ih = w_ih_ref[l]                                 # (D, 4D)
            w_hh = w_hh_ref[l]                                 # (D, 4D)
            b = b_ref[l]                                       # (1, 4D)
            gx = jnp.dot(seq_in, w_ih, preferred_element_type=jnp.float32) + b
            h = jnp.zeros((Bp, D), jnp.float32)
            c = jnp.zeros((Bp, D), jnp.float32)
            for t in range(T):                                 # fully unrolled
                g = gx[t * Bp:(t + 1) * Bp, :] + jnp.dot(
                    h, w_hh, preferred_element_type=jnp.float32)
                i_g = jax.nn.sigmoid(g[:, 0 * D:1 * D])
                f_g = jax.nn.sigmoid(g[:, 1 * D:2 * D])
                g_g = jnp.tanh(g[:, 2 * D:3 * D])
                o_g = jax.nn.sigmoid(g[:, 3 * D:4 * D])
                c = f_g * c + i_g * g_g
                h = o_g * jnp.tanh(c)
                seq_scr[t * Bp:(t + 1) * Bp, :] = h
        # Output Linear on the whole sequence at once (lane-padded -> dense store).
        y_ref[...] = jnp.dot(seq_scr[...], w_out_ref[...],
                             preferred_element_type=jnp.float32) + b_out_ref[...]

    return kernel


def decoder_pallas(x2d, w_ih, w_hh, b, w_out_t, b_out, *, num_layers, batch_pad):
    TB, D = x2d.shape
    Op = w_out_t.shape[1]
    L = num_layers
    kernel = _make_decoder_kernel(L, D, batch_pad)
    return pl.pallas_call(
        kernel,
        out_shape=jax.ShapeDtypeStruct((TB, Op), jnp.float32),
        grid_spec=pltpu.PrefetchScalarGridSpec(
            num_scalar_prefetch=0,
            grid=(1,),
            in_specs=[
                pl.BlockSpec((TB, D), lambda i: (0, 0)),
                pl.BlockSpec((L, D, 4 * D), lambda i: (0, 0, 0)),
                pl.BlockSpec((L, D, 4 * D), lambda i: (0, 0, 0)),
                pl.BlockSpec((L, 1, 4 * D), lambda i: (0, 0, 0)),
                pl.BlockSpec((D, Op), lambda i: (0, 0)),
                pl.BlockSpec((1, Op), lambda i: (0, 0)),
            ],
            out_specs=pl.BlockSpec((TB, Op), lambda i: (0, 0)),
            scratch_shapes=[pltpu.VMEM((TB, D), jnp.float32)],
        ),
        compiler_params=pltpu.CompilerParams(dimension_semantics=("arbitrary",)),
    )(x2d, w_ih, w_hh, b, w_out_t, b_out)


# ----------------------------------------------------------------------------
# Full module forward (Pallas): (comp0, comp1) -> (loss, reconstructed_x)
# ----------------------------------------------------------------------------
def _stack_encoder_params(enc_list):
    L = len(enc_list[0])
    E = enc_list[0][0]["w_hh_t"].shape[0]
    w_ih0 = jnp.stack([enc[0]["w_ih_t"] for enc in enc_list])             # (N, F, 4E)
    if L > 1:
        w_ihr = jnp.stack(
            [jnp.stack([enc[l]["w_ih_t"] for l in range(1, L)]) for enc in enc_list])
    else:                                                                 # unused dummy
        w_ihr = jnp.zeros((len(enc_list), 1, E, 4 * E), jnp.float32)
    w_hh = jnp.stack([jnp.stack([lay["w_hh_t"] for lay in enc]) for enc in enc_list])
    b = jnp.stack([jnp.stack([lay["b"] for lay in enc]) for enc in enc_list])
    return w_ih0, w_ihr, w_hh, b


@jax.jit
def lstm_ae_multi_encoder_forward_pallas(comp0, comp1, params):
    B, T0, F = comp0.shape
    _, T1, _ = comp1.shape
    enc0 = params["enc"][0]
    L = len(enc0)
    E = enc0[0]["w_hh_t"].shape[0]
    D = 2 * E
    O = params["b_out"].shape[1]

    # Pad batch to a sublane-full multiple of 8 (free: recurrence latency is batch-independent).
    Bp = ((B + 7) // 8) * 8
    pad_b = Bp - B
    c0 = jnp.pad(comp0.astype(jnp.float32), ((0, pad_b), (0, 0), (0, 0)))
    c1 = jnp.pad(comp1.astype(jnp.float32), ((0, pad_b), (0, 0), (0, 0)))
    # Time-major flatten: (Bp, T, F) -> (T*Bp, F); zero-pad features to a multiple of 8.
    Fp = ((F + 7) // 8) * 8
    x0 = jnp.pad(jnp.transpose(c0, (1, 0, 2)).reshape(T0 * Bp, F), ((0, 0), (0, Fp - F)))
    x1 = jnp.pad(jnp.transpose(c1, (1, 0, 2)).reshape(T1 * Bp, F), ((0, 0), (0, Fp - F)))

    w_ih0, w_ihr, w_hh, b = _stack_encoder_params(params["enc"])
    w_ih0 = jnp.pad(w_ih0, ((0, 0), (0, Fp - F), (0, 0)))

    if T0 == T1:
        lat = encoders_pallas(jnp.stack([x0, x1]), w_ih0, w_ihr, w_hh, b,
                              num_layers=L, hidden=E, batch_pad=Bp)       # (2, Bp, E)
        lat0, lat1 = lat[0], lat[1]
    else:  # different sequence lengths -> one call per encoder
        lat0 = encoders_pallas(x0[None], w_ih0[:1], w_ihr[:1], w_hh[:1], b[:1],
                               num_layers=L, hidden=E, batch_pad=Bp)[0]
        lat1 = encoders_pallas(x1[None], w_ih0[1:], w_ihr[1:], w_hh[1:], b[1:],
                               num_layers=L, hidden=E, batch_pad=Bp)[0]

    latent = jnp.concatenate([lat0, lat1], axis=1)                        # (Bp, 2E)

    # stacked_LV = repeat_interleave(latent, total, dim=1).reshape(-1, total, 2E)
    total = T0 + T1
    stacked = jnp.repeat(latent, total, axis=1).reshape(Bp, total, D)
    dec_in = jnp.transpose(stacked, (1, 0, 2)).reshape(total * Bp, D)

    dw_ih = jnp.stack([lay["w_ih_t"] for lay in params["dec"]])           # (L, D, 4D)
    dw_hh = jnp.stack([lay["w_hh_t"] for lay in params["dec"]])
    db = jnp.stack([lay["b"] for lay in params["dec"]])                   # (L, 1, 4D)

    # Lane-pad the output projection so the single HBM store is lane-dense.
    Op = ((O + 127) // 128) * 128
    w_out_p = jnp.pad(params["w_out_t"], ((0, 0), (0, Op - O)))
    b_out_p = jnp.pad(params["b_out"], ((0, 0), (0, Op - O)))

    y2d = decoder_pallas(dec_in, dw_ih, dw_hh, db, w_out_p, b_out_p,
                         num_layers=L, batch_pad=Bp)                      # (total*Bp, Op)

    recon = jnp.transpose(y2d.reshape(total, Bp, Op)[:, :B, :O], (1, 0, 2))  # (B, total, O)
    original = jnp.concatenate([comp0, comp1], axis=1).astype(jnp.float32)
    loss = jnp.mean((recon - original) ** 2)
    return loss, recon


# ----------------------------------------------------------------------------
# Pure-JAX reference (lax.scan) for the correctness check
# ----------------------------------------------------------------------------
def _lstm_stack_ref(x_bti, layers):
    x = jnp.transpose(x_bti, (1, 0, 2)).astype(jnp.float32)   # (T, B, In)
    B = x.shape[1]
    h_last = None
    for lay in layers:
        w_ih_t, w_hh_t, bias = lay["w_ih_t"], lay["w_hh_t"], lay["b"]
        H = w_hh_t.shape[0]

        def step(carry, x_t, w_ih_t=w_ih_t, w_hh_t=w_hh_t, bias=bias, H=H):
            h, c = carry
            g = x_t @ w_ih_t + h @ w_hh_t + bias
            i_g = jax.nn.sigmoid(g[:, 0 * H:1 * H])
            f_g = jax.nn.sigmoid(g[:, 1 * H:2 * H])
            g_g = jnp.tanh(g[:, 2 * H:3 * H])
            o_g = jax.nn.sigmoid(g[:, 3 * H:4 * H])
            c = f_g * c + i_g * g_g
            h = o_g * jnp.tanh(c)
            return (h, c), h

        init = (jnp.zeros((B, H), jnp.float32), jnp.zeros((B, H), jnp.float32))
        (h_last, _), x = lax.scan(step, init, x)
    return jnp.transpose(x, (1, 0, 2)), h_last


def lstm_ae_multi_encoder_forward_ref(comp0, comp1, params):
    E = params["enc"][0][0]["w_hh_t"].shape[0]
    D = 2 * E
    _, lat0 = _lstm_stack_ref(comp0, params["enc"][0])
    _, lat1 = _lstm_stack_ref(comp1, params["enc"][1])
    latent = jnp.concatenate([lat0, lat1], axis=1)                        # (B, 2E)
    total = comp0.shape[1] + comp1.shape[1]
    stacked = jnp.repeat(latent, total, axis=1).reshape(-1, total, D)     # (B, total, 2E)
    dec_seq, _ = _lstm_stack_ref(stacked, params["dec"])                  # (B, total, D)
    y = dec_seq @ params["w_out_t"] + params["b_out"]
    original = jnp.concatenate([comp0, comp1], axis=1).astype(jnp.float32)
    loss = jnp.mean((y - original) ** 2)
    return loss, y


# ----------------------------------------------------------------------------
# Deterministic parameter init (matches nn.LSTM / nn.Linear shapes)
# ----------------------------------------------------------------------------
def init_params(key, n_features, emb_dim, lstm_layers):
    def lstm_stack(key, input_dim, hidden, num_layers):
        bound = 1.0 / (hidden ** 0.5)
        layers = []
        in_dim = input_dim
        for _ in range(num_layers):
            key, k1, k2, k3, k4 = jax.random.split(key, 5)
            w_ih = jax.random.uniform(k1, (4 * hidden, in_dim), jnp.float32, -bound, bound)
            w_hh = jax.random.uniform(k2, (4 * hidden, hidden), jnp.float32, -bound, bound)
            b_ih = jax.random.uniform(k3, (4 * hidden,), jnp.float32, -bound, bound)
            b_hh = jax.random.uniform(k4, (4 * hidden,), jnp.float32, -bound, bound)
            layers.append({
                "w_ih_t": w_ih.T,                            # (in, 4H)
                "w_hh_t": w_hh.T,                            # (H, 4H)
                "b": (b_ih + b_hh).reshape(1, 4 * hidden),   # (1, 4H) fused bias
            })
            in_dim = hidden
        return key, layers

    E, F = emb_dim, n_features
    D = 2 * E
    key, enc0 = lstm_stack(key, F, E, lstm_layers)
    key, enc1 = lstm_stack(key, F, E, lstm_layers)
    key, dec = lstm_stack(key, D, D, lstm_layers)
    bound = 1.0 / (D ** 0.5)
    key, k1, k2 = jax.random.split(key, 3)
    w_out = jax.random.uniform(k1, (F, D), jnp.float32, -bound, bound)
    b_out = jax.random.uniform(k2, (F,), jnp.float32, -bound, bound)
    return {
        "enc": [enc0, enc1],
        "dec": dec,
        "w_out_t": w_out.T,               # (D, F)
        "b_out": b_out.reshape(1, F),     # (1, F)
    }


if __name__ == "__main__":
    # LSTM_AE_MultiEncoder(n_features=4, emb_dim=32, dropout=0.2, lstm_layers=2)
    # applied to x = (comp0, comp1), each of shape (batch=2, seq=8, n_features=4).
    B, T, F, E, L = 2, 8, 4, 32, 2

    key = jax.random.PRNGKey(0)
    key, k0, k1 = jax.random.split(key, 3)
    comp0 = jax.random.normal(k0, (B, T, F), jnp.float32)
    comp1 = jax.random.normal(k1, (B, T, F), jnp.float32)
    params = init_params(key, n_features=F, emb_dim=E, lstm_layers=L)

    loss, recon = lstm_ae_multi_encoder_forward_pallas(comp0, comp1, params)
    loss, recon = jax.block_until_ready((loss, recon))
    assert recon.shape == (B, 2 * T, F), recon.shape

    ref_loss, ref_recon = lstm_ae_multi_encoder_forward_ref(comp0, comp1, params)
    assert jnp.allclose(recon, ref_recon, atol=3e-3, rtol=3e-3), (
        float(jnp.max(jnp.abs(recon - ref_recon))))
    assert jnp.allclose(loss, ref_loss, atol=3e-3, rtol=3e-3), (
        float(loss), float(ref_loss))

    print("KERNEL_OK")
</pallas_src>

<mosaic_0001>
module attributes {stable_mosaic.version = 11 : i64} {
  func.func @kernel(%arg0: i32, %arg1: memref<1x64x8xf32, #tpu.memory_space<vmem>>, %arg2: memref<1x8x128xf32, #tpu.memory_space<vmem>>, %arg3: memref<1x1x32x128xf32, #tpu.memory_space<vmem>>, %arg4: memref<1x2x32x128xf32, #tpu.memory_space<vmem>>, %arg5: memref<1x2x1x128xf32, #tpu.memory_space<vmem>>, %arg6: memref<1x8x32xf32, #tpu.memory_space<vmem>>, %arg7: memref<64x32xf32, #tpu.memory_space<vmem>>) attributes {dimension_semantics = [#tpu.dimension_semantics<parallel>], iteration_bounds = array<i64: 2>, scalar_prefetch = 0 : i64, scratch_operands = 1 : i64, tpu.core_type = #tpu.core_type<tc>, window_params = [{transform_indices = @transform_0, window_bounds = array<i64: 1, 64, 8>}, {transform_indices = @transform_1, window_bounds = array<i64: 1, 8, 128>}, {transform_indices = @transform_2, window_bounds = array<i64: 1, 1, 32, 128>}, {transform_indices = @transform_3, window_bounds = array<i64: 1, 2, 32, 128>}, {transform_indices = @transform_4, window_bounds = array<i64: 1, 2, 1, 128>}, {transform_indices = @transform_5, window_bounds = array<i64: 1, 8, 32>}]} {
    %c0 = arith.constant 0 : index
    %c0_0 = arith.constant 0 : index
    %c0_1 = arith.constant 0 : index
    %0 = vector.load %arg1[%c0, %c0_0, %c0_1] : memref<1x64x8xf32, #tpu.memory_space<vmem>>, vector<1x64x8xf32>
    %1 = vector.shape_cast %0 : vector<1x64x8xf32> to vector<64x8xf32>
    %c0_2 = arith.constant 0 : index
    %c0_3 = arith.constant 0 : index
    %c0_4 = arith.constant 0 : index
    %2 = vector.load %arg2[%c0_2, %c0_3, %c0_4] : memref<1x8x128xf32, #tpu.memory_space<vmem>>, vector<1x8x128xf32>
    %3 = vector.shape_cast %2 : vector<1x8x128xf32> to vector<8x128xf32>
    %c0_5 = arith.constant 0 : index
    %c0_6 = arith.constant 0 : index
    %c0_7 = arith.constant 0 : index
    %c0_8 = arith.constant 0 : index
    %4 = vector.load %arg4[%c0_5, %c0_6, %c0_7, %c0_8] : memref<1x2x32x128xf32, #tpu.memory_space<vmem>>, vector<1x1x32x128xf32>
    %5 = vector.shape_cast %4 : vector<1x1x32x128xf32> to vector<32x128xf32>
    %c0_9 = arith.constant 0 : index
    %c0_10 = arith.constant 0 : index
    %c0_11 = arith.constant 0 : index
    %c0_12 = arith.constant 0 : index
    %6 = vector.load %arg5[%c0_9, %c0_10, %c0_11, %c0_12] : memref<1x2x1x128xf32, #tpu.memory_space<vmem>>, vector<1x1x1x128xf32>
    %7 = vector.shape_cast %6 : vector<1x1x1x128xf32> to vector<1x128xf32>
    %cst = arith.constant dense<0.000000e+00> : vector<64x128xf32>
    %8 = tpu.matmul %1, %3, %cst {dimension_numbers = #tpu.dot_dimension_numbers<[1], [0], [0], [1], [0, 0, 1, 1], [], []>} : vector<64x8xf32>, vector<8x128xf32>, vector<64x128xf32> -> vector<64x128xf32>
    %9 = vector.broadcast %7 : vector<1x128xf32> to vector<64x128xf32>
    %10 = arith.addf %8, %9 : vector<64x128xf32>
    %cst_13 = arith.constant 0.000000e+00 : f32
    %11 = vector.broadcast %cst_13 : f32 to vector<8x32xf32>
    %cst_14 = arith.constant 0.000000e+00 : f32
    %12 = vector.broadcast %cst_14 : f32 to vector<8x32xf32>
    %13 = vector.extract_strided_slice %10 {offsets = [0, 0], sizes = [8, 128], strides = [1, 1]} : vector<64x128xf32> to vector<8x128xf32>
    %cst_15 = arith.constant dense<0.000000e+00> : vector<8x128xf32>
    %14 = tpu.matmul %11, %5, %cst_15 {dimension_numbers = #tpu.dot_dimension_numbers<[1], [0], [0], [1], [0, 0, 1, 1], [], []>} : vector<8x32xf32>, vector<32x128xf32>, vector<8x128xf32> -> vector<8x128xf32>
    %15 = arith.addf %13, %14 : vector<8x128xf32>
    %16 = vector.extract_strided_slice %15 {offsets = [0, 0], sizes = [8, 32], strides = [1, 1]} : vector<8x128xf32> to vector<8x32xf32>
    %17 = arith.negf %16 : vector<8x32xf32>
    %18 = math.exp %17 : vector<8x32xf32>
    %cst_16 = arith.constant 1.000000e+00 : f32
    %19 = vector.broadcast %cst_16 : f32 to vector<8x32xf32>
    %20 = arith.addf %19, %18 : vector<8x32xf32>
    %21 = arith.divf %19, %20 : vector<8x32xf32>
    %22 = vector.extract_strided_slice %15 {offsets = [0, 32], sizes = [8, 32], strides = [1, 1]} : vector<8x128xf32> to vector<8x32xf32>
    %23 = arith.negf %22 : vector<8x32xf32>
    %24 = math.exp %23 : vector<8x32xf32>
    %cst_17 = arith.constant 1.000000e+00 : f32
    %25 = vector.broadcast %cst_17 : f32 to vector<8x32xf32>
    %26 = arith.addf %25, %24 : vector<8x32xf32>
    %27 = arith.divf %25, %26 : vector<8x32xf32>
    %28 = vector.extract_strided_slice %15 {offsets = [0, 64], sizes = [8, 32], strides = [1, 1]} : vector<8x128xf32> to vector<8x32xf32>
    %29 = math.tanh %28 : vector<8x32xf32>
    %30 = vector.extract_strided_slice %15 {offsets = [0, 96], sizes = [8, 32], strides = [1, 1]} : vector<8x128xf32> to vector<8x32xf32>
    %31 = arith.negf %30 : vector<8x32xf32>
    %32 = math.exp %31 : vector<8x32xf32>
    %cst_18 = arith.constant 1.000000e+00 : f32
    %33 = vector.broadcast %cst_18 : f32 to vector<8x32xf32>
    %34 = arith.addf %33, %32 : vector<8x32xf32>
    %35 = arith.divf %33, %34 : vector<8x32xf32>
    %36 = arith.mulf %27, %12 : vector<8x32xf32>
    %37 = arith.mulf %21, %29 : vector<8x32xf32>
    %38 = arith.addf %36, %37 : vector<8x32xf32>
    %39 = math.tanh %38 : vector<8x32xf32>
    %40 = arith.mulf %35, %39 : vector<8x32xf32>
    %c0_19 = arith.constant 0 : index
    %c0_20 = arith.constant 0 : index
    %41 = vector.load %arg7[%c0_19, %c0_20] : memref<64x32xf32, #tpu.memory_space<vmem>>, vector<8x32xf32>
    tpu.vector_store %arg7[%c0_19, %c0_20], %40 {strides = array<i32>} : memref<64x32xf32, #tpu.memory_space<vmem>>, vector<8x32xf32>,
    %42 = vector.extract_strided_slice %10 {offsets = [8, 0], sizes = [8, 128], strides = [1, 1]} : vector<64x128xf32> to vector<8x128xf32>
    %cst_21 = arith.constant dense<0.000000e+00> : vector<8x128xf32>
    %43 = tpu.matmul %40, %5, %cst_21 {dimension_numbers = #tpu.dot_dimension_numbers<[1], [0], [0], [1], [0, 0, 1, 1], [], []>} : vector<8x32xf32>, vector<32x128xf32>, vector<8x128xf32> -> vector<8x128xf32>
    %44 = arith.addf %42, %43 : vector<8x128xf32>
    %45 = vector.extract_strided_slice %44 {offsets = [0, 0], sizes = [8, 32], strides = [1, 1]} : vector<8x128xf32> to vector<8x32xf32>
    %46 = arith.negf %45 : vector<8x32xf32>
    %47 = math.exp %46 : vector<8x32xf32>
    %cst_22 = arith.constant 1.000000e+00 : f32
    %48 = vector.broadcast %cst_22 : f32 to vector<8x32xf32>
    %49 = arith.addf %48, %47 : vector<8x32xf32>
    %50 = arith.divf %48, %49 : vector<8x32xf32>
    %51 = vector.extract_strided_slice %44 {offsets = [0, 32], sizes = [8, 32], strides = [1, 1]} : vector<8x128xf32> to vector<8x32xf32>
    %52 = arith.negf %51 : vector<8x32xf32>
    %53 = math.exp %52 : vector<8x32xf32>
    %cst_23 = arith.constant 1.000000e+00 : f32
    %54 = vector.broadcast %cst_23 : f32 to vector<8x32xf32>
    %55 = arith.addf %54, %53 : vector<8x32xf32>
    %56 = arith.divf %54, %55 : vector<8x32xf32>
    %57 = vector.extract_strided_slice %44 {offsets = [0, 64], sizes = [8, 32], strides = [1, 1]} : vector<8x128xf32> to vector<8x32xf32>
    %58 = math.tanh %57 : vector<8x32xf32>
    %59 = vector.extract_strided_slice %44 {offsets = [0, 96], sizes = [8, 32], strides = [1, 1]} : vector<8x128xf32> to vector<8x32xf32>
    %60 = arith.negf %59 : vector<8x32xf32>
    %61 = math.exp %60 : vector<8x32xf32>
    %cst_24 = arith.constant 1.000000e+00 : f32
    %62 = vector.broadcast %cst_24 : f32 to vector<8x32xf32>
    %63 = arith.addf %62, %61 : vector<8x32xf32>
    %64 = arith.divf %62, %63 : vector<8x32xf32>
    %65 = arith.mulf %56, %38 : vector<8x32xf32>
    %66 = arith.mulf %50, %58 : vector<8x32xf32>
    %67 = arith.addf %65, %66 : vector<8x32xf32>
    %68 = math.tanh %67 : vector<8x32xf32>
    %69 = arith.mulf %64, %68 : vector<8x32xf32>
    %c8 = arith.constant 8 : index
    %c0_25 = arith.constant 0 : index
    %70 = vector.load %arg7[%c8, %c0_25] : memref<64x32xf32, #tpu.memory_space<vmem>>, vector<8x32xf32>
    tpu.vector_store %arg7[%c8, %c0_25], %69 {strides = array<i32>} : memref<64x32xf32, #tpu.memory_space<vmem>>, vector<8x32xf32>,
    %71 = vector.extract_strided_slice %10 {offsets = [16, 0], sizes = [8, 128], strides = [1, 1]} : vector<64x128xf32> to vector<8x128xf32>
    %cst_26 = arith.constant dense<0.000000e+00> : vector<8x128xf32>
    %72 = tpu.matmul %69, %5, %cst_26 {dimension_numbers = #tpu.dot_dimension_numbers<[1], [0], [0], [1], [0, 0, 1, 1], [], []>} : vector<8x32xf32>, vector<32x128xf32>, vector<8x128xf32> -> vector<8x128xf32>
    %73 = arith.addf %71, %72 : vector<8x128xf32>
    %74 = vector.extract_strided_slice %73 {offsets = [0, 0], sizes = [8, 32], strides = [1, 1]} : vector<8x128xf32> to vector<8x32xf32>
    %75 = arith.negf %74 : vector<8x32xf32>
    %76 = math.exp %75 : vector<8x32xf32>
    %cst_27 = arith.constant 1.000000e+00 : f32
    %77 = vector.broadcast %cst_27 : f32 to vector<8x32xf32>
    %78 = arith.addf %77, %76 : vector<8x32xf32>
    %79 = arith.divf %77, %78 : vector<8x32xf32>
    %80 = vector.extract_strided_slice %73 {offsets = [0, 32], sizes = [8, 32], strides = [1, 1]} : vector<8x128xf32> to vector<8x32xf32>
    %81 = arith.negf %80 : vector<8x32xf32>
    %82 = math.exp %81 : vector<8x32xf32>
    %cst_28 = arith.constant 1.000000e+00 : f32
    %83 = vector.broadcast %cst_28 : f32 to vector<8x32xf32>
    %84 = arith.addf %83, %82 : vector<8x32xf32>
    %85 = arith.divf %83, %84 : vector<8x32xf32>
    %86 = vector.extract_strided_slice %73 {offsets = [0, 64], sizes = [8, 32], strides = [1, 1]} : vector<8x128xf32> to vector<8x32xf32>
    %87 = math.tanh %86 : vector<8x32xf32>
    %88 = vector.extract_strided_slice %73 {offsets = [0, 96], sizes = [8, 32], strides = [1, 1]} : vector<8x128xf32> to vector<8x32xf32>
    %89 = arith.negf %88 : vector<8x32xf32>
    %90 = math.exp %89 : vector<8x32xf32>
    %cst_29 = arith.constant 1.000000e+00 : f32
    %91 = vector.broadcast %cst_29 : f32 to vector<8x32xf32>
    %92 = arith.addf %91, %90 : vector<8x32xf32>
    %93 = arith.divf %91, %92 : vector<8x32xf32>
    %94 = arith.mulf %85, %67 : vector<8x32xf32>
    %95 = arith.mulf %79, %87 : vector<8x32xf32>
    %96 = arith.addf %94, %95 : vector<8x32xf32>
    %97 = math.tanh %96 : vector<8x32xf32>
    %98 = arith.mulf %93, %97 : vector<8x32xf32>
    %c16 = arith.constant 16 : index
    %c0_30 = arith.constant 0 : index
    %99 = vector.load %arg7[%c16, %c0_30] : memref<64x32xf32, #tpu.memory_space<vmem>>, vector<8x32xf32>
    tpu.vector_store %arg7[%c16, %c0_30], %98 {strides = array<i32>} : memref<64x32xf32, #tpu.memory_space<vmem>>, vector<8x32xf32>,
    %100 = vector.extract_strided_slice %10 {offsets = [24, 0], sizes = [8, 128], strides = [1, 1]} : vector<64x128xf32> to vector<8x128xf32>
    %cst_31 = arith.constant dense<0.000000e+00> : vector<8x128xf32>
    %101 = tpu.matmul %98, %5, %cst_31 {dimension_numbers = #tpu.dot_dimension_numbers<[1], [0], [0], [1], [0, 0, 1, 1], [], []>} : vector<8x32xf32>, vector<32x128xf32>, vector<8x128xf32> -> vector<8x128xf32>
    %102 = arith.addf %100, %101 : vector<8x128xf32>
    %103 = vector.extract_strided_slice %102 {offsets = [0, 0], sizes = [8, 32], strides = [1, 1]} : vector<8x128xf32> to vector<8x32xf32>
    %104 = arith.negf %103 : vector<8x32xf32>
    %105 = math.exp %104 : vector<8x32xf32>
    %cst_32 = arith.constant 1.000000e+00 : f32
    %106 = vector.broadcast %cst_32 : f32 to vector<8x32xf32>
    %107 = arith.addf %106, %105 : vector<8x32xf32>
    %108 = arith.divf %106, %107 : vector<8x32xf32>
    %109 = vector.extract_strided_slice %102 {offsets = [0, 32], sizes = [8, 32], strides = [1, 1]} : vector<8x128xf32> to vector<8x32xf32>
    %110 = arith.negf %109 : vector<8x32xf32>
    %111 = math.exp %110 : vector<8x32xf32>
    %cst_33 = arith.constant 1.000000e+00 : f32
    %112 = vector.broadcast %cst_33 : f32 to vector<8x32xf32>
    %113 = arith.addf %112, %111 : vector<8x32xf32>
    %114 = arith.divf %112, %113 : vector<8x32xf32>
    %115 = vector.extract_strided_slice %102 {offsets = [0, 64], sizes = [8, 32], strides = [1, 1]} : vector<8x128xf32> to vector<8x32xf32>
    %116 = math.tanh %115 : vector<8x32xf32>
    %117 = vector.extract_strided_slice %102 {offsets = [0, 96], sizes = [8, 32], strides = [1, 1]} : vector<8x128xf32> to vector<8x32xf32>
    %118 = arith.negf %117 : vector<8x32xf32>
    %119 = math.exp %118 : vector<8x32xf32>
    %cst_34 = arith.constant 1.000000e+00 : f32
    %120 = vector.broadcast %cst_34 : f32 to vector<8x32xf32>
    %121 = arith.addf %120, %119 : vector<8x32xf32>
    %122 = arith.divf %120, %121 : vector<8x32xf32>
    %123 = arith.mulf %114, %96 : vector<8x32xf32>
    %124 = arith.mulf %108, %116 : vector<8x32xf32>
    %125 = arith.addf %123, %124 : vector<8x32xf32>
    %126 = math.tanh %125 : vector<8x32xf32>
    %127 = arith.mulf %122, %126 : vector<8x32xf32>
    %c24 = arith.constant 24 : index
    %c0_35 = arith.constant 0 : index
    %128 = vector.load %arg7[%c24, %c0_35] : memref<64x32xf32, #tpu.memory_space<vmem>>, vector<8x32xf32>
    tpu.vector_store %arg7[%c24, %c0_35], %127 {strides = array<i32>} : memref<64x32xf32, #tpu.memory_space<vmem>>, vector<8x32xf32>,
    %129 = vector.extract_strided_slice %10 {offsets = [32, 0], sizes = [8, 128], strides = [1, 1]} : vector<64x128xf32> to vector<8x128xf32>
    %cst_36 = arith.constant dense<0.000000e+00> : vector<8x128xf32>
    %130 = tpu.matmul %127, %5, %cst_36 {dimension_numbers = #tpu.dot_dimension_numbers<[1], [0], [0], [1], [0, 0, 1, 1], [], []>} : vector<8x32xf32>, vector<32x128xf32>, vector<8x128xf32> -> vector<8x128xf32>
    %131 = arith.addf %129, %130 : vector<8x128xf32>
    %132 = vector.extract_strided_slice %131 {offsets = [0, 0], sizes = [8, 32], strides = [1, 1]} : vector<8x128xf32> to vector<8x32xf32>
    %133 = arith.negf %132 : vector<8x32xf32>
    %134 = math.exp %133 : vector<8x32xf32>
    %cst_37 = arith.constant 1.000000e+00 : f32
    %135 = vector.broadcast %cst_37 : f32 to vector<8x32xf32>
    %136 = arith.addf %135, %134 : vector<8x32xf32>
    %137 = arith.divf %135, %136 : vector<8x32xf32>
    %138 = vector.extract_strided_slice %131 {offsets = [0, 32], sizes = [8, 32], strides = [1, 1]} : vector<8x128xf32> to vector<8x32xf32>
    %139 = arith.negf %138 : vector<8x32xf32>
    %140 = math.exp %139 : vector<8x32xf32>
    %cst_38 = arith.constant 1.000000e+00 : f32
    %141 = vector.broadcast %cst_38 : f32 to vector<8x32xf32>
    %142 = arith.addf %141, %140 : vector<8x32xf32>
    %143 = arith.divf %141, %142 : vector<8x32xf32>
    %144 = vector.extract_strided_slice %131 {offsets = [0, 64], sizes = [8, 32], strides = [1, 1]} : vector<8x128xf32> to vector<8x32xf32>
    %145 = math.tanh %144 : vector<8x32xf32>
    %146 = vector.extract_strided_slice %131 {offsets = [0, 96], sizes = [8, 32], strides = [1, 1]} : vector<8x128xf32> to vector<8x32xf32>
    %147 = arith.negf %146 : vector<8x32xf32>
    %148 = math.exp %147 : vector<8x32xf32>
    %cst_39 = arith.constant 1.000000e+00 : f32
    %149 = vector.broadcast %cst_39 : f32 to vector<8x32xf32>
    %150 = arith.addf %149, %148 : vector<8x32xf32>
    %151 = arith.divf %149, %150 : vector<8x32xf32>
    %152 = arith.mulf %143, %125 : vector<8x32xf32>
    %153 = arith.mulf %137, %145 : vector<8x32xf32>
    %154 = arith.addf %152, %153 : vector<8x32xf32>
    %155 = math.tanh %154 : vector<8x32xf32>
    %156 = arith.mulf %151, %155 : vector<8x32xf32>
    %c32 = arith.constant 32 : index
    %c0_40 = arith.constant 0 : index
    %157 = vector.load %arg7[%c32, %c0_40] : memref<64x32xf32, #tpu.memory_space<vmem>>, vector<8x32xf32>
    tpu.vector_store %arg7[%c32, %c0_40], %156 {strides = array<i32>} : memref<64x32xf32, #tpu.memory_space<vmem>>, vector<8x32xf32>,
    %158 = vector.extract_strided_slice %10 {offsets = [40, 0], sizes = [8, 128], strides = [1, 1]} : vector<64x128xf32> to vector<8x128xf32>
    %cst_41 = arith.constant dense<0.000000e+00> : vector<8x128xf32>
    %159 = tpu.matmul %156, %5, %cst_41 {dimension_numbers = #tpu.dot_dimension_numbers<[1], [0], [0], [1], [0, 0, 1, 1], [], []>} : vector<8x32xf32>, vector<32x128xf32>, vector<8x128xf32> -> vector<8x128xf32>
    %160 = arith.addf %158, %159 : vector<8x128xf32>
    %161 = vector.extract_strided_slice %160 {offsets = [0, 0], sizes = [8, 32], strides = [1, 1]} : vector<8x128xf32> to vector<8x32xf32>
    %162 = arith.negf %161 : vector<8x32xf32>
    %163 = math.exp %162 : vector<8x32xf32>
    %cst_42 = arith.constant 1.000000e+00 : f32
    %164 = vector.broadcast %cst_42 : f32 to vector<8x32xf32>
    %165 = arith.addf %164, %163 : vector<8x32xf32>
    %166 = arith.divf %164, %165 : vector<8x32xf32>
    %167 = vector.extract_strided_slice %160 {offsets = [0, 32], sizes = [8, 32], strides = [1, 1]} : vector<8x128xf32> to vector<8x32xf32>
    %168 = arith.negf %167 : vector<8x32xf32>
    %169 = math.exp %168 : vector<8x32xf32>
    %cst_43 = arith.constant 1.000000e+00 : f32
    %170 = vector.broadcast %cst_43 : f32 to vector<8x32xf32>
    %171 = arith.addf %170, %169 : vector<8x32xf32>
    %172 = arith.divf %170, %171 : vector<8x32xf32>
    %173 = vector.extract_strided_slice %160 {offsets = [0, 64], sizes = [8, 32], strides = [1, 1]} : vector<8x128xf32> to vector<8x32xf32>
    %174 = math.tanh %173 : vector<8x32xf32>
    %175 = vector.extract_strided_slice %160 {offsets = [0, 96], sizes = [8, 32], strides = [1, 1]} : vector<8x128xf32> to vector<8x32xf32>
    %176 = arith.negf %175 : vector<8x32xf32>
    %177 = math.exp %176 : vector<8x32xf32>
    %cst_44 = arith.constant 1.000000e+00 : f32
    %178 = vector.broadcast %cst_44 : f32 to vector<8x32xf32>
    %179 = arith.addf %178, %177 : vector<8x32xf32>
    %180 = arith.divf %178, %179 : vector<8x32xf32>
    %181 = arith.mulf %172, %154 : vector<8x32xf32>
    %182 = arith.mulf %166, %174 : vector<8x32xf32>
    %183 = arith.addf %181, %182 : vector<8x32xf32>
    %184 = math.tanh %183 : vector<8x32xf32>
    %185 = arith.mulf %180, %184 : vector<8x32xf32>
    %c40 = arith.constant 40 : index
    %c0_45 = arith.constant 0 : index
    %186 = vector.load %arg7[%c40, %c0_45] : memref<64x32xf32, #tpu.memory_space<vmem>>, vector<8x32xf32>
    tpu.vector_store %arg7[%c40, %c0_45], %185 {strides = array<i32>} : memref<64x32xf32, #tpu.memory_space<vmem>>, vector<8x32xf32>,
    %187 = vector.extract_strided_slice %10 {offsets = [48, 0], sizes = [8, 128], strides = [1, 1]} : vector<64x128xf32> to vector<8x128xf32>
    %cst_46 = arith.constant dense<0.000000e+00> : vector<8x128xf32>
    %188 = tpu.matmul %185, %5, %cst_46 {dimension_numbers = #tpu.dot_dimension_numbers<[1], [0], [0], [1], [0, 0, 1, 1], [], []>} : vector<8x32xf32>, vector<32x128xf32>, vector<8x128xf32> -> vector<8x128xf32>
    %189 = arith.addf %187, %188 : vector<8x128xf32>
    %190 = vector.extract_strided_slice %189 {offsets = [0, 0], sizes = [8, 32], strides = [1, 1]} : vector<8x128xf32> to vector<8x32xf32>
    %191 = arith.negf %190 : vector<8x32xf32>
    %192 = math.exp %191 : vector<8x32xf32>
    %cst_47 = arith.constant 1.000000e+00 : f32
    %193 = vector.broadcast %cst_47 : f32 to vector<8x32xf32>
    %194 = arith.addf %193, %192 : vector<8x32xf32>
    %195 = arith.divf %193, %194 : vector<8x32xf32>
    %196 = vector.extract_strided_slice %189 {offsets = [0, 32], sizes = [8, 32], strides = [1, 1]} : vector<8x128xf32> to vector<8x32xf32>
    %197 = arith.negf %196 : vector<8x32xf32>
    %198 = math.exp %197 : vector<8x32xf32>
    %cst_48 = arith.constant 1.000000e+00 : f32
    %199 = vector.broadcast %cst_48 : f32 to vector<8x32xf32>
    %200 = arith.addf %199, %198 : vector<8x32xf32>
    %201 = arith.divf %199, %200 : vector<8x32xf32>
    %202 = vector.extract_strided_slice %189 {offsets = [0, 64], sizes = [8, 32], strides = [1, 1]} : vector<8x128xf32> to vector<8x32xf32>
    %203 = math.tanh %202 : vector<8x32xf32>
    %204 = vector.extract_strided_slice %189 {offsets = [0, 96], sizes = [8, 32], strides = [1, 1]} : vector<8x128xf32> to vector<8x32xf32>
    %205 = arith.negf %204 : vector<8x32xf32>
    %206 = math.exp %205 : vector<8x32xf32>
    %cst_49 = arith.constant 1.000000e+00 : f32
    %207 = vector.broadcast %cst_49 : f32 to vector<8x32xf32>
    %208 = arith.addf %207, %206 : vector<8x32xf32>
    %209 = arith.divf %207, %208 : vector<8x32xf32>
    %210 = arith.mulf %201, %183 : vector<8x32xf32>
    %211 = arith.mulf %195, %203 : vector<8x32xf32>
    %212 = arith.addf %210, %211 : vector<8x32xf32>
    %213 = math.tanh %212 : vector<8x32xf32>
    %214 = arith.mulf %209, %213 : vector<8x32xf32>
    %c48 = arith.constant 48 : index
    %c0_50 = arith.constant 0 : index
    %215 = vector.load %arg7[%c48, %c0_50] : memref<64x32xf32, #tpu.memory_space<vmem>>, vector<8x32xf32>
    tpu.vector_store %arg7[%c48, %c0_50], %214 {strides = array<i32>} : memref<64x32xf32, #tpu.memory_space<vmem>>, vector<8x32xf32>,
    %216 = vector.extract_strided_slice %10 {offsets = [56, 0], sizes = [8, 128], strides = [1, 1]} : vector<64x128xf32> to vector<8x128xf32>
    %cst_51 = arith.constant dense<0.000000e+00> : vector<8x128xf32>
    %217 = tpu.matmul %214, %5, %cst_51 {dimension_numbers = #tpu.dot_dimension_numbers<[1], [0], [0], [1], [0, 0, 1, 1], [], []>} : vector<8x32xf32>, vector<32x128xf32>, vector<8x128xf32> -> vector<8x128xf32>
    %218 = arith.addf %216, %217 : vector<8x128xf32>
    %219 = vector.extract_strided_slice %218 {offsets = [0, 0], sizes = [8, 32], strides = [1, 1]} : vector<8x128xf32> to vector<8x32xf32>
    %220 = arith.negf %219 : vector<8x32xf32>
    %221 = math.exp %220 : vector<8x32xf32>
    %cst_52 = arith.constant 1.000000e+00 : f32
    %222 = vector.broadcast %cst_52 : f32 to vector<8x32xf32>
    %223 = arith.addf %222, %221 : vector<8x32xf32>
    %224 = arith.divf %222, %223 : vector<8x32xf32>
    %225 = vector.extract_strided_slice %218 {offsets = [0, 32], sizes = [8, 32], strides = [1, 1]} : vector<8x128xf32> to vector<8x32xf32>
    %226 = arith.negf %225 : vector<8x32xf32>
    %227 = math.exp %226 : vector<8x32xf32>
    %cst_53 = arith.constant 1.000000e+00 : f32
    %228 = vector.broadcast %cst_53 : f32 to vector<8x32xf32>
    %229 = arith.addf %228, %227 : vector<8x32xf32>
    %230 = arith.divf %228, %229 : vector<8x32xf32>
    %231 = vector.extract_strided_slice %218 {offsets = [0, 64], sizes = [8, 32], strides = [1, 1]} : vector<8x128xf32> to vector<8x32xf32>
    %232 = math.tanh %231 : vector<8x32xf32>
    %233 = vector.extract_strided_slice %218 {offsets = [0, 96], sizes = [8, 32], strides = [1, 1]} : vector<8x128xf32> to vector<8x32xf32>
    %234 = arith.negf %233 : vector<8x32xf32>
    %235 = math.exp %234 : vector<8x32xf32>
    %cst_54 = arith.constant 1.000000e+00 : f32
    %236 = vector.broadcast %cst_54 : f32 to vector<8x32xf32>
    %237 = arith.addf %236, %235 : vector<8x32xf32>
    %238 = arith.divf %236, %237 : vector<8x32xf32>
    %239 = arith.mulf %230, %212 : vector<8x32xf32>
    %240 = arith.mulf %224, %232 : vector<8x32xf32>
    %241 = arith.addf %239, %240 : vector<8x32xf32>
    %242 = math.tanh %241 : vector<8x32xf32>
    %243 = arith.mulf %238, %242 : vector<8x32xf32>
    %c56 = arith.constant 56 : index
    %c0_55 = arith.constant 0 : index
    %244 = vector.load %arg7[%c56, %c0_55] : memref<64x32xf32, #tpu.memory_space<vmem>>, vector<8x32xf32>
    tpu.vector_store %arg7[%c56, %c0_55], %243 {strides = array<i32>} : memref<64x32xf32, #tpu.memory_space<vmem>>, vector<8x32xf32>,
    %c0_56 = arith.constant 0 : index
    %c0_57 = arith.constant 0 : index
    %245 = vector.load %arg7[%c0_56, %c0_57] : memref<64x32xf32, #tpu.memory_space<vmem>>, vector<64x32xf32>
    %c0_58 = arith.constant 0 : index
    %c0_59 = arith.constant 0 : index
    %c0_60 = arith.constant 0 : index
    %c0_61 = arith.constant 0 : index
    %246 = vector.load %arg3[%c0_58, %c0_59, %c0_60, %c0_61] : memref<1x1x32x128xf32, #tpu.memory_space<vmem>>, vector<1x1x32x128xf32>
    %247 = vector.shape_cast %246 : vector<1x1x32x128xf32> to vector<32x128xf32>
    %c0_62 = arith.constant 0 : index
    %c1 = arith.constant 1 : index
    %c0_63 = arith.constant 0 : index
    %c0_64 = arith.constant 0 : index
    %248 = vector.load %arg4[%c0_62, %c1, %c0_63, %c0_64] : memref<1x2x32x128xf32, #tpu.memory_space<vmem>>, vector<1x1x32x128xf32>
    %249 = vector.shape_cast %248 : vector<1x1x32x128xf32> to vector<32x128xf32>
    %c0_65 = arith.constant 0 : index
    %c1_66 = arith.constant 1 : index
    %c0_67 = arith.constant 0 : index
    %c0_68 = arith.constant 0 : index
    %250 = vector.load %arg5[%c0_65, %c1_66, %c0_67, %c0_68] : memref<1x2x1x128xf32, #tpu.memory_space<vmem>>, vector<1x1x1x128xf32>
    %251 = vector.shape_cast %250 : vector<1x1x1x128xf32> to vector<1x128xf32>
    %cst_69 = arith.constant dense<0.000000e+00> : vector<64x128xf32>
    %252 = tpu.matmul %245, %247, %cst_69 {dimension_numbers = #tpu.dot_dimension_numbers<[1], [0], [0], [1], [0, 0, 1, 1], [], []>} : vector<64x32xf32>, vector<32x128xf32>, vector<64x128xf32> -> vector<64x128xf32>
    %253 = vector.broadcast %251 : vector<1x128xf32> to vector<64x128xf32>
    %254 = arith.addf %252, %253 : vector<64x128xf32>
    %cst_70 = arith.constant 0.000000e+00 : f32
    %255 = vector.broadcast %cst_70 : f32 to vector<8x32xf32>
    %cst_71 = arith.constant 0.000000e+00 : f32
    %256 = vector.broadcast %cst_71 : f32 to vector<8x32xf32>
    %257 = vector.extract_strided_slice %254 {offsets = [0, 0], sizes = [8, 128], strides = [1, 1]} : vector<64x128xf32> to vector<8x128xf32>
    %cst_72 = arith.constant dense<0.000000e+00> : vector<8x128xf32>
    %258 = tpu.matmul %255, %249, %cst_72 {dimension_numbers = #tpu.dot_dimension_numbers<[1], [0], [0], [1], [0, 0, 1, 1], [], []>} : vector<8x32xf32>, vector<32x128xf32>, vector<8x128xf32> -> vector<8x128xf32>
    %259 = arith.addf %257, %258 : vector<8x128xf32>
    %260 = vector.extract_strided_slice %259 {offsets = [0, 0], sizes = [8, 32], strides = [1, 1]} : vector<8x128xf32> to vector<8x32xf32>
    %261 = arith.negf %260 : vector<8x32xf32>
    %262 = math.exp %261 : vector<8x32xf32>
    %cst_73 = arith.constant 1.000000e+00 : f32
    %263 = vector.broadcast %cst_73 : f32 to vector<8x32xf32>
    %264 = arith.addf %263, %262 : vector<8x32xf32>
    %265 = arith.divf %263, %264 : vector<8x32xf32>
    %266 = vector.extract_strided_slice %259 {offsets = [0, 32], sizes = [8, 32], strides = [1, 1]} : vector<8x128xf32> to vector<8x32xf32>
    %267 = arith.negf %266 : vector<8x32xf32>
    %268 = math.exp %267 : vector<8x32xf32>
    %cst_74 = arith.constant 1.000000e+00 : f32
    %269 = vector.broadcast %cst_74 : f32 to vector<8x32xf32>
    %270 = arith.addf %269, %268 : vector<8x32xf32>
    %271 = arith.divf %269, %270 : vector<8x32xf32>
    %272 = vector.extract_strided_slice %259 {offsets = [0, 64], sizes = [8, 32], strides = [1, 1]} : vector<8x128xf32> to vector<8x32xf32>
    %273 = math.tanh %272 : vector<8x32xf32>
    %274 = vector.extract_strided_slice %259 {offsets = [0, 96], sizes = [8, 32], strides = [1, 1]} : vector<8x128xf32> to vector<8x32xf32>
    %275 = arith.negf %274 : vector<8x32xf32>
    %276 = math.exp %275 : vector<8x32xf32>
    %cst_75 = arith.constant 1.000000e+00 : f32
    %277 = vector.broadcast %cst_75 : f32 to vector<8x32xf32>
    %278 = arith.addf %277, %276 : vector<8x32xf32>
    %279 = arith.divf %277, %278 : vector<8x32xf32>
    %280 = arith.mulf %271, %256 : vector<8x32xf32>
    %281 = arith.mulf %265, %273 : vector<8x32xf32>
    %282 = arith.addf %280, %281 : vector<8x32xf32>
    %283 = math.tanh %282 : vector<8x32xf32>
    %284 = arith.mulf %279, %283 : vector<8x32xf32>
    %285 = vector.extract_strided_slice %254 {offsets = [8, 0], sizes = [8, 128], strides = [1, 1]} : vector<64x128xf32> to vector<8x128xf32>
    %cst_76 = arith.constant dense<0.000000e+00> : vector<8x128xf32>
    %286 = tpu.matmul %284, %249, %cst_76 {dimension_numbers = #tpu.dot_dimension_numbers<[1], [0], [0], [1], [0, 0, 1, 1], [], []>} : vector<8x32xf32>, vector<32x128xf32>, vector<8x128xf32> -> vector<8x128xf32>
    %287 = arith.addf %285, %286 : vector<8x128xf32>
    %288 = vector.extract_strided_slice %287 {offsets = [0, 0], sizes = [8, 32], strides = [1, 1]} : vector<8x128xf32> to vector<8x32xf32>
    %289 = arith.negf %288 : vector<8x32xf32>
    %290 = math.exp %289 : vector<8x32xf32>
    %cst_77 = arith.constant 1.000000e+00 : f32
    %291 = vector.broadcast %cst_77 : f32 to vector<8x32xf32>
    %292 = arith.addf %291, %290 : vector<8x32xf32>
    %293 = arith.divf %291, %292 : vector<8x32xf32>
    %294 = vector.extract_strided_slice %287 {offsets = [0, 32], sizes = [8, 32], strides = [1, 1]} : vector<8x128xf32> to vector<8x32xf32>
    %295 = arith.negf %294 : vector<8x32xf32>
    %296 = math.exp %295 : vector<8x32xf32>
    %cst_78 = arith.constant 1.000000e+00 : f32
    %297 = vector.broadcast %cst_78 : f32 to vector<8x32xf32>
    %298 = arith.addf %297, %296 : vector<8x32xf32>
    %299 = arith.divf %297, %298 : vector<8x32xf32>
    %300 = vector.extract_strided_slice %287 {offsets = [0, 64], sizes = [8, 32], strides = [1, 1]} : vector<8x128xf32> to vector<8x32xf32>
    %301 = math.tanh %300 : vector<8x32xf32>
    %302 = vector.extract_strided_slice %287 {offsets = [0, 96], sizes = [8, 32], strides = [1, 1]} : vector<8x128xf32> to vector<8x32xf32>
    %303 = arith.negf %302 : vector<8x32xf32>
    %304 = math.exp %303 : vector<8x32xf32>
    %cst_79 = arith.constant 1.000000e+00 : f32
    %305 = vector.broadcast %cst_79 : f32 to vector<8x32xf32>
    %306 = arith.addf %305, %304 : vector<8x32xf32>
    %307 = arith.divf %305, %306 : vector<8x32xf32>
    %308 = arith.mulf %299, %282 : vector<8x32xf32>
    %309 = arith.mulf %293, %301 : vector<8x32xf32>
    %310 = arith.addf %308, %309 : vector<8x32xf32>
    %311 = math.tanh %310 : vector<8x32xf32>
    %312 = arith.mulf %307, %311 : vector<8x32xf32>
    %313 = vector.extract_strided_slice %254 {offsets = [16, 0], sizes = [8, 128], strides = [1, 1]} : vector<64x128xf32> to vector<8x128xf32>
    %cst_80 = arith.constant dense<0.000000e+00> : vector<8x128xf32>
    %314 = tpu.matmul %312, %249, %cst_80 {dimension_numbers = #tpu.dot_dimension_numbers<[1], [0], [0], [1], [0, 0, 1, 1], [], []>} : vector<8x32xf32>, vector<32x128xf32>, vector<8x128xf32> -> vector<8x128xf32>
    %315 = arith.addf %313, %314 : vector<8x128xf32>
    %316 = vector.extract_strided_slice %315 {offsets = [0, 0], sizes = [8, 32], strides = [1, 1]} : vector<8x128xf32> to vector<8x32xf32>
    %317 = arith.negf %316 : vector<8x32xf32>
    %318 = math.exp %317 : vector<8x32xf32>
    %cst_81 = arith.constant 1.000000e+00 : f32
    %319 = vector.broadcast %cst_81 : f32 to vector<8x32xf32>
    %320 = arith.addf %319, %318 : vector<8x32xf32>
    %321 = arith.divf %319, %320 : vector<8x32xf32>
    %322 = vector.extract_strided_slice %315 {offsets = [0, 32], sizes = [8, 32], strides = [1, 1]} : vector<8x128xf32> to vector<8x32xf32>
    %323 = arith.negf %322 : vector<8x32xf32>
    %324 = math.exp %323 : vector<8x32xf32>
    %cst_82 = arith.constant 1.000000e+00 : f32
    %325 = vector.broadcast %cst_82 : f32 to vector<8x32xf32>
    %326 = arith.addf %325, %324 : vector<8x32xf32>
    %327 = arith.divf %325, %326 : vector<8x32xf32>
    %328 = vector.extract_strided_slice %315 {offsets = [0, 64], sizes = [8, 32], strides = [1, 1]} : vector<8x128xf32> to vector<8x32xf32>
    %329 = math.tanh %328 : vector<8x32xf32>
    %330 = vector.extract_strided_slice %315 {offsets = [0, 96], sizes = [8, 32], strides = [1, 1]} : vector<8x128xf32> to vector<8x32xf32>
    %331 = arith.negf %330 : vector<8x32xf32>
    %332 = math.exp %331 : vector<8x32xf32>
    %cst_83 = arith.constant 1.000000e+00 : f32
    %333 = vector.broadcast %cst_83 : f32 to vector<8x32xf32>
    %334 = arith.addf %333, %332 : vector<8x32xf32>
    %335 = arith.divf %333, %334 : vector<8x32xf32>
    %336 = arith.mulf %327, %310 : vector<8x32xf32>
    %337 = arith.mulf %321, %329 : vector<8x32xf32>
    %338 = arith.addf %336, %337 : vector<8x32xf32>
    %339 = math.tanh %338 : vector<8x32xf32>
    %340 = arith.mulf %335, %339 : vector<8x32xf32>
    %341 = vector.extract_strided_slice %254 {offsets = [24, 0], sizes = [8, 128], strides = [1, 1]} : vector<64x128xf32> to vector<8x128xf32>
    %cst_84 = arith.constant dense<0.000000e+00> : vector<8x128xf32>
    %342 = tpu.matmul %340, %249, %cst_84 {dimension_numbers = #tpu.dot_dimension_numbers<[1], [0], [0], [1], [0, 0, 1, 1], [], []>} : vector<8x32xf32>, vector<32x128xf32>, vector<8x128xf32> -> vector<8x128xf32>
    %343 = arith.addf %341, %342 : vector<8x128xf32>
    %344 = vector.extract_strided_slice %343 {offsets = [0, 0], sizes = [8, 32], strides = [1, 1]} : vector<8x128xf32> to vector<8x32xf32>
    %345 = arith.negf %344 : vector<8x32xf32>
    %346 = math.exp %345 : vector<8x32xf32>
    %cst_85 = arith.constant 1.000000e+00 : f32
    %347 = vector.broadcast %cst_85 : f32 to vector<8x32xf32>
    %348 = arith.addf %347, %346 : vector<8x32xf32>
    %349 = arith.divf %347, %348 : vector<8x32xf32>
    %350 = vector.extract_strided_slice %343 {offsets = [0, 32], sizes = [8, 32], strides = [1, 1]} : vector<8x128xf32> to vector<8x32xf32>
    %351 = arith.negf %350 : vector<8x32xf32>
    %352 = math.exp %351 : vector<8x32xf32>
    %cst_86 = arith.constant 1.000000e+00 : f32
    %353 = vector.broadcast %cst_86 : f32 to vector<8x32xf32>
    %354 = arith.addf %353, %352 : vector<8x32xf32>
    %355 = arith.divf %353, %354 : vector<8x32xf32>
    %356 = vector.extract_strided_slice %343 {offsets = [0, 64], sizes = [8, 32], strides = [1, 1]} : vector<8x128xf32> to vector<8x32xf32>
    %357 = math.tanh %356 : vector<8x32xf32>
    %358 = vector.extract_strided_slice %343 {offsets = [0, 96], sizes = [8, 32], strides = [1, 1]} : vector<8x128xf32> to vector<8x32xf32>
    %359 = arith.negf %358 : vector<8x32xf32>
    %360 = math.exp %359 : vector<8x32xf32>
    %cst_87 = arith.constant 1.000000e+00 : f32
    %361 = vector.broadcast %cst_87 : f32 to vector<8x32xf32>
    %362 = arith.addf %361, %360 : vector<8x32xf32>
    %363 = arith.divf %361, %362 : vector<8x32xf32>
    %364 = arith.mulf %355, %338 : vector<8x32xf32>
    %365 = arith.mulf %349, %357 : vector<8x32xf32>
    %366 = arith.addf %364, %365 : vector<8x32xf32>
    %367 = math.tanh %366 : vector<8x32xf32>
    %368 = arith.mulf %363, %367 : vector<8x32xf32>
    %369 = vector.extract_strided_slice %254 {offsets = [32, 0], sizes = [8, 128], strides = [1, 1]} : vector<64x128xf32> to vector<8x128xf32>
    %cst_88 = arith.constant dense<0.000000e+00> : vector<8x128xf32>
    %370 = tpu.matmul %368, %249, %cst_88 {dimension_numbers = #tpu.dot_dimension_numbers<[1], [0], [0], [1], [0, 0, 1, 1], [], []>} : vector<8x32xf32>, vector<32x128xf32>, vector<8x128xf32> -> vector<8x128xf32>
    %371 = arith.addf %369, %370 : vector<8x128xf32>
    %372 = vector.extract_strided_slice %371 {offsets = [0, 0], sizes = [8, 32], strides = [1, 1]} : vector<8x128xf32> to vector<8x32xf32>
    %373 = arith.negf %372 : vector<8x32xf32>
    %374 = math.exp %373 : vector<8x32xf32>
    %cst_89 = arith.constant 1.000000e+00 : f32
    %375 = vector.broadcast %cst_89 : f32 to vector<8x32xf32>
    %376 = arith.addf %375, %374 : vector<8x32xf32>
    %377 = arith.divf %375, %376 : vector<8x32xf32>
    %378 = vector.extract_strided_slice %371 {offsets = [0, 32], sizes = [8, 32], strides = [1, 1]} : vector<8x128xf32> to vector<8x32xf32>
    %379 = arith.negf %378 : vector<8x32xf32>
    %380 = math.exp %379 : vector<8x32xf32>
    %cst_90 = arith.constant 1.000000e+00 : f32
    %381 = vector.broadcast %cst_90 : f32 to vector<8x32xf32>
    %382 = arith.addf %381, %380 : vector<8x32xf32>
    %383 = arith.divf %381, %382 : vector<8x32xf32>
    %384 = vector.extract_strided_slice %371 {offsets = [0, 64], sizes = [8, 32], strides = [1, 1]} : vector<8x128xf32> to vector<8x32xf32>
    %385 = math.tanh %384 : vector<8x32xf32>
    %386 = vector.extract_strided_slice %371 {offsets = [0, 96], sizes = [8, 32], strides = [1, 1]} : vector<8x128xf32> to vector<8x32xf32>
    %387 = arith.negf %386 : vector<8x32xf32>
    %388 = math.exp %387 : vector<8x32xf32>
    %cst_91 = arith.constant 1.000000e+00 : f32
    %389 = vector.broadcast %cst_91 : f32 to vector<8x32xf32>
    %390 = arith.addf %389, %388 : vector<8x32xf32>
    %391 = arith.divf %389, %390 : vector<8x32xf32>
    %392 = arith.mulf %383, %366 : vector<8x32xf32>
    %393 = arith.mulf %377, %385 : vector<8x32xf32>
    %394 = arith.addf %392, %393 : vector<8x32xf32>
    %395 = math.tanh %394 : vector<8x32xf32>
    %396 = arith.mulf %391, %395 : vector<8x32xf32>
    %397 = vector.extract_strided_slice %254 {offsets = [40, 0], sizes = [8, 128], strides = [1, 1]} : vector<64x128xf32> to vector<8x128xf32>
    %cst_92 = arith.constant dense<0.000000e+00> : vector<8x128xf32>
    %398 = tpu.matmul %396, %249, %cst_92 {dimension_numbers = #tpu.dot_dimension_numbers<[1], [0], [0], [1], [0, 0, 1, 1], [], []>} : vector<8x32xf32>, vector<32x128xf32>, vector<8x128xf32> -> vector<8x128xf32>
    %399 = arith.addf %397, %398 : vector<8x128xf32>
    %400 = vector.extract_strided_slice %399 {offsets = [0, 0], sizes = [8, 32], strides = [1, 1]} : vector<8x128xf32> to vector<8x32xf32>
    %401 = arith.negf %400 : vector<8x32xf32>
    %402 = math.exp %401 : vector<8x32xf32>
    %cst_93 = arith.constant 1.000000e+00 : f32
    %403 = vector.broadcast %cst_93 : f32 to vector<8x32xf32>
    %404 = arith.addf %403, %402 : vector<8x32xf32>
    %405 = arith.divf %403, %404 : vector<8x32xf32>
    %406 = vector.extract_strided_slice %399 {offsets = [0, 32], sizes = [8, 32], strides = [1, 1]} : vector<8x128xf32> to vector<8x32xf32>
    %407 = arith.negf %406 : vector<8x32xf32>
    %408 = math.exp %407 : vector<8x32xf32>
    %cst_94 = arith.constant 1.000000e+00 : f32
    %409 = vector.broadcast %cst_94 : f32 to vector<8x32xf32>
    %410 = arith.addf %409, %408 : vector<8x32xf32>
    %411 = arith.divf %409, %410 : vector<8x32xf32>
    %412 = vector.extract_strided_slice %399 {offsets = [0, 64], sizes = [8, 32], strides = [1, 1]} : vector<8x128xf32> to vector<8x32xf32>
    %413 = math.tanh %412 : vector<8x32xf32>
    %414 = vector.extract_strided_slice %399 {offsets = [0, 96], sizes = [8, 32], strides = [1, 1]} : vector<8x128xf32> to vector<8x32xf32>
    %415 = arith.negf %414 : vector<8x32xf32>
    %416 = math.exp %415 : vector<8x32xf32>
    %cst_95 = arith.constant 1.000000e+00 : f32
    %417 = vector.broadcast %cst_95 : f32 to vector<8x32xf32>
    %418 = arith.addf %417, %416 : vector<8x32xf32>
    %419 = arith.divf %417, %418 : vector<8x32xf32>
    %420 = arith.mulf %411, %394 : vector<8x32xf32>
    %421 = arith.mulf %405, %413 : vector<8x32xf32>
    %422 = arith.addf %420, %421 : vector<8x32xf32>
    %423 = math.tanh %422 : vector<8x32xf32>
    %424 = arith.mulf %419, %423 : vector<8x32xf32>
    %425 = vector.extract_strided_slice %254 {offsets = [48, 0], sizes = [8, 128], strides = [1, 1]} : vector<64x128xf32> to vector<8x128xf32>
    %cst_96 = arith.constant dense<0.000000e+00> : vector<8x128xf32>
    %426 = tpu.matmul %424, %249, %cst_96 {dimension_numbers = #tpu.dot_dimension_numbers<[1], [0], [0], [1], [0, 0, 1, 1], [], []>} : vector<8x32xf32>, vector<32x128xf32>, vector<8x128xf32> -> vector<8x128xf32>
    %427 = arith.addf %425, %426 : vector<8x128xf32>
    %428 = vector.extract_strided_slice %427 {offsets = [0, 0], sizes = [8, 32], strides = [1, 1]} : vector<8x128xf32> to vector<8x32xf32>
    %429 = arith.negf %428 : vector<8x32xf32>
    %430 = math.exp %429 : vector<8x32xf32>
    %cst_97 = arith.constant 1.000000e+00 : f32
    %431 = vector.broadcast %cst_97 : f32 to vector<8x32xf32>
    %432 = arith.addf %431, %430 : vector<8x32xf32>
    %433 = arith.divf %431, %432 : vector<8x32xf32>
    %434 = vector.extract_strided_slice %427 {offsets = [0, 32], sizes = [8, 32], strides = [1, 1]} : vector<8x128xf32> to vector<8x32xf32>
    %435 = arith.negf %434 : vector<8x32xf32>
    %436 = math.exp %435 : vector<8x32xf32>
    %cst_98 = arith.constant 1.000000e+00 : f32
    %437 = vector.broadcast %cst_98 : f32 to vector<8x32xf32>
    %438 = arith.addf %437, %436 : vector<8x32xf32>
    %439 = arith.divf %437, %438 : vector<8x32xf32>
    %440 = vector.extract_strided_slice %427 {offsets = [0, 64], sizes = [8, 32], strides = [1, 1]} : vector<8x128xf32> to vector<8x32xf32>
    %441 = math.tanh %440 : vector<8x32xf32>
    %442 = vector.extract_strided_slice %427 {offsets = [0, 96], sizes = [8, 32], strides = [1, 1]} : vector<8x128xf32> to vector<8x32xf32>
    %443 = arith.negf %442 : vector<8x32xf32>
    %444 = math.exp %443 : vector<8x32xf32>
    %cst_99 = arith.constant 1.000000e+00 : f32
    %445 = vector.broadcast %cst_99 : f32 to vector<8x32xf32>
    %446 = arith.addf %445, %444 : vector<8x32xf32>
    %447 = arith.divf %445, %446 : vector<8x32xf32>
    %448 = arith.mulf %439, %422 : vector<8x32xf32>
    %449 = arith.mulf %433, %441 : vector<8x32xf32>
    %450 = arith.addf %448, %449 : vector<8x32xf32>
    %451 = math.tanh %450 : vector<8x32xf32>
    %452 = arith.mulf %447, %451 : vector<8x32xf32>
    %453 = vector.extract_strided_slice %254 {offsets = [56, 0], sizes = [8, 128], strides = [1, 1]} : vector<64x128xf32> to vector<8x128xf32>
    %cst_100 = arith.constant dense<0.000000e+00> : vector<8x128xf32>
    %454 = tpu.matmul %452, %249, %cst_100 {dimension_numbers = #tpu.dot_dimension_numbers<[1], [0], [0], [1], [0, 0, 1, 1], [], []>} : vector<8x32xf32>, vector<32x128xf32>, vector<8x128xf32> -> vector<8x128xf32>
    %455 = arith.addf %453, %454 : vector<8x128xf32>
    %456 = vector.extract_strided_slice %455 {offsets = [0, 0], sizes = [8, 32], strides = [1, 1]} : vector<8x128xf32> to vector<8x32xf32>
    %457 = arith.negf %456 : vector<8x32xf32>
    %458 = math.exp %457 : vector<8x32xf32>
    %cst_101 = arith.constant 1.000000e+00 : f32
    %459 = vector.broadcast %cst_101 : f32 to vector<8x32xf32>
    %460 = arith.addf %459, %458 : vector<8x32xf32>
    %461 = arith.divf %459, %460 : vector<8x32xf32>
    %462 = vector.extract_strided_slice %455 {offsets = [0, 32], sizes = [8, 32], strides = [1, 1]} : vector<8x128xf32> to vector<8x32xf32>
    %463 = arith.negf %462 : vector<8x32xf32>
    %464 = math.exp %463 : vector<8x32xf32>
    %cst_102 = arith.constant 1.000000e+00 : f32
    %465 = vector.broadcast %cst_102 : f32 to vector<8x32xf32>
    %466 = arith.addf %465, %464 : vector<8x32xf32>
    %467 = arith.divf %465, %466 : vector<8x32xf32>
    %468 = vector.extract_strided_slice %455 {offsets = [0, 64], sizes = [8, 32], strides = [1, 1]} : vector<8x128xf32> to vector<8x32xf32>
    %469 = math.tanh %468 : vector<8x32xf32>
    %470 = vector.extract_strided_slice %455 {offsets = [0, 96], sizes = [8, 32], strides = [1, 1]} : vector<8x128xf32> to vector<8x32xf32>
    %471 = arith.negf %470 : vector<8x32xf32>
    %472 = math.exp %471 : vector<8x32xf32>
    %cst_103 = arith.constant 1.000000e+00 : f32
    %473 = vector.broadcast %cst_103 : f32 to vector<8x32xf32>
    %474 = arith.addf %473, %472 : vector<8x32xf32>
    %475 = arith.divf %473, %474 : vector<8x32xf32>
    %476 = arith.mulf %467, %450 : vector<8x32xf32>
    %477 = arith.mulf %461, %469 : vector<8x32xf32>
    %478 = arith.addf %476, %477 : vector<8x32xf32>
    %479 = math.tanh %478 : vector<8x32xf32>
    %480 = arith.mulf %475, %479 : vector<8x32xf32>
    %c0_104 = arith.constant 0 : index
    %c0_105 = arith.constant 0 : index
    %c0_106 = arith.constant 0 : index
    %481 = vector.load %arg6[%c0_104, %c0_105, %c0_106] : memref<1x8x32xf32, #tpu.memory_space<vmem>>, vector<1x8x32xf32>
    %482 = vector.shape_cast %481 : vector<1x8x32xf32> to vector<8x32xf32>
    %483 = vector.shape_cast %480 : vector<8x32xf32> to vector<1x8x32xf32>
    tpu.vector_store %arg6[%c0_104, %c0_105, %c0_106], %483 {strides = array<i32>} : memref<1x8x32xf32, #tpu.memory_space<vmem>>, vector<1x8x32xf32>,
    return
  }
  func.func @transform_0(%arg0: i32) -> (i32, i32, i32) {
    %c0_i32 = arith.constant 0 : i32
    %c0_i32_0 = arith.constant 0 : i32
    %c0_i32_1 = arith.constant 0 : i32
    return %arg0, %c0_i32, %c0_i32_0 : i32, i32, i32
  }
  func.func @transform_1(%arg0: i32) -> (i32, i32, i32) {
    %c0_i32 = arith.constant 0 : i32
    %c0_i32_0 = arith.constant 0 : i32
    %c0_i32_1 = arith.constant 0 : i32
    return %arg0, %c0_i32, %c0_i32_0 : i32, i32, i32
  }
  func.func @transform_2(%arg0: i32) -> (i32, i32, i32, i32) {
    %c0_i32 = arith.constant 0 : i32
    %c0_i32_0 = arith.constant 0 : i32
    %c0_i32_1 = arith.constant 0 : i32
    %c0_i32_2 = arith.constant 0 : i32
    return %arg0, %c0_i32, %c0_i32_0, %c0_i32_1 : i32, i32, i32, i32
  }
  func.func @transform_3(%arg0: i32) -> (i32, i32, i32, i32) {
    %c0_i32 = arith.constant 0 : i32
    %c0_i32_0 = arith.constant 0 : i32
    %c0_i32_1 = arith.constant 0 : i32
    %c0_i32_2 = arith.constant 0 : i32
    return %arg0, %c0_i32, %c0_i32_0, %c0_i32_1 : i32, i32, i32, i32
  }
  func.func @transform_4(%arg0: i32) -> (i32, i32, i32, i32) {
    %c0_i32 = arith.constant 0 : i32
    %c0_i32_0 = arith.constant 0 : i32
    %c0_i32_1 = arith.constant 0 : i32
    %c0_i32_2 = arith.constant 0 : i32
    return %arg0, %c0_i32, %c0_i32_0, %c0_i32_1 : i32, i32, i32, i32
  }
  func.func @transform_5(%arg0: i32) -> (i32, i32, i32) {
    %c0_i32 = arith.constant 0 : i32
    %c0_i32_0 = arith.constant 0 : i32
    %c0_i32_1 = arith.constant 0 : i32
    return %arg0, %c0_i32, %c0_i32_0 : i32, i32, i32
  }
}

module attributes {stable_mosaic.version = 11 : i64} {
  func.func @kernel(%arg0: i32, %arg1: memref<128x64xf32, #tpu.memory_space<vmem>>, %arg2: memref<2x64x256xf32, #tpu.memory_space<vmem>>, %arg3: memref<2x64x256xf32, #tpu.memory_space<vmem>>, %arg4: memref<2x1x256xf32, #tpu.memory_space<vmem>>, %arg5: memref<64x128xf32, #tpu.memory_space<vmem>>, %arg6: memref<1x128xf32, #tpu.memory_space<vmem>>, %arg7: memref<128x128xf32, #tpu.memory_space<vmem>>, %arg8: memref<128x64xf32, #tpu.memory_space<vmem>>) attributes {dimension_semantics = [#tpu.dimension_semantics<arbitrary>], iteration_bounds = array<i64: 1>, scalar_prefetch = 0 : i64, scratch_operands = 1 : i64, tpu.core_type = #tpu.core_type<tc>, window_params = [{pipeline_mode = #tpu.pipeline_mode<synchronous>, transform_indices = @transform_0, window_bounds = array<i64: 128, 64>}, {pipeline_mode = #tpu.pipeline_mode<synchronous>, transform_indices = @transform_1, window_bounds = array<i64: 2, 64, 256>}, {pipeline_mode = #tpu.pipeline_mode<synchronous>, transform_indices = @transform_2, window_bounds = array<i64: 2, 64, 256>}, {pipeline_mode = #tpu.pipeline_mode<synchronous>, transform_indices = @transform_3, window_bounds = array<i64: 2, 1, 256>}, {pipeline_mode = #tpu.pipeline_mode<synchronous>, transform_indices = @transform_4, window_bounds = array<i64: 64, 128>}, {pipeline_mode = #tpu.pipeline_mode<synchronous>, transform_indices = @transform_5, window_bounds = array<i64: 1, 128>}, {pipeline_mode = #tpu.pipeline_mode<synchronous>, transform_indices = @transform_6, window_bounds = array<i64: 128, 128>}]} {
    %c0 = arith.constant 0 : index
    %c0_0 = arith.constant 0 : index
    %0 = vector.load %arg1[%c0, %c0_0] : memref<128x64xf32, #tpu.memory_space<vmem>>, vector<128x64xf32>
    %c0_1 = arith.constant 0 : index
    %c0_2 = arith.constant 0 : index
    %c0_3 = arith.constant 0 : index
    %1 = vector.load %arg2[%c0_1, %c0_2, %c0_3] : memref<2x64x256xf32, #tpu.memory_space<vmem>>, vector<1x64x256xf32>
    %2 = vector.shape_cast %1 : vector<1x64x256xf32> to vector<64x256xf32>
    %c0_4 = arith.constant 0 : index
    %c0_5 = arith.constant 0 : index
    %c0_6 = arith.constant 0 : index
    %3 = vector.load %arg3[%c0_4, %c0_5, %c0_6] : memref<2x64x256xf32, #tpu.memory_space<vmem>>, vector<1x64x256xf32>
    %4 = vector.shape_cast %3 : vector<1x64x256xf32> to vector<64x256xf32>
    %c0_7 = arith.constant 0 : index
    %c0_8 = arith.constant 0 : index
    %c0_9 = arith.constant 0 : index
    %5 = vector.load %arg4[%c0_7, %c0_8, %c0_9] : memref<2x1x256xf32, #tpu.memory_space<vmem>>, vector<1x1x256xf32>
    %6 = vector.shape_cast %5 : vector<1x1x256xf32> to vector<1x256xf32>
    %cst = arith.constant dense<0.000000e+00> : vector<128x256xf32>
    %7 = tpu.matmul %0, %2, %cst {dimension_numbers = #tpu.dot_dimension_numbers<[1], [0], [0], [1], [0, 0, 1, 1], [], []>} : vector<128x64xf32>, vector<64x256xf32>, vector<128x256xf32> -> vector<128x256xf32>
    %8 = vector.broadcast %6 : vector<1x256xf32> to vector<128x256xf32>
    %9 = arith.addf %7, %8 : vector<128x256xf32>
    %cst_10 = arith.constant 0.000000e+00 : f32
    %10 = vector.broadcast %cst_10 : f32 to vector<8x64xf32>
    %cst_11 = arith.constant 0.000000e+00 : f32
    %11 = vector.broadcast %cst_11 : f32 to vector<8x64xf32>
    %12 = vector.extract_strided_slice %9 {offsets = [0, 0], sizes = [8, 256], strides = [1, 1]} : vector<128x256xf32> to vector<8x256xf32>
    %cst_12 = arith.constant dense<0.000000e+00> : vector<8x256xf32>
    %13 = tpu.matmul %10, %4, %cst_12 {dimension_numbers = #tpu.dot_dimension_numbers<[1], [0], [0], [1], [0, 0, 1, 1], [], []>} : vector<8x64xf32>, vector<64x256xf32>, vector<8x256xf32> -> vector<8x256xf32>
    %14 = arith.addf %12, %13 : vector<8x256xf32>
    %15 = vector.extract_strided_slice %14 {offsets = [0, 0], sizes = [8, 64], strides = [1, 1]} : vector<8x256xf32> to vector<8x64xf32>
    %16 = arith.negf %15 : vector<8x64xf32>
    %17 = math.exp %16 : vector<8x64xf32>
    %cst_13 = arith.constant 1.000000e+00 : f32
    %18 = vector.broadcast %cst_13 : f32 to vector<8x64xf32>
    %19 = arith.addf %18, %17 : vector<8x64xf32>
    %20 = arith.divf %18, %19 : vector<8x64xf32>
    %21 = vector.extract_strided_slice %14 {offsets = [0, 64], sizes = [8, 64], strides = [1, 1]} : vector<8x256xf32> to vector<8x64xf32>
    %22 = arith.negf %21 : vector<8x64xf32>
    %23 = math.exp %22 : vector<8x64xf32>
    %cst_14 = arith.constant 1.000000e+00 : f32
    %24 = vector.broadcast %cst_14 : f32 to vector<8x64xf32>
    %25 = arith.addf %24, %23 : vector<8x64xf32>
    %26 = arith.divf %24, %25 : vector<8x64xf32>
    %27 = vector.extract_strided_slice %14 {offsets = [0, 128], sizes = [8, 64], strides = [1, 1]} : vector<8x256xf32> to vector<8x64xf32>
    %28 = math.tanh %27 : vector<8x64xf32>
    %29 = vector.extract_strided_slice %14 {offsets = [0, 192], sizes = [8, 64], strides = [1, 1]} : vector<8x256xf32> to vector<8x64xf32>
    %30 = arith.negf %29 : vector<8x64xf32>
    %31 = math.exp %30 : vector<8x64xf32>
    %cst_15 = arith.constant 1.000000e+00 : f32
    %32 = vector.broadcast %cst_15 : f32 to vector<8x64xf32>
    %33 = arith.addf %32, %31 : vector<8x64xf32>
    %34 = arith.divf %32, %33 : vector<8x64xf32>
    %35 = arith.mulf %26, %11 : vector<8x64xf32>
    %36 = arith.mulf %20, %28 : vector<8x64xf32>
    %37 = arith.addf %35, %36 : vector<8x64xf32>
    %38 = math.tanh %37 : vector<8x64xf32>
    %39 = arith.mulf %34, %38 : vector<8x64xf32>
    %c0_16 = arith.constant 0 : index
    %c0_17 = arith.constant 0 : index
    %40 = vector.load %arg8[%c0_16, %c0_17] : memref<128x64xf32, #tpu.memory_space<vmem>>, vector<8x64xf32>
    tpu.vector_store %arg8[%c0_16, %c0_17], %39 {strides = array<i32>} : memref<128x64xf32, #tpu.memory_space<vmem>>, vector<8x64xf32>,
    %41 = vector.extract_strided_slice %9 {offsets = [8, 0], sizes = [8, 256], strides = [1, 1]} : vector<128x256xf32> to vector<8x256xf32>
    %cst_18 = arith.constant dense<0.000000e+00> : vector<8x256xf32>
    %42 = tpu.matmul %39, %4, %cst_18 {dimension_numbers = #tpu.dot_dimension_numbers<[1], [0], [0], [1], [0, 0, 1, 1], [], []>} : vector<8x64xf32>, vector<64x256xf32>, vector<8x256xf32> -> vector<8x256xf32>
    %43 = arith.addf %41, %42 : vector<8x256xf32>
    %44 = vector.extract_strided_slice %43 {offsets = [0, 0], sizes = [8, 64], strides = [1, 1]} : vector<8x256xf32> to vector<8x64xf32>
    %45 = arith.negf %44 : vector<8x64xf32>
    %46 = math.exp %45 : vector<8x64xf32>
    %cst_19 = arith.constant 1.000000e+00 : f32
    %47 = vector.broadcast %cst_19 : f32 to vector<8x64xf32>
    %48 = arith.addf %47, %46 : vector<8x64xf32>
    %49 = arith.divf %47, %48 : vector<8x64xf32>
    %50 = vector.extract_strided_slice %43 {offsets = [0, 64], sizes = [8, 64], strides = [1, 1]} : vector<8x256xf32> to vector<8x64xf32>
    %51 = arith.negf %50 : vector<8x64xf32>
    %52 = math.exp %51 : vector<8x64xf32>
    %cst_20 = arith.constant 1.000000e+00 : f32
    %53 = vector.broadcast %cst_20 : f32 to vector<8x64xf32>
    %54 = arith.addf %53, %52 : vector<8x64xf32>
    %55 = arith.divf %53, %54 : vector<8x64xf32>
    %56 = vector.extract_strided_slice %43 {offsets = [0, 128], sizes = [8, 64], strides = [1, 1]} : vector<8x256xf32> to vector<8x64xf32>
    %57 = math.tanh %56 : vector<8x64xf32>
    %58 = vector.extract_strided_slice %43 {offsets = [0, 192], sizes = [8, 64], strides = [1, 1]} : vector<8x256xf32> to vector<8x64xf32>
    %59 = arith.negf %58 : vector<8x64xf32>
    %60 = math.exp %59 : vector<8x64xf32>
    %cst_21 = arith.constant 1.000000e+00 : f32
    %61 = vector.broadcast %cst_21 : f32 to vector<8x64xf32>
    %62 = arith.addf %61, %60 : vector<8x64xf32>
    %63 = arith.divf %61, %62 : vector<8x64xf32>
    %64 = arith.mulf %55, %37 : vector<8x64xf32>
    %65 = arith.mulf %49, %57 : vector<8x64xf32>
    %66 = arith.addf %64, %65 : vector<8x64xf32>
    %67 = math.tanh %66 : vector<8x64xf32>
    %68 = arith.mulf %63, %67 : vector<8x64xf32>
    %c8 = arith.constant 8 : index
    %c0_22 = arith.constant 0 : index
    %69 = vector.load %arg8[%c8, %c0_22] : memref<128x64xf32, #tpu.memory_space<vmem>>, vector<8x64xf32>
    tpu.vector_store %arg8[%c8, %c0_22], %68 {strides = array<i32>} : memref<128x64xf32, #tpu.memory_space<vmem>>, vector<8x64xf32>,
    %70 = vector.extract_strided_slice %9 {offsets = [16, 0], sizes = [8, 256], strides = [1, 1]} : vector<128x256xf32> to vector<8x256xf32>
    %cst_23 = arith.constant dense<0.000000e+00> : vector<8x256xf32>
    %71 = tpu.matmul %68, %4, %cst_23 {dimension_numbers = #tpu.dot_dimension_numbers<[1], [0], [0], [1], [0, 0, 1, 1], [], []>} : vector<8x64xf32>, vector<64x256xf32>, vector<8x256xf32> -> vector<8x256xf32>
    %72 = arith.addf %70, %71 : vector<8x256xf32>
    %73 = vector.extract_strided_slice %72 {offsets = [0, 0], sizes = [8, 64], strides = [1, 1]} : vector<8x256xf32> to vector<8x64xf32>
    %74 = arith.negf %73 : vector<8x64xf32>
    %75 = math.exp %74 : vector<8x64xf32>
    %cst_24 = arith.constant 1.000000e+00 : f32
    %76 = vector.broadcast %cst_24 : f32 to vector<8x64xf32>
    %77 = arith.addf %76, %75 : vector<8x64xf32>
    %78 = arith.divf %76, %77 : vector<8x64xf32>
    %79 = vector.extract_strided_slice %72 {offsets = [0, 64], sizes = [8, 64], strides = [1, 1]} : vector<8x256xf32> to vector<8x64xf32>
    %80 = arith.negf %79 : vector<8x64xf32>
    %81 = math.exp %80 : vector<8x64xf32>
    %cst_25 = arith.constant 1.000000e+00 : f32
    %82 = vector.broadcast %cst_25 : f32 to vector<8x64xf32>
    %83 = arith.addf %82, %81 : vector<8x64xf32>
    %84 = arith.divf %82, %83 : vector<8x64xf32>
    %85 = vector.extract_strided_slice %72 {offsets = [0, 128], sizes = [8, 64], strides = [1, 1]} : vector<8x256xf32> to vector<8x64xf32>
    %86 = math.tanh %85 : vector<8x64xf32>
    %87 = vector.extract_strided_slice %72 {offsets = [0, 192], sizes = [8, 64], strides = [1, 1]} : vector<8x256xf32> to vector<8x64xf32>
    %88 = arith.negf %87 : vector<8x64xf32>
    %89 = math.exp %88 : vector<8x64xf32>
    %cst_26 = arith.constant 1.000000e+00 : f32
    %90 = vector.broadcast %cst_26 : f32 to vector<8x64xf32>
    %91 = arith.addf %90, %89 : vector<8x64xf32>
    %92 = arith.divf %90, %91 : vector<8x64xf32>
    %93 = arith.mulf %84, %66 : vector<8x64xf32>
    %94 = arith.mulf %78, %86 : vector<8x64xf32>
    %95 = arith.addf %93, %94 : vector<8x64xf32>
    %96 = math.tanh %95 : vector<8x64xf32>
    %97 = arith.mulf %92, %96 : vector<8x64xf32>
    %c16 = arith.constant 16 : index
    %c0_27 = arith.constant 0 : index
    %98 = vector.load %arg8[%c16, %c0_27] : memref<128x64xf32, #tpu.memory_space<vmem>>, vector<8x64xf32>
    tpu.vector_store %arg8[%c16, %c0_27], %97 {strides = array<i32>} : memref<128x64xf32, #tpu.memory_space<vmem>>, vector<8x64xf32>,
    %99 = vector.extract_strided_slice %9 {offsets = [24, 0], sizes = [8, 256], strides = [1, 1]} : vector<128x256xf32> to vector<8x256xf32>
    %cst_28 = arith.constant dense<0.000000e+00> : vector<8x256xf32>
    %100 = tpu.matmul %97, %4, %cst_28 {dimension_numbers = #tpu.dot_dimension_numbers<[1], [0], [0], [1], [0, 0, 1, 1], [], []>} : vector<8x64xf32>, vector<64x256xf32>, vector<8x256xf32> -> vector<8x256xf32>
    %101 = arith.addf %99, %100 : vector<8x256xf32>
    %102 = vector.extract_strided_slice %101 {offsets = [0, 0], sizes = [8, 64], strides = [1, 1]} : vector<8x256xf32> to vector<8x64xf32>
    %103 = arith.negf %102 : vector<8x64xf32>
    %104 = math.exp %103 : vector<8x64xf32>
    %cst_29 = arith.constant 1.000000e+00 : f32
    %105 = vector.broadcast %cst_29 : f32 to vector<8x64xf32>
    %106 = arith.addf %105, %104 : vector<8x64xf32>
    %107 = arith.divf %105, %106 : vector<8x64xf32>
    %108 = vector.extract_strided_slice %101 {offsets = [0, 64], sizes = [8, 64], strides = [1, 1]} : vector<8x256xf32> to vector<8x64xf32>
    %109 = arith.negf %108 : vector<8x64xf32>
    %110 = math.exp %109 : vector<8x64xf32>
    %cst_30 = arith.constant 1.000000e+00 : f32
    %111 = vector.broadcast %cst_30 : f32 to vector<8x64xf32>
    %112 = arith.addf %111, %110 : vector<8x64xf32>
    %113 = arith.divf %111, %112 : vector<8x64xf32>
    %114 = vector.extract_strided_slice %101 {offsets = [0, 128], sizes = [8, 64], strides = [1, 1]} : vector<8x256xf32> to vector<8x64xf32>
    %115 = math.tanh %114 : vector<8x64xf32>
    %116 = vector.extract_strided_slice %101 {offsets = [0, 192], sizes = [8, 64], strides = [1, 1]} : vector<8x256xf32> to vector<8x64xf32>
    %117 = arith.negf %116 : vector<8x64xf32>
    %118 = math.exp %117 : vector<8x64xf32>
    %cst_31 = arith.constant 1.000000e+00 : f32
    %119 = vector.broadcast %cst_31 : f32 to vector<8x64xf32>
    %120 = arith.addf %119, %118 : vector<8x64xf32>
    %121 = arith.divf %119, %120 : vector<8x64xf32>
    %122 = arith.mulf %113, %95 : vector<8x64xf32>
    %123 = arith.mulf %107, %115 : vector<8x64xf32>
    %124 = arith.addf %122, %123 : vector<8x64xf32>
    %125 = math.tanh %124 : vector<8x64xf32>
    %126 = arith.mulf %121, %125 : vector<8x64xf32>
    %c24 = arith.constant 24 : index
    %c0_32 = arith.constant 0 : index
    %127 = vector.load %arg8[%c24, %c0_32] : memref<128x64xf32, #tpu.memory_space<vmem>>, vector<8x64xf32>
    tpu.vector_store %arg8[%c24, %c0_32], %126 {strides = array<i32>} : memref<128x64xf32, #tpu.memory_space<vmem>>, vector<8x64xf32>,
    %128 = vector.extract_strided_slice %9 {offsets = [32, 0], sizes = [8, 256], strides = [1, 1]} : vector<128x256xf32> to vector<8x256xf32>
    %cst_33 = arith.constant dense<0.000000e+00> : vector<8x256xf32>
    %129 = tpu.matmul %126, %4, %cst_33 {dimension_numbers = #tpu.dot_dimension_numbers<[1], [0], [0], [1], [0, 0, 1, 1], [], []>} : vector<8x64xf32>, vector<64x256xf32>, vector<8x256xf32> -> vector<8x256xf32>
    %130 = arith.addf %128, %129 : vector<8x256xf32>
    %131 = vector.extract_strided_slice %130 {offsets = [0, 0], sizes = [8, 64], strides = [1, 1]} : vector<8x256xf32> to vector<8x64xf32>
    %132 = arith.negf %131 : vector<8x64xf32>
    %133 = math.exp %132 : vector<8x64xf32>
    %cst_34 = arith.constant 1.000000e+00 : f32
    %134 = vector.broadcast %cst_34 : f32 to vector<8x64xf32>
    %135 = arith.addf %134, %133 : vector<8x64xf32>
    %136 = arith.divf %134, %135 : vector<8x64xf32>
    %137 = vector.extract_strided_slice %130 {offsets = [0, 64], sizes = [8, 64], strides = [1, 1]} : vector<8x256xf32> to vector<8x64xf32>
    %138 = arith.negf %137 : vector<8x64xf32>
    %139 = math.exp %138 : vector<8x64xf32>
    %cst_35 = arith.constant 1.000000e+00 : f32
    %140 = vector.broadcast %cst_35 : f32 to vector<8x64xf32>
    %141 = arith.addf %140, %139 : vector<8x64xf32>
    %142 = arith.divf %140, %141 : vector<8x64xf32>
    %143 = vector.extract_strided_slice %130 {offsets = [0, 128], sizes = [8, 64], strides = [1, 1]} : vector<8x256xf32> to vector<8x64xf32>
    %144 = math.tanh %143 : vector<8x64xf32>
    %145 = vector.extract_strided_slice %130 {offsets = [0, 192], sizes = [8, 64], strides = [1, 1]} : vector<8x256xf32> to vector<8x64xf32>
    %146 = arith.negf %145 : vector<8x64xf32>
    %147 = math.exp %146 : vector<8x64xf32>
    %cst_36 = arith.constant 1.000000e+00 : f32
    %148 = vector.broadcast %cst_36 : f32 to vector<8x64xf32>
    %149 = arith.addf %148, %147 : vector<8x64xf32>
    %150 = arith.divf %148, %149 : vector<8x64xf32>
    %151 = arith.mulf %142, %124 : vector<8x64xf32>
    %152 = arith.mulf %136, %144 : vector<8x64xf32>
    %153 = arith.addf %151, %152 : vector<8x64xf32>
    %154 = math.tanh %153 : vector<8x64xf32>
    %155 = arith.mulf %150, %154 : vector<8x64xf32>
    %c32 = arith.constant 32 : index
    %c0_37 = arith.constant 0 : index
    %156 = vector.load %arg8[%c32, %c0_37] : memref<128x64xf32, #tpu.memory_space<vmem>>, vector<8x64xf32>
    tpu.vector_store %arg8[%c32, %c0_37], %155 {strides = array<i32>} : memref<128x64xf32, #tpu.memory_space<vmem>>, vector<8x64xf32>,
    %157 = vector.extract_strided_slice %9 {offsets = [40, 0], sizes = [8, 256], strides = [1, 1]} : vector<128x256xf32> to vector<8x256xf32>
    %cst_38 = arith.constant dense<0.000000e+00> : vector<8x256xf32>
    %158 = tpu.matmul %155, %4, %cst_38 {dimension_numbers = #tpu.dot_dimension_numbers<[1], [0], [0], [1], [0, 0, 1, 1], [], []>} : vector<8x64xf32>, vector<64x256xf32>, vector<8x256xf32> -> vector<8x256xf32>
    %159 = arith.addf %157, %158 : vector<8x256xf32>
    %160 = vector.extract_strided_slice %159 {offsets = [0, 0], sizes = [8, 64], strides = [1, 1]} : vector<8x256xf32> to vector<8x64xf32>
    %161 = arith.negf %160 : vector<8x64xf32>
    %162 = math.exp %161 : vector<8x64xf32>
    %cst_39 = arith.constant 1.000000e+00 : f32
    %163 = vector.broadcast %cst_39 : f32 to vector<8x64xf32>
    %164 = arith.addf %163, %162 : vector<8x64xf32>
    %165 = arith.divf %163, %164 : vector<8x64xf32>
    %166 = vector.extract_strided_slice %159 {offsets = [0, 64], sizes = [8, 64], strides = [1, 1]} : vector<8x256xf32> to vector<8x64xf32>
    %167 = arith.negf %166 : vector<8x64xf32>
    %168 = math.exp %167 : vector<8x64xf32>
    %cst_40 = arith.constant 1.000000e+00 : f32
    %169 = vector.broadcast %cst_40 : f32 to vector<8x64xf32>
    %170 = arith.addf %169, %168 : vector<8x64xf32>
    %171 = arith.divf %169, %170 : vector<8x64xf32>
    %172 = vector.extract_strided_slice %159 {offsets = [0, 128], sizes = [8, 64], strides = [1, 1]} : vector<8x256xf32> to vector<8x64xf32>
    %173 = math.tanh %172 : vector<8x64xf32>
    %174 = vector.extract_strided_slice %159 {offsets = [0, 192], sizes = [8, 64], strides = [1, 1]} : vector<8x256xf32> to vector<8x64xf32>
    %175 = arith.negf %174 : vector<8x64xf32>
    %176 = math.exp %175 : vector<8x64xf32>
    %cst_41 = arith.constant 1.000000e+00 : f32
    %177 = vector.broadcast %cst_41 : f32 to vector<8x64xf32>
    %178 = arith.addf %177, %176 : vector<8x64xf32>
    %179 = arith.divf %177, %178 : vector<8x64xf32>
    %180 = arith.mulf %171, %153 : vector<8x64xf32>
    %181 = arith.mulf %165, %173 : vector<8x64xf32>
    %182 = arith.addf %180, %181 : vector<8x64xf32>
    %183 = math.tanh %182 : vector<8x64xf32>
    %184 = arith.mulf %179, %183 : vector<8x64xf32>
    %c40 = arith.constant 40 : index
    %c0_42 = arith.constant 0 : index
    %185 = vector.load %arg8[%c40, %c0_42] : memref<128x64xf32, #tpu.memory_space<vmem>>, vector<8x64xf32>
    tpu.vector_store %arg8[%c40, %c0_42], %184 {strides = array<i32>} : memref<128x64xf32, #tpu.memory_space<vmem>>, vector<8x64xf32>,
    %186 = vector.extract_strided_slice %9 {offsets = [48, 0], sizes = [8, 256], strides = [1, 1]} : vector<128x256xf32> to vector<8x256xf32>
    %cst_43 = arith.constant dense<0.000000e+00> : vector<8x256xf32>
    %187 = tpu.matmul %184, %4, %cst_43 {dimension_numbers = #tpu.dot_dimension_numbers<[1], [0], [0], [1], [0, 0, 1, 1], [], []>} : vector<8x64xf32>, vector<64x256xf32>, vector<8x256xf32> -> vector<8x256xf32>
    %188 = arith.addf %186, %187 : vector<8x256xf32>
    %189 = vector.extract_strided_slice %188 {offsets = [0, 0], sizes = [8, 64], strides = [1, 1]} : vector<8x256xf32> to vector<8x64xf32>
    %190 = arith.negf %189 : vector<8x64xf32>
    %191 = math.exp %190 : vector<8x64xf32>
    %cst_44 = arith.constant 1.000000e+00 : f32
    %192 = vector.broadcast %cst_44 : f32 to vector<8x64xf32>
    %193 = arith.addf %192, %191 : vector<8x64xf32>
    %194 = arith.divf %192, %193 : vector<8x64xf32>
    %195 = vector.extract_strided_slice %188 {offsets = [0, 64], sizes = [8, 64], strides = [1, 1]} : vector<8x256xf32> to vector<8x64xf32>
    %196 = arith.negf %195 : vector<8x64xf32>
    %197 = math.exp %196 : vector<8x64xf32>
    %cst_45 = arith.constant 1.000000e+00 : f32
    %198 = vector.broadcast %cst_45 : f32 to vector<8x64xf32>
    %199 = arith.addf %198, %197 : vector<8x64xf32>
    %200 = arith.divf %198, %199 : vector<8x64xf32>
    %201 = vector.extract_strided_slice %188 {offsets = [0, 128], sizes = [8, 64], strides = [1, 1]} : vector<8x256xf32> to vector<8x64xf32>
    %202 = math.tanh %201 : vector<8x64xf32>
    %203 = vector.extract_strided_slice %188 {offsets = [0, 192], sizes = [8, 64], strides = [1, 1]} : vector<8x256xf32> to vector<8x64xf32>
    %204 = arith.negf %203 : vector<8x64xf32>
    %205 = math.exp %204 : vector<8x64xf32>
    %cst_46 = arith.constant 1.000000e+00 : f32
    %206 = vector.broadcast %cst_46 : f32 to vector<8x64xf32>
    %207 = arith.addf %206, %205 : vector<8x64xf32>
    %208 = arith.divf %206, %207 : vector<8x64xf32>
    %209 = arith.mulf %200, %182 : vector<8x64xf32>
    %210 = arith.mulf %194, %202 : vector<8x64xf32>
    %211 = arith.addf %209, %210 : vector<8x64xf32>
    %212 = math.tanh %211 : vector<8x64xf32>
    %213 = arith.mulf %208, %212 : vector<8x64xf32>
    %c48 = arith.constant 48 : index
    %c0_47 = arith.constant 0 : index
    %214 = vector.load %arg8[%c48, %c0_47] : memref<128x64xf32, #tpu.memory_space<vmem>>, vector<8x64xf32>
    tpu.vector_store %arg8[%c48, %c0_47], %213 {strides = array<i32>} : memref<128x64xf32, #tpu.memory_space<vmem>>, vector<8x64xf32>,
    %215 = vector.extract_strided_slice %9 {offsets = [56, 0], sizes = [8, 256], strides = [1, 1]} : vector<128x256xf32> to vector<8x256xf32>
    %cst_48 = arith.constant dense<0.000000e+00> : vector<8x256xf32>
    %216 = tpu.matmul %213, %4, %cst_48 {dimension_numbers = #tpu.dot_dimension_numbers<[1], [0], [0], [1], [0, 0, 1, 1], [], []>} : vector<8x64xf32>, vector<64x256xf32>, vector<8x256xf32> -> vector<8x256xf32>
    %217 = arith.addf %215, %216 : vector<8x256xf32>
    %218 = vector.extract_strided_slice %217 {offsets = [0, 0], sizes = [8, 64], strides = [1, 1]} : vector<8x256xf32> to vector<8x64xf32>
    %219 = arith.negf %218 : vector<8x64xf32>
    %220 = math.exp %219 : vector<8x64xf32>
    %cst_49 = arith.constant 1.000000e+00 : f32
    %221 = vector.broadcast %cst_49 : f32 to vector<8x64xf32>
    %222 = arith.addf %221, %220 : vector<8x64xf32>
    %223 = arith.divf %221, %222 : vector<8x64xf32>
    %224 = vector.extract_strided_slice %217 {offsets = [0, 64], sizes = [8, 64], strides = [1, 1]} : vector<8x256xf32> to vector<8x64xf32>
    %225 = arith.negf %224 : vector<8x64xf32>
    %226 = math.exp %225 : vector<8x64xf32>
    %cst_50 = arith.constant 1.000000e+00 : f32
    %227 = vector.broadcast %cst_50 : f32 to vector<8x64xf32>
    %228 = arith.addf %227, %226 : vector<8x64xf32>
    %229 = arith.divf %227, %228 : vector<8x64xf32>
    %230 = vector.extract_strided_slice %217 {offsets = [0, 128], sizes = [8, 64], strides = [1, 1]} : vector<8x256xf32> to vector<8x64xf32>
    %231 = math.tanh %230 : vector<8x64xf32>
    %232 = vector.extract_strided_slice %217 {offsets = [0, 192], sizes = [8, 64], strides = [1, 1]} : vector<8x256xf32> to vector<8x64xf32>
    %233 = arith.negf %232 : vector<8x64xf32>
    %234 = math.exp %233 : vector<8x64xf32>
    %cst_51 = arith.constant 1.000000e+00 : f32
    %235 = vector.broadcast %cst_51 : f32 to vector<8x64xf32>
    %236 = arith.addf %235, %234 : vector<8x64xf32>
    %237 = arith.divf %235, %236 : vector<8x64xf32>
    %238 = arith.mulf %229, %211 : vector<8x64xf32>
    %239 = arith.mulf %223, %231 : vector<8x64xf32>
    %240 = arith.addf %238, %239 : vector<8x64xf32>
    %241 = math.tanh %240 : vector<8x64xf32>
    %242 = arith.mulf %237, %241 : vector<8x64xf32>
    %c56 = arith.constant 56 : index
    %c0_52 = arith.constant 0 : index
    %243 = vector.load %arg8[%c56, %c0_52] : memref<128x64xf32, #tpu.memory_space<vmem>>, vector<8x64xf32>
    tpu.vector_store %arg8[%c56, %c0_52], %242 {strides = array<i32>} : memref<128x64xf32, #tpu.memory_space<vmem>>, vector<8x64xf32>,
    %244 = vector.extract_strided_slice %9 {offsets = [64, 0], sizes = [8, 256], strides = [1, 1]} : vector<128x256xf32> to vector<8x256xf32>
    %cst_53 = arith.constant dense<0.000000e+00> : vector<8x256xf32>
    %245 = tpu.matmul %242, %4, %cst_53 {dimension_numbers = #tpu.dot_dimension_numbers<[1], [0], [0], [1], [0, 0, 1, 1], [], []>} : vector<8x64xf32>, vector<64x256xf32>, vector<8x256xf32> -> vector<8x256xf32>
    %246 = arith.addf %244, %245 : vector<8x256xf32>
    %247 = vector.extract_strided_slice %246 {offsets = [0, 0], sizes = [8, 64], strides = [1, 1]} : vector<8x256xf32> to vector<8x64xf32>
    %248 = arith.negf %247 : vector<8x64xf32>
    %249 = math.exp %248 : vector<8x64xf32>
    %cst_54 = arith.constant 1.000000e+00 : f32
    %250 = vector.broadcast %cst_54 : f32 to vector<8x64xf32>
    %251 = arith.addf %250, %249 : vector<8x64xf32>
    %252 = arith.divf %250, %251 : vector<8x64xf32>
    %253 = vector.extract_strided_slice %246 {offsets = [0, 64], sizes = [8, 64], strides = [1, 1]} : vector<8x256xf32> to vector<8x64xf32>
    %254 = arith.negf %253 : vector<8x64xf32>
    %255 = math.exp %254 : vector<8x64xf32>
    %cst_55 = arith.constant 1.000000e+00 : f32
    %256 = vector.broadcast %cst_55 : f32 to vector<8x64xf32>
    %257 = arith.addf %256, %255 : vector<8x64xf32>
    %258 = arith.divf %256, %257 : vector<8x64xf32>
    %259 = vector.extract_strided_slice %246 {offsets = [0, 128], sizes = [8, 64], strides = [1, 1]} : vector<8x256xf32> to vector<8x64xf32>
    %260 = math.tanh %259 : vector<8x64xf32>
    %261 = vector.extract_strided_slice %246 {offsets = [0, 192], sizes = [8, 64], strides = [1, 1]} : vector<8x256xf32> to vector<8x64xf32>
    %262 = arith.negf %261 : vector<8x64xf32>
    %263 = math.exp %262 : vector<8x64xf32>
    %cst_56 = arith.constant 1.000000e+00 : f32
    %264 = vector.broadcast %cst_56 : f32 to vector<8x64xf32>
    %265 = arith.addf %264, %263 : vector<8x64xf32>
    %266 = arith.divf %264, %265 : vector<8x64xf32>
    %267 = arith.mulf %258, %240 : vector<8x64xf32>
    %268 = arith.mulf %252, %260 : vector<8x64xf32>
    %269 = arith.addf %267, %268 : vector<8x64xf32>
    %270 = math.tanh %269 : vector<8x64xf32>
    %271 = arith.mulf %266, %270 : vector<8x64xf32>
    %c64 = arith.constant 64 : index
    %c0_57 = arith.constant 0 : index
    %272 = vector.load %arg8[%c64, %c0_57] : memref<128x64xf32, #tpu.memory_space<vmem>>, vector<8x64xf32>
    tpu.vector_store %arg8[%c64, %c0_57], %271 {strides = array<i32>} : memref<128x64xf32, #tpu.memory_space<vmem>>, vector<8x64xf32>,
    %273 = vector.extract_strided_slice %9 {offsets = [72, 0], sizes = [8, 256], strides = [1, 1]} : vector<128x256xf32> to vector<8x256xf32>
    %cst_58 = arith.constant dense<0.000000e+00> : vector<8x256xf32>
    %274 = tpu.matmul %271, %4, %cst_58 {dimension_numbers = #tpu.dot_dimension_numbers<[1], [0], [0], [1], [0, 0, 1, 1], [], []>} : vector<8x64xf32>, vector<64x256xf32>, vector<8x256xf32> -> vector<8x256xf32>
    %275 = arith.addf %273, %274 : vector<8x256xf32>
    %276 = vector.extract_strided_slice %275 {offsets = [0, 0], sizes = [8, 64], strides = [1, 1]} : vector<8x256xf32> to vector<8x64xf32>
    %277 = arith.negf %276 : vector<8x64xf32>
    %278 = math.exp %277 : vector<8x64xf32>
    %cst_59 = arith.constant 1.000000e+00 : f32
    %279 = vector.broadcast %cst_59 : f32 to vector<8x64xf32>
    %280 = arith.addf %279, %278 : vector<8x64xf32>
    %281 = arith.divf %279, %280 : vector<8x64xf32>
    %282 = vector.extract_strided_slice %275 {offsets = [0, 64], sizes = [8, 64], strides = [1, 1]} : vector<8x256xf32> to vector<8x64xf32>
    %283 = arith.negf %282 : vector<8x64xf32>
    %284 = math.exp %283 : vector<8x64xf32>
    %cst_60 = arith.constant 1.000000e+00 : f32
    %285 = vector.broadcast %cst_60 : f32 to vector<8x64xf32>
    %286 = arith.addf %285, %284 : vector<8x64xf32>
    %287 = arith.divf %285, %286 : vector<8x64xf32>
    %288 = vector.extract_strided_slice %275 {offsets = [0, 128], sizes = [8, 64], strides = [1, 1]} : vector<8x256xf32> to vector<8x64xf32>
    %289 = math.tanh %288 : vector<8x64xf32>
    %290 = vector.extract_strided_slice %275 {offsets = [0, 192], sizes = [8, 64], strides = [1, 1]} : vector<8x256xf32> to vector<8x64xf32>
    %291 = arith.negf %290 : vector<8x64xf32>
    %292 = math.exp %291 : vector<8x64xf32>
    %cst_61 = arith.constant 1.000000e+00 : f32
    %293 = vector.broadcast %cst_61 : f32 to vector<8x64xf32>
    %294 = arith.addf %293, %292 : vector<8x64xf32>
    %295 = arith.divf %293, %294 : vector<8x64xf32>
    %296 = arith.mulf %287, %269 : vector<8x64xf32>
    %297 = arith.mulf %281, %289 : vector<8x64xf32>
    %298 = arith.addf %296, %297 : vector<8x64xf32>
    %299 = math.tanh %298 : vector<8x64xf32>
    %300 = arith.mulf %295, %299 : vector<8x64xf32>
    %c72 = arith.constant 72 : index
    %c0_62 = arith.constant 0 : index
    %301 = vector.load %arg8[%c72, %c0_62] : memref<128x64xf32, #tpu.memory_space<vmem>>, vector<8x64xf32>
    tpu.vector_store %arg8[%c72, %c0_62], %300 {strides = array<i32>} : memref<128x64xf32, #tpu.memory_space<vmem>>, vector<8x64xf32>,
    %302 = vector.extract_strided_slice %9 {offsets = [80, 0], sizes = [8, 256], strides = [1, 1]} : vector<128x256xf32> to vector<8x256xf32>
    %cst_63 = arith.constant dense<0.000000e+00> : vector<8x256xf32>
    %303 = tpu.matmul %300, %4, %cst_63 {dimension_numbers = #tpu.dot_dimension_numbers<[1], [0], [0], [1], [0, 0, 1, 1], [], []>} : vector<8x64xf32>, vector<64x256xf32>, vector<8x256xf32> -> vector<8x256xf32>
    %304 = arith.addf %302, %303 : vector<8x256xf32>
    %305 = vector.extract_strided_slice %304 {offsets = [0, 0], sizes = [8, 64], strides = [1, 1]} : vector<8x256xf32> to vector<8x64xf32>
    %306 = arith.negf %305 : vector<8x64xf32>
    %307 = math.exp %306 : vector<8x64xf32>
    %cst_64 = arith.constant 1.000000e+00 : f32
    %308 = vector.broadcast %cst_64 : f32 to vector<8x64xf32>
    %309 = arith.addf %308, %307 : vector<8x64xf32>
    %310 = arith.divf %308, %309 : vector<8x64xf32>
    %311 = vector.extract_strided_slice %304 {offsets = [0, 64], sizes = [8, 64], strides = [1, 1]} : vector<8x256xf32> to vector<8x64xf32>
    %312 = arith.negf %311 : vector<8x64xf32>
    %313 = math.exp %312 : vector<8x64xf32>
    %cst_65 = arith.constant 1.000000e+00 : f32
    %314 = vector.broadcast %cst_65 : f32 to vector<8x64xf32>
    %315 = arith.addf %314, %313 : vector<8x64xf32>
    %316 = arith.divf %314, %315 : vector<8x64xf32>
    %317 = vector.extract_strided_slice %304 {offsets = [0, 128], sizes = [8, 64], strides = [1, 1]} : vector<8x256xf32> to vector<8x64xf32>
    %318 = math.tanh %317 : vector<8x64xf32>
    %319 = vector.extract_strided_slice %304 {offsets = [0, 192], sizes = [8, 64], strides = [1, 1]} : vector<8x256xf32> to vector<8x64xf32>
    %320 = arith.negf %319 : vector<8x64xf32>
    %321 = math.exp %320 : vector<8x64xf32>
    %cst_66 = arith.constant 1.000000e+00 : f32
    %322 = vector.broadcast %cst_66 : f32 to vector<8x64xf32>
    %323 = arith.addf %322, %321 : vector<8x64xf32>
    %324 = arith.divf %322, %323 : vector<8x64xf32>
    %325 = arith.mulf %316, %298 : vector<8x64xf32>
    %326 = arith.mulf %310, %318 : vector<8x64xf32>
    %327 = arith.addf %325, %326 : vector<8x64xf32>
    %328 = math.tanh %327 : vector<8x64xf32>
    %329 = arith.mulf %324, %328 : vector<8x64xf32>
    %c80 = arith.constant 80 : index
    %c0_67 = arith.constant 0 : index
    %330 = vector.load %arg8[%c80, %c0_67] : memref<128x64xf32, #tpu.memory_space<vmem>>, vector<8x64xf32>
    tpu.vector_store %arg8[%c80, %c0_67], %329 {strides = array<i32>} : memref<128x64xf32, #tpu.memory_space<vmem>>, vector<8x64xf32>,
    %331 = vector.extract_strided_slice %9 {offsets = [88, 0], sizes = [8, 256], strides = [1, 1]} : vector<128x256xf32> to vector<8x256xf32>
    %cst_68 = arith.constant dense<0.000000e+00> : vector<8x256xf32>
    %332 = tpu.matmul %329, %4, %cst_68 {dimension_numbers = #tpu.dot_dimension_numbers<[1], [0], [0], [1], [0, 0, 1, 1], [], []>} : vector<8x64xf32>, vector<64x256xf32>, vector<8x256xf32> -> vector<8x256xf32>
    %333 = arith.addf %331, %332 : vector<8x256xf32>
    %334 = vector.extract_strided_slice %333 {offsets = [0, 0], sizes = [8, 64], strides = [1, 1]} : vector<8x256xf32> to vector<8x64xf32>
    %335 = arith.negf %334 : vector<8x64xf32>
    %336 = math.exp %335 : vector<8x64xf32>
    %cst_69 = arith.constant 1.000000e+00 : f32
    %337 = vector.broadcast %cst_69 : f32 to vector<8x64xf32>
    %338 = arith.addf %337, %336 : vector<8x64xf32>
    %339 = arith.divf %337, %338 : vector<8x64xf32>
    %340 = vector.extract_strided_slice %333 {offsets = [0, 64], sizes = [8, 64], strides = [1, 1]} : vector<8x256xf32> to vector<8x64xf32>
    %341 = arith.negf %340 : vector<8x64xf32>
    %342 = math.exp %341 : vector<8x64xf32>
    %cst_70 = arith.constant 1.000000e+00 : f32
    %343 = vector.broadcast %cst_70 : f32 to vector<8x64xf32>
    %344 = arith.addf %343, %342 : vector<8x64xf32>
    %345 = arith.divf %343, %344 : vector<8x64xf32>
    %346 = vector.extract_strided_slice %333 {offsets = [0, 128], sizes = [8, 64], strides = [1, 1]} : vector<8x256xf32> to vector<8x64xf32>
    %347 = math.tanh %346 : vector<8x64xf32>
    %348 = vector.extract_strided_slice %333 {offsets = [0, 192], sizes = [8, 64], strides = [1, 1]} : vector<8x256xf32> to vector<8x64xf32>
    %349 = arith.negf %348 : vector<8x64xf32>
    %350 = math.exp %349 : vector<8x64xf32>
    %cst_71 = arith.constant 1.000000e+00 : f32
    %351 = vector.broadcast %cst_71 : f32 to vector<8x64xf32>
    %352 = arith.addf %351, %350 : vector<8x64xf32>
    %353 = arith.divf %351, %352 : vector<8x64xf32>
    %354 = arith.mulf %345, %327 : vector<8x64xf32>
    %355 = arith.mulf %339, %347 : vector<8x64xf32>
    %356 = arith.addf %354, %355 : vector<8x64xf32>
    %357 = math.tanh %356 : vector<8x64xf32>
    %358 = arith.mulf %353, %357 : vector<8x64xf32>
    %c88 = arith.constant 88 : index
    %c0_72 = arith.constant 0 : index
    %359 = vector.load %arg8[%c88, %c0_72] : memref<128x64xf32, #tpu.memory_space<vmem>>, vector<8x64xf32>
    tpu.vector_store %arg8[%c88, %c0_72], %358 {strides = array<i32>} : memref<128x64xf32, #tpu.memory_space<vmem>>, vector<8x64xf32>,
    %360 = vector.extract_strided_slice %9 {offsets = [96, 0], sizes = [8, 256], strides = [1, 1]} : vector<128x256xf32> to vector<8x256xf32>
    %cst_73 = arith.constant dense<0.000000e+00> : vector<8x256xf32>
    %361 = tpu.matmul %358, %4, %cst_73 {dimension_numbers = #tpu.dot_dimension_numbers<[1], [0], [0], [1], [0, 0, 1, 1], [], []>} : vector<8x64xf32>, vector<64x256xf32>, vector<8x256xf32> -> vector<8x256xf32>
    %362 = arith.addf %360, %361 : vector<8x256xf32>
    %363 = vector.extract_strided_slice %362 {offsets = [0, 0], sizes = [8, 64], strides = [1, 1]} : vector<8x256xf32> to vector<8x64xf32>
    %364 = arith.negf %363 : vector<8x64xf32>
    %365 = math.exp %364 : vector<8x64xf32>
    %cst_74 = arith.constant 1.000000e+00 : f32
    %366 = vector.broadcast %cst_74 : f32 to vector<8x64xf32>
    %367 = arith.addf %366, %365 : vector<8x64xf32>
    %368 = arith.divf %366, %367 : vector<8x64xf32>
    %369 = vector.extract_strided_slice %362 {offsets = [0, 64], sizes = [8, 64], strides = [1, 1]} : vector<8x256xf32> to vector<8x64xf32>
    %370 = arith.negf %369 : vector<8x64xf32>
    %371 = math.exp %370 : vector<8x64xf32>
    %cst_75 = arith.constant 1.000000e+00 : f32
    %372 = vector.broadcast %cst_75 : f32 to vector<8x64xf32>
    %373 = arith.addf %372, %371 : vector<8x64xf32>
    %374 = arith.divf %372, %373 : vector<8x64xf32>
    %375 = vector.extract_strided_slice %362 {offsets = [0, 128], sizes = [8, 64], strides = [1, 1]} : vector<8x256xf32> to vector<8x64xf32>
    %376 = math.tanh %375 : vector<8x64xf32>
    %377 = vector.extract_strided_slice %362 {offsets = [0, 192], sizes = [8, 64], strides = [1, 1]} : vector<8x256xf32> to vector<8x64xf32>
    %378 = arith.negf %377 : vector<8x64xf32>
    %379 = math.exp %378 : vector<8x64xf32>
    %cst_76 = arith.constant 1.000000e+00 : f32
    %380 = vector.broadcast %cst_76 : f32 to vector<8x64xf32>
    %381 = arith.addf %380, %379 : vector<8x64xf32>
    %382 = arith.divf %380, %381 : vector<8x64xf32>
    %383 = arith.mulf %374, %356 : vector<8x64xf32>
    %384 = arith.mulf %368, %376 : vector<8x64xf32>
    %385 = arith.addf %383, %384 : vector<8x64xf32>
    %386 = math.tanh %385 : vector<8x64xf32>
    %387 = arith.mulf %382, %386 : vector<8x64xf32>
    %c96 = arith.constant 96 : index
    %c0_77 = arith.constant 0 : index
    %388 = vector.load %arg8[%c96, %c0_77] : memref<128x64xf32, #tpu.memory_space<vmem>>, vector<8x64xf32>
    tpu.vector_store %arg8[%c96, %c0_77], %387 {strides = array<i32>} : memref<128x64xf32, #tpu.memory_space<vmem>>, vector<8x64xf32>,
    %389 = vector.extract_strided_slice %9 {offsets = [104, 0], sizes = [8, 256], strides = [1, 1]} : vector<128x256xf32> to vector<8x256xf32>
    %cst_78 = arith.constant dense<0.000000e+00> : vector<8x256xf32>
    %390 = tpu.matmul %387, %4, %cst_78 {dimension_numbers = #tpu.dot_dimension_numbers<[1], [0], [0], [1], [0, 0, 1, 1], [], []>} : vector<8x64xf32>, vector<64x256xf32>, vector<8x256xf32> -> vector<8x256xf32>
    %391 = arith.addf %389, %390 : vector<8x256xf32>
    %392 = vector.extract_strided_slice %391 {offsets = [0, 0], sizes = [8, 64], strides = [1, 1]} : vector<8x256xf32> to vector<8x64xf32>
    %393 = arith.negf %392 : vector<8x64xf32>
    %394 = math.exp %393 : vector<8x64xf32>
    %cst_79 = arith.constant 1.000000e+00 : f32
    %395 = vector.broadcast %cst_79 : f32 to vector<8x64xf32>
    %396 = arith.addf %395, %394 : vector<8x64xf32>
    %397 = arith.divf %395, %396 : vector<8x64xf32>
    %398 = vector.extract_strided_slice %391 {offsets = [0, 64], sizes = [8, 64], strides = [1, 1]} : vector<8x256xf32> to vector<8x64xf32>
    %399 = arith.negf %398 : vector<8x64xf32>
    %400 = math.exp %399 : vector<8x64xf32>
    %cst_80 = arith.constant 1.000000e+00 : f32
    %401 = vector.broadcast %cst_80 : f32 to vector<8x64xf32>
    %402 = arith.addf %401, %400 : vector<8x64xf32>
    %403 = arith.divf %401, %402 : vector<8x64xf32>
    %404 = vector.extract_strided_slice %391 {offsets = [0, 128], sizes = [8, 64], strides = [1, 1]} : vector<8x256xf32> to vector<8x64xf32>
    %405 = math.tanh %404 : vector<8x64xf32>
    %406 = vector.extract_strided_slice %391 {offsets = [0, 192], sizes = [8, 64], strides = [1, 1]} : vector<8x256xf32> to vector<8x64xf32>
    %407 = arith.negf %406 : vector<8x64xf32>
    %408 = math.exp %407 : vector<8x64xf32>
    %cst_81 = arith.constant 1.000000e+00 : f32
    %409 = vector.broadcast %cst_81 : f32 to vector<8x64xf32>
    %410 = arith.addf %409, %408 : vector<8x64xf32>
    %411 = arith.divf %409, %410 : vector<8x64xf32>
    %412 = arith.mulf %403, %385 : vector<8x64xf32>
    %413 = arith.mulf %397, %405 : vector<8x64xf32>
    %414 = arith.addf %412, %413 : vector<8x64xf32>
    %415 = math.tanh %414 : vector<8x64xf32>
    %416 = arith.mulf %411, %415 : vector<8x64xf32>
    %c104 = arith.constant 104 : index
    %c0_82 = arith.constant 0 : index
    %417 = vector.load %arg8[%c104, %c0_82] : memref<128x64xf32, #tpu.memory_space<vmem>>, vector<8x64xf32>
    tpu.vector_store %arg8[%c104, %c0_82], %416 {strides = array<i32>} : memref<128x64xf32, #tpu.memory_space<vmem>>, vector<8x64xf32>,
    %418 = vector.extract_strided_slice %9 {offsets = [112, 0], sizes = [8, 256], strides = [1, 1]} : vector<128x256xf32> to vector<8x256xf32>
    %cst_83 = arith.constant dense<0.000000e+00> : vector<8x256xf32>
    %419 = tpu.matmul %416, %4, %cst_83 {dimension_numbers = #tpu.dot_dimension_numbers<[1], [0], [0], [1], [0, 0, 1, 1], [], []>} : vector<8x64xf32>, vector<64x256xf32>, vector<8x256xf32> -> vector<8x256xf32>
    %420 = arith.addf %418, %419 : vector<8x256xf32>
    %421 = vector.extract_strided_slice %420 {offsets = [0, 0], sizes = [8, 64], strides = [1, 1]} : vector<8x256xf32> to vector<8x64xf32>
    %422 = arith.negf %421 : vector<8x64xf32>
    %423 = math.exp %422 : vector<8x64xf32>
    %cst_84 = arith.constant 1.000000e+00 : f32
    %424 = vector.broadcast %cst_84 : f32 to vector<8x64xf32>
    %425 = arith.addf %424, %423 : vector<8x64xf32>
    %426 = arith.divf %424, %425 : vector<8x64xf32>
    %427 = vector.extract_strided_slice %420 {offsets = [0, 64], sizes = [8, 64], strides = [1, 1]} : vector<8x256xf32> to vector<8x64xf32>
    %428 = arith.negf %427 : vector<8x64xf32>
    %429 = math.exp %428 : vector<8x64xf32>
    %cst_85 = arith.constant 1.000000e+00 : f32
    %430 = vector.broadcast %cst_85 : f32 to vector<8x64xf32>
    %431 = arith.addf %430, %429 : vector<8x64xf32>
    %432 = arith.divf %430, %431 : vector<8x64xf32>
    %433 = vector.extract_strided_slice %420 {offsets = [0, 128], sizes = [8, 64], strides = [1, 1]} : vector<8x256xf32> to vector<8x64xf32>
    %434 = math.tanh %433 : vector<8x64xf32>
    %435 = vector.extract_strided_slice %420 {offsets = [0, 192], sizes = [8, 64], strides = [1, 1]} : vector<8x256xf32> to vector<8x64xf32>
    %436 = arith.negf %435 : vector<8x64xf32>
    %437 = math.exp %436 : vector<8x64xf32>
    %cst_86 = arith.constant 1.000000e+00 : f32
    %438 = vector.broadcast %cst_86 : f32 to vector<8x64xf32>
    %439 = arith.addf %438, %437 : vector<8x64xf32>
    %440 = arith.divf %438, %439 : vector<8x64xf32>
    %441 = arith.mulf %432, %414 : vector<8x64xf32>
    %442 = arith.mulf %426, %434 : vector<8x64xf32>
    %443 = arith.addf %441, %442 : vector<8x64xf32>
    %444 = math.tanh %443 : vector<8x64xf32>
    %445 = arith.mulf %440, %444 : vector<8x64xf32>
    %c112 = arith.constant 112 : index
    %c0_87 = arith.constant 0 : index
    %446 = vector.load %arg8[%c112, %c0_87] : memref<128x64xf32, #tpu.memory_space<vmem>>, vector<8x64xf32>
    tpu.vector_store %arg8[%c112, %c0_87], %445 {strides = array<i32>} : memref<128x64xf32, #tpu.memory_space<vmem>>, vector<8x64xf32>,
    %447 = vector.extract_strided_slice %9 {offsets = [120, 0], sizes = [8, 256], strides = [1, 1]} : vector<128x256xf32> to vector<8x256xf32>
    %cst_88 = arith.constant dense<0.000000e+00> : vector<8x256xf32>
    %448 = tpu.matmul %445, %4, %cst_88 {dimension_numbers = #tpu.dot_dimension_numbers<[1], [0], [0], [1], [0, 0, 1, 1], [], []>} : vector<8x64xf32>, vector<64x256xf32>, vector<8x256xf32> -> vector<8x256xf32>
    %449 = arith.addf %447, %448 : vector<8x256xf32>
    %450 = vector.extract_strided_slice %449 {offsets = [0, 0], sizes = [8, 64], strides = [1, 1]} : vector<8x256xf32> to vector<8x64xf32>
    %451 = arith.negf %450 : vector<8x64xf32>
    %452 = math.exp %451 : vector<8x64xf32>
    %cst_89 = arith.constant 1.000000e+00 : f32
    %453 = vector.broadcast %cst_89 : f32 to vector<8x64xf32>
    %454 = arith.addf %453, %452 : vector<8x64xf32>
    %455 = arith.divf %453, %454 : vector<8x64xf32>
    %456 = vector.extract_strided_slice %449 {offsets = [0, 64], sizes = [8, 64], strides = [1, 1]} : vector<8x256xf32> to vector<8x64xf32>
    %457 = arith.negf %456 : vector<8x64xf32>
    %458 = math.exp %457 : vector<8x64xf32>
    %cst_90 = arith.constant 1.000000e+00 : f32
    %459 = vector.broadcast %cst_90 : f32 to vector<8x64xf32>
    %460 = arith.addf %459, %458 : vector<8x64xf32>
    %461 = arith.divf %459, %460 : vector<8x64xf32>
    %462 = vector.extract_strided_slice %449 {offsets = [0, 128], sizes = [8, 64], strides = [1, 1]} : vector<8x256xf32> to vector<8x64xf32>
    %463 = math.tanh %462 : vector<8x64xf32>
    %464 = vector.extract_strided_slice %449 {offsets = [0, 192], sizes = [8, 64], strides = [1, 1]} : vector<8x256xf32> to vector<8x64xf32>
    %465 = arith.negf %464 : vector<8x64xf32>
    %466 = math.exp %465 : vector<8x64xf32>
    %cst_91 = arith.constant 1.000000e+00 : f32
    %467 = vector.broadcast %cst_91 : f32 to vector<8x64xf32>
    %468 = arith.addf %467, %466 : vector<8x64xf32>
    %469 = arith.divf %467, %468 : vector<8x64xf32>
    %470 = arith.mulf %461, %443 : vector<8x64xf32>
    %471 = arith.mulf %455, %463 : vector<8x64xf32>
    %472 = arith.addf %470, %471 : vector<8x64xf32>
    %473 = math.tanh %472 : vector<8x64xf32>
    %474 = arith.mulf %469, %473 : vector<8x64xf32>
    %c120 = arith.constant 120 : index
    %c0_92 = arith.constant 0 : index
    %475 = vector.load %arg8[%c120, %c0_92] : memref<128x64xf32, #tpu.memory_space<vmem>>, vector<8x64xf32>
    tpu.vector_store %arg8[%c120, %c0_92], %474 {strides = array<i32>} : memref<128x64xf32, #tpu.memory_space<vmem>>, vector<8x64xf32>,
    %c0_93 = arith.constant 0 : index
    %c0_94 = arith.constant 0 : index
    %476 = vector.load %arg8[%c0_93, %c0_94] : memref<128x64xf32, #tpu.memory_space<vmem>>, vector<128x64xf32>
    %c1 = arith.constant 1 : index
    %c0_95 = arith.constant 0 : index
    %c0_96 = arith.constant 0 : index
    %477 = vector.load %arg2[%c1, %c0_95, %c0_96] : memref<2x64x256xf32, #tpu.memory_space<vmem>>, vector<1x64x256xf32>
    %478 = vector.shape_cast %477 : vector<1x64x256xf32> to vector<64x256xf32>
    %c1_97 = arith.constant 1 : index
    %c0_98 = arith.constant 0 : index
    %c0_99 = arith.constant 0 : index
    %479 = vector.load %arg3[%c1_97, %c0_98, %c0_99] : memref<2x64x256xf32, #tpu.memory_space<vmem>>, vector<1x64x256xf32>
    %480 = vector.shape_cast %479 : vector<1x64x256xf32> to vector<64x256xf32>
    %c1_100 = arith.constant 1 : index
    %c0_101 = arith.constant 0 : index
    %c0_102 = arith.constant 0 : index
    %481 = vector.load %arg4[%c1_100, %c0_101, %c0_102] : memref<2x1x256xf32, #tpu.memory_space<vmem>>, vector<1x1x256xf32>
    %482 = vector.shape_cast %481 : vector<1x1x256xf32> to vector<1x256xf32>
    %cst_103 = arith.constant dense<0.000000e+00> : vector<128x256xf32>
    %483 = tpu.matmul %476, %478, %cst_103 {dimension_numbers = #tpu.dot_dimension_numbers<[1], [0], [0], [1], [0, 0, 1, 1], [], []>} : vector<128x64xf32>, vector<64x256xf32>, vector<128x256xf32> -> vector<128x256xf32>
    %484 = vector.broadcast %482 : vector<1x256xf32> to vector<128x256xf32>
    %485 = arith.addf %483, %484 : vector<128x256xf32>
    %cst_104 = arith.constant 0.000000e+00 : f32
    %486 = vector.broadcast %cst_104 : f32 to vector<8x64xf32>
    %cst_105 = arith.constant 0.000000e+00 : f32
    %487 = vector.broadcast %cst_105 : f32 to vector<8x64xf32>
    %488 = vector.extract_strided_slice %485 {offsets = [0, 0], sizes = [8, 256], strides = [1, 1]} : vector<128x256xf32> to vector<8x256xf32>
    %cst_106 = arith.constant dense<0.000000e+00> : vector<8x256xf32>
    %489 = tpu.matmul %486, %480, %cst_106 {dimension_numbers = #tpu.dot_dimension_numbers<[1], [0], [0], [1], [0, 0, 1, 1], [], []>} : vector<8x64xf32>, vector<64x256xf32>, vector<8x256xf32> -> vector<8x256xf32>
    %490 = arith.addf %488, %489 : vector<8x256xf32>
    %491 = vector.extract_strided_slice %490 {offsets = [0, 0], sizes = [8, 64], strides = [1, 1]} : vector<8x256xf32> to vector<8x64xf32>
    %492 = arith.negf %491 : vector<8x64xf32>
    %493 = math.exp %492 : vector<8x64xf32>
    %cst_107 = arith.constant 1.000000e+00 : f32
    %494 = vector.broadcast %cst_107 : f32 to vector<8x64xf32>
    %495 = arith.addf %494, %493 : vector<8x64xf32>
    %496 = arith.divf %494, %495 : vector<8x64xf32>
    %497 = vector.extract_strided_slice %490 {offsets = [0, 64], sizes = [8, 64], strides = [1, 1]} : vector<8x256xf32> to vector<8x64xf32>
    %498 = arith.negf %497 : vector<8x64xf32>
    %499 = math.exp %498 : vector<8x64xf32>
    %cst_108 = arith.constant 1.000000e+00 : f32
    %500 = vector.broadcast %cst_108 : f32 to vector<8x64xf32>
    %501 = arith.addf %500, %499 : vector<8x64xf32>
    %502 = arith.divf %500, %501 : vector<8x64xf32>
    %503 = vector.extract_strided_slice %490 {offsets = [0, 128], sizes = [8, 64], strides = [1, 1]} : vector<8x256xf32> to vector<8x64xf32>
    %504 = math.tanh %503 : vector<8x64xf32>
    %505 = vector.extract_strided_slice %490 {offsets = [0, 192], sizes = [8, 64], strides = [1, 1]} : vector<8x256xf32> to vector<8x64xf32>
    %506 = arith.negf %505 : vector<8x64xf32>
    %507 = math.exp %506 : vector<8x64xf32>
    %cst_109 = arith.constant 1.000000e+00 : f32
    %508 = vector.broadcast %cst_109 : f32 to vector<8x64xf32>
    %509 = arith.addf %508, %507 : vector<8x64xf32>
    %510 = arith.divf %508, %509 : vector<8x64xf32>
    %511 = arith.mulf %502, %487 : vector<8x64xf32>
    %512 = arith.mulf %496, %504 : vector<8x64xf32>
    %513 = arith.addf %511, %512 : vector<8x64xf32>
    %514 = math.tanh %513 : vector<8x64xf32>
    %515 = arith.mulf %510, %514 : vector<8x64xf32>
    %c0_110 = arith.constant 0 : index
    %c0_111 = arith.constant 0 : index
    %516 = vector.load %arg8[%c0_110, %c0_111] : memref<128x64xf32, #tpu.memory_space<vmem>>, vector<8x64xf32>
    tpu.vector_store %arg8[%c0_110, %c0_111], %515 {strides = array<i32>} : memref<128x64xf32, #tpu.memory_space<vmem>>, vector<8x64xf32>,
    %517 = vector.extract_strided_slice %485 {offsets = [8, 0], sizes = [8, 256], strides = [1, 1]} : vector<128x256xf32> to vector<8x256xf32>
    %cst_112 = arith.constant dense<0.000000e+00> : vector<8x256xf32>
    %518 = tpu.matmul %515, %480, %cst_112 {dimension_numbers = #tpu.dot_dimension_numbers<[1], [0], [0], [1], [0, 0, 1, 1], [], []>} : vector<8x64xf32>, vector<64x256xf32>, vector<8x256xf32> -> vector<8x256xf32>
    %519 = arith.addf %517, %518 : vector<8x256xf32>
    %520 = vector.extract_strided_slice %519 {offsets = [0, 0], sizes = [8, 64], strides = [1, 1]} : vector<8x256xf32> to vector<8x64xf32>
    %521 = arith.negf %520 : vector<8x64xf32>
    %522 = math.exp %521 : vector<8x64xf32>
    %cst_113 = arith.constant 1.000000e+00 : f32
    %523 = vector.broadcast %cst_113 : f32 to vector<8x64xf32>
    %524 = arith.addf %523, %522 : vector<8x64xf32>
    %525 = arith.divf %523, %524 : vector<8x64xf32>
    %526 = vector.extract_strided_slice %519 {offsets = [0, 64], sizes = [8, 64], strides = [1, 1]} : vector<8x256xf32> to vector<8x64xf32>
    %527 = arith.negf %526 : vector<8x64xf32>
    %528 = math.exp %527 : vector<8x64xf32>
    %cst_114 = arith.constant 1.000000e+00 : f32
    %529 = vector.broadcast %cst_114 : f32 to vector<8x64xf32>
    %530 = arith.addf %529, %528 : vector<8x64xf32>
    %531 = arith.divf %529, %530 : vector<8x64xf32>
    %532 = vector.extract_strided_slice %519 {offsets = [0, 128], sizes = [8, 64], strides = [1, 1]} : vector<8x256xf32> to vector<8x64xf32>
    %533 = math.tanh %532 : vector<8x64xf32>
    %534 = vector.extract_strided_slice %519 {offsets = [0, 192], sizes = [8, 64], strides = [1, 1]} : vector<8x256xf32> to vector<8x64xf32>
    %535 = arith.negf %534 : vector<8x64xf32>
    %536 = math.exp %535 : vector<8x64xf32>
    %cst_115 = arith.constant 1.000000e+00 : f32
    %537 = vector.broadcast %cst_115 : f32 to vector<8x64xf32>
    %538 = arith.addf %537, %536 : vector<8x64xf32>
    %539 = arith.divf %537, %538 : vector<8x64xf32>
    %540 = arith.mulf %531, %513 : vector<8x64xf32>
    %541 = arith.mulf %525, %533 : vector<8x64xf32>
    %542 = arith.addf %540, %541 : vector<8x64xf32>
    %543 = math.tanh %542 : vector<8x64xf32>
    %544 = arith.mulf %539, %543 : vector<8x64xf32>
    %c8_116 = arith.constant 8 : index
    %c0_117 = arith.constant 0 : index
    %545 = vector.load %arg8[%c8_116, %c0_117] : memref<128x64xf32, #tpu.memory_space<vmem>>, vector<8x64xf32>
    tpu.vector_store %arg8[%c8_116, %c0_117], %544 {strides = array<i32>} : memref<128x64xf32, #tpu.memory_space<vmem>>, vector<8x64xf32>,
    %546 = vector.extract_strided_slice %485 {offsets = [16, 0], sizes = [8, 256], strides = [1, 1]} : vector<128x256xf32> to vector<8x256xf32>
    %cst_118 = arith.constant dense<0.000000e+00> : vector<8x256xf32>
    %547 = tpu.matmul %544, %480, %cst_118 {dimension_numbers = #tpu.dot_dimension_numbers<[1], [0], [0], [1], [0, 0, 1, 1], [], []>} : vector<8x64xf32>, vector<64x256xf32>, vector<8x256xf32> -> vector<8x256xf32>
    %548 = arith.addf %546, %547 : vector<8x256xf32>
    %549 = vector.extract_strided_slice %548 {offsets = [0, 0], sizes = [8, 64], strides = [1, 1]} : vector<8x256xf32> to vector<8x64xf32>
    %550 = arith.negf %549 : vector<8x64xf32>
    %551 = math.exp %550 : vector<8x64xf32>
    %cst_119 = arith.constant 1.000000e+00 : f32
    %552 = vector.broadcast %cst_119 : f32 to vector<8x64xf32>
    %553 = arith.addf %552, %551 : vector<8x64xf32>
    %554 = arith.divf %552, %553 : vector<8x64xf32>
    %555 = vector.extract_strided_slice %548 {offsets = [0, 64], sizes = [8, 64], strides = [1, 1]} : vector<8x256xf32> to vector<8x64xf32>
    %556 = arith.negf %555 : vector<8x64xf32>
    %557 = math.exp %556 : vector<8x64xf32>
    %cst_120 = arith.constant 1.000000e+00 : f32
    %558 = vector.broadcast %cst_120 : f32 to vector<8x64xf32>
    %559 = arith.addf %558, %557 : vector<8x64xf32>
    %560 = arith.divf %558, %559 : vector<8x64xf32>
    %561 = vector.extract_strided_slice %548 {offsets = [0, 128], sizes = [8, 64], strides = [1, 1]} : vector<8x256xf32> to vector<8x64xf32>
    %562 = math.tanh %561 : vector<8x64xf32>
    %563 = vector.extract_strided_slice %548 {offsets = [0, 192], sizes = [8, 64], strides = [1, 1]} : vector<8x256xf32> to vector<8x64xf32>
    %564 = arith.negf %563 : vector<8x64xf32>
    %565 = math.exp %564 : vector<8x64xf32>
    %cst_121 = arith.constant 1.000000e+00 : f32
    %566 = vector.broadcast %cst_121 : f32 to vector<8x64xf32>
    %567 = arith.addf %566, %565 : vector<8x64xf32>
    %568 = arith.divf %566, %567 : vector<8x64xf32>
    %569 = arith.mulf %560, %542 : vector<8x64xf32>
    %570 = arith.mulf %554, %562 : vector<8x64xf32>
    %571 = arith.addf %569, %570 : vector<8x64xf32>
    %572 = math.tanh %571 : vector<8x64xf32>
    %573 = arith.mulf %568, %572 : vector<8x64xf32>
    %c16_122 = arith.constant 16 : index
    %c0_123 = arith.constant 0 : index
    %574 = vector.load %arg8[%c16_122, %c0_123] : memref<128x64xf32, #tpu.memory_space<vmem>>, vector<8x64xf32>
    tpu.vector_store %arg8[%c16_122, %c0_123], %573 {strides = array<i32>} : memref<128x64xf32, #tpu.memory_space<vmem>>, vector<8x64xf32>,
    %575 = vector.extract_strided_slice %485 {offsets = [24, 0], sizes = [8, 256], strides = [1, 1]} : vector<128x256xf32> to vector<8x256xf32>
    %cst_124 = arith.constant dense<0.000000e+00> : vector<8x256xf32>
    %576 = tpu.matmul %573, %480, %cst_124 {dimension_numbers = #tpu.dot_dimension_numbers<[1], [0], [0], [1], [0, 0, 1, 1], [], []>} : vector<8x64xf32>, vector<64x256xf32>, vector<8x256xf32> -> vector<8x256xf32>
    %577 = arith.addf %575, %576 : vector<8x256xf32>
    %578 = vector.extract_strided_slice %577 {offsets = [0, 0], sizes = [8, 64], strides = [1, 1]} : vector<8x256xf32> to vector<8x64xf32>
    %579 = arith.negf %578 : vector<8x64xf32>
    %580 = math.exp %579 : vector<8x64xf32>
    %cst_125 = arith.constant 1.000000e+00 : f32
    %581 = vector.broadcast %cst_125 : f32 to vector<8x64xf32>
    %582 = arith.addf %581, %580 : vector<8x64xf32>
    %583 = arith.divf %581, %582 : vector<8x64xf32>
    %584 = vector.extract_strided_slice %577 {offsets = [0, 64], sizes = [8, 64], strides = [1, 1]} : vector<8x256xf32> to vector<8x64xf32>
    %585 = arith.negf %584 : vector<8x64xf32>
    %586 = math.exp %585 : vector<8x64xf32>
    %cst_126 = arith.constant 1.000000e+00 : f32
    %587 = vector.broadcast %cst_126 : f32 to vector<8x64xf32>
    %588 = arith.addf %587, %586 : vector<8x64xf32>
    %589 = arith.divf %587, %588 : vector<8x64xf32>
    %590 = vector.extract_strided_slice %577 {offsets = [0, 128], sizes = [8, 64], strides = [1, 1]} : vector<8x256xf32> to vector<8x64xf32>
    %591 = math.tanh %590 : vector<8x64xf32>
    %592 = vector.extract_strided_slice %577 {offsets = [0, 192], sizes = [8, 64], strides = [1, 1]} : vector<8x256xf32> to vector<8x64xf32>
    %593 = arith.negf %592 : vector<8x64xf32>
    %594 = math.exp %593 : vector<8x64xf32>
    %cst_127 = arith.constant 1.000000e+00 : f32
    %595 = vector.broadcast %cst_127 : f32 to vector<8x64xf32>
    %596 = arith.addf %595, %594 : vector<8x64xf32>
    %597 = arith.divf %595, %596 : vector<8x64xf32>
    %598 = arith.mulf %589, %571 : vector<8x64xf32>
    %599 = arith.mulf %583, %591 : vector<8x64xf32>
    %600 = arith.addf %598, %599 : vector<8x64xf32>
    %601 = math.tanh %600 : vector<8x64xf32>
    %602 = arith.mulf %597, %601 : vector<8x64xf32>
    %c24_128 = arith.constant 24 : index
    %c0_129 = arith.constant 0 : index
    %603 = vector.load %arg8[%c24_128, %c0_129] : memref<128x64xf32, #tpu.memory_space<vmem>>, vector<8x64xf32>
    tpu.vector_store %arg8[%c24_128, %c0_129], %602 {strides = array<i32>} : memref<128x64xf32, #tpu.memory_space<vmem>>, vector<8x64xf32>,
    %604 = vector.extract_strided_slice %485 {offsets = [32, 0], sizes = [8, 256], strides = [1, 1]} : vector<128x256xf32> to vector<8x256xf32>
    %cst_130 = arith.constant dense<0.000000e+00> : vector<8x256xf32>
    %605 = tpu.matmul %602, %480, %cst_130 {dimension_numbers = #tpu.dot_dimension_numbers<[1], [0], [0], [1], [0, 0, 1, 1], [], []>} : vector<8x64xf32>, vector<64x256xf32>, vector<8x256xf32> -> vector<8x256xf32>
    %606 = arith.addf %604, %605 : vector<8x256xf32>
    %607 = vector.extract_strided_slice %606 {offsets = [0, 0], sizes = [8, 64], strides = [1, 1]} : vector<8x256xf32> to vector<8x64xf32>
    %608 = arith.negf %607 : vector<8x64xf32>
    %609 = math.exp %608 : vector<8x64xf32>
    %cst_131 = arith.constant 1.000000e+00 : f32
    %610 = vector.broadcast %cst_131 : f32 to vector<8x64xf32>
    %611 = arith.addf %610, %609 : vector<8x64xf32>
    %612 = arith.divf %610, %611 : vector<8x64xf32>
    %613 = vector.extract_strided_slice %606 {offsets = [0, 64], sizes = [8, 64], strides = [1, 1]} : vector<8x256xf32> to vector<8x64xf32>
    %614 = arith.negf %613 : vector<8x64xf32>
    %615 = math.exp %614 : vector<8x64xf32>
    %cst_132 = arith.constant 1.000000e+00 : f32
    %616 = vector.broadcast %cst_132 : f32 to vector<8x64xf32>
    %617 = arith.addf %616, %615 : vector<8x64xf32>
    %618 = arith.divf %616, %617 : vector<8x64xf32>
    %619 = vector.extract_strided_slice %606 {offsets = [0, 128], sizes = [8, 64], strides = [1, 1]} : vector<8x256xf32> to vector<8x64xf32>
    %620 = math.tanh %619 : vector<8x64xf32>
    %621 = vector.extract_strided_slice %606 {offsets = [0, 192], sizes = [8, 64], strides = [1, 1]} : vector<8x256xf32> to vector<8x64xf32>
    %622 = arith.negf %621 : vector<8x64xf32>
    %623 = math.exp %622 : vector<8x64xf32>
    %cst_133 = arith.constant 1.000000e+00 : f32
    %624 = vector.broadcast %cst_133 : f32 to vector<8x64xf32>
    %625 = arith.addf %624, %623 : vector<8x64xf32>
    %626 = arith.divf %624, %625 : vector<8x64xf32>
    %627 = arith.mulf %618, %600 : vector<8x64xf32>
    %628 = arith.mulf %612, %620 : vector<8x64xf32>
    %629 = arith.addf %627, %628 : vector<8x64xf32>
    %630 = math.tanh %629 : vector<8x64xf32>
    %631 = arith.mulf %626, %630 : vector<8x64xf32>
    %c32_134 = arith.constant 32 : index
    %c0_135 = arith.constant 0 : index
    %632 = vector.load %arg8[%c32_134, %c0_135] : memref<128x64xf32, #tpu.memory_space<vmem>>, vector<8x64xf32>
    tpu.vector_store %arg8[%c32_134, %c0_135], %631 {strides = array<i32>} : memref<128x64xf32, #tpu.memory_space<vmem>>, vector<8x64xf32>,
    %633 = vector.extract_strided_slice %485 {offsets = [40, 0], sizes = [8, 256], strides = [1, 1]} : vector<128x256xf32> to vector<8x256xf32>
    %cst_136 = arith.constant dense<0.000000e+00> : vector<8x256xf32>
    %634 = tpu.matmul %631, %480, %cst_136 {dimension_numbers = #tpu.dot_dimension_numbers<[1], [0], [0], [1], [0, 0, 1, 1], [], []>} : vector<8x64xf32>, vector<64x256xf32>, vector<8x256xf32> -> vector<8x256xf32>
    %635 = arith.addf %633, %634 : vector<8x256xf32>
    %636 = vector.extract_strided_slice %635 {offsets = [0, 0], sizes = [8, 64], strides = [1, 1]} : vector<8x256xf32> to vector<8x64xf32>
    %637 = arith.negf %636 : vector<8x64xf32>
    %638 = math.exp %637 : vector<8x64xf32>
    %cst_137 = arith.constant 1.000000e+00 : f32
    %639 = vector.broadcast %cst_137 : f32 to vector<8x64xf32>
    %640 = arith.addf %639, %638 : vector<8x64xf32>
    %641 = arith.divf %639, %640 : vector<8x64xf32>
    %642 = vector.extract_strided_slice %635 {offsets = [0, 64], sizes = [8, 64], strides = [1, 1]} : vector<8x256xf32> to vector<8x64xf32>
    %643 = arith.negf %642 : vector<8x64xf32>
    %644 = math.exp %643 : vector<8x64xf32>
    %cst_138 = arith.constant 1.000000e+00 : f32
    %645 = vector.broadcast %cst_138 : f32 to vector<8x64xf32>
    %646 = arith.addf %645, %644 : vector<8x64xf32>
    %647 = arith.divf %645, %646 : vector<8x64xf32>
    %648 = vector.extract_strided_slice %635 {offsets = [0, 128], sizes = [8, 64], strides = [1, 1]} : vector<8x256xf32> to vector<8x64xf32>
    %649 = math.tanh %648 : vector<8x64xf32>
    %650 = vector.extract_strided_slice %635 {offsets = [0, 192], sizes = [8, 64], strides = [1, 1]} : vector<8x256xf32> to vector<8x64xf32>
    %651 = arith.negf %650 : vector<8x64xf32>
    %652 = math.exp %651 : vector<8x64xf32>
    %cst_139 = arith.constant 1.000000e+00 : f32
    %653 = vector.broadcast %cst_139 : f32 to vector<8x64xf32>
    %654 = arith.addf %653, %652 : vector<8x64xf32>
    %655 = arith.divf %653, %654 : vector<8x64xf32>
    %656 = arith.mulf %647, %629 : vector<8x64xf32>
    %657 = arith.mulf %641, %649 : vector<8x64xf32>
    %658 = arith.addf %656, %657 : vector<8x64xf32>
    %659 = math.tanh %658 : vector<8x64xf32>
    %660 = arith.mulf %655, %659 : vector<8x64xf32>
    %c40_140 = arith.constant 40 : index
    %c0_141 = arith.constant 0 : index
    %661 = vector.load %arg8[%c40_140, %c0_141] : memref<128x64xf32, #tpu.memory_space<vmem>>, vector<8x64xf32>
    tpu.vector_store %arg8[%c40_140, %c0_141], %660 {strides = array<i32>} : memref<128x64xf32, #tpu.memory_space<vmem>>, vector<8x64xf32>,
    %662 = vector.extract_strided_slice %485 {offsets = [48, 0], sizes = [8, 256], strides = [1, 1]} : vector<128x256xf32> to vector<8x256xf32>
    %cst_142 = arith.constant dense<0.000000e+00> : vector<8x256xf32>
    %663 = tpu.matmul %660, %480, %cst_142 {dimension_numbers = #tpu.dot_dimension_numbers<[1], [0], [0], [1], [0, 0, 1, 1], [], []>} : vector<8x64xf32>, vector<64x256xf32>, vector<8x256xf32> -> vector<8x256xf32>
    %664 = arith.addf %662, %663 : vector<8x256xf32>
    %665 = vector.extract_strided_slice %664 {offsets = [0, 0], sizes = [8, 64], strides = [1, 1]} : vector<8x256xf32> to vector<8x64xf32>
    %666 = arith.negf %665 : vector<8x64xf32>
    %667 = math.exp %666 : vector<8x64xf32>
    %cst_143 = arith.constant 1.000000e+00 : f32
    %668 = vector.broadcast %cst_143 : f32 to vector<8x64xf32>
    %669 = arith.addf %668, %667 : vector<8x64xf32>
    %670 = arith.divf %668, %669 : vector<8x64xf32>
    %671 = vector.extract_strided_slice %664 {offsets = [0, 64], sizes = [8, 64], strides = [1, 1]} : vector<8x256xf32> to vector<8x64xf32>
    %672 = arith.negf %671 : vector<8x64xf32>
    %673 = math.exp %672 : vector<8x64xf32>
    %cst_144 = arith.constant 1.000000e+00 : f32
    %674 = vector.broadcast %cst_144 : f32 to vector<8x64xf32>
    %675 = arith.addf %674, %673 : vector<8x64xf32>
    %676 = arith.divf %674, %675 : vector<8x64xf32>
    %677 = vector.extract_strided_slice %664 {offsets = [0, 128], sizes = [8, 64], strides = [1, 1]} : vector<8x256xf32> to vector<8x64xf32>
    %678 = math.tanh %677 : vector<8x64xf32>
    %679 = vector.extract_strided_slice %664 {offsets = [0, 192], sizes = [8, 64], strides = [1, 1]} : vector<8x256xf32> to vector<8x64xf32>
    %680 = arith.negf %679 : vector<8x64xf32>
    %681 = math.exp %680 : vector<8x64xf32>
    %cst_145 = arith.constant 1.000000e+00 : f32
    %682 = vector.broadcast %cst_145 : f32 to vector<8x64xf32>
    %683 = arith.addf %682, %681 : vector<8x64xf32>
    %684 = arith.divf %682, %683 : vector<8x64xf32>
    %685 = arith.mulf %676, %658 : vector<8x64xf32>
    %686 = arith.mulf %670, %678 : vector<8x64xf32>
    %687 = arith.addf %685, %686 : vector<8x64xf32>
    %688 = math.tanh %687 : vector<8x64xf32>
    %689 = arith.mulf %684, %688 : vector<8x64xf32>
    %c48_146 = arith.constant 48 : index
    %c0_147 = arith.constant 0 : index
    %690 = vector.load %arg8[%c48_146, %c0_147] : memref<128x64xf32, #tpu.memory_space<vmem>>, vector<8x64xf32>
    tpu.vector_store %arg8[%c48_146, %c0_147], %689 {strides = array<i32>} : memref<128x64xf32, #tpu.memory_space<vmem>>, vector<8x64xf32>,
    %691 = vector.extract_strided_slice %485 {offsets = [56, 0], sizes = [8, 256], strides = [1, 1]} : vector<128x256xf32> to vector<8x256xf32>
    %cst_148 = arith.constant dense<0.000000e+00> : vector<8x256xf32>
    %692 = tpu.matmul %689, %480, %cst_148 {dimension_numbers = #tpu.dot_dimension_numbers<[1], [0], [0], [1], [0, 0, 1, 1], [], []>} : vector<8x64xf32>, vector<64x256xf32>, vector<8x256xf32> -> vector<8x256xf32>
    %693 = arith.addf %691, %692 : vector<8x256xf32>
    %694 = vector.extract_strided_slice %693 {offsets = [0, 0], sizes = [8, 64], strides = [1, 1]} : vector<8x256xf32> to vector<8x64xf32>
    %695 = arith.negf %694 : vector<8x64xf32>
    %696 = math.exp %695 : vector<8x64xf32>
    %cst_149 = arith.constant 1.000000e+00 : f32
    %697 = vector.broadcast %cst_149 : f32 to vector<8x64xf32>
    %698 = arith.addf %697, %696 : vector<8x64xf32>
    %699 = arith.divf %697, %698 : vector<8x64xf32>
    %700 = vector.extract_strided_slice %693 {offsets = [0, 64], sizes = [8, 64], strides = [1, 1]} : vector<8x256xf32> to vector<8x64xf32>
    %701 = arith.negf %700 : vector<8x64xf32>
    %702 = math.exp %701 : vector<8x64xf32>
    %cst_150 = arith.constant 1.000000e+00 : f32
    %703 = vector.broadcast %cst_150 : f32 to vector<8x64xf32>
    %704 = arith.addf %703, %702 : vector<8x64xf32>
    %705 = arith.divf %703, %704 : vector<8x64xf32>
    %706 = vector.extract_strided_slice %693 {offsets = [0, 128], sizes = [8, 64], strides = [1, 1]} : vector<8x256xf32> to vector<8x64xf32>
    %707 = math.tanh %706 : vector<8x64xf32>
    %708 = vector.extract_strided_slice %693 {offsets = [0, 192], sizes = [8, 64], strides = [1, 1]} : vector<8x256xf32> to vector<8x64xf32>
    %709 = arith.negf %708 : vector<8x64xf32>
    %710 = math.exp %709 : vector<8x64xf32>
    %cst_151 = arith.constant 1.000000e+00 : f32
    %711 = vector.broadcast %cst_151 : f32 to vector<8x64xf32>
    %712 = arith.addf %711, %710 : vector<8x64xf32>
    %713 = arith.divf %711, %712 : vector<8x64xf32>
    %714 = arith.mulf %705, %687 : vector<8x64xf32>
    %715 = arith.mulf %699, %707 : vector<8x64xf32>
    %716 = arith.addf %714, %715 : vector<8x64xf32>
    %717 = math.tanh %716 : vector<8x64xf32>
    %718 = arith.mulf %713, %717 : vector<8x64xf32>
    %c56_152 = arith.constant 56 : index
    %c0_153 = arith.constant 0 : index
    %719 = vector.load %arg8[%c56_152, %c0_153] : memref<128x64xf32, #tpu.memory_space<vmem>>, vector<8x64xf32>
    tpu.vector_store %arg8[%c56_152, %c0_153], %718 {strides = array<i32>} : memref<128x64xf32, #tpu.memory_space<vmem>>, vector<8x64xf32>,
    %720 = vector.extract_strided_slice %485 {offsets = [64, 0], sizes = [8, 256], strides = [1, 1]} : vector<128x256xf32> to vector<8x256xf32>
    %cst_154 = arith.constant dense<0.000000e+00> : vector<8x256xf32>
    %721 = tpu.matmul %718, %480, %cst_154 {dimension_numbers = #tpu.dot_dimension_numbers<[1], [0], [0], [1], [0, 0, 1, 1], [], []>} : vector<8x64xf32>, vector<64x256xf32>, vector<8x256xf32> -> vector<8x256xf32>
    %722 = arith.addf %720, %721 : vector<8x256xf32>
    %723 = vector.extract_strided_slice %722 {offsets = [0, 0], sizes = [8, 64], strides = [1, 1]} : vector<8x256xf32> to vector<8x64xf32>
    %724 = arith.negf %723 : vector<8x64xf32>
    %725 = math.exp %724 : vector<8x64xf32>
    %cst_155 = arith.constant 1.000000e+00 : f32
    %726 = vector.broadcast %cst_155 : f32 to vector<8x64xf32>
    %727 = arith.addf %726, %725 : vector<8x64xf32>
    %728 = arith.divf %726, %727 : vector<8x64xf32>
    %729 = vector.extract_strided_slice %722 {offsets = [0, 64], sizes = [8, 64], strides = [1, 1]} : vector<8x256xf32> to vector<8x64xf32>
    %730 = arith.negf %729 : vector<8x64xf32>
    %731 = math.exp %730 : vector<8x64xf32>
    %cst_156 = arith.constant 1.000000e+00 : f32
    %732 = vector.broadcast %cst_156 : f32 to vector<8x64xf32>
    %733 = arith.addf %732, %731 : vector<8x64xf32>
    %734 = arith.divf %732, %733 : vector<8x64xf32>
    %735 = vector.extract_strided_slice %722 {offsets = [0, 128], sizes = [8, 64], strides = [1, 1]} : vector<8x256xf32> to vector<8x64xf32>
    %736 = math.tanh %735 : vector<8x64xf32>
    %737 = vector.extract_strided_slice %722 {offsets = [0, 192], sizes = [8, 64], strides = [1, 1]} : vector<8x256xf32> to vector<8x64xf32>
    %738 = arith.negf %737 : vector<8x64xf32>
    %739 = math.exp %738 : vector<8x64xf32>
    %cst_157 = arith.constant 1.000000e+00 : f32
    %740 = vector.broadcast %cst_157 : f32 to vector<8x64xf32>
    %741 = arith.addf %740, %739 : vector<8x64xf32>
    %742 = arith.divf %740, %741 : vector<8x64xf32>
    %743 = arith.mulf %734, %716 : vector<8x64xf32>
    %744 = arith.mulf %728, %736 : vector<8x64xf32>
    %745 = arith.addf %743, %744 : vector<8x64xf32>
    %746 = math.tanh %745 : vector<8x64xf32>
    %747 = arith.mulf %742, %746 : vector<8x64xf32>
    %c64_158 = arith.constant 64 : index
    %c0_159 = arith.constant 0 : index
    %748 = vector.load %arg8[%c64_158, %c0_159] : memref<128x64xf32, #tpu.memory_space<vmem>>, vector<8x64xf32>
    tpu.vector_store %arg8[%c64_158, %c0_159], %747 {strides = array<i32>} : memref<128x64xf32, #tpu.memory_space<vmem>>, vector<8x64xf32>,
    %749 = vector.extract_strided_slice %485 {offsets = [72, 0], sizes = [8, 256], strides = [1, 1]} : vector<128x256xf32> to vector<8x256xf32>
    %cst_160 = arith.constant dense<0.000000e+00> : vector<8x256xf32>
    %750 = tpu.matmul %747, %480, %cst_160 {dimension_numbers = #tpu.dot_dimension_numbers<[1], [0], [0], [1], [0, 0, 1, 1], [], []>} : vector<8x64xf32>, vector<64x256xf32>, vector<8x256xf32> -> vector<8x256xf32>
    %751 = arith.addf %749, %750 : vector<8x256xf32>
    %752 = vector.extract_strided_slice %751 {offsets = [0, 0], sizes = [8, 64], strides = [1, 1]} : vector<8x256xf32> to vector<8x64xf32>
    %753 = arith.negf %752 : vector<8x64xf32>
    %754 = math.exp %753 : vector<8x64xf32>
    %cst_161 = arith.constant 1.000000e+00 : f32
    %755 = vector.broadcast %cst_161 : f32 to vector<8x64xf32>
    %756 = arith.addf %755, %754 : vector<8x64xf32>
    %757 = arith.divf %755, %756 : vector<8x64xf32>
    %758 = vector.extract_strided_slice %751 {offsets = [0, 64], sizes = [8, 64], strides = [1, 1]} : vector<8x256xf32> to vector<8x64xf32>
    %759 = arith.negf %758 : vector<8x64xf32>
    %760 = math.exp %759 : vector<8x64xf32>
    %cst_162 = arith.constant 1.000000e+00 : f32
    %761 = vector.broadcast %cst_162 : f32 to vector<8x64xf32>
    %762 = arith.addf %761, %760 : vector<8x64xf32>
    %763 = arith.divf %761, %762 : vector<8x64xf32>
    %764 = vector.extract_strided_slice %751 {offsets = [0, 128], sizes = [8, 64], strides = [1, 1]} : vector<8x256xf32> to vector<8x64xf32>
    %765 = math.tanh %764 : vector<8x64xf32>
    %766 = vector.extract_strided_slice %751 {offsets = [0, 192], sizes = [8, 64], strides = [1, 1]} : vector<8x256xf32> to vector<8x64xf32>
    %767 = arith.negf %766 : vector<8x64xf32>
    %768 = math.exp %767 : vector<8x64xf32>
    %cst_163 = arith.constant 1.000000e+00 : f32
    %769 = vector.broadcast %cst_163 : f32 to vector<8x64xf32>
    %770 = arith.addf %769, %768 : vector<8x64xf32>
    %771 = arith.divf %769, %770 : vector<8x64xf32>
    %772 = arith.mulf %763, %745 : vector<8x64xf32>
    %773 = arith.mulf %757, %765 : vector<8x64xf32>
    %774 = arith.addf %772, %773 : vector<8x64xf32>
    %775 = math.tanh %774 : vector<8x64xf32>
    %776 = arith.mulf %771, %775 : vector<8x64xf32>
    %c72_164 = arith.constant 72 : index
    %c0_165 = arith.constant 0 : index
    %777 = vector.load %arg8[%c72_164, %c0_165] : memref<128x64xf32, #tpu.memory_space<vmem>>, vector<8x64xf32>
    tpu.vector_store %arg8[%c72_164, %c0_165], %776 {strides = array<i32>} : memref<128x64xf32, #tpu.memory_space<vmem>>, vector<8x64xf32>,
    %778 = vector.extract_strided_slice %485 {offsets = [80, 0], sizes = [8, 256], strides = [1, 1]} : vector<128x256xf32> to vector<8x256xf32>
    %cst_166 = arith.constant dense<0.000000e+00> : vector<8x256xf32>
    %779 = tpu.matmul %776, %480, %cst_166 {dimension_numbers = #tpu.dot_dimension_numbers<[1], [0], [0], [1], [0, 0, 1, 1], [], []>} : vector<8x64xf32>, vector<64x256xf32>, vector<8x256xf32> -> vector<8x256xf32>
    %780 = arith.addf %778, %779 : vector<8x256xf32>
    %781 = vector.extract_strided_slice %780 {offsets = [0, 0], sizes = [8, 64], strides = [1, 1]} : vector<8x256xf32> to vector<8x64xf32>
    %782 = arith.negf %781 : vector<8x64xf32>
    %783 = math.exp %782 : vector<8x64xf32>
    %cst_167 = arith.constant 1.000000e+00 : f32
    %784 = vector.broadcast %cst_167 : f32 to vector<8x64xf32>
    %785 = arith.addf %784, %783 : vector<8x64xf32>
    %786 = arith.divf %784, %785 : vector<8x64xf32>
    %787 = vector.extract_strided_slice %780 {offsets = [0, 64], sizes = [8, 64], strides = [1, 1]} : vector<8x256xf32> to vector<8x64xf32>
    %788 = arith.negf %787 : vector<8x64xf32>
    %789 = math.exp %788 : vector<8x64xf32>
    %cst_168 = arith.constant 1.000000e+00 : f32
    %790 = vector.broadcast %cst_168 : f32 to vector<8x64xf32>
    %791 = arith.addf %790, %789 : vector<8x64xf32>
    %792 = arith.divf %790, %791 : vector<8x64xf32>
    %793 = vector.extract_strided_slice %780 {offsets = [0, 128], sizes = [8, 64], strides = [1, 1]} : vector<8x256xf32> to vector<8x64xf32>
    %794 = math.tanh %793 : vector<8x64xf32>
    %795 = vector.extract_strided_slice %780 {offsets = [0, 192], sizes = [8, 64], strides = [1, 1]} : vector<8x256xf32> to vector<8x64xf32>
    %796 = arith.negf %795 : vector<8x64xf32>
    %797 = math.exp %796 : vector<8x64xf32>
    %cst_169 = arith.constant 1.000000e+00 : f32
    %798 = vector.broadcast %cst_169 : f32 to vector<8x64xf32>
    %799 = arith.addf %798, %797 : vector<8x64xf32>
    %800 = arith.divf %798, %799 : vector<8x64xf32>
    %801 = arith.mulf %792, %774 : vector<8x64xf32>
    %802 = arith.mulf %786, %794 : vector<8x64xf32>
    %803 = arith.addf %801, %802 : vector<8x64xf32>
    %804 = math.tanh %803 : vector<8x64xf32>
    %805 = arith.mulf %800, %804 : vector<8x64xf32>
    %c80_170 = arith.constant 80 : index
    %c0_171 = arith.constant 0 : index
    %806 = vector.load %arg8[%c80_170, %c0_171] : memref<128x64xf32, #tpu.memory_space<vmem>>, vector<8x64xf32>
    tpu.vector_store %arg8[%c80_170, %c0_171], %805 {strides = array<i32>} : memref<128x64xf32, #tpu.memory_space<vmem>>, vector<8x64xf32>,
    %807 = vector.extract_strided_slice %485 {offsets = [88, 0], sizes = [8, 256], strides = [1, 1]} : vector<128x256xf32> to vector<8x256xf32>
    %cst_172 = arith.constant dense<0.000000e+00> : vector<8x256xf32>
    %808 = tpu.matmul %805, %480, %cst_172 {dimension_numbers = #tpu.dot_dimension_numbers<[1], [0], [0], [1], [0, 0, 1, 1], [], []>} : vector<8x64xf32>, vector<64x256xf32>, vector<8x256xf32> -> vector<8x256xf32>
    %809 = arith.addf %807, %808 : vector<8x256xf32>
    %810 = vector.extract_strided_slice %809 {offsets = [0, 0], sizes = [8, 64], strides = [1, 1]} : vector<8x256xf32> to vector<8x64xf32>
    %811 = arith.negf %810 : vector<8x64xf32>
    %812 = math.exp %811 : vector<8x64xf32>
    %cst_173 = arith.constant 1.000000e+00 : f32
    %813 = vector.broadcast %cst_173 : f32 to vector<8x64xf32>
    %814 = arith.addf %813, %812 : vector<8x64xf32>
    %815 = arith.divf %813, %814 : vector<8x64xf32>
    %816 = vector.extract_strided_slice %809 {offsets = [0, 64], sizes = [8, 64], strides = [1, 1]} : vector<8x256xf32> to vector<8x64xf32>
    %817 = arith.negf %816 : vector<8x64xf32>
    %818 = math.exp %817 : vector<8x64xf32>
    %cst_174 = arith.constant 1.000000e+00 : f32
    %819 = vector.broadcast %cst_174 : f32 to vector<8x64xf32>
    %820 = arith.addf %819, %818 : vector<8x64xf32>
    %821 = arith.divf %819, %820 : vector<8x64xf32>
    %822 = vector.extract_strided_slice %809 {offsets = [0, 128], sizes = [8, 64], strides = [1, 1]} : vector<8x256xf32> to vector<8x64xf32>
    %823 = math.tanh %822 : vector<8x64xf32>
    %824 = vector.extract_strided_slice %809 {offsets = [0, 192], sizes = [8, 64], strides = [1, 1]} : vector<8x256xf32> to vector<8x64xf32>
    %825 = arith.negf %824 : vector<8x64xf32>
    %826 = math.exp %825 : vector<8x64xf32>
    %cst_175 = arith.constant 1.000000e+00 : f32
    %827 = vector.broadcast %cst_175 : f32 to vector<8x64xf32>
    %828 = arith.addf %827, %826 : vector<8x64xf32>
    %829 = arith.divf %827, %828 : vector<8x64xf32>
    %830 = arith.mulf %821, %803 : vector<8x64xf32>
    %831 = arith.mulf %815, %823 : vector<8x64xf32>
    %832 = arith.addf %830, %831 : vector<8x64xf32>
    %833 = math.tanh %832 : vector<8x64xf32>
    %834 = arith.mulf %829, %833 : vector<8x64xf32>
    %c88_176 = arith.constant 88 : index
    %c0_177 = arith.constant 0 : index
    %835 = vector.load %arg8[%c88_176, %c0_177] : memref<128x64xf32, #tpu.memory_space<vmem>>, vector<8x64xf32>
    tpu.vector_store %arg8[%c88_176, %c0_177], %834 {strides = array<i32>} : memref<128x64xf32, #tpu.memory_space<vmem>>, vector<8x64xf32>,
    %836 = vector.extract_strided_slice %485 {offsets = [96, 0], sizes = [8, 256], strides = [1, 1]} : vector<128x256xf32> to vector<8x256xf32>
    %cst_178 = arith.constant dense<0.000000e+00> : vector<8x256xf32>
    %837 = tpu.matmul %834, %480, %cst_178 {dimension_numbers = #tpu.dot_dimension_numbers<[1], [0], [0], [1], [0, 0, 1, 1], [], []>} : vector<8x64xf32>, vector<64x256xf32>, vector<8x256xf32> -> vector<8x256xf32>
    %838 = arith.addf %836, %837 : vector<8x256xf32>
    %839 = vector.extract_strided_slice %838 {offsets = [0, 0], sizes = [8, 64], strides = [1, 1]} : vector<8x256xf32> to vector<8x64xf32>
    %840 = arith.negf %839 : vector<8x64xf32>
    %841 = math.exp %840 : vector<8x64xf32>
    %cst_179 = arith.constant 1.000000e+00 : f32
    %842 = vector.broadcast %cst_179 : f32 to vector<8x64xf32>
    %843 = arith.addf %842, %841 : vector<8x64xf32>
    %844 = arith.divf %842, %843 : vector<8x64xf32>
    %845 = vector.extract_strided_slice %838 {offsets = [0, 64], sizes = [8, 64], strides = [1, 1]} : vector<8x256xf32> to vector<8x64xf32>
    %846 = arith.negf %845 : vector<8x64xf32>
    %847 = math.exp %846 : vector<8x64xf32>
    %cst_180 = arith.constant 1.000000e+00 : f32
    %848 = vector.broadcast %cst_180 : f32 to vector<8x64xf32>
    %849 = arith.addf %848, %847 : vector<8x64xf32>
    %850 = arith.divf %848, %849 : vector<8x64xf32>
    %851 = vector.extract_strided_slice %838 {offsets = [0, 128], sizes = [8, 64], strides = [1, 1]} : vector<8x256xf32> to vector<8x64xf32>
    %852 = math.tanh %851 : vector<8x64xf32>
    %853 = vector.extract_strided_slice %838 {offsets = [0, 192], sizes = [8, 64], strides = [1, 1]} : vector<8x256xf32> to vector<8x64xf32>
    %854 = arith.negf %853 : vector<8x64xf32>
    %855 = math.exp %854 : vector<8x64xf32>
    %cst_181 = arith.constant 1.000000e+00 : f32
    %856 = vector.broadcast %cst_181 : f32 to vector<8x64xf32>
    %857 = arith.addf %856, %855 : vector<8x64xf32>
    %858 = arith.divf %856, %857 : vector<8x64xf32>
    %859 = arith.mulf %850, %832 : vector<8x64xf32>
    %860 = arith.mulf %844, %852 : vector<8x64xf32>
    %861 = arith.addf %859, %860 : vector<8x64xf32>
    %862 = math.tanh %861 : vector<8x64xf32>
    %863 = arith.mulf %858, %862 : vector<8x64xf32>
    %c96_182 = arith.constant 96 : index
    %c0_183 = arith.constant 0 : index
    %864 = vector.load %arg8[%c96_182, %c0_183] : memref<128x64xf32, #tpu.memory_space<vmem>>, vector<8x64xf32>
    tpu.vector_store %arg8[%c96_182, %c0_183], %863 {strides = array<i32>} : memref<128x64xf32, #tpu.memory_space<vmem>>, vector<8x64xf32>,
    %865 = vector.extract_strided_slice %485 {offsets = [104, 0], sizes = [8, 256], strides = [1, 1]} : vector<128x256xf32> to vector<8x256xf32>
    %cst_184 = arith.constant dense<0.000000e+00> : vector<8x256xf32>
    %866 = tpu.matmul %863, %480, %cst_184 {dimension_numbers = #tpu.dot_dimension_numbers<[1], [0], [0], [1], [0, 0, 1, 1], [], []>} : vector<8x64xf32>, vector<64x256xf32>, vector<8x256xf32> -> vector<8x256xf32>
    %867 = arith.addf %865, %866 : vector<8x256xf32>
    %868 = vector.extract_strided_slice %867 {offsets = [0, 0], sizes = [8, 64], strides = [1, 1]} : vector<8x256xf32> to vector<8x64xf32>
    %869 = arith.negf %868 : vector<8x64xf32>
    %870 = math.exp %869 : vector<8x64xf32>
    %cst_185 = arith.constant 1.000000e+00 : f32
    %871 = vector.broadcast %cst_185 : f32 to vector<8x64xf32>
    %872 = arith.addf %871, %870 : vector<8x64xf32>
    %873 = arith.divf %871, %872 : vector<8x64xf32>
    %874 = vector.extract_strided_slice %867 {offsets = [0, 64], sizes = [8, 64], strides = [1, 1]} : vector<8x256xf32> to vector<8x64xf32>
    %875 = arith.negf %874 : vector<8x64xf32>
    %876 = math.exp %875 : vector<8x64xf32>
    %cst_186 = arith.constant 1.000000e+00 : f32
    %877 = vector.broadcast %cst_186 : f32 to vector<8x64xf32>
    %878 = arith.addf %877, %876 : vector<8x64xf32>
    %879 = arith.divf %877, %878 : vector<8x64xf32>
    %880 = vector.extract_strided_slice %867 {offsets = [0, 128], sizes = [8, 64], strides = [1, 1]} : vector<8x256xf32> to vector<8x64xf32>
    %881 = math.tanh %880 : vector<8x64xf32>
    %882 = vector.extract_strided_slice %867 {offsets = [0, 192], sizes = [8, 64], strides = [1, 1]} : vector<8x256xf32> to vector<8x64xf32>
    %883 = arith.negf %882 : vector<8x64xf32>
    %884 = math.exp %883 : vector<8x64xf32>
    %cst_187 = arith.constant 1.000000e+00 : f32
    %885 = vector.broadcast %cst_187 : f32 to vector<8x64xf32>
    %886 = arith.addf %885, %884 : vector<8x64xf32>
    %887 = arith.divf %885, %886 : vector<8x64xf32>
    %888 = arith.mulf %879, %861 : vector<8x64xf32>
    %889 = arith.mulf %873, %881 : vector<8x64xf32>
    %890 = arith.addf %888, %889 : vector<8x64xf32>
    %891 = math.tanh %890 : vector<8x64xf32>
    %892 = arith.mulf %887, %891 : vector<8x64xf32>
    %c104_188 = arith.constant 104 : index
    %c0_189 = arith.constant 0 : index
    %893 = vector.load %arg8[%c104_188, %c0_189] : memref<128x64xf32, #tpu.memory_space<vmem>>, vector<8x64xf32>
    tpu.vector_store %arg8[%c104_188, %c0_189], %892 {strides = array<i32>} : memref<128x64xf32, #tpu.memory_space<vmem>>, vector<8x64xf32>,
    %894 = vector.extract_strided_slice %485 {offsets = [112, 0], sizes = [8, 256], strides = [1, 1]} : vector<128x256xf32> to vector<8x256xf32>
    %cst_190 = arith.constant dense<0.000000e+00> : vector<8x256xf32>
    %895 = tpu.matmul %892, %480, %cst_190 {dimension_numbers = #tpu.dot_dimension_numbers<[1], [0], [0], [1], [0, 0, 1, 1], [], []>} : vector<8x64xf32>, vector<64x256xf32>, vector<8x256xf32> -> vector<8x256xf32>
    %896 = arith.addf %894, %895 : vector<8x256xf32>
    %897 = vector.extract_strided_slice %896 {offsets = [0, 0], sizes = [8, 64], strides = [1, 1]} : vector<8x256xf32> to vector<8x64xf32>
    %898 = arith.negf %897 : vector<8x64xf32>
    %899 = math.exp %898 : vector<8x64xf32>
    %cst_191 = arith.constant 1.000000e+00 : f32
    %900 = vector.broadcast %cst_191 : f32 to vector<8x64xf32>
    %901 = arith.addf %900, %899 : vector<8x64xf32>
    %902 = arith.divf %900, %901 : vector<8x64xf32>
    %903 = vector.extract_strided_slice %896 {offsets = [0, 64], sizes = [8, 64], strides = [1, 1]} : vector<8x256xf32> to vector<8x64xf32>
    %904 = arith.negf %903 : vector<8x64xf32>
    %905 = math.exp %904 : vector<8x64xf32>
    %cst_192 = arith.constant 1.000000e+00 : f32
    %906 = vector.broadcast %cst_192 : f32 to vector<8x64xf32>
    %907 = arith.addf %906, %905 : vector<8x64xf32>
    %908 = arith.divf %906, %907 : vector<8x64xf32>
    %909 = vector.extract_strided_slice %896 {offsets = [0, 128], sizes = [8, 64], strides = [1, 1]} : vector<8x256xf32> to vector<8x64xf32>
    %910 = math.tanh %909 : vector<8x64xf32>
    %911 = vector.extract_strided_slice %896 {offsets = [0, 192], sizes = [8, 64], strides = [1, 1]} : vector<8x256xf32> to vector<8x64xf32>
    %912 = arith.negf %911 : vector<8x64xf32>
    %913 = math.exp %912 : vector<8x64xf32>
    %cst_193 = arith.constant 1.000000e+00 : f32
    %914 = vector.broadcast %cst_193 : f32 to vector<8x64xf32>
    %915 = arith.addf %914, %913 : vector<8x64xf32>
    %916 = arith.divf %914, %915 : vector<8x64xf32>
    %917 = arith.mulf %908, %890 : vector<8x64xf32>
    %918 = arith.mulf %902, %910 : vector<8x64xf32>
    %919 = arith.addf %917, %918 : vector<8x64xf32>
    %920 = math.tanh %919 : vector<8x64xf32>
    %921 = arith.mulf %916, %920 : vector<8x64xf32>
    %c112_194 = arith.constant 112 : index
    %c0_195 = arith.constant 0 : index
    %922 = vector.load %arg8[%c112_194, %c0_195] : memref<128x64xf32, #tpu.memory_space<vmem>>, vector<8x64xf32>
    tpu.vector_store %arg8[%c112_194, %c0_195], %921 {strides = array<i32>} : memref<128x64xf32, #tpu.memory_space<vmem>>, vector<8x64xf32>,
    %923 = vector.extract_strided_slice %485 {offsets = [120, 0], sizes = [8, 256], strides = [1, 1]} : vector<128x256xf32> to vector<8x256xf32>
    %cst_196 = arith.constant dense<0.000000e+00> : vector<8x256xf32>
    %924 = tpu.matmul %921, %480, %cst_196 {dimension_numbers = #tpu.dot_dimension_numbers<[1], [0], [0], [1], [0, 0, 1, 1], [], []>} : vector<8x64xf32>, vector<64x256xf32>, vector<8x256xf32> -> vector<8x256xf32>
    %925 = arith.addf %923, %924 : vector<8x256xf32>
    %926 = vector.extract_strided_slice %925 {offsets = [0, 0], sizes = [8, 64], strides = [1, 1]} : vector<8x256xf32> to vector<8x64xf32>
    %927 = arith.negf %926 : vector<8x64xf32>
    %928 = math.exp %927 : vector<8x64xf32>
    %cst_197 = arith.constant 1.000000e+00 : f32
    %929 = vector.broadcast %cst_197 : f32 to vector<8x64xf32>
    %930 = arith.addf %929, %928 : vector<8x64xf32>
    %931 = arith.divf %929, %930 : vector<8x64xf32>
    %932 = vector.extract_strided_slice %925 {offsets = [0, 64], sizes = [8, 64], strides = [1, 1]} : vector<8x256xf32> to vector<8x64xf32>
    %933 = arith.negf %932 : vector<8x64xf32>
    %934 = math.exp %933 : vector<8x64xf32>
    %cst_198 = arith.constant 1.000000e+00 : f32
    %935 = vector.broadcast %cst_198 : f32 to vector<8x64xf32>
    %936 = arith.addf %935, %934 : vector<8x64xf32>
    %937 = arith.divf %935, %936 : vector<8x64xf32>
    %938 = vector.extract_strided_slice %925 {offsets = [0, 128], sizes = [8, 64], strides = [1, 1]} : vector<8x256xf32> to vector<8x64xf32>
    %939 = math.tanh %938 : vector<8x64xf32>
    %940 = vector.extract_strided_slice %925 {offsets = [0, 192], sizes = [8, 64], strides = [1, 1]} : vector<8x256xf32> to vector<8x64xf32>
    %941 = arith.negf %940 : vector<8x64xf32>
    %942 = math.exp %941 : vector<8x64xf32>
    %cst_199 = arith.constant 1.000000e+00 : f32
    %943 = vector.broadcast %cst_199 : f32 to vector<8x64xf32>
    %944 = arith.addf %943, %942 : vector<8x64xf32>
    %945 = arith.divf %943, %944 : vector<8x64xf32>
    %946 = arith.mulf %937, %919 : vector<8x64xf32>
    %947 = arith.mulf %931, %939 : vector<8x64xf32>
    %948 = arith.addf %946, %947 : vector<8x64xf32>
    %949 = math.tanh %948 : vector<8x64xf32>
    %950 = arith.mulf %945, %949 : vector<8x64xf32>
    %c120_200 = arith.constant 120 : index
    %c0_201 = arith.constant 0 : index
    %951 = vector.load %arg8[%c120_200, %c0_201] : memref<128x64xf32, #tpu.memory_space<vmem>>, vector<8x64xf32>
    tpu.vector_store %arg8[%c120_200, %c0_201], %950 {strides = array<i32>} : memref<128x64xf32, #tpu.memory_space<vmem>>, vector<8x64xf32>,
    %c0_202 = arith.constant 0 : index
    %c0_203 = arith.constant 0 : index
    %952 = vector.load %arg8[%c0_202, %c0_203] : memref<128x64xf32, #tpu.memory_space<vmem>>, vector<128x64xf32>
    %c0_204 = arith.constant 0 : index
    %c0_205 = arith.constant 0 : index
    %953 = vector.load %arg5[%c0_204, %c0_205] : memref<64x128xf32, #tpu.memory_space<vmem>>, vector<64x128xf32>
    %cst_206 = arith.constant dense<0.000000e+00> : vector<128x128xf32>
    %954 = tpu.matmul %952, %953, %cst_206 {dimension_numbers = #tpu.dot_dimension_numbers<[1], [0], [0], [1], [0, 0, 1, 1], [], []>} : vector<128x64xf32>, vector<64x128xf32>, vector<128x128xf32> -> vector<128x128xf32>
    %c0_207 = arith.constant 0 : index
    %c0_208 = arith.constant 0 : index
    %955 = vector.load %arg6[%c0_207, %c0_208] : memref<1x128xf32, #tpu.memory_space<vmem>>, vector<1x128xf32>
    %956 = vector.broadcast %955 : vector<1x128xf32> to vector<128x128xf32>
    %957 = arith.addf %954, %956 : vector<128x128xf32>
    %c0_209 = arith.constant 0 : index
    %c0_210 = arith.constant 0 : index
    %958 = vector.load %arg7[%c0_209, %c0_210] : memref<128x128xf32, #tpu.memory_space<vmem>>, vector<128x128xf32>
    tpu.vector_store %arg7[%c0_209, %c0_210], %957 {strides = array<i32>} : memref<128x128xf32, #tpu.memory_space<vmem>>, vector<128x128xf32>,
    return
  }
  func.func @transform_0(%arg0: i32) -> (i32, i32) {
    %c0_i32 = arith.constant 0 : i32
    %c0_i32_0 = arith.constant 0 : i32
    %c0_i32_1 = arith.constant 0 : i32
    return %c0_i32, %c0_i32_0 : i32, i32
  }
  func.func @transform_1(%arg0: i32) -> (i32, i32, i32) {
    %c0_i32 = arith.constant 0 : i32
    %c0_i32_0 = arith.constant 0 : i32
    %c0_i32_1 = arith.constant 0 : i32
    %c0_i32_2 = arith.constant 0 : i32
    return %c0_i32, %c0_i32_0, %c0_i32_1 : i32, i32, i32
  }
  func.func @transform_2(%arg0: i32) -> (i32, i32, i32) {
    %c0_i32 = arith.constant 0 : i32
    %c0_i32_0 = arith.constant 0 : i32
    %c0_i32_1 = arith.constant 0 : i32
    %c0_i32_2 = arith.constant 0 : i32
    return %c0_i32, %c0_i32_0, %c0_i32_1 : i32, i32, i32
  }
  func.func @transform_3(%arg0: i32) -> (i32, i32, i32) {
    %c0_i32 = arith.constant 0 : i32
    %c0_i32_0 = arith.constant 0 : i32
    %c0_i32_1 = arith.constant 0 : i32
    %c0_i32_2 = arith.constant 0 : i32
    return %c0_i32, %c0_i32_0, %c0_i32_1 : i32, i32, i32
  }
  func.func @transform_4(%arg0: i32) -> (i32, i32) {
    %c0_i32 = arith.constant 0 : i32
    %c0_i32_0 = arith.constant 0 : i32
    %c0_i32_1 = arith.constant 0 : i32
    return %c0_i32, %c0_i32_0 : i32, i32
  }
  func.func @transform_5(%arg0: i32) -> (i32, i32) {
    %c0_i32 = arith.constant 0 : i32
    %c0_i32_0 = arith.constant 0 : i32
    %c0_i32_1 = arith.constant 0 : i32
    return %c0_i32, %c0_i32_0 : i32, i32
  }
  func.func @transform_6(%arg0: i32) -> (i32, i32) {
    %c0_i32 = arith.constant 0 : i32
    %c0_i32_0 = arith.constant 0 : i32
    %c0_i32_1 = arith.constant 0 : i32
    return %c0_i32, %c0_i32_0 : i32, i32
  }
}

</mosaic_0001>

<bundles_post_ra>
// kernel: lstm_ae_multi_encoder_forward_pallas.2
= control target key start
LH: loop header
LB: loop body
LE: loop exit
PB: predicated region body
PF: predicated region fallthrough
CT: control target
= control target key end

     0   :  { %s1847_s18 = smov 0   ;;  %s2130_s0 = inlined_call_operand.vmem [shape: f32[2,64,8], index: 0, kind: input, shape index: {}]   ;;  %s2131_s1 = inlined_call_operand.vmem [shape: f32[2,8,128], index: 1, kind: input, shape index: {}]   ;;  %s2132_s2 = inlined_call_operand.vmem [shape: f32[2,1,32,128], index: 2, kind: input, shape index: {}]   ;;  %s2133_s3 = inlined_call_operand.vmem [shape: f32[2,2,32,128], index: 3, kind: input, shape index: {}]   ;;  %s2134_s4 = inlined_call_operand.vmem [shape: f32[2,2,1,128], index: 4, kind: input, shape index: {}]   ;;  %s2135_s5 = inlined_call_operand.vmem [shape: f32[2,8,32], index: 5, kind: output, shape index: {}]  }
   0x1 LB: > { %s1594_s19 = sadd.s32 4294967295, %s1812_s18   ;;  %p1598_p0 = scmp.ge.s32.totalorder %s1812_s18, 1  ;;  %s1812_s18 = sphi %s1847_s18, %s15_s18  }
   0x2   : > { %p225_p1 = scmp.lt.s32.totalorder %s1812_s18, 3 }
   0x4   : > { %p226_p2 = pnand %p1598_p0, %p225_p1 }
   0x5   : > { %p270_p3 = scmp.lt.s32.totalorder (!%p226_p2), %s1594_s19, 1  ;;  %s1815_s10 = smov (!%p226_p2), 64  }
   0x6   : > { %229 = sbr.rel (%p226_p2) target bundleno = 8129 (0x1fc1), region = 40  ;;  %s1816_s11 = smov (!%p226_p2), 32  }
   0xb   : > { %s2137_s19 = smov (!%p270_p3, %s1594_s19), 1  ;;  %vm314_vm0 = vcmask 64512   ;;  %v1814_v6 = vmov 0.0   ;;  %vm380_vm5 = vcmask 261120  }
   0xc   : > { %s1661_s20 = sshll.u32 %s2137_s19, 6  ;;  %s1601_s21 = sshll.u32 %s2137_s19, 3 }
   0xd   : > { %s1862_s24 = scalar_lea.vmem %s2133_s3, %s1661_s20  ;;  %s278_s27 = scalar_lea.vmem %s2131_s1, %s1601_s21 }
   0xe   : > { %v1870_v0 = vld [vmem:[%s1862_s24 + $0x18] sm:$0xff]  ;;  %v1873_v1 = vld [vmem:[%s1862_s24 + $0x10] sm:$0xff]  ;;  %v305_v2 = vld [vmem:[%s278_s27] sm:$0xff]  ;;  %s1878_s30 = scalar_lea.vmem %s2130_s0, %s1661_s20  ;;  %s1606_s6 = sshll.u32 %s2137_s19, 1 }
   0xf   : > { %396 = vmatpush.msra.mxu1 %v1870_v0  ;;  %354 = vmatpush.msra.mxu0 %v305_v2  ;;  %v297_v3 = vld [vmem:[%s1878_s30] sm:$0xff]  ;;  %v1884_v4 = vld [vmem:[%s1862_s24 + $0x8] sm:$0xff]  ;;  %s1890_s9 = scalar_lea.vmem %s2134_s4, %s1606_s6  ;;  %s1662_s12 = sshll.u32 %s2137_s19, 5 }
  0x10   : > { %1608 = vmatmul.msk.f32.vlgmr.msra.gmra.mxu0 %vm314_vm0, %v297_v3  ;;  %461 = vmatpush.msra.mxu2 %v1870_v0  ;;  %v1895_v5 = vld [vmem:[%s1862_s24] sm:$0xff]  ;;  %s283_s15 = scalar_lea.vmem %s2132_s2, %s1662_s12  ;;  %v298_v36 = vld [vmem:[%s1878_s30 + $0x8] sm:$0xff]  ;;  %v299_v3 = vld [vmem:[%s1878_s30 + $0x10] sm:$0xff]  ;;  %s296_s20 = scalar_lea.vmem %s2135_s5, %s1601_s21 }
  0x11   : > { %397 = vmatpush.msra.mxu1 %v1873_v1  ;;  %v1916_v7 = vld [vmem:[%s1890_s9] ss:$0 sm:$0xff]  ;;  %v913_v34 = vld [vmem:[%s283_s15 + $0x18] sm:$0xff]  ;;  %v912_v35 = vld [vmem:[%s283_s15 + $0x10] sm:$0xff] }
  0x12   : > { %462 = vmatpush.msra.mxu2 %v1873_v1  ;;  %960 = vmatpush.msra.mxu3 %v913_v34  ;;  %v911_v37 = vld [vmem:[%s283_s15 + $0x8] sm:$0xff]  ;;  %v910_v38 = vld [vmem:[%s283_s15] sm:$0xff] }
  0x13   : > { %398 = vmatpush.msra.mxu1 %v1884_v4 }
  0x14   : > { %463 = vmatpush.msra.mxu2 %v1884_v4  ;;  %961 = vmatpush.msra.mxu3 %v912_v35 }
  0x15   : > { %399 = vmatpush.msra.mxu1 %v1895_v5 }
  0x16   : > { %400 = vmatmul.f32.vlgmr.msra.gmra.mxu1 %v1814_v6  ;;  %464 = vmatpush.msra.mxu2 %v1895_v5 }
  0x17   : > { %526 = vmatpush.msrb.mxu1 %v1870_v0  ;;  %962 = vmatpush.msra.mxu3 %v911_v37 }
  0x18   : > { %656 = vmatpush.msrb.mxu2 %v1870_v0  ;;  %1609 = vmatmul.msk.f32.gmra.mxu0 %vm314_vm0, %v298_v36  ;;  %v300_v36 = vld [vmem:[%s1878_s30 + $0x18] sm:$0xff] }
  0x19   : > { %527 = vmatpush.msrb.mxu1 %v1873_v1  ;;  %963 = vmatpush.msra.mxu3 %v910_v38 }
  0x1a   : > { %657 = vmatpush.msrb.mxu2 %v1873_v1 }
  0x1b   : > { %528 = vmatpush.msrb.mxu1 %v1884_v4 }
  0x1c   : > { %658 = vmatpush.msrb.mxu2 %v1884_v4 }
  0x1d   : > { %529 = vmatpush.msrb.mxu1 %v1895_v5 }
  0x1e   : > { %659 = vmatpush.msrb.mxu2 %v1895_v5 }
  0x1f   : > { %591 = vmatpush.msra.mxu1 %v1870_v0 }
  0x20   : > { %1610 = vmatmul.msk.f32.gmra.mxu0 %vm314_vm0, %v299_v3 }
  0x21   : > { %592 = vmatpush.msra.mxu1 %v1873_v1 }
  0x23   : > { %593 = vmatpush.msra.mxu1 %v1884_v4 }
  0x25   : > { %594 = vmatpush.msra.mxu1 %v1895_v5 }
  0x28   : > { %1611 = vmatmul.msk.f32.gmra.mxu0 %vm314_vm0, %v300_v36 }
  0x8d   : > { %v356_v8 = vpop.f32.mrf.mxu0 }
  0x8e   : > { %v357_v9 = vadd.f32 %v1916_v7, %v356_v8 }
  0x93   : > { %v401_v10 = vpop.f32.mrf.mxu1 }
  0x94   : > { %v404_v11 = vadd.f32 %v401_v10, %v357_v9 }
  0x95   : > { %v359_v41 = vpop.f32.mrf.mxu0 }
  0x96   : > { %1677 = vtanh.f32 %v404_v11  ;;  %v1616_v13 = vmul.f32 -1.442695, %v404_v11  ;;  %v360_v42 = vadd.f32 %v1916_v7, %v359_v41 }
  0x98   : > { %1679 = vpow2.f32 %v1616_v13 }
  0x9c   : > { %v1678_v12 = vpop.eup %1677 }
  0x9d   : > { %427 = vrot.lane.b32.xlu0 %v1678_v12, %s1815_s10  ;;  %v362_v12 = vpop.f32.mrf.mxu0 }
  0x9e   : > { %v1680_v14 = vpop.eup %1679  ;;  %v363_v13 = vadd.f32 %v1916_v7, %v362_v12 }
  0x9f   : > { %v408_v15 = vadd.f32 1.0, %v1680_v14 }
  0xa1   : > { %1681 = vrcp.f32 %v408_v15  ;;  %v420_v21 = vand.u32 2147483648, %v408_v15  ;;  %vm414_vm2 = vweird.f32 %v408_v15  ;;  %v418_v22 = vand.u32 2147483647, %v408_v15 }
  0xa3   : > { %v421_v24 = vor.u32 1.1754944e-38, %v420_v21  ;;  %vm419_vm4 = vcmp.eq.f32.partialorder %v418_v22, 8.507059e+37 }
  0xa5   : > { %v365_v41 = vpop.f32.mrf.mxu0 }
  0xa7   : > { %v1682_v16 = vpop.eup %1681 }
  0xa8   : > { %v410_v17 = vmul.f32 %v1682_v16, %v408_v15  ;;  %vm415_vm1 = vweird.f32 %v1682_v16 }
  0xa9   : > { %vm416_vm3 = vmor %vm414_vm2, %vm415_vm1 }
  0xaa   : > { %v411_v18 = vsub.f32 1.0, %v410_v17 }
  0xac   : > { %v412_v19 = vmul.f32 %v1682_v16, %v411_v18 }
  0xae   : > { %v413_v20 = vadd.f32 %v1682_v16, %v412_v19 }
  0xb0   : > { %v417_v23 = vsel %vm416_vm3, %v1682_v16, %v413_v20 }
  0xb1   : > { %v422_v26 = vsel %vm419_vm4, %v421_v24, %v417_v23 }
  0xb2   : > { %v425_v28 = vmul.f32 0.0, %v422_v26 }
 0x10f   : > { %v428_v25 = vpop.permute.xlu0 %427 }
 0x110   : > { %v430_v27 = vmul.f32 %v428_v25, %v422_v26 }
 0x112   : > { %432 = vrot.lane.b32.xlu0 %v430_v27, %s1816_s11 }
 0x184   : > { %v433_v29 = vpop.permute.xlu0 %432 }
 0x185   : > { %v435_v30 = vadd.f32 %v433_v29, %v425_v28 }
 0x187   : > { %1683 = vtanh.f32 %v435_v30 }
 0x18d   : > { %v1684_v31 = vpop.eup %1683 }
 0x18e   : > { %438 = vrot.lane.b32.xlu1 %v1684_v31, %s1815_s10 }
 0x200   : > { %v439_v32 = vpop.permute.xlu1 %438 }
 0x201   : > { %v441_v33 = vmul.f32 %v439_v32, %v422_v26 }
 0x203   : > { %443 = vrot.lane.b32.xlu1 %v441_v33, %s1816_s11 }
 0x275   : > { %v444_v39 = vpop.permute.xlu1 %443 }
 0x276   : > { %446 = vst.msk [vmem:[#allocation2] sm:$0xff] %vm380_vm5, %v444_v39  ;;  %1617 = vmatmul.msk.f32.vlgmr.msra.gmra.mxu2 %vm380_vm5, %v444_v39 }
 0x277   : > { %721 = vmatpush.msra.mxu2 %v1870_v0 }
 0x279   : > { %722 = vmatpush.msra.mxu2 %v1873_v1 }
 0x27b   : > { %723 = vmatpush.msra.mxu2 %v1884_v4 }
 0x27d   : > { %v902_v40 = vld [vmem:[#allocation2] sm:$0xff]  ;;  %724 = vmatpush.msra.mxu2 %v1895_v5 }
 0x27e   : > { %1636 = vmatmul.msk.f32.vlgmr.msra.gmra.mxu3 %vm380_vm5, %v902_v40 }
 0x2f9   : > { %v466_v43 = vpop.f32.mrf.mxu2 }
 0x2fa   : > { %v469_v44 = vadd.f32 %v466_v43, %v360_v42  ;;  %v366_v42 = vadd.f32 %v1916_v7, %v365_v41 }
 0x2fc   : > { %1685 = vtanh.f32 %v469_v44  ;;  %v1618_v46 = vmul.f32 -1.442695, %v469_v44 }
 0x2fe   : > { %1687 = vpow2.f32 %v1618_v46 }
 0x302   : > { %v1686_v45 = vpop.eup %1685 }
 0x303   : > { %492 = vrot.lane.b32.xlu2 %v1686_v45, %s1815_s10 }
 0x304   : > { %v1688_v47 = vpop.eup %1687 }
 0x305   : > { %v473_v48 = vadd.f32 1.0, %v1688_v47 }
 0x307   : > { %1689 = vrcp.f32 %v473_v48  ;;  %v485_v54 = vand.u32 2147483648, %v473_v48  ;;  %vm479_vm7 = vweird.f32 %v473_v48  ;;  %v483_v55 = vand.u32 2147483647, %v473_v48 }
 0x309   : > { %v486_v57 = vor.u32 1.1754944e-38, %v485_v54  ;;  %vm484_vm9 = vcmp.eq.f32.partialorder %v483_v55, 8.507059e+37 }
 0x30d   : > { %v1690_v49 = vpop.eup %1689 }
 0x30e   : > { %v475_v50 = vmul.f32 %v1690_v49, %v473_v48  ;;  %vm480_vm6 = vweird.f32 %v1690_v49 }
 0x30f   : > { %vm481_vm8 = vmor %vm479_vm7, %vm480_vm6 }
 0x310   : > { %v476_v51 = vsub.f32 1.0, %v475_v50 }
 0x312   : > { %v477_v52 = vmul.f32 %v1690_v49, %v476_v51 }
 0x314   : > { %v478_v53 = vadd.f32 %v1690_v49, %v477_v52 }
 0x316   : > { %v482_v56 = vsel %vm481_vm8, %v1690_v49, %v478_v53 }
 0x317   : > { %v487_v59 = vsel %vm484_vm9, %v486_v57, %v482_v56 }
 0x318   : > { %v490_v61 = vmul.f32 %v487_v59, %v435_v30 }
 0x35d   : > { %v493_v58 = vpop.permute.xlu2 %492 }
 0x35e   : > { %v495_v60 = vmul.f32 %v493_v58, %v487_v59 }
 0x360   : > { %497 = vrot.lane.b32.xlu2 %v495_v60, %s1816_s11 }
 0x3ba   : > { %v498_v62 = vpop.permute.xlu2 %497 }
 0x3bb   : > { %v500_v63 = vadd.f32 %v498_v62, %v490_v61 }
 0x3bd   : > { %1691 = vtanh.f32 %v500_v63 }
 0x3c3   : > { %v1692_v2 = vpop.eup %1691 }
 0x3c4   : > { %503 = vrot.lane.b32.xlu0 %v1692_v2, %s1815_s10 }
 0x436   : > { %v504_v8 = vpop.permute.xlu0 %503 }
 0x437   : > { %v506_v9 = vmul.f32 %v504_v8, %v487_v59 }
 0x439   : > { %508 = vrot.lane.b32.xlu1 %v506_v9, %s1816_s11  ;;  %v301_v9 = vld [vmem:[%s1878_s30 + $0x20] sm:$0xff] }
 0x43a   : > { %1612 = vmatmul.msk.f32.gmra.mxu0 %vm314_vm0, %v301_v9  ;;  %v2008_v9 = vld [vmem:[%s1862_s24 + $0x20] sm:$0xff] }
 0x4ab   : > { %v509_v10 = vpop.permute.xlu1 %508 }
 0x4ac   : > { %511 = vst.msk [vmem:[#allocation2 + $0x8] sm:$0xff] %vm380_vm5, %v509_v10  ;;  %1619 = vmatmul.msk.f32.vlgmr.msrb.gmra.mxu1 %vm380_vm5, %v509_v10 }
 0x4ad   : > { %786 = vmatpush.msrb.mxu1 %v1870_v0 }
 0x4af   : > { %787 = vmatpush.msrb.mxu1 %v1873_v1 }
 0x4b1   : > { %788 = vmatpush.msrb.mxu1 %v1884_v4 }
 0x4b3   : > { %v903_v11 = vld [vmem:[#allocation2 + $0x8] sm:$0xff]  ;;  %789 = vmatpush.msrb.mxu1 %v1895_v5 }
 0x4b4   : > { %1637 = vmatmul.msk.f32.gmra.mxu3 %vm380_vm5, %v903_v11 }
 0x4b7   : > { %v368_v12 = vpop.f32.mrf.mxu0 }
 0x529   : > { %v531_v14 = vpop.f32.mrf.mxu1 }
 0x52a   : > { %v534_v15 = vadd.f32 %v531_v14, %v363_v13  ;;  %v369_v13 = vadd.f32 %v1916_v7, %v368_v12 }
 0x52c   : > { %1693 = vtanh.f32 %v534_v15  ;;  %v1620_v17 = vmul.f32 -1.442695, %v534_v15 }
 0x52e   : > { %1695 = vpow2.f32 %v1620_v17 }
 0x532   : > { %v1694_v16 = vpop.eup %1693 }
 0x533   : > { %557 = vrot.lane.b32.xlu2 %v1694_v16, %s1815_s10 }
 0x534   : > { %v1696_v18 = vpop.eup %1695 }
 0x535   : > { %v538_v19 = vadd.f32 1.0, %v1696_v18 }
 0x537   : > { %1697 = vrcp.f32 %v538_v19  ;;  %v550_v25 = vand.u32 2147483648, %v538_v19  ;;  %vm544_vm11 = vweird.f32 %v538_v19  ;;  %v548_v26 = vand.u32 2147483647, %v538_v19 }
 0x539   : > { %v551_v28 = vor.u32 1.1754944e-38, %v550_v25  ;;  %vm549_vm13 = vcmp.eq.f32.partialorder %v548_v26, 8.507059e+37 }
 0x53d   : > { %v1698_v20 = vpop.eup %1697 }
 0x53e   : > { %v540_v21 = vmul.f32 %v1698_v20, %v538_v19  ;;  %vm545_vm10 = vweird.f32 %v1698_v20 }
 0x53f   : > { %vm546_vm12 = vmor %vm544_vm11, %vm545_vm10 }
 0x540   : > { %v541_v22 = vsub.f32 1.0, %v540_v21 }
 0x542   : > { %v542_v23 = vmul.f32 %v1698_v20, %v541_v22 }
 0x544   : > { %v543_v24 = vadd.f32 %v1698_v20, %v542_v23 }
 0x546   : > { %v547_v27 = vsel %vm546_vm12, %v1698_v20, %v543_v24 }
 0x547   : > { %v552_v30 = vsel %vm549_vm13, %v551_v28, %v547_v27 }
 0x548   : > { %v555_v32 = vmul.f32 %v552_v30, %v500_v63 }
 0x58d   : > { %v558_v29 = vpop.permute.xlu2 %557 }
 0x58e   : > { %v560_v31 = vmul.f32 %v558_v29, %v552_v30 }
 0x590   : > { %562 = vrot.lane.b32.xlu0 %v560_v31, %s1816_s11 }
 0x602   : > { %v563_v33 = vpop.permute.xlu0 %562 }
 0x603   : > { %v565_v34 = vadd.f32 %v563_v33, %v555_v32 }
 0x605   : > { %1699 = vtanh.f32 %v565_v34 }
 0x60b   : > { %v1700_v35 = vpop.eup %1699 }
 0x60c   : > { %568 = vrot.lane.b32.xlu1 %v1700_v35, %s1815_s10 }
 0x67e   : > { %v569_v37 = vpop.permute.xlu1 %568 }
 0x67f   : > { %v571_v38 = vmul.f32 %v569_v37, %v552_v30 }
 0x681   : > { %573 = vrot.lane.b32.xlu2 %v571_v38, %s1816_s11 }
 0x6db   : > { %v574_v39 = vpop.permute.xlu2 %573 }
 0x6dc   : > { %576 = vst.msk [vmem:[#allocation2 + $0x10] sm:$0xff] %vm380_vm5, %v574_v39  ;;  %1621 = vmatmul.msk.f32.vlgmr.msra.gmra.mxu1 %vm380_vm5, %v574_v39 }
 0x6e3   : > { %v904_v40 = vld [vmem:[#allocation2 + $0x10] sm:$0xff] }
 0x6e4   : > { %1638 = vmatmul.msk.f32.gmra.mxu3 %vm380_vm5, %v904_v40 }
 0x759   : > { %v596_v43 = vpop.f32.mrf.mxu1 }
 0x75a   : > { %v599_v44 = vadd.f32 %v596_v43, %v366_v42 }
 0x75c   : > { %1701 = vtanh.f32 %v599_v44  ;;  %v1622_v46 = vmul.f32 -1.442695, %v599_v44 }
 0x75e   : > { %1703 = vpow2.f32 %v1622_v46 }
 0x762   : > { %v1702_v45 = vpop.eup %1701 }
 0x763   : > { %622 = vrot.lane.b32.xlu0 %v1702_v45, %s1815_s10 }
 0x764   : > { %v1704_v47 = vpop.eup %1703 }
 0x765   : > { %v603_v48 = vadd.f32 1.0, %v1704_v47 }
 0x767   : > { %1705 = vrcp.f32 %v603_v48  ;;  %v615_v54 = vand.u32 2147483648, %v603_v48  ;;  %vm609_vm15 = vweird.f32 %v603_v48  ;;  %v613_v55 = vand.u32 2147483647, %v603_v48 }
 0x769   : > { %v616_v57 = vor.u32 1.1754944e-38, %v615_v54  ;;  %vm614_vm2 = vcmp.eq.f32.partialorder %v613_v55, 8.507059e+37 }
 0x76d   : > { %v1706_v49 = vpop.eup %1705 }
 0x76e   : > { %v605_v50 = vmul.f32 %v1706_v49, %v603_v48  ;;  %vm610_vm14 = vweird.f32 %v1706_v49 }
 0x76f   : > { %vm611_vm1 = vmor %vm609_vm15, %vm610_vm14 }
 0x770   : > { %v606_v51 = vsub.f32 1.0, %v605_v50 }
 0x772   : > { %v607_v52 = vmul.f32 %v1706_v49, %v606_v51 }
 0x774   : > { %v608_v53 = vadd.f32 %v1706_v49, %v607_v52 }
 0x776   : > { %v612_v56 = vsel %vm611_vm1, %v1706_v49, %v608_v53 }
 0x777   : > { %v617_v59 = vsel %vm614_vm2, %v616_v57, %v612_v56 }
 0x778   : > { %v620_v61 = vmul.f32 %v617_v59, %v565_v34  ;;  %v302_v34 = vld [vmem:[%s1878_s30 + $0x28] sm:$0xff] }
 0x779   : > { %1613 = vmatmul.msk.f32.gmra.mxu0 %vm314_vm0, %v302_v34 }
 0x7d5   : > { %v623_v58 = vpop.permute.xlu0 %622 }
 0x7d6   : > { %v625_v60 = vmul.f32 %v623_v58, %v617_v59 }
 0x7d8   : > { %627 = vrot.lane.b32.xlu1 %v625_v60, %s1816_s11 }
 0x7f6   : > { %v371_v37 = vpop.f32.mrf.mxu0 }
 0x7f7   : > { %v372_v38 = vadd.f32 %v1916_v7, %v371_v37 }
 0x84a   : > { %v628_v62 = vpop.permute.xlu1 %627 }
 0x84b   : > { %v630_v63 = vadd.f32 %v628_v62, %v620_v61  ;;  %v303_v61 = vld [vmem:[%s1878_s30 + $0x30] sm:$0xff] }
 0x84c   : > { %1614 = vmatmul.msk.f32.gmra.mxu0 %vm314_vm0, %v303_v61 }
 0x84d   : > { %1707 = vtanh.f32 %v630_v63 }
 0x853   : > { %v1708_v2 = vpop.eup %1707 }
 0x854   : > { %633 = vrot.lane.b32.xlu2 %v1708_v2, %s1815_s10  ;;  %v1995_v2 = vld [vmem:[%s1862_s24 + $0x38] sm:$0xff] }
 0x855   : > { %1001 = vmatpush.msra.mxu1 %v1995_v2 }
 0x8ae   : > { %v634_v3 = vpop.permute.xlu2 %633 }
 0x8af   : > { %v636_v8 = vmul.f32 %v634_v3, %v617_v59  ;;  %v1998_v3 = vld [vmem:[%s1862_s24 + $0x30] sm:$0xff] }
 0x8b0   : > { %1002 = vmatpush.msra.mxu1 %v1998_v3 }
 0x8b1   : > { %638 = vrot.lane.b32.xlu0 %v636_v8, %s1816_s11  ;;  %v2003_v8 = vld [vmem:[%s1862_s24 + $0x28] sm:$0xff] }
 0x8b2   : > { %1003 = vmatpush.msra.mxu1 %v2003_v8 }
 0x8b4   : > { %1004 = vmatpush.msra.mxu1 %v2008_v9 }
 0x8c9   : > { %v374_v12 = vpop.f32.mrf.mxu0 }
 0x923   : > { %v639_v10 = vpop.permute.xlu0 %638 }
 0x924   : > { %641 = vst.msk [vmem:[#allocation2 + $0x18] sm:$0xff] %vm380_vm5, %v639_v10  ;;  %1623 = vmatmul.msk.f32.vlgmr.msrb.gmra.mxu2 %vm380_vm5, %v639_v10 }
 0x925   : > { %851 = vmatpush.msrb.mxu2 %v1870_v0 }
 0x927   : > { %852 = vmatpush.msrb.mxu2 %v1873_v1 }
 0x929   : > { %853 = vmatpush.msrb.mxu2 %v1884_v4 }
 0x92b   : > { %v905_v11 = vld [vmem:[#allocation2 + $0x18] sm:$0xff]  ;;  %854 = vmatpush.msrb.mxu2 %v1895_v5 }
 0x92c   : > { %1639 = vmatmul.msk.f32.gmra.mxu3 %vm380_vm5, %v905_v11 }
 0x9a7   : > { %v661_v14 = vpop.f32.mrf.mxu2 }
 0x9a8   : > { %v664_v15 = vadd.f32 %v661_v14, %v369_v13  ;;  %v375_v13 = vadd.f32 %v1916_v7, %v374_v12 }
 0x9aa   : > { %1709 = vtanh.f32 %v664_v15  ;;  %v1624_v17 = vmul.f32 -1.442695, %v664_v15 }
 0x9ac   : > { %1711 = vpow2.f32 %v1624_v17  ;;  %v965_v17 = vpop.f32.mrf.mxu3 }
 0x9b0   : > { %v1710_v16 = vpop.eup %1709 }
 0x9b1   : > { %687 = vrot.lane.b32.xlu1 %v1710_v16, %s1815_s10  ;;  %v2028_v16 = vld [vmem:[%s1890_s9 + $0x1] ss:$0 sm:$0xff] }
 0x9b2   : > { %v1712_v0 = vpop.eup %1711 }
 0x9b3   : > { %v668_v1 = vadd.f32 1.0, %v1712_v0  ;;  %v966_v0 = vadd.f32 %v2028_v16, %v965_v17 }
 0x9b5   : > { %1713 = vrcp.f32 %v668_v1  ;;  %v680_v21 = vand.u32 2147483648, %v668_v1  ;;  %vm674_vm4 = vweird.f32 %v668_v1  ;;  %v678_v22 = vand.u32 2147483647, %v668_v1 }
 0x9b7   : > { %v681_v24 = vor.u32 1.1754944e-38, %v680_v21  ;;  %vm679_vm7 = vcmp.eq.f32.partialorder %v678_v22, 8.507059e+37 }
 0x9bb   : > { %v1714_v4 = vpop.eup %1713 }
 0x9bc   : > { %v670_v18 = vmul.f32 %v1714_v4, %v668_v1  ;;  %vm675_vm3 = vweird.f32 %v1714_v4 }
 0x9bd   : > { %vm676_vm6 = vmor %vm674_vm4, %vm675_vm3 }
 0x9be   : > { %v671_v19 = vsub.f32 1.0, %v670_v18 }
 0x9c0   : > { %v672_v5 = vmul.f32 %v1714_v4, %v671_v19 }
 0x9c2   : > { %v673_v20 = vadd.f32 %v1714_v4, %v672_v5 }
 0x9c4   : > { %v677_v23 = vsel %vm676_vm6, %v1714_v4, %v673_v20 }
 0x9c5   : > { %v682_v26 = vsel %vm679_vm7, %v681_v24, %v677_v23 }
 0x9c6   : > { %v685_v28 = vmul.f32 %v682_v26, %v630_v63 }
 0xa23   : > { %v688_v25 = vpop.permute.xlu1 %687 }
 0xa24   : > { %v690_v27 = vmul.f32 %v688_v25, %v682_v26 }
 0xa26   : > { %692 = vrot.lane.b32.xlu2 %v690_v27, %s1816_s11 }
 0xa80   : > { %v693_v29 = vpop.permute.xlu2 %692 }
 0xa81   : > { %v695_v30 = vadd.f32 %v693_v29, %v685_v28 }
 0xa83   : > { %1715 = vtanh.f32 %v695_v30 }
 0xa89   : > { %v1716_v31 = vpop.eup %1715 }
 0xa8a   : > { %698 = vrot.lane.b32.xlu0 %v1716_v31, %s1815_s10 }
 0xafc   : > { %v699_v32 = vpop.permute.xlu0 %698 }
 0xafd   : > { %v701_v33 = vmul.f32 %v699_v32, %v682_v26 }
 0xaff   : > { %703 = vrot.lane.b32.xlu1 %v701_v33, %s1816_s11 }
 0xb71   : > { %v704_v35 = vpop.permute.xlu1 %703 }
 0xb72   : > { %706 = vst.msk [vmem:[#allocation2 + $0x20] sm:$0xff] %vm380_vm5, %v704_v35  ;;  %1625 = vmatmul.msk.f32.vlgmr.msra.gmra.mxu2 %vm380_vm5, %v704_v35 }
 0xb73   : > { %1064 = vmatpush.msra.mxu2 %v1995_v2 }
 0xb75   : > { %1065 = vmatpush.msra.mxu2 %v1998_v3 }
 0xb77   : > { %1066 = vmatpush.msra.mxu2 %v2003_v8 }
 0xb79   : > { %v906_v36 = vld [vmem:[#allocation2 + $0x20] sm:$0xff]  ;;  %1067 = vmatpush.msra.mxu2 %v2008_v9 }
 0xb7a   : > { %1640 = vmatmul.msk.f32.gmra.mxu3 %vm380_vm5, %v906_v36 }
 0xbf5   : > { %v726_v39 = vpop.f32.mrf.mxu2 }
 0xbf6   : > { %v729_v40 = vadd.f32 %v726_v39, %v372_v38 }
 0xbf8   : > { %1717 = vtanh.f32 %v729_v40  ;;  %v1626_v42 = vmul.f32 -1.442695, %v729_v40 }
 0xbfa   : > { %1719 = vpow2.f32 %v1626_v42 }
 0xbfe   : > { %v1718_v41 = vpop.eup %1717 }
 0xbff   : > { %752 = vrot.lane.b32.xlu2 %v1718_v41, %s1815_s10 }
 0xc00   : > { %v1720_v43 = vpop.eup %1719 }
 0xc01   : > { %v733_v44 = vadd.f32 1.0, %v1720_v43 }
 0xc03   : > { %1721 = vrcp.f32 %v733_v44  ;;  %v745_v50 = vand.u32 2147483648, %v733_v44  ;;  %vm739_vm9 = vweird.f32 %v733_v44  ;;  %v743_v51 = vand.u32 2147483647, %v733_v44 }
 0xc05   : > { %v746_v53 = vor.u32 1.1754944e-38, %v745_v50  ;;  %vm744_vm11 = vcmp.eq.f32.partialorder %v743_v51, 8.507059e+37 }
 0xc09   : > { %v1722_v45 = vpop.eup %1721 }
 0xc0a   : > { %v735_v46 = vmul.f32 %v1722_v45, %v733_v44  ;;  %vm740_vm8 = vweird.f32 %v1722_v45 }
 0xc0b   : > { %vm741_vm10 = vmor %vm739_vm9, %vm740_vm8 }
 0xc0c   : > { %v736_v47 = vsub.f32 1.0, %v735_v46 }
 0xc0e   : > { %v737_v48 = vmul.f32 %v1722_v45, %v736_v47 }
 0xc10   : > { %v738_v49 = vadd.f32 %v1722_v45, %v737_v48 }
 0xc12   : > { %v742_v52 = vsel %vm741_vm10, %v1722_v45, %v738_v49 }
 0xc13   : > { %v747_v55 = vsel %vm744_vm11, %v746_v53, %v742_v52 }
 0xc14   : > { %v750_v57 = vmul.f32 %v747_v55, %v695_v30 }
 0xc59   : > { %v753_v54 = vpop.permute.xlu2 %752 }
 0xc5a   : > { %v755_v56 = vmul.f32 %v753_v54, %v747_v55 }
 0xc5c   : > { %757 = vrot.lane.b32.xlu0 %v755_v56, %s1816_s11 }
 0xcce   : > { %v758_v58 = vpop.permute.xlu0 %757 }
 0xccf   : > { %v1987_v59 = vadd.f32 %v758_v58, %v750_v57 }
 0xcd1   : > { %1723 = vtanh.f32 %v1987_v59 }
 0xcd7   : > { %v1724_v60 = vpop.eup %1723 }
 0xcd8   : > { %763 = vrot.lane.b32.xlu1 %v1724_v60, %s1815_s10 }
 0xd4a   : > { %v764_v62 = vpop.permute.xlu1 %763 }
 0xd4b   : > { %v766_v63 = vmul.f32 %v764_v62, %v747_v55 }
 0xd4d   : > { %768 = vrot.lane.b32.xlu2 %v766_v63, %s1816_s11 }
 0xda7   : > { %v769_v10 = vpop.permute.xlu2 %768 }
 0xda8   : > { %771 = vst.msk [vmem:[#allocation2 + $0x28] sm:$0xff] %vm380_vm5, %v769_v10  ;;  %1627 = vmatmul.msk.f32.vlgmr.msrb.gmra.mxu1 %vm380_vm5, %v769_v10  ;;  %v968_v10 = vpop.f32.mrf.mxu3 }
 0xda9   : > { %1127 = vmatpush.msrb.mxu1 %v1995_v2 }
 0xdab   : > { %1128 = vmatpush.msrb.mxu1 %v1998_v3 }
 0xdad   : > { %1129 = vmatpush.msrb.mxu1 %v2003_v8 }
 0xdaf   : > { %v907_v11 = vld [vmem:[#allocation2 + $0x28] sm:$0xff]  ;;  %1130 = vmatpush.msrb.mxu1 %v2008_v9 }
 0xdb0   : > { %1641 = vmatmul.msk.f32.gmra.mxu3 %vm380_vm5, %v907_v11  ;;  %1005 = vmatmul.f32.vlgmr.msra.gmra.mxu1 %v1814_v6  ;;  %v969_v11 = vadd.f32 %v2028_v16, %v968_v10 }
 0xdb1   : > { %1253 = vmatpush.msra.mxu1 %v1995_v2 }
 0xdb3   : > { %1254 = vmatpush.msra.mxu1 %v1998_v3 }
 0xdb5   : > { %1255 = vmatpush.msra.mxu1 %v2003_v8 }
 0xdb7   : > { %1256 = vmatpush.msra.mxu1 %v2008_v9 }
 0xe25   : > { %v791_v14 = vpop.f32.mrf.mxu1 }
 0xe26   : > { %v794_v15 = vadd.f32 %v791_v14, %v375_v13 }
 0xe28   : > { %1725 = vtanh.f32 %v794_v15  ;;  %v1628_v19 = vmul.f32 -1.442695, %v794_v15 }
 0xe2d   : > { %v1006_v6 = vpop.f32.mrf.mxu1 }
 0xe2e   : > { %v1726_v1 = vpop.eup %1725  ;;  %v1009_v4 = vadd.f32 %v1006_v6, %v966_v0 }
 0xe2f   : > { %817 = vrot.lane.b32.xlu0 %v1726_v1, %s1815_s10 }
 0xe30   : > { %1727 = vtanh.f32 %v1009_v4  ;;  %v1644_v7 = vmul.f32 -1.442695, %v1009_v4 }
 0xe31   : > { %1729 = vpow2.f32 %v1628_v19 }
 0xe32   : > { %1731 = vpow2.f32 %v1644_v7 }
 0xe36   : > { %v1728_v18 = vpop.eup %1727 }
 0xe37   : > { %1032 = vrot.lane.b32.xlu1 %v1728_v18, %s1815_s10  ;;  %v1730_v5 = vpop.eup %1729 }
 0xe38   : > { %v798_v20 = vadd.f32 1.0, %v1730_v5  ;;  %v1732_v21 = vpop.eup %1731 }
 0xe39   : > { %v1013_v22 = vadd.f32 1.0, %v1732_v21 }
 0xe3a   : > { %1733 = vrcp.f32 %v798_v20  ;;  %v810_v31 = vand.u32 2147483648, %v798_v20  ;;  %vm804_vm13 = vweird.f32 %v798_v20  ;;  %v808_v32 = vand.u32 2147483647, %v798_v20 }
 0xe3b   : > { %1735 = vrcp.f32 %v1013_v22  ;;  %v1025_v40 = vand.u32 2147483648, %v1013_v22  ;;  %vm1019_vm2 = vweird.f32 %v1013_v22  ;;  %v1023_v41 = vand.u32 2147483647, %v1013_v22 }
 0xe3c   : > { %v811_v35 = vor.u32 1.1754944e-38, %v810_v31  ;;  %vm809_vm15 = vcmp.eq.f32.partialorder %v808_v32, 8.507059e+37  ;;  %v971_v32 = vpop.f32.mrf.mxu3 }
 0xe3d   : > { %v1026_v43 = vor.u32 1.1754944e-38, %v1025_v40  ;;  %vm1024_vm4 = vcmp.eq.f32.partialorder %v1023_v41, 8.507059e+37 }
 0xe40   : > { %v1734_v23 = vpop.eup %1733 }
 0xe41   : > { %v800_v24 = vmul.f32 %v1734_v23, %v798_v20  ;;  %v1736_v26 = vpop.eup %1735  ;;  %vm805_vm12 = vweird.f32 %v1734_v23 }
 0xe42   : > { %v1015_v28 = vmul.f32 %v1736_v26, %v1013_v22  ;;  %vm806_vm14 = vmor %vm804_vm13, %vm805_vm12  ;;  %vm1020_vm1 = vweird.f32 %v1736_v26 }
 0xe43   : > { %v801_v25 = vsub.f32 1.0, %v800_v24  ;;  %vm1021_vm3 = vmor %vm1019_vm2, %vm1020_vm1 }
 0xe44   : > { %v1016_v30 = vsub.f32 1.0, %v1015_v28 }
 0xe45   : > { %v802_v27 = vmul.f32 %v1734_v23, %v801_v25 }
 0xe46   : > { %v1017_v34 = vmul.f32 %v1736_v26, %v1016_v30 }
 0xe47   : > { %v803_v29 = vadd.f32 %v1734_v23, %v802_v27 }
 0xe48   : > { %v1018_v39 = vadd.f32 %v1736_v26, %v1017_v34 }
 0xe49   : > { %v807_v33 = vsel %vm806_vm14, %v1734_v23, %v803_v29 }
 0xe4a   : > { %v812_v37 = vsel %vm809_vm15, %v811_v35, %v807_v33  ;;  %v1022_v42 = vsel %vm1021_vm3, %v1736_v26, %v1018_v39  ;;  %v972_v33 = vadd.f32 %v2028_v16, %v971_v32 }
 0xe4b   : > { %v1027_v45 = vsel %vm1024_vm4, %v1026_v43, %v1022_v42  ;;  %v815_v47 = vmul.f32 %v812_v37, %v1987_v59  ;;  %v304_v59 = vld [vmem:[%s1878_s30 + $0x38] sm:$0xff] }
 0xe4c   : > { %v1030_v51 = vmul.f32 0.0, %v1027_v45  ;;  %1615 = vmatmul.msk.f32.gmra.mxu0 %vm314_vm0, %v304_v59 }
 0xea1   : > { %v818_v36 = vpop.permute.xlu0 %817 }
 0xea2   : > { %v820_v38 = vmul.f32 %v818_v36, %v812_v37 }
 0xea4   : > { %822 = vrot.lane.b32.xlu2 %v820_v38, %s1816_s11 }
 0xea9   : > { %v1033_v44 = vpop.permute.xlu1 %1032 }
 0xeaa   : > { %v1035_v46 = vmul.f32 %v1033_v44, %v1027_v45 }
 0xeac   : > { %1037 = vrot.lane.b32.xlu0 %v1035_v46, %s1816_s11 }
 0xefe   : > { %v823_v48 = vpop.permute.xlu2 %822 }
 0xeff   : > { %v2036_v49 = vadd.f32 %v823_v48, %v815_v47 }
 0xf01   : > { %1737 = vtanh.f32 %v2036_v49 }
 0xf07   : > { %v1738_v50 = vpop.eup %1737 }
 0xf08   : > { %828 = vrot.lane.b32.xlu1 %v1738_v50, %s1815_s10 }
 0xf1e   : > { %v1038_v52 = vpop.permute.xlu0 %1037 }
 0xf1f   : > { %v1040_v53 = vadd.f32 %v1038_v52, %v1030_v51 }
 0xf21   : > { %1739 = vtanh.f32 %v1040_v53 }
 0xf27   : > { %v1740_v54 = vpop.eup %1739 }
 0xf28   : > { %1043 = vrot.lane.b32.xlu2 %v1740_v54, %s1815_s10 }
 0xf7a   : > { %v829_v55 = vpop.permute.xlu1 %828 }
 0xf7b   : > { %v831_v56 = vmul.f32 %v829_v55, %v812_v37 }
 0xf7d   : > { %833 = vrot.lane.b32.xlu0 %v831_v56, %s1816_s11 }
 0xf82   : > { %v1044_v57 = vpop.permute.xlu2 %1043 }
 0xf83   : > { %v1046_v58 = vmul.f32 %v1044_v57, %v1027_v45 }
 0xf85   : > { %1048 = vrot.lane.b32.xlu1 %v1046_v58, %s1816_s11 }
 0xfef   : > { %v834_v60 = vpop.permute.xlu0 %833 }
 0xff0   : > { %836 = vst.msk [vmem:[#allocation2 + $0x30] sm:$0xff] %vm380_vm5, %v834_v60  ;;  %1629 = vmatmul.msk.f32.vlgmr.msrb.gmra.mxu2 %vm380_vm5, %v834_v60  ;;  %v974_v60 = vpop.f32.mrf.mxu3 }
 0xff1   : > { %1190 = vmatpush.msrb.mxu2 %v1995_v2 }
 0xff3   : > { %1191 = vmatpush.msrb.mxu2 %v1998_v3 }
 0xff5   : > { %1192 = vmatpush.msrb.mxu2 %v2003_v8 }
 0xff7   : > { %v1049_v61 = vpop.permute.xlu1 %1048  ;;  %v908_v62 = vld [vmem:[#allocation2 + $0x30] sm:$0xff]  ;;  %1193 = vmatpush.msrb.mxu2 %v2008_v9 }
 0xff8   : > { %1642 = vmatmul.msk.f32.gmra.mxu3 %vm380_vm5, %v908_v62  ;;  %1645 = vmatmul.msk.f32.vlgmr.msra.gmra.mxu2 %vm380_vm5, %v1049_v61  ;;  %v975_v61 = vadd.f32 %v2028_v16, %v974_v60 }
 0xff9   : > { %1316 = vmatpush.msra.mxu2 %v1995_v2 }
 0xffb   : > { %1317 = vmatpush.msra.mxu2 %v1998_v3 }
 0xffd   : > { %1318 = vmatpush.msra.mxu2 %v2003_v8 }
 0xfff   : > { %1319 = vmatpush.msra.mxu2 %v2008_v9 }
0x1073   : > { %v2057_v63 = vpop.f32.mrf.mxu2 }
0x107b   : > { %v1069_v12 = vpop.f32.mrf.mxu2 }
0x107c   : > { %v1072_v13 = vadd.f32 %v1069_v12, %v969_v11 }
0x107e   : > { %1741 = vtanh.f32 %v1072_v13  ;;  %v1646_v15 = vmul.f32 -1.442695, %v1072_v13 }
0x1080   : > { %1743 = vpow2.f32 %v1646_v15 }
0x1084   : > { %v1742_v14 = vpop.eup %1741 }
0x1085   : > { %1095 = vrot.lane.b32.xlu2 %v1742_v14, %s1815_s10 }
0x1086   : > { %v1744_v17 = vpop.eup %1743 }
0x1087   : > { %v1076_v0 = vadd.f32 1.0, %v1744_v17 }
0x1089   : > { %1745 = vrcp.f32 %v1076_v0  ;;  %v1088_v7 = vand.u32 2147483648, %v1076_v0  ;;  %vm1082_vm6 = vweird.f32 %v1076_v0  ;;  %v1086_v5 = vand.u32 2147483647, %v1076_v0 }
0x108b   : > { %v1089_v21 = vor.u32 1.1754944e-38, %v1088_v7  ;;  %vm1087_vm8 = vcmp.eq.f32.partialorder %v1086_v5, 8.507059e+37 }
0x108f   : > { %v1746_v6 = vpop.eup %1745 }
0x1090   : > { %v1078_v1 = vmul.f32 %v1746_v6, %v1076_v0  ;;  %vm1083_vm0 = vweird.f32 %v1746_v6 }
0x1091   : > { %vm1084_vm7 = vmor %vm1082_vm6, %vm1083_vm0 }
0x1092   : > { %v1079_v4 = vsub.f32 1.0, %v1078_v1 }
0x1094   : > { %v1080_v18 = vmul.f32 %v1746_v6, %v1079_v4 }
0x1096   : > { %v1081_v19 = vadd.f32 %v1746_v6, %v1080_v18 }
0x1098   : > { %v1085_v20 = vsel %vm1084_vm7, %v1746_v6, %v1081_v19 }
0x1099   : > { %v1090_v23 = vsel %vm1087_vm8, %v1089_v21, %v1085_v20 }
0x109a   : > { %v1093_v25 = vmul.f32 %v1090_v23, %v1040_v53 }
0x10df   : > { %v1096_v22 = vpop.permute.xlu2 %1095 }
0x10e0   : > { %v1098_v24 = vmul.f32 %v1096_v22, %v1090_v23 }
0x10e2   : > { %1100 = vrot.lane.b32.xlu0 %v1098_v24, %s1816_s11 }
0x1154   : > { %v1101_v26 = vpop.permute.xlu0 %1100 }
0x1155   : > { %v1103_v27 = vadd.f32 %v1101_v26, %v1093_v25  ;;  %v977_v25 = vpop.f32.mrf.mxu3 }
0x1156   : > { %v978_v26 = vadd.f32 %v2028_v16, %v977_v25 }
0x1157   : > { %1747 = vtanh.f32 %v1103_v27 }
0x115d   : > { %v1748_v28 = vpop.eup %1747 }
0x115e   : > { %1106 = vrot.lane.b32.xlu1 %v1748_v28, %s1815_s10 }
0x11d0   : > { %v1107_v29 = vpop.permute.xlu1 %1106 }
0x11d1   : > { %v1109_v30 = vmul.f32 %v1107_v29, %v1090_v23 }
0x11d3   : > { %1111 = vrot.lane.b32.xlu2 %v1109_v30, %s1816_s11 }
0x122d   : > { %v1112_v31 = vpop.permute.xlu2 %1111 }
0x122e   : > { %1647 = vmatmul.msk.f32.vlgmr.msrb.gmra.mxu1 %vm380_vm5, %v1112_v31 }
0x122f   : > { %1379 = vmatpush.msrb.mxu1 %v1995_v2 }
0x1231   : > { %1380 = vmatpush.msrb.mxu1 %v1998_v3 }
0x1233   : > { %1381 = vmatpush.msrb.mxu1 %v2003_v8 }
0x1235   : > { %1382 = vmatpush.msrb.mxu1 %v2008_v9 }
0x12ab   : > { %v1132_v34 = vpop.f32.mrf.mxu1 }
0x12ac   : > { %v1135_v35 = vadd.f32 %v1132_v34, %v972_v33 }
0x12ae   : > { %1749 = vtanh.f32 %v1135_v35  ;;  %v1648_v37 = vmul.f32 -1.442695, %v1135_v35 }
0x12b0   : > { %1751 = vpow2.f32 %v1648_v37 }
0x12b4   : > { %v1750_v36 = vpop.eup %1749 }
0x12b5   : > { %1158 = vrot.lane.b32.xlu0 %v1750_v36, %s1815_s10 }
0x12b6   : > { %v1752_v38 = vpop.eup %1751 }
0x12b7   : > { %v1139_v39 = vadd.f32 1.0, %v1752_v38 }
0x12b9   : > { %1753 = vrcp.f32 %v1139_v39  ;;  %v1151_v45 = vand.u32 2147483648, %v1139_v39  ;;  %vm1145_vm10 = vweird.f32 %v1139_v39  ;;  %v1149_v46 = vand.u32 2147483647, %v1139_v39 }
0x12bb   : > { %v1152_v48 = vor.u32 1.1754944e-38, %v1151_v45  ;;  %vm1150_vm12 = vcmp.eq.f32.partialorder %v1149_v46, 8.507059e+37 }
0x12bf   : > { %v1754_v40 = vpop.eup %1753 }
0x12c0   : > { %v1141_v41 = vmul.f32 %v1754_v40, %v1139_v39  ;;  %vm1146_vm9 = vweird.f32 %v1754_v40 }
0x12c1   : > { %vm1147_vm11 = vmor %vm1145_vm10, %vm1146_vm9 }
0x12c2   : > { %v1142_v42 = vsub.f32 1.0, %v1141_v41 }
0x12c4   : > { %v1143_v43 = vmul.f32 %v1754_v40, %v1142_v42 }
0x12c6   : > { %v1144_v44 = vadd.f32 %v1754_v40, %v1143_v43 }
0x12c8   : > { %v1148_v47 = vsel %vm1147_vm11, %v1754_v40, %v1144_v44 }
0x12c9   : > { %v1153_v51 = vsel %vm1150_vm12, %v1152_v48, %v1148_v47 }
0x12ca   : > { %v1156_v53 = vmul.f32 %v1153_v51, %v1103_v27 }
0x1327   : > { %v1159_v50 = vpop.permute.xlu0 %1158 }
0x1328   : > { %v1161_v52 = vmul.f32 %v1159_v50, %v1153_v51 }
0x132a   : > { %1163 = vrot.lane.b32.xlu1 %v1161_v52, %s1816_s11 }
0x139c   : > { %v1164_v54 = vpop.permute.xlu1 %1163 }
0x139d   : > { %v1166_v55 = vadd.f32 %v1164_v54, %v1156_v53  ;;  %v980_v53 = vpop.f32.mrf.mxu3 }
0x139e   : > { %v981_v54 = vadd.f32 %v2028_v16, %v980_v53 }
0x139f   : > { %1755 = vtanh.f32 %v1166_v55 }
0x13a5   : > { %v1756_v56 = vpop.eup %1755 }
0x13a6   : > { %1169 = vrot.lane.b32.xlu2 %v1756_v56, %s1815_s10 }
0x1400   : > { %v1170_v57 = vpop.permute.xlu2 %1169 }
0x1401   : > { %v1172_v58 = vmul.f32 %v1170_v57, %v1153_v51 }
0x1403   : > { %1174 = vrot.lane.b32.xlu0 %v1172_v58, %s1816_s11 }
0x1475   : > { %v1175_v59 = vpop.permute.xlu0 %1174 }
0x1476   : > { %1649 = vmatmul.msk.f32.vlgmr.msrb.gmra.mxu2 %vm380_vm5, %v1175_v59 }
0x1477   : > { %1442 = vmatpush.msrb.mxu2 %v1995_v2 }
0x1479   : > { %1443 = vmatpush.msrb.mxu2 %v1998_v3 }
0x147b   : > { %1444 = vmatpush.msrb.mxu2 %v2003_v8 }
0x147d   : > { %1445 = vmatpush.msrb.mxu2 %v2008_v9 }
0x14f9   : > { %v1195_v62 = vpop.f32.mrf.mxu2 }
0x14fa   : > { %v1198_v10 = vadd.f32 %v1195_v62, %v975_v61 }
0x14fc   : > { %1757 = vtanh.f32 %v1198_v10  ;;  %v1650_v12 = vmul.f32 -1.442695, %v1198_v10 }
0x14fe   : > { %1759 = vpow2.f32 %v1650_v12  ;;  %v377_v12 = vpop.f32.mrf.mxu0 }
0x1502   : > { %v1758_v11 = vpop.eup %1757 }
0x1503   : > { %1221 = vrot.lane.b32.xlu1 %v1758_v11, %s1815_s10 }
0x1504   : > { %v1760_v13 = vpop.eup %1759 }
0x1505   : > { %v1202_v14 = vadd.f32 1.0, %v1760_v13 }
0x1507   : > { %1761 = vrcp.f32 %v1202_v14  ;;  %v1214_v9 = vand.u32 2147483648, %v1202_v14  ;;  %vm1208_vm14 = vweird.f32 %v1202_v14  ;;  %v1212_v0 = vand.u32 2147483647, %v1202_v14 }
0x1509   : > { %v1215_v1 = vor.u32 1.1754944e-38, %v1214_v9  ;;  %vm1213_vm1 = vcmp.eq.f32.partialorder %v1212_v0, 8.507059e+37 }
0x150d   : > { %v1762_v2 = vpop.eup %1761 }
0x150e   : > { %v1204_v3 = vmul.f32 %v1762_v2, %v1202_v14  ;;  %vm1209_vm13 = vweird.f32 %v1762_v2 }
0x150f   : > { %vm1210_vm15 = vmor %vm1208_vm14, %vm1209_vm13 }
0x1510   : > { %v1205_v15 = vsub.f32 1.0, %v1204_v3  ;;  %v1805_v3 = vld [vmem:[%s1890_s9] ss:$0 sm:$0xff] }
0x1512   : > { %v1206_v8 = vmul.f32 %v1762_v2, %v1205_v15  ;;  %v378_v15 = vadd.f32 %v1805_v3, %v377_v12 }
0x1514   : > { %v1207_v17 = vadd.f32 %v1762_v2, %v1206_v8  ;;  %v859_v9 = vadd.f32 %v2057_v63, %v378_v15 }
0x1516   : > { %v1211_v6 = vsel %vm1210_vm15, %v1762_v2, %v1207_v17 }
0x1517   : > { %v1216_v18 = vsel %vm1213_vm1, %v1215_v1, %v1211_v6 }
0x1518   : > { %v1219_v7 = vmul.f32 %v1216_v18, %v1166_v55 }
0x1575   : > { %v1222_v4 = vpop.permute.xlu1 %1221 }
0x1576   : > { %v1224_v19 = vmul.f32 %v1222_v4, %v1216_v18 }
0x1578   : > { %1226 = vrot.lane.b32.xlu2 %v1224_v19, %s1816_s11 }
0x15d2   : > { %v1227_v5 = vpop.permute.xlu2 %1226 }
0x15d3   : > { %v1229_v20 = vadd.f32 %v1227_v5, %v1219_v7 }
0x15d5   : > { %1763 = vtanh.f32 %v1229_v20 }
0x15db   : > { %v1764_v21 = vpop.eup %1763 }
0x15dc   : > { %1232 = vrot.lane.b32.xlu0 %v1764_v21, %s1815_s10 }
0x164e   : > { %v1233_v22 = vpop.permute.xlu0 %1232 }
0x164f   : > { %v1235_v23 = vmul.f32 %v1233_v22, %v1216_v18 }
0x1651   : > { %1237 = vrot.lane.b32.xlu1 %v1235_v23, %s1816_s11 }
0x16c3   : > { %v1238_v24 = vpop.permute.xlu1 %1237 }
0x16c4   : > { %1651 = vmatmul.msk.f32.vlgmr.msra.gmra.mxu1 %vm380_vm5, %v1238_v24 }
0x1741   : > { %v1258_v27 = vpop.f32.mrf.mxu1 }
0x1742   : > { %v1261_v28 = vadd.f32 %v1258_v27, %v978_v26 }
0x1744   : > { %1765 = vtanh.f32 %v1261_v28  ;;  %v1652_v30 = vmul.f32 -1.442695, %v1261_v28 }
0x1746   : > { %1767 = vpow2.f32 %v1652_v30 }
0x174a   : > { %v1766_v29 = vpop.eup %1765 }
0x174b   : > { %1284 = vrot.lane.b32.xlu2 %v1766_v29, %s1815_s10 }
0x174c   : > { %v1768_v31 = vpop.eup %1767 }
0x174d   : > { %v1265_v32 = vadd.f32 1.0, %v1768_v31 }
0x174f   : > { %1769 = vrcp.f32 %v1265_v32  ;;  %v1277_v38 = vand.u32 2147483648, %v1265_v32  ;;  %vm1271_vm3 = vweird.f32 %v1265_v32  ;;  %v1275_v39 = vand.u32 2147483647, %v1265_v32 }
0x1751   : > { %v1278_v41 = vor.u32 1.1754944e-38, %v1277_v38  ;;  %vm1276_vm0 = vcmp.eq.f32.partialorder %v1275_v39, 8.507059e+37 }
0x1755   : > { %v1770_v33 = vpop.eup %1769 }
0x1756   : > { %v1267_v34 = vmul.f32 %v1770_v33, %v1265_v32  ;;  %vm1272_vm2 = vweird.f32 %v1770_v33 }
0x1757   : > { %vm1273_vm4 = vmor %vm1271_vm3, %vm1272_vm2 }
0x1758   : > { %v1268_v35 = vsub.f32 1.0, %v1267_v34 }
0x175a   : > { %v1269_v36 = vmul.f32 %v1770_v33, %v1268_v35 }
0x175c   : > { %v1270_v37 = vadd.f32 %v1770_v33, %v1269_v36 }
0x175e   : > { %v1274_v40 = vsel %vm1273_vm4, %v1770_v33, %v1270_v37  ;;  %v983_v37 = vpop.f32.mrf.mxu3 }
0x175f   : > { %v1279_v43 = vsel %vm1276_vm0, %v1278_v41, %v1274_v40  ;;  %v984_v38 = vadd.f32 %v2028_v16, %v983_v37 }
0x1760   : > { %v1282_v45 = vmul.f32 %v1279_v43, %v1229_v20  ;;  %v1630_v20 = vmul.f32 -1.442695, %v859_v9 }
0x17a5   : > { %v1285_v42 = vpop.permute.xlu2 %1284 }
0x17a6   : > { %v1287_v44 = vmul.f32 %v1285_v42, %v1279_v43 }
0x17a8   : > { %1289 = vrot.lane.b32.xlu0 %v1287_v44, %s1816_s11 }
0x181a   : > { %v1290_v46 = vpop.permute.xlu0 %1289 }
0x181b   : > { %v1292_v47 = vadd.f32 %v1290_v46, %v1282_v45 }
0x181d   : > { %1771 = vtanh.f32 %v1292_v47 }
0x1823   : > { %v1772_v48 = vpop.eup %1771 }
0x1824   : > { %1295 = vrot.lane.b32.xlu1 %v1772_v48, %s1815_s10 }
0x1896   : > { %v1296_v50 = vpop.permute.xlu1 %1295 }
0x1897   : > { %v1298_v51 = vmul.f32 %v1296_v50, %v1279_v43 }
0x1899   : > { %1300 = vrot.lane.b32.xlu2 %v1298_v51, %s1816_s11 }
0x18f3   : > { %v1301_v52 = vpop.permute.xlu2 %1300 }
0x18f4   : > { %1653 = vmatmul.msk.f32.vlgmr.msra.gmra.mxu2 %vm380_vm5, %v1301_v52 }
0x1977   : > { %v1321_v55 = vpop.f32.mrf.mxu2 }
0x1978   : > { %v1324_v56 = vadd.f32 %v1321_v55, %v981_v54 }
0x197a   : > { %1773 = vtanh.f32 %v1324_v56  ;;  %v1654_v58 = vmul.f32 -1.442695, %v1324_v56 }
0x197c   : > { %1775 = vpow2.f32 %v1654_v58 }
0x1980   : > { %v1774_v57 = vpop.eup %1773 }
0x1981   : > { %1347 = vrot.lane.b32.xlu0 %v1774_v57, %s1815_s10 }
0x1982   : > { %v1776_v59 = vpop.eup %1775 }
0x1983   : > { %v1328_v60 = vadd.f32 1.0, %v1776_v59 }
0x1985   : > { %1777 = vrcp.f32 %v1328_v60  ;;  %v1340_v14 = vand.u32 2147483648, %v1328_v60  ;;  %vm1334_vm7 = vweird.f32 %v1328_v60  ;;  %v1338_v2 = vand.u32 2147483647, %v1328_v60 }
0x1986   : > { %1779 = vtanh.f32 %v859_v9 }
0x1987   : > { %v1341_v17 = vor.u32 1.1754944e-38, %v1340_v14  ;;  %vm1339_vm9 = vcmp.eq.f32.partialorder %v1338_v2, 8.507059e+37 }
0x198b   : > { %v1778_v61 = vpop.eup %1777 }
0x198c   : > { %v1330_v62 = vmul.f32 %v1778_v61, %v1328_v60  ;;  %vm1335_vm6 = vweird.f32 %v1778_v61  ;;  %v1780_v4 = vpop.eup %1779 }
0x198d   : > { %vm1336_vm8 = vmor %vm1334_vm7, %vm1335_vm6 }
0x198e   : > { %v1331_v10 = vsub.f32 1.0, %v1330_v62 }
0x1990   : > { %v1332_v11 = vmul.f32 %v1778_v61, %v1331_v10 }
0x1992   : > { %v1333_v13 = vadd.f32 %v1778_v61, %v1332_v11 }
0x1994   : > { %v1337_v8 = vsel %vm1336_vm8, %v1778_v61, %v1333_v13 }
0x1995   : > { %v1342_v6 = vsel %vm1339_vm9, %v1341_v17, %v1337_v8 }
0x1996   : > { %v1345_v18 = vmul.f32 %v1342_v6, %v1292_v47 }
0x19f3   : > { %v1348_v0 = vpop.permute.xlu0 %1347 }
0x19f4   : > { %v1350_v1 = vmul.f32 %v1348_v0, %v1342_v6 }
0x19f6   : > { %1352 = vrot.lane.b32.xlu1 %v1350_v1, %s1816_s11 }
0x19fe   : > { %882 = vrot.lane.b32.xlu1 %v1780_v4, %s1815_s10 }
0x1a68   : > { %v1353_v19 = vpop.permute.xlu1 %1352 }
0x1a69   : > { %v2097_v7 = vadd.f32 %v1353_v19, %v1345_v18 }
0x1a6b   : > { %1781 = vtanh.f32 %v2097_v7 }
0x1a6c   : > { %1783 = vpow2.f32 %v1630_v20 }
0x1a70   : > { %v883_v33 = vpop.permute.xlu1 %882 }
0x1a71   : > { %v1782_v5 = vpop.eup %1781 }
0x1a72   : > { %1358 = vrot.lane.b32.xlu2 %v1782_v5, %s1815_s10  ;;  %v1784_v63 = vpop.eup %1783 }
0x1a73   : > { %v863_v21 = vadd.f32 1.0, %v1784_v63 }
0x1a75   : > { %1785 = vrcp.f32 %v863_v21  ;;  %v875_v29 = vand.u32 2147483648, %v863_v21  ;;  %vm869_vm11 = vweird.f32 %v863_v21  ;;  %v873_v30 = vand.u32 2147483647, %v863_v21 }
0x1a77   : > { %v876_v32 = vor.u32 1.1754944e-38, %v875_v29  ;;  %vm874_vm13 = vcmp.eq.f32.partialorder %v873_v30, 8.507059e+37 }
0x1a7b   : > { %v1786_v22 = vpop.eup %1785 }
0x1a7c   : > { %v865_v23 = vmul.f32 %v1786_v22, %v863_v21  ;;  %vm870_vm10 = vweird.f32 %v1786_v22 }
0x1a7d   : > { %vm871_vm12 = vmor %vm869_vm11, %vm870_vm10 }
0x1a7e   : > { %v866_v24 = vsub.f32 1.0, %v865_v23 }
0x1a80   : > { %v867_v25 = vmul.f32 %v1786_v22, %v866_v24 }
0x1a82   : > { %v868_v27 = vadd.f32 %v1786_v22, %v867_v25 }
0x1a84   : > { %v872_v31 = vsel %vm871_vm12, %v1786_v22, %v868_v27 }
0x1a85   : > { %v877_v34 = vsel %vm874_vm13, %v876_v32, %v872_v31 }
0x1a86   : > { %v885_v35 = vmul.f32 %v883_v33, %v877_v34  ;;  %v880_v42 = vmul.f32 %v877_v34, %v2036_v49 }
0x1acc   : > { %v1359_v26 = vpop.permute.xlu2 %1358 }
0x1acd   : > { %v1361_v28 = vmul.f32 %v1359_v26, %v1342_v6 }
0x1acf   : > { %1363 = vrot.lane.b32.xlu0 %v1361_v28, %s1816_s11 }
0x1ad7   : > { %887 = vrot.lane.b32.xlu0 %v885_v35, %s1816_s11 }
0x1b41   : > { %v1364_v36 = vpop.permute.xlu0 %1363 }
0x1b42   : > { %1655 = vmatmul.msk.f32.vlgmr.msrb.gmra.mxu1 %vm380_vm5, %v1364_v36 }
0x1b49   : > { %v888_v41 = vpop.permute.xlu0 %887 }
0x1b4a   : > { %v890_v43 = vadd.f32 %v888_v41, %v880_v42 }
0x1bbf   : > { %v1384_v39 = vpop.f32.mrf.mxu1 }
0x1bc0   : > { %v1387_v40 = vadd.f32 %v1384_v39, %v984_v38 }
0x1bc2   : > { %1787 = vtanh.f32 %v1387_v40  ;;  %v1656_v46 = vmul.f32 -1.442695, %v1387_v40 }
0x1bc3   : > { %1789 = vtanh.f32 %v890_v43 }
0x1bc4   : > { %1791 = vpow2.f32 %v1656_v46 }
0x1bc8   : > { %v1788_v44 = vpop.eup %1787 }
0x1bc9   : > { %1410 = vrot.lane.b32.xlu2 %v1788_v44, %s1815_s10  ;;  %v1790_v45 = vpop.eup %1789 }
0x1bca   : > { %v1792_v47 = vpop.eup %1791 }
0x1bcb   : > { %v1391_v48 = vadd.f32 1.0, %v1792_v47 }
0x1bcd   : > { %1793 = vrcp.f32 %v1391_v48  ;;  %v1403_v49 = vand.u32 2147483648, %v1391_v48  ;;  %vm1397_vm15 = vweird.f32 %v1391_v48  ;;  %v1401_v55 = vand.u32 2147483647, %v1391_v48 }
0x1bcf   : > { %v1404_v57 = vor.u32 1.1754944e-38, %v1403_v49  ;;  %vm1402_vm2 = vcmp.eq.f32.partialorder %v1401_v55, 8.507059e+37 }
0x1bd1   : > { %893 = vrot.lane.b32.xlu2 %v1790_v45, %s1815_s10 }
0x1bd3   : > { %v1794_v50 = vpop.eup %1793 }
0x1bd4   : > { %v1393_v51 = vmul.f32 %v1794_v50, %v1391_v48  ;;  %vm1398_vm14 = vweird.f32 %v1794_v50 }
0x1bd5   : > { %vm1399_vm1 = vmor %vm1397_vm15, %vm1398_vm14 }
0x1bd6   : > { %v1394_v52 = vsub.f32 1.0, %v1393_v51 }
0x1bd8   : > { %v1395_v53 = vmul.f32 %v1794_v50, %v1394_v52 }
0x1bda   : > { %v1396_v54 = vadd.f32 %v1794_v50, %v1395_v53 }
0x1bdc   : > { %v1400_v56 = vsel %vm1399_vm1, %v1794_v50, %v1396_v54 }
0x1bdd   : > { %v1405_v59 = vsel %vm1402_vm2, %v1404_v57, %v1400_v56 }
0x1bde   : > { %v1408_v10 = vmul.f32 %v1405_v59, %v2097_v7 }
0x1c23   : > { %v1411_v58 = vpop.permute.xlu2 %1410 }
0x1c24   : > { %v1413_v60 = vmul.f32 %v1411_v58, %v1405_v59 }
0x1c26   : > { %1415 = vrot.lane.b32.xlu1 %v1413_v60, %s1816_s11 }
0x1c2b   : > { %v894_v61 = vpop.permute.xlu2 %893 }
0x1c2c   : > { %v896_v62 = vmul.f32 %v894_v61, %v877_v34 }
0x1c2e   : > { %898 = vrot.lane.b32.xlu1 %v896_v62, %s1816_s11 }
0x1c98   : > { %v1416_v11 = vpop.permute.xlu1 %1415 }
0x1c99   : > { %v1418_v12 = vadd.f32 %v1416_v11, %v1408_v10 }
0x1c9b   : > { %1795 = vtanh.f32 %v1418_v12 }
0x1ca0   : > { %v899_v13 = vpop.permute.xlu1 %898 }
0x1ca1   : > { %v1796_v14 = vpop.eup %1795  ;;  %901 = vst.msk [vmem:[#allocation2 + $0x38] sm:$0xff] %vm380_vm5, %v899_v13 }
0x1ca2   : > { %1421 = vrot.lane.b32.xlu0 %v1796_v14, %s1815_s10 }
0x1ca8   : > { %v909_v2 = vld [vmem:[#allocation2 + $0x38] sm:$0xff] }
0x1ca9   : > { %1643 = vmatmul.msk.f32.gmra.mxu3 %vm380_vm5, %v909_v2 }
0x1d14   : > { %v1422_v3 = vpop.permute.xlu0 %1421 }
0x1d15   : > { %v1424_v15 = vmul.f32 %v1422_v3, %v1405_v59 }
0x1d17   : > { %1426 = vrot.lane.b32.xlu2 %v1424_v15, %s1816_s11 }
0x1d2c   : > { %v986_v17 = vpop.f32.mrf.mxu3 }
0x1d2d   : > { %v987_v9 = vadd.f32 %v2028_v16, %v986_v17 }
0x1d71   : > { %v1427_v8 = vpop.permute.xlu2 %1426 }
0x1d72   : > { %1657 = vmatmul.msk.f32.vlgmr.msrb.gmra.mxu2 %vm380_vm5, %v1427_v8 }
0x1df5   : > { %v1447_v0 = vpop.f32.mrf.mxu2 }
0x1df6   : > { %v1450_v6 = vadd.f32 %v1447_v0, %v987_v9 }
0x1df8   : > { %1797 = vtanh.f32 %v1450_v6  ;;  %v1658_v4 = vmul.f32 -1.442695, %v1450_v6 }
0x1dfa   : > { %1799 = vpow2.f32 %v1658_v4 }
0x1dfe   : > { %v1798_v1 = vpop.eup %1797 }
0x1dff   : > { %1473 = vrot.lane.b32.xlu0 %v1798_v1, %s1815_s10 }
0x1e00   : > { %v1800_v18 = vpop.eup %1799 }
0x1e01   : > { %v1454_v19 = vadd.f32 1.0, %v1800_v18 }
0x1e03   : > { %1801 = vrcp.f32 %v1454_v19  ;;  %v1466_v22 = vand.u32 2147483648, %v1454_v19  ;;  %vm1460_vm4 = vweird.f32 %v1454_v19  ;;  %v1464_v16 = vand.u32 2147483647, %v1454_v19 }
0x1e05   : > { %v1467_v24 = vor.u32 1.1754944e-38, %v1466_v22  ;;  %vm1465_vm6 = vcmp.eq.f32.partialorder %v1464_v16, 8.507059e+37 }
0x1e09   : > { %v1802_v7 = vpop.eup %1801 }
0x1e0a   : > { %v1456_v5 = vmul.f32 %v1802_v7, %v1454_v19  ;;  %vm1461_vm3 = vweird.f32 %v1802_v7 }
0x1e0b   : > { %vm1462_vm0 = vmor %vm1460_vm4, %vm1461_vm3 }
0x1e0c   : > { %v1457_v20 = vsub.f32 1.0, %v1456_v5 }
0x1e0e   : > { %v1458_v63 = vmul.f32 %v1802_v7, %v1457_v20 }
0x1e10   : > { %v1459_v21 = vadd.f32 %v1802_v7, %v1458_v63 }
0x1e12   : > { %v1463_v23 = vsel %vm1462_vm0, %v1802_v7, %v1459_v21 }
0x1e13   : > { %v1468_v26 = vsel %vm1465_vm6, %v1467_v24, %v1463_v23 }
0x1e14   : > { %v1471_v28 = vmul.f32 %v1468_v26, %v1418_v12 }
0x1e71   : > { %v1474_v25 = vpop.permute.xlu0 %1473 }
0x1e72   : > { %v1476_v27 = vmul.f32 %v1474_v25, %v1468_v26 }
0x1e74   : > { %1478 = vrot.lane.b32.xlu1 %v1476_v27, %s1816_s11 }
0x1ee6   : > { %v1479_v29 = vpop.permute.xlu1 %1478 }
0x1ee7   : > { %v1481_v30 = vadd.f32 %v1479_v29, %v1471_v28 }
0x1ee9   : > { %1803 = vtanh.f32 %v1481_v30 }
0x1eef   : > { %v1804_v31 = vpop.eup %1803 }
0x1ef0   : > { %1484 = vrot.lane.b32.xlu2 %v1804_v31, %s1815_s10 }
0x1f4a   : > { %v1485_v32 = vpop.permute.xlu2 %1484 }
0x1f4b   : > { %v1487_v33 = vmul.f32 %v1485_v32, %v1468_v26 }
0x1f4d   : > { %1489 = vrot.lane.b32.xlu0 %v1487_v33, %s1816_s11 }
0x1fbf   : > { %v1490_v34 = vpop.permute.xlu0 %1489 }
0x1fc0   : > { %1492 = vst.msk [vmem:[%s296_s20] sm:$0xff] %vm380_vm5, %v1490_v34 }
0x1fc1 PF: > { %s15_s18 = sadd.s32 1, %s1812_s18  }
0x1fc2   : > { %p12_p4 = scmp.ge.s32.totalorder %s15_s18, 4  }
0x1fc4   :  { %14 = sbr.rel (!%p12_p4) target bundleno = 1 (0x1), region = 84 }

// kernel: lstm_ae_multi_encoder_forward_pallas.3
= control target key start
LH: loop header
LB: loop body
LE: loop exit
PB: predicated region body
PF: predicated region fallthrough
CT: control target
= control target key end

     0   :  { %vm77_vm0 = vcmask 523264   ;;  %v6150_v47 = vmov 0.0   ;;  %s4436_s21 = smov 64   ;;  %s6143_s1 = inlined_call_operand.vmem [shape: f32[2,64,256], index: 1, kind: input, shape index: {}]   ;;  %s6144_s0 = inlined_call_operand.vmem [shape: f32[128,64], index: 0, kind: input, shape index: {}]   ;;  %s6145_s2 = inlined_call_operand.vmem [shape: f32[2,64,256], index: 2, kind: input, shape index: {}]   ;;  %s6146_s3 = inlined_call_operand.vmem [shape: f32[2,1,256], index: 3, kind: input, shape index: {}]   ;;  %s6147_s4 = inlined_call_operand.vmem [shape: f32[64,128], index: 4, kind: input, shape index: {}]   ;;  %s6148_s5 = inlined_call_operand.vmem [shape: f32[1,128], index: 5, kind: input, shape index: {}]   ;;  %s6149_s6 = inlined_call_operand.vmem [shape: f32[128,128], index: 6, kind: output, shape index: {}]  }
   0x1   :  { %v53_v0 = vld [vmem:[%s6143_s1 + $0x70] sm:$0xff]  ;;  %v51_v1 = vld [vmem:[%s6143_s1 + $0x60] sm:$0xff]  ;;  %v4499_v8 = vld [vmem:[%s6144_s0 + $0x38] sm:$0xff] }
   0x2   :  { %3993 = vmatpush.msra.mxu2 %v53_v0  ;;  %3994 = vmatpush.msra.mxu3 %v53_v0  ;;  %v49_v2 = vld [vmem:[%s6143_s1 + $0x50] sm:$0xff]  ;;  %v47_v3 = vld [vmem:[%s6143_s1 + $0x40] sm:$0xff]  ;;  %v4504_v9 = vld [vmem:[%s6144_s0 + $0x58] sm:$0xff] }
   0x3   :  { %3992 = vmatpush.msra.mxu1 %v53_v0  ;;  %134 = vmatpush.msra.mxu0 %v53_v0  ;;  %v45_v4 = vld [vmem:[%s6143_s1 + $0x30] sm:$0xff]  ;;  %v43_v5 = vld [vmem:[%s6143_s1 + $0x20] sm:$0xff]  ;;  %v4519_v12 = vld [vmem:[%s6145_s2 + $0x78] sm:$0xff] }
   0x4   :  { %3996 = vmatpush.msra.mxu2 %v51_v1  ;;  %3997 = vmatpush.msra.mxu3 %v51_v1  ;;  %v41_v6 = vld [vmem:[%s6143_s1 + $0x10] sm:$0xff]  ;;  %v39_v7 = vld [vmem:[%s6143_s1] sm:$0xff]  ;;  %v54_v14 = vld [vmem:[%s6143_s1 + $0x78] sm:$0xff] }
   0x5   :  { %3995 = vmatpush.msra.mxu1 %v51_v1  ;;  %135 = vmatpush.msra.mxu0 %v51_v1  ;;  %v4509_v10 = vld [vmem:[%s6145_s2 + $0x70] sm:$0xff]  ;;  %v4528_v13 = vld [vmem:[%s6145_s2 + $0x60] sm:$0xff]  ;;  %v4537_v15 = vld [vmem:[%s6145_s2 + $0x68] sm:$0xff] }
   0x6   :  { %3999 = vmatpush.msra.mxu2 %v49_v2  ;;  %4000 = vmatpush.msra.mxu3 %v49_v2  ;;  %v4514_v11 = vld [vmem:[%s6144_s0 + $0x10] sm:$0xff]  ;;  %v52_v17 = vld [vmem:[%s6143_s1 + $0x68] sm:$0xff]  ;;  %v4554_v18 = vld [vmem:[%s6145_s2 + $0x58] sm:$0xff] }
   0x7   :  { %3998 = vmatpush.msra.mxu1 %v49_v2  ;;  %136 = vmatpush.msra.mxu0 %v49_v2  ;;  %v4544_v16 = vld [vmem:[%s6145_s2 + $0x50] sm:$0xff]  ;;  %v4559_v19 = vld [vmem:[%s6144_s0] sm:$0xff]  ;;  %v50_v21 = vld [vmem:[%s6143_s1 + $0x58] sm:$0xff] }
   0x8   :  { %4002 = vmatpush.msra.mxu2 %v47_v3  ;;  %4003 = vmatpush.msra.mxu3 %v47_v3  ;;  %v4564_v20 = vld [vmem:[%s6145_s2 + $0x40] sm:$0xff]  ;;  %v4584_v24 = vld [vmem:[%s6145_s2 + $0x30] sm:$0xff]  ;;  %v4590_v25 = vld [vmem:[%s6145_s2 + $0x48] sm:$0xff] }
   0x9   :  { %4001 = vmatpush.msra.mxu1 %v47_v3  ;;  %137 = vmatpush.msra.mxu0 %v47_v3  ;;  %v4573_v22 = vld [vmem:[%s6144_s0 + $0x40] sm:$0xff]  ;;  %v4597_v26 = vld [vmem:[%s6144_s0 + $0x18] sm:$0xff]  ;;  %v48_v28 = vld [vmem:[%s6143_s1 + $0x48] sm:$0xff] }
   0xa   :  { %4005 = vmatpush.msra.mxu2 %v45_v4  ;;  %4006 = vmatpush.msra.mxu3 %v45_v4  ;;  %v4578_v23 = vld [vmem:[%s6144_s0 + $0x60] sm:$0xff]  ;;  %v4617_v29 = vld [vmem:[%s6145_s2 + $0x38] sm:$0xff]  ;;  %v4624_v30 = vld [vmem:[%s6145_s2 + $0x10] sm:$0xff] }
   0xb   :  { %4004 = vmatpush.msra.mxu1 %v45_v4  ;;  %138 = vmatpush.msra.mxu0 %v45_v4  ;;  %v4607_v27 = vld [vmem:[%s6145_s2 + $0x20] sm:$0xff]  ;;  %v46_v31 = vld [vmem:[%s6143_s1 + $0x38] sm:$0xff]  ;;  %v4634_v32 = vld [vmem:[%s6145_s2 + $0x28] sm:$0xff] }
   0xc   :  { %4008 = vmatpush.msra.mxu2 %v43_v5  ;;  %4009 = vmatpush.msra.mxu3 %v43_v5  ;;  %v4639_v33 = vld [vmem:[%s6145_s2] sm:$0xff]  ;;  %v44_v34 = vld [vmem:[%s6143_s1 + $0x28] sm:$0xff]  ;;  %v4661_v37 = vld [vmem:[%s6145_s2 + $0x18] sm:$0xff] }
   0xd   :  { %4007 = vmatpush.msra.mxu1 %v43_v5  ;;  %139 = vmatpush.msra.mxu0 %v43_v5  ;;  %v4649_v35 = vld [vmem:[%s6144_s0 + $0x48] sm:$0xff]  ;;  %v42_v38 = vld [vmem:[%s6143_s1 + $0x18] sm:$0xff]  ;;  %v4670_v39 = vld [vmem:[%s6144_s0 + $0x20] sm:$0xff] }
   0xe   :  { %4011 = vmatpush.msra.mxu2 %v41_v6  ;;  %4012 = vmatpush.msra.mxu3 %v41_v6  ;;  %v4654_v36 = vld [vmem:[%s6144_s0 + $0x68] sm:$0xff]  ;;  %v4695_v42 = vld [vmem:[%s6144_s0 + $0x50] sm:$0xff]  ;;  %v4729_v45 = vld [vmem:[%s6144_s0 + $0x78] sm:$0xff] }
   0xf   :  { %4010 = vmatpush.msra.mxu1 %v41_v6  ;;  %140 = vmatpush.msra.mxu0 %v41_v6  ;;  %v4680_v40 = vld [vmem:[%s6145_s2 + $0x8] sm:$0xff]  ;;  %v4700_v43 = vld [vmem:[%s6144_s0 + $0x70] sm:$0xff]  ;;  %v71_v57 = vld [vmem:[%s6146_s3] sm:$0x3] }
  0x10   :  { %4014 = vmatpush.msra.mxu2 %v39_v7  ;;  %4015 = vmatpush.msra.mxu3 %v39_v7  ;;  %v40_v41 = vld [vmem:[%s6143_s1 + $0x8] sm:$0xff]  ;;  %v4738_v46 = vld [vmem:[%s6144_s0 + $0x30] sm:$0xff]  ;;  %v4814_v61 = vperm.slane %v71_v57, 0 }
  0x11   :  { %3762 = vmatmul.msk.f32.vlgmr.msra.gmra.mxu2 %vm77_vm0, %v4499_v8  ;;  %3766 = vmatmul.msk.f32.vlgmr.msra.gmra.mxu3 %vm77_vm0, %v4504_v9  ;;  %v4709_v44 = vld [vmem:[%s6144_s0 + $0x28] sm:$0xff] }
  0x12   :  { %267 = vmatpush.msrb.mxu2 %v4509_v10  ;;  %4013 = vmatpush.msra.mxu1 %v39_v7 }
  0x13   :  { %3757 = vmatmul.msk.f32.vlgmr.msra.gmra.mxu1 %vm77_vm0, %v4514_v11  ;;  %287 = vmatpush.msrb.mxu3 %v4519_v12 }
  0x14   :  { %268 = vmatpush.msrb.mxu2 %v4528_v13  ;;  %199 = vmatpush.msrb.mxu1 %v54_v14 }
  0x15   :  { %288 = vmatpush.msrb.mxu3 %v4537_v15  ;;  %141 = vmatpush.msra.mxu0 %v39_v7  ;;  %v4823_v7 = vperm.slane %v71_v57, 1 }
  0x16   :  { %269 = vmatpush.msrb.mxu2 %v4544_v16  ;;  %200 = vmatpush.msrb.mxu1 %v52_v17 }
  0x17   :  { %289 = vmatpush.msrb.mxu3 %v4554_v18  ;;  %3755 = vmatmul.msk.f32.vlgmr.msra.gmra.mxu0 %vm77_vm0, %v4559_v19 }
  0x18   :  { %270 = vmatpush.msrb.mxu2 %v4564_v20  ;;  %201 = vmatpush.msrb.mxu1 %v50_v21 }
  0x19   :  { %3763 = vmatmul.msk.f32.gmra.mxu2 %vm77_vm0, %v4573_v22  ;;  %3767 = vmatmul.msk.f32.gmra.mxu3 %vm77_vm0, %v4578_v23 }
  0x1a   :  { %271 = vmatpush.msrb.mxu2 %v4584_v24  ;;  %290 = vmatpush.msrb.mxu3 %v4590_v25 }
  0x1b   :  { %3758 = vmatmul.msk.f32.gmra.mxu1 %vm77_vm0, %v4597_v26  ;;  %1043 = vmatpush.msrb.mxu0 %v4509_v10 }
  0x1c   :  { %272 = vmatpush.msrb.mxu2 %v4607_v27  ;;  %202 = vmatpush.msrb.mxu1 %v48_v28 }
  0x1d   :  { %291 = vmatpush.msrb.mxu3 %v4617_v29  ;;  %1044 = vmatpush.msrb.mxu0 %v4528_v13 }
  0x1e   :  { %273 = vmatpush.msrb.mxu2 %v4624_v30  ;;  %203 = vmatpush.msrb.mxu1 %v46_v31 }
  0x1f   :  { %292 = vmatpush.msrb.mxu3 %v4634_v32  ;;  %1045 = vmatpush.msrb.mxu0 %v4544_v16 }
  0x20   :  { %274 = vmatpush.msrb.mxu2 %v4639_v33  ;;  %204 = vmatpush.msrb.mxu1 %v44_v34 }
  0x21   :  { %3764 = vmatmul.msk.f32.gmra.mxu2 %vm77_vm0, %v4649_v35  ;;  %3768 = vmatmul.msk.f32.gmra.mxu3 %vm77_vm0, %v4654_v36 }
  0x22   :  { %293 = vmatpush.msrb.mxu3 %v4661_v37  ;;  %205 = vmatpush.msrb.mxu1 %v42_v38 }
  0x23   :  { %3759 = vmatmul.msk.f32.gmra.mxu1 %vm77_vm0, %v4670_v39  ;;  %364 = vmatpush.msra.mxu2 %v4509_v10 }
  0x24   :  { %294 = vmatpush.msrb.mxu3 %v4680_v40  ;;  %206 = vmatpush.msrb.mxu1 %v40_v41 }
  0x25   :  { %365 = vmatpush.msra.mxu2 %v4528_v13  ;;  %1046 = vmatpush.msrb.mxu0 %v4564_v20 }
  0x26   :  { %384 = vmatpush.msra.mxu3 %v4519_v12  ;;  %1063 = vmatpush.msra.mxu1 %v4519_v12 }
  0x27   :  { %366 = vmatpush.msra.mxu2 %v4544_v16  ;;  %1047 = vmatpush.msrb.mxu0 %v4584_v24 }
  0x28   :  { %385 = vmatpush.msra.mxu3 %v4537_v15  ;;  %1064 = vmatpush.msra.mxu1 %v4537_v15 }
  0x29   :  { %3765 = vmatmul.msk.f32.gmra.mxu2 %vm77_vm0, %v4695_v42  ;;  %3769 = vmatmul.msk.f32.gmra.mxu3 %vm77_vm0, %v4700_v43 }
  0x2a   :  { %386 = vmatpush.msra.mxu3 %v4554_v18  ;;  %367 = vmatpush.msra.mxu2 %v4564_v20 }
  0x2b   :  { %3760 = vmatmul.msk.f32.gmra.mxu1 %vm77_vm0, %v4709_v44  ;;  %1048 = vmatpush.msrb.mxu0 %v4607_v27 }
  0x2c   :  { %387 = vmatpush.msra.mxu3 %v4590_v25  ;;  %368 = vmatpush.msra.mxu2 %v4584_v24 }
  0x2d   :  { %1065 = vmatpush.msra.mxu1 %v4554_v18  ;;  %1049 = vmatpush.msrb.mxu0 %v4624_v30 }
  0x2e   :  { %388 = vmatpush.msra.mxu3 %v4617_v29  ;;  %369 = vmatpush.msra.mxu2 %v4607_v27 }
  0x2f   :  { %1066 = vmatpush.msra.mxu1 %v4590_v25  ;;  %1050 = vmatpush.msrb.mxu0 %v4639_v33 }
  0x30   :  { %389 = vmatpush.msra.mxu3 %v4634_v32  ;;  %370 = vmatpush.msra.mxu2 %v4624_v30 }
  0x31   :  { %3770 = vmatmul.msk.f32.gmra.mxu3 %vm77_vm0, %v4729_v45  ;;  %275 = vmatmul.f32.vlgmr.msrb.gmra.mxu2 %v6150_v47 }
  0x32   :  { %390 = vmatpush.msra.mxu3 %v4661_v37  ;;  %371 = vmatpush.msra.mxu2 %v4639_v33 }
  0x33   :  { %3761 = vmatmul.msk.f32.gmra.mxu1 %vm77_vm0, %v4738_v46  ;;  %1237 = vmatpush.msra.mxu0 %v4509_v10 }
  0x34   :  { %461 = vmatpush.msrb.mxu2 %v4509_v10  ;;  %391 = vmatpush.msra.mxu3 %v4680_v40 }
  0x35   :  { %1067 = vmatpush.msra.mxu1 %v4617_v29  ;;  %1238 = vmatpush.msra.mxu0 %v4528_v13 }
  0x36   :  { %462 = vmatpush.msrb.mxu2 %v4528_v13 }
  0x37   :  { %1068 = vmatpush.msra.mxu1 %v4634_v32  ;;  %1239 = vmatpush.msra.mxu0 %v4544_v16 }
  0x38   :  { %463 = vmatpush.msrb.mxu2 %v4544_v16 }
  0x39   :  { %1069 = vmatpush.msra.mxu1 %v4661_v37  ;;  %295 = vmatmul.f32.vlgmr.msrb.gmra.mxu3 %v6150_v47 }
  0x3a   :  { %464 = vmatpush.msrb.mxu2 %v4564_v20  ;;  %481 = vmatpush.msrb.mxu3 %v4519_v12 }
  0x3b   :  { %1070 = vmatpush.msra.mxu1 %v4680_v40  ;;  %1240 = vmatpush.msra.mxu0 %v4564_v20 }
  0x3c   :  { %3771 = vmatmul.msk.f32.vlgmr.msrb.gmra.mxu1 %vm77_vm0, %v4559_v19  ;;  %465 = vmatpush.msrb.mxu2 %v4584_v24 }
  0x3d   :  { %482 = vmatpush.msrb.mxu3 %v4537_v15  ;;  %1257 = vmatpush.msrb.mxu1 %v4519_v12 }
  0x3e   :  { %466 = vmatpush.msrb.mxu2 %v4607_v27  ;;  %1241 = vmatpush.msra.mxu0 %v4584_v24 }
  0x3f   :  { %483 = vmatpush.msrb.mxu3 %v4554_v18  ;;  %1258 = vmatpush.msrb.mxu1 %v4537_v15 }
  0x40   :  { %467 = vmatpush.msrb.mxu2 %v4624_v30  ;;  %1242 = vmatpush.msra.mxu0 %v4607_v27 }
  0x41   :  { %484 = vmatpush.msrb.mxu3 %v4590_v25  ;;  %1259 = vmatpush.msrb.mxu1 %v4554_v18 }
  0x42   :  { %468 = vmatpush.msrb.mxu2 %v4639_v33  ;;  %1243 = vmatpush.msra.mxu0 %v4624_v30 }
  0x43   :  { %485 = vmatpush.msrb.mxu3 %v4617_v29  ;;  %1260 = vmatpush.msrb.mxu1 %v4590_v25 }
  0x44   :  { %1244 = vmatpush.msra.mxu0 %v4639_v33 }
  0x45   :  { %486 = vmatpush.msrb.mxu3 %v4634_v32  ;;  %1261 = vmatpush.msrb.mxu1 %v4617_v29 }
  0x47   :  { %487 = vmatpush.msrb.mxu3 %v4661_v37  ;;  %1262 = vmatpush.msrb.mxu1 %v4634_v32 }
  0x49   :  { %488 = vmatpush.msrb.mxu3 %v4680_v40  ;;  %1263 = vmatpush.msrb.mxu1 %v4661_v37 }
  0x4b   :  { %1264 = vmatpush.msrb.mxu1 %v4680_v40 }
  0x90   :  { %v4789_v48 = vpop.f32.mrf.mxu1 }
  0x94   :  { %v4791_v49 = vpop.f32.mrf.mxu2  ;;  %v4793_v50 = vpop.f32.mrf.mxu3 }
  0x95   :  { %v143_v60 = vpop.f32.mrf.mxu0 }
  0x96   :  { %v144_v63 = vadd.f32 %v143_v60, %v4814_v61 }
  0x98   :  { %v4795_v51 = vpop.f32.mrf.mxu1 }
  0x9c   :  { %v4797_v52 = vpop.f32.mrf.mxu2  ;;  %v4799_v53 = vpop.f32.mrf.mxu3 }
  0xa0   :  { %v4801_v54 = vpop.f32.mrf.mxu1 }
  0xa4   :  { %v4803_v55 = vpop.f32.mrf.mxu2  ;;  %v4805_v56 = vpop.f32.mrf.mxu3 }
  0xa8   :  { %v4812_v59 = vpop.f32.mrf.mxu1 }
  0xac   :  { %v4810_v58 = vpop.f32.mrf.mxu2  ;;  %v4816_v62 = vpop.f32.mrf.mxu3 }
  0xb0   :  { %v4819_v2 = vpop.f32.mrf.mxu1 }
  0xb4   :  { %v276_v0 = vpop.f32.mrf.mxu2  ;;  %v4821_v4 = vpop.f32.mrf.mxu3 }
  0xb5   :  { %v299_v1 = vadd.f32 %v276_v0, %v144_v63  ;;  %6152 = vst [vmem:[#allocation3_spill] sm:$0xff] %v4821_v4 }
  0xb7   :  { %v3787_v3 = vmul.f32 -1.442695, %v299_v1 }
  0xb9   :  { %4019 = vpow2.f32 %v3787_v3  ;;  %v208_v14 = vpop.f32.mrf.mxu1 }
  0xba   :  { %v209_v17 = vadd.f32 %v208_v14, %v4823_v7 }
  0xbc   :  { %v296_v19 = vpop.f32.mrf.mxu3 }
  0xbd   :  { %v300_v28 = vadd.f32 %v296_v19, %v209_v17 }
  0xbf   :  { %v4020_v5 = vpop.eup %4019  ;;  %v3788_v14 = vmul.f32 -1.442695, %v300_v28 }
  0xc0   :  { %v304_v6 = vadd.f32 1.0, %v4020_v5 }
  0xc2   :  { %4021 = vrcp.f32 %v304_v6  ;;  %v316_v38 = vand.u32 2147483648, %v304_v6  ;;  %v314_v60 = vand.u32 2147483647, %v304_v6  ;;  %vm310_vm2 = vweird.f32 %v304_v6 }
  0xc3   :  { %4023 = vtanh.f32 %v300_v28 }
  0xc4   :  { %v317_v57 = vor.u32 1.1754944e-38, %v316_v38  ;;  %vm315_vm4 = vcmp.eq.f32.partialorder %v314_v60, 8.507059e+37  ;;  %4025 = vpow2.f32 %v3788_v14 }
  0xc8   :  { %v4022_v21 = vpop.eup %4021 }
  0xc9   :  { %v306_v31 = vmul.f32 %v4022_v21, %v304_v6  ;;  %vm311_vm1 = vweird.f32 %v4022_v21  ;;  %v4024_v0 = vpop.eup %4023 }
  0xca   :  { %vm312_vm3 = vmor %vm310_vm2, %vm311_vm1  ;;  %v4026_v17 = vpop.eup %4025 }
  0xcb   :  { %v307_v34 = vsub.f32 1.0, %v306_v31  ;;  %v324_v19 = vadd.f32 1.0, %v4026_v17 }
  0xcd   :  { %v308_v41 = vmul.f32 %v4022_v21, %v307_v34  ;;  %4027 = vrcp.f32 %v324_v19  ;;  %vm330_vm5 = vweird.f32 %v324_v19  ;;  %v336_v38 = vand.u32 2147483648, %v324_v19 }
  0xcf   :  { %v309_v63 = vadd.f32 %v4022_v21, %v308_v41  ;;  %v337_v28 = vor.u32 1.1754944e-38, %v336_v38 }
  0xd1   :  { %v313_v1 = vsel %vm312_vm3, %v4022_v21, %v309_v63  ;;  %v334_v63 = vand.u32 2147483647, %v324_v19 }
  0xd2   :  { %v318_v3 = vsel %vm315_vm4, %v317_v57, %v313_v1 }
  0xd3   :  { %v341_v5 = vmul.f32 %v4024_v0, %v318_v3  ;;  %v4028_v31 = vpop.eup %4027  ;;  %v340_v6 = vmul.f32 0.0, %v318_v3  ;;  %vm335_vm8 = vcmp.eq.f32.partialorder %v334_v63, 8.507059e+37 }
  0xd4   :  { %v326_v34 = vmul.f32 %v4028_v31, %v324_v19  ;;  %vm331_vm6 = vweird.f32 %v4028_v31 }
  0xd5   :  { %343 = vrot.lane.b32.xlu0 %v341_v5, %s4436_s21  ;;  %vm332_vm7 = vmor %vm330_vm5, %vm331_vm6 }
  0xd6   :  { %v327_v47 = vsub.f32 1.0, %v326_v34 }
  0xd8   :  { %v328_v41 = vmul.f32 %v4028_v31, %v327_v47  ;;  %v24_v47 = vld [vmem:[%s6144_s0 + $0x8] sm:$0xff] }
  0xd9   :  { %3756 = vmatmul.msk.f32.gmra.mxu0 %vm77_vm0, %v24_v47  ;;  %3772 = vmatmul.msk.f32.gmra.mxu1 %vm77_vm0, %v24_v47 }
  0xda   :  { %v329_v60 = vadd.f32 %v4028_v31, %v328_v41 }
  0xdc   :  { %v333_v0 = vsel %vm332_vm7, %v4028_v31, %v329_v60 }
  0xdd   :  { %v338_v1 = vsel %vm335_vm8, %v337_v28, %v333_v0 }
  0xe1   :  { %3773 = vmatmul.msk.f32.gmra.mxu1 %vm77_vm0, %v4514_v11 }
  0xe9   :  { %3774 = vmatmul.msk.f32.gmra.mxu1 %vm77_vm0, %v4597_v26 }
  0xf1   :  { %3775 = vmatmul.msk.f32.gmra.mxu1 %vm77_vm0, %v4670_v39 }
  0xf9   :  { %3776 = vmatmul.msk.f32.gmra.mxu1 %vm77_vm0, %v4709_v44 }
 0x101   :  { %3777 = vmatmul.msk.f32.gmra.mxu1 %vm77_vm0, %v4738_v46 }
 0x109   :  { %3778 = vmatmul.msk.f32.gmra.mxu1 %vm77_vm0, %v4499_v8 }
 0x111   :  { %3779 = vmatmul.msk.f32.gmra.mxu1 %vm77_vm0, %v4573_v22 }
 0x119   :  { %3780 = vmatmul.msk.f32.gmra.mxu1 %vm77_vm0, %v4649_v35 }
 0x121   :  { %3781 = vmatmul.msk.f32.gmra.mxu1 %vm77_vm0, %v4695_v42 }
 0x129   :  { %3782 = vmatmul.msk.f32.gmra.mxu1 %vm77_vm0, %v4504_v9 }
 0x131   :  { %3783 = vmatmul.msk.f32.gmra.mxu1 %vm77_vm0, %v4578_v23 }
 0x139   :  { %3784 = vmatmul.msk.f32.gmra.mxu1 %vm77_vm0, %v4654_v36 }
 0x141   :  { %3785 = vmatmul.msk.f32.gmra.mxu1 %vm77_vm0, %v4700_v43 }
 0x147   :  { %v344_v4 = vpop.permute.xlu0 %343 }
 0x148   :  { %v4827_v21 = vadd.f32 %v344_v4, %v340_v6 }
 0x149   :  { %3786 = vmatmul.msk.f32.gmra.mxu1 %vm77_vm0, %v4729_v45 }
 0x14a   :  { %4029 = vtanh.f32 %v4827_v21 }
 0x150   :  { %v4030_v57 = vpop.eup %4029 }
 0x151   :  { %v348_v5 = vmul.f32 %v4030_v57, %v338_v1 }
 0x153   :  { %350 = vrot.lane.b32.xlu0 %v348_v5, %s4436_s21 }
 0x156   :  { %v146_v8 = vpop.f32.mrf.mxu0  ;;  %v211_v42 = vpop.f32.mrf.mxu1 }
 0x157   :  { %v147_v11 = vadd.f32 %v146_v8, %v4814_v61  ;;  %v212_v23 = vadd.f32 %v211_v42, %v4823_v7 }
 0x1c5   :  { %v351_v4 = vpop.permute.xlu0 %350 }
 0x1c6   :  { %353 = vst.msk [vmem:[#allocation2] sm:$0xff] %vm77_vm0, %v351_v4  ;;  %3789 = vmatmul.msk.f32.vlgmr.msra.gmra.mxu2 %vm77_vm0, %v351_v4  ;;  %3790 = vmatmul.msk.f32.vlgmr.msra.gmra.mxu3 %vm77_vm0, %v351_v4 }
 0x1c7   :  { %558 = vmatpush.msra.mxu2 %v4509_v10  ;;  %578 = vmatpush.msra.mxu3 %v4519_v12 }
 0x1c9   :  { %559 = vmatpush.msra.mxu2 %v4528_v13  ;;  %579 = vmatpush.msra.mxu3 %v4537_v15 }
 0x1cb   :  { %560 = vmatpush.msra.mxu2 %v4544_v16  ;;  %580 = vmatpush.msra.mxu3 %v4554_v18 }
 0x1cd   :  { %561 = vmatpush.msra.mxu2 %v4564_v20  ;;  %581 = vmatpush.msra.mxu3 %v4590_v25 }
 0x1cf   :  { %562 = vmatpush.msra.mxu2 %v4584_v24  ;;  %582 = vmatpush.msra.mxu3 %v4617_v29 }
 0x1d1   :  { %563 = vmatpush.msra.mxu2 %v4607_v27  ;;  %583 = vmatpush.msra.mxu3 %v4634_v32 }
 0x1d3   :  { %564 = vmatpush.msra.mxu2 %v4624_v30  ;;  %584 = vmatpush.msra.mxu3 %v4661_v37 }
 0x1d5   :  { %565 = vmatpush.msra.mxu2 %v4639_v33  ;;  %585 = vmatpush.msra.mxu3 %v4680_v40 }
 0x249   :  { %v373_v22 = vpop.f32.mrf.mxu2  ;;  %v393_v36 = vpop.f32.mrf.mxu3 }
 0x24a   :  { %v396_v26 = vadd.f32 %v373_v22, %v147_v11  ;;  %v397_v46 = vadd.f32 %v393_v36, %v212_v23  ;;  %v150_v36 = vadd.f32 %v4789_v48, %v4814_v61 }
 0x24c   :  { %v3791_v35 = vmul.f32 -1.442695, %v396_v26  ;;  %v3792_v60 = vmul.f32 -1.442695, %v397_v46 }
 0x24e   :  { %4031 = vpow2.f32 %v3791_v35 }
 0x254   :  { %v4032_v9 = vpop.eup %4031 }
 0x255   :  { %v401_v39 = vadd.f32 1.0, %v4032_v9 }
 0x257   :  { %4033 = vrcp.f32 %v401_v39  ;;  %v413_v45 = vand.u32 2147483648, %v401_v39  ;;  %v411_v17 = vand.u32 2147483647, %v401_v39  ;;  %vm407_vm10 = vweird.f32 %v401_v39 }
 0x258   :  { %4035 = vtanh.f32 %v397_v46 }
 0x259   :  { %v414_v31 = vor.u32 1.1754944e-38, %v413_v45  ;;  %vm412_vm12 = vcmp.eq.f32.partialorder %v411_v17, 8.507059e+37  ;;  %4037 = vpow2.f32 %v3792_v60 }
 0x25d   :  { %v4034_v44 = vpop.eup %4033 }
 0x25e   :  { %v403_v43 = vmul.f32 %v4034_v44, %v401_v39  ;;  %vm408_vm9 = vweird.f32 %v4034_v44  ;;  %v4036_v41 = vpop.eup %4035 }
 0x25f   :  { %vm409_vm11 = vmor %vm407_vm10, %vm408_vm9  ;;  %v4038_v63 = vpop.eup %4037 }
 0x260   :  { %v404_v3 = vsub.f32 1.0, %v403_v43  ;;  %v421_v28 = vadd.f32 1.0, %v4038_v63 }
 0x262   :  { %v405_v14 = vmul.f32 %v4034_v44, %v404_v3  ;;  %4039 = vrcp.f32 %v421_v28  ;;  %v433_v22 = vand.u32 2147483648, %v421_v28  ;;  %vm427_vm14 = vweird.f32 %v421_v28 }
 0x263   :  { %v431_v26 = vand.u32 2147483647, %v421_v28 }
 0x264   :  { %v406_v19 = vadd.f32 %v4034_v44, %v405_v14  ;;  %v434_v9 = vor.u32 1.1754944e-38, %v433_v22  ;;  %v214_v14 = vpop.f32.mrf.mxu1 }
 0x265   :  { %vm432_vm1 = vcmp.eq.f32.partialorder %v431_v26, 8.507059e+37  ;;  %v215_v17 = vadd.f32 %v214_v14, %v4823_v7 }
 0x266   :  { %v410_v34 = vsel %vm409_vm11, %v4034_v44, %v406_v19 }
 0x267   :  { %v415_v6 = vsel %vm412_vm12, %v414_v31, %v410_v34 }
 0x268   :  { %v438_v38 = vmul.f32 %v4036_v41, %v415_v6  ;;  %v4040_v0 = vpop.eup %4039  ;;  %v437_v47 = vmul.f32 %v415_v6, %v4827_v21 }
 0x269   :  { %v423_v57 = vmul.f32 %v4040_v0, %v421_v28  ;;  %vm428_vm13 = vweird.f32 %v4040_v0 }
 0x26a   :  { %440 = vrot.lane.b32.xlu1 %v438_v38, %s4436_s21  ;;  %vm429_vm15 = vmor %vm427_vm14, %vm428_vm13 }
 0x26b   :  { %v424_v1 = vsub.f32 1.0, %v423_v57 }
 0x26d   :  { %v425_v5 = vmul.f32 %v4040_v0, %v424_v1 }
 0x26f   :  { %v426_v11 = vadd.f32 %v4040_v0, %v425_v5 }
 0x271   :  { %v430_v35 = vsel %vm429_vm15, %v4040_v0, %v426_v11 }
 0x272   :  { %v435_v42 = vsel %vm432_vm1, %v434_v9, %v430_v35 }
 0x2dc   :  { %v441_v4 = vpop.permute.xlu1 %440 }
 0x2dd   :  { %v4887_v8 = vadd.f32 %v441_v4, %v437_v47 }
 0x2df   :  { %4041 = vtanh.f32 %v4887_v8 }
 0x2e5   :  { %v4042_v39 = vpop.eup %4041 }
 0x2e6   :  { %v445_v23 = vmul.f32 %v4042_v39, %v435_v42 }
 0x2e8   :  { %447 = vrot.lane.b32.xlu1 %v445_v23, %s4436_s21 }
 0x35a   :  { %v448_v21 = vpop.permute.xlu1 %447 }
 0x35b   :  { %450 = vst.msk [vmem:[#allocation2 + $0x8] sm:$0xff] %vm77_vm0, %v448_v21  ;;  %3793 = vmatmul.msk.f32.vlgmr.msrb.gmra.mxu2 %vm77_vm0, %v448_v21  ;;  %3794 = vmatmul.msk.f32.vlgmr.msrb.gmra.mxu3 %vm77_vm0, %v448_v21 }
 0x35c   :  { %655 = vmatpush.msrb.mxu2 %v4509_v10  ;;  %675 = vmatpush.msrb.mxu3 %v4519_v12 }
 0x35e   :  { %656 = vmatpush.msrb.mxu2 %v4528_v13  ;;  %676 = vmatpush.msrb.mxu3 %v4537_v15 }
 0x360   :  { %657 = vmatpush.msrb.mxu2 %v4544_v16  ;;  %677 = vmatpush.msrb.mxu3 %v4554_v18 }
 0x362   :  { %658 = vmatpush.msrb.mxu2 %v4564_v20  ;;  %678 = vmatpush.msrb.mxu3 %v4590_v25 }
 0x364   :  { %659 = vmatpush.msrb.mxu2 %v4584_v24  ;;  %679 = vmatpush.msrb.mxu3 %v4617_v29 }
 0x366   :  { %660 = vmatpush.msrb.mxu2 %v4607_v27  ;;  %680 = vmatpush.msrb.mxu3 %v4634_v32 }
 0x368   :  { %661 = vmatpush.msrb.mxu2 %v4624_v30  ;;  %681 = vmatpush.msrb.mxu3 %v4661_v37 }
 0x36a   :  { %662 = vmatpush.msrb.mxu2 %v4639_v33  ;;  %682 = vmatpush.msrb.mxu3 %v4680_v40 }
 0x3de   :  { %v470_v44 = vpop.f32.mrf.mxu2  ;;  %v490_v19 = vpop.f32.mrf.mxu3 }
 0x3df   :  { %v493_v46 = vadd.f32 %v470_v44, %v150_v36  ;;  %v494_v34 = vadd.f32 %v490_v19, %v215_v17  ;;  %v153_v17 = vadd.f32 %v4795_v51, %v4814_v61 }
 0x3e1   :  { %v3795_v43 = vmul.f32 -1.442695, %v493_v46  ;;  %v3796_v47 = vmul.f32 -1.442695, %v494_v34 }
 0x3e3   :  { %4043 = vpow2.f32 %v3795_v43 }
 0x3e9   :  { %v4044_v3 = vpop.eup %4043 }
 0x3ea   :  { %v498_v45 = vadd.f32 1.0, %v4044_v3 }
 0x3ec   :  { %4045 = vrcp.f32 %v498_v45  ;;  %v510_v38 = vand.u32 2147483648, %v498_v45  ;;  %v508_v48 = vand.u32 2147483647, %v498_v45  ;;  %vm504_vm3 = vweird.f32 %v498_v45 }
 0x3ed   :  { %4047 = vtanh.f32 %v494_v34 }
 0x3ee   :  { %v511_v28 = vor.u32 1.1754944e-38, %v510_v38  ;;  %vm509_vm5 = vcmp.eq.f32.partialorder %v508_v48, 8.507059e+37  ;;  %4049 = vpow2.f32 %v3796_v47  ;;  %v217_v38 = vpop.f32.mrf.mxu1 }
 0x3f2   :  { %v4046_v31 = vpop.eup %4045 }
 0x3f3   :  { %v500_v41 = vmul.f32 %v4046_v31, %v498_v45  ;;  %vm505_vm2 = vweird.f32 %v4046_v31  ;;  %v4048_v57 = vpop.eup %4047 }
 0x3f4   :  { %vm506_vm4 = vmor %vm504_vm3, %vm505_vm2  ;;  %v4050_v4 = vpop.eup %4049 }
 0x3f5   :  { %v501_v6 = vsub.f32 1.0, %v500_v41  ;;  %v518_v11 = vadd.f32 1.0, %v4050_v4 }
 0x3f7   :  { %v502_v60 = vmul.f32 %v4046_v31, %v501_v6  ;;  %4051 = vrcp.f32 %v518_v11  ;;  %v530_v36 = vand.u32 2147483648, %v518_v11  ;;  %vm524_vm7 = vweird.f32 %v518_v11 }
 0x3f8   :  { %v528_v44 = vand.u32 2147483647, %v518_v11 }
 0x3f9   :  { %v503_v63 = vadd.f32 %v4046_v31, %v502_v60  ;;  %v531_v43 = vor.u32 1.1754944e-38, %v530_v36  ;;  %v218_v60 = vadd.f32 %v217_v38, %v4823_v7 }
 0x3fa   :  { %vm529_vm9 = vcmp.eq.f32.partialorder %v528_v44, 8.507059e+37 }
 0x3fb   :  { %v507_v0 = vsel %vm506_vm4, %v4046_v31, %v503_v63 }
 0x3fc   :  { %v512_v1 = vsel %vm509_vm5, %v511_v28, %v507_v0 }
 0x3fd   :  { %v535_v5 = vmul.f32 %v4048_v57, %v512_v1  ;;  %v4052_v22 = vpop.eup %4051  ;;  %v534_v39 = vmul.f32 %v512_v1, %v4887_v8 }
 0x3fe   :  { %v520_v26 = vmul.f32 %v4052_v22, %v518_v11  ;;  %vm525_vm6 = vweird.f32 %v4052_v22 }
 0x3ff   :  { %537 = vrot.lane.b32.xlu2 %v535_v5, %s4436_s21  ;;  %vm526_vm8 = vmor %vm524_vm7, %vm525_vm6 }
 0x400   :  { %v521_v35 = vsub.f32 1.0, %v520_v26 }
 0x402   :  { %v522_v9 = vmul.f32 %v4052_v22, %v521_v35 }
 0x404   :  { %v523_v21 = vadd.f32 %v4052_v22, %v522_v9 }
 0x406   :  { %v527_v46 = vsel %vm526_vm8, %v4052_v22, %v523_v21 }
 0x407   :  { %v532_v45 = vsel %vm529_vm9, %v531_v43, %v527_v46 }
 0x459   :  { %v538_v42 = vpop.permute.xlu2 %537 }
 0x45a   :  { %v4915_v23 = vadd.f32 %v538_v42, %v534_v39 }
 0x45c   :  { %4053 = vtanh.f32 %v4915_v23 }
 0x462   :  { %v4054_v3 = vpop.eup %4053 }
 0x463   :  { %v542_v14 = vmul.f32 %v4054_v3, %v532_v45 }
 0x465   :  { %544 = vrot.lane.b32.xlu2 %v542_v14, %s4436_s21 }
 0x4bf   :  { %v545_v8 = vpop.permute.xlu2 %544 }
 0x4c0   :  { %547 = vst.msk [vmem:[#allocation2 + $0x10] sm:$0xff] %vm77_vm0, %v545_v8  ;;  %3797 = vmatmul.msk.f32.vlgmr.msra.gmra.mxu2 %vm77_vm0, %v545_v8  ;;  %3798 = vmatmul.msk.f32.vlgmr.msra.gmra.mxu3 %vm77_vm0, %v545_v8 }
 0x4c1   :  { %752 = vmatpush.msra.mxu2 %v4509_v10  ;;  %772 = vmatpush.msra.mxu3 %v4519_v12 }
 0x4c3   :  { %753 = vmatpush.msra.mxu2 %v4528_v13  ;;  %773 = vmatpush.msra.mxu3 %v4537_v15 }
 0x4c5   :  { %754 = vmatpush.msra.mxu2 %v4544_v16  ;;  %774 = vmatpush.msra.mxu3 %v4554_v18 }
 0x4c7   :  { %755 = vmatpush.msra.mxu2 %v4564_v20  ;;  %775 = vmatpush.msra.mxu3 %v4590_v25 }
 0x4c9   :  { %756 = vmatpush.msra.mxu2 %v4584_v24  ;;  %776 = vmatpush.msra.mxu3 %v4617_v29 }
 0x4cb   :  { %757 = vmatpush.msra.mxu2 %v4607_v27  ;;  %777 = vmatpush.msra.mxu3 %v4634_v32 }
 0x4cd   :  { %758 = vmatpush.msra.mxu2 %v4624_v30  ;;  %778 = vmatpush.msra.mxu3 %v4661_v37 }
 0x4cf   :  { %759 = vmatpush.msra.mxu2 %v4639_v33  ;;  %779 = vmatpush.msra.mxu3 %v4680_v40 }
 0x543   :  { %v567_v19 = vpop.f32.mrf.mxu2  ;;  %v587_v48 = vpop.f32.mrf.mxu3 }
 0x544   :  { %v590_v31 = vadd.f32 %v567_v19, %v153_v17  ;;  %v591_v28 = vadd.f32 %v587_v48, %v218_v60 }
 0x546   :  { %v3799_v34 = vmul.f32 -1.442695, %v590_v31  ;;  %v3800_v9 = vmul.f32 -1.442695, %v591_v28 }
 0x548   :  { %4055 = vpow2.f32 %v3799_v34 }
 0x54e   :  { %v4056_v41 = vpop.eup %4055 }
 0x54f   :  { %v595_v6 = vadd.f32 1.0, %v4056_v41 }
 0x551   :  { %4057 = vrcp.f32 %v595_v6  ;;  %v607_v1 = vand.u32 2147483648, %v595_v6  ;;  %v605_v51 = vand.u32 2147483647, %v595_v6  ;;  %vm601_vm11 = vweird.f32 %v595_v6 }
 0x552   :  { %4059 = vtanh.f32 %v591_v28 }
 0x553   :  { %v608_v4 = vor.u32 1.1754944e-38, %v607_v1  ;;  %vm606_vm13 = vcmp.eq.f32.partialorder %v605_v51, 8.507059e+37  ;;  %4061 = vpow2.f32 %v3800_v9 }
 0x557   :  { %v4058_v63 = vpop.eup %4057 }
 0x558   :  { %v597_v0 = vmul.f32 %v4058_v63, %v595_v6  ;;  %vm602_vm10 = vweird.f32 %v4058_v63  ;;  %v4060_v22 = vpop.eup %4059 }
 0x559   :  { %vm603_vm12 = vmor %vm601_vm11, %vm602_vm10  ;;  %v4062_v39 = vpop.eup %4061 }
 0x55a   :  { %v598_v57 = vsub.f32 1.0, %v597_v0  ;;  %v615_v42 = vadd.f32 1.0, %v4062_v39 }
 0x55c   :  { %v599_v5 = vmul.f32 %v4058_v63, %v598_v57  ;;  %4063 = vrcp.f32 %v615_v42  ;;  %v627_v8 = vand.u32 2147483648, %v615_v42  ;;  %vm621_vm15 = vweird.f32 %v615_v42 }
 0x55d   :  { %v625_v17 = vand.u32 2147483647, %v615_v42 }
 0x55e   :  { %v600_v47 = vadd.f32 %v4058_v63, %v599_v5  ;;  %v628_v31 = vor.u32 1.1754944e-38, %v627_v8  ;;  %v4987_v8 = vld [vmem:[%s6145_s2 + $0x78] sm:$0xff] }
 0x55f   :  { %vm626_vm2 = vcmp.eq.f32.partialorder %v625_v17, 8.507059e+37  ;;  %v4993_v17 = vld [vmem:[%s6145_s2 + $0x60] sm:$0xff] }
 0x560   :  { %v604_v11 = vsel %vm603_vm12, %v4058_v63, %v600_v47 }
 0x561   :  { %v609_v26 = vsel %vm606_vm13, %v608_v4, %v604_v11 }
 0x562   :  { %v632_v35 = vmul.f32 %v4060_v22, %v609_v26  ;;  %v4064_v21 = vpop.eup %4063  ;;  %v631_v43 = vmul.f32 %v609_v26, %v4915_v23 }
 0x563   :  { %v617_v36 = vmul.f32 %v4064_v21, %v615_v42  ;;  %vm622_vm14 = vweird.f32 %v4064_v21 }
 0x564   :  { %634 = vrot.lane.b32.xlu0 %v632_v35, %s4436_s21  ;;  %vm623_vm1 = vmor %vm621_vm15, %vm622_vm14 }
 0x565   :  { %v618_v44 = vsub.f32 1.0, %v617_v36 }
 0x567   :  { %v619_v46 = vmul.f32 %v4064_v21, %v618_v44 }
 0x569   :  { %v620_v14 = vadd.f32 %v4064_v21, %v619_v46 }
 0x56b   :  { %v624_v19 = vsel %vm623_vm1, %v4064_v21, %v620_v14  ;;  %v4981_v14 = vld [vmem:[%s6145_s2 + $0x70] sm:$0xff] }
 0x56c   :  { %v629_v41 = vsel %vm626_vm2, %v628_v31, %v624_v19  ;;  %v4999_v19 = vld [vmem:[%s6145_s2 + $0x68] sm:$0xff]  ;;  %v5005_v31 = vld [vmem:[%s6145_s2 + $0x50] sm:$0xff] }
 0x5d6   :  { %v635_v3 = vpop.permute.xlu0 %634 }
 0x5d7   :  { %v4943_v45 = vadd.f32 %v635_v3, %v631_v43 }
 0x5d9   :  { %4065 = vtanh.f32 %v4943_v45 }
 0x5df   :  { %v4066_v34 = vpop.eup %4065 }
 0x5e0   :  { %v639_v6 = vmul.f32 %v4066_v34, %v629_v41  ;;  %v5011_v34 = vld [vmem:[%s6145_s2 + $0x58] sm:$0xff]  ;;  %v5017_v41 = vld [vmem:[%s6145_s2 + $0x40] sm:$0xff] }
 0x5e2   :  { %641 = vrot.lane.b32.xlu1 %v639_v6, %s4436_s21  ;;  %v5023_v6 = vld [vmem:[%s6145_s2 + $0x48] sm:$0xff] }
 0x654   :  { %v642_v23 = vpop.permute.xlu1 %641 }
 0x655   :  { %644 = vst.msk [vmem:[#allocation2 + $0x18] sm:$0xff] %vm77_vm0, %v642_v23  ;;  %3801 = vmatmul.msk.f32.vlgmr.msrb.gmra.mxu2 %vm77_vm0, %v642_v23  ;;  %3802 = vmatmul.msk.f32.vlgmr.msrb.gmra.mxu3 %vm77_vm0, %v642_v23  ;;  %v5029_v23 = vld [vmem:[%s6145_s2 + $0x30] sm:$0xff] }
 0x656   :  { %849 = vmatpush.msrb.mxu2 %v4509_v10  ;;  %869 = vmatpush.msrb.mxu3 %v4519_v12  ;;  %v156_v10 = vadd.f32 %v4801_v54, %v4814_v61 }
 0x658   :  { %850 = vmatpush.msrb.mxu2 %v4528_v13  ;;  %870 = vmatpush.msrb.mxu3 %v4537_v15 }
 0x65a   :  { %851 = vmatpush.msrb.mxu2 %v4544_v16  ;;  %871 = vmatpush.msrb.mxu3 %v4554_v18 }
 0x65c   :  { %852 = vmatpush.msrb.mxu2 %v4564_v20  ;;  %872 = vmatpush.msrb.mxu3 %v4590_v25  ;;  %v220_v20 = vpop.f32.mrf.mxu1 }
 0x65e   :  { %853 = vmatpush.msrb.mxu2 %v4584_v24  ;;  %873 = vmatpush.msrb.mxu3 %v4617_v29  ;;  %v221_v24 = vadd.f32 %v220_v20, %v4823_v7 }
 0x660   :  { %854 = vmatpush.msrb.mxu2 %v4607_v27  ;;  %874 = vmatpush.msrb.mxu3 %v4634_v32 }
 0x662   :  { %855 = vmatpush.msrb.mxu2 %v4624_v30  ;;  %875 = vmatpush.msrb.mxu3 %v4661_v37 }
 0x664   :  { %856 = vmatpush.msrb.mxu2 %v4639_v33  ;;  %876 = vmatpush.msrb.mxu3 %v4680_v40 }
 0x6d8   :  { %v664_v12 = vpop.f32.mrf.mxu2  ;;  %v684_v25 = vpop.f32.mrf.mxu3 }
 0x6d9   :  { %v687_v13 = vadd.f32 %v664_v12, %v156_v10  ;;  %v688_v29 = vadd.f32 %v684_v25, %v221_v24  ;;  %v5035_v10 = vld [vmem:[%s6145_s2 + $0x38] sm:$0xff]  ;;  %v5041_v12 = vld [vmem:[%s6145_s2 + $0x20] sm:$0xff] }
 0x6db   :  { %v3803_v15 = vmul.f32 -1.442695, %v687_v13  ;;  %v3804_v1 = vmul.f32 -1.442695, %v688_v29  ;;  %v5047_v13 = vld [vmem:[%s6145_s2 + $0x28] sm:$0xff] }
 0x6dd   :  { %4067 = vpow2.f32 %v3803_v15  ;;  %v5053_v15 = vld [vmem:[%s6145_s2 + $0x10] sm:$0xff] }
 0x6e3   :  { %v4068_v16 = vpop.eup %4067 }
 0x6e4   :  { %v692_v18 = vadd.f32 1.0, %v4068_v16  ;;  %v5060_v16 = vld [vmem:[%s6145_s2] sm:$0xff] }
 0x6e6   :  { %4069 = vrcp.f32 %v692_v18  ;;  %v704_v33 = vand.u32 2147483648, %v692_v18  ;;  %v702_v54 = vand.u32 2147483647, %v692_v18  ;;  %vm698_vm4 = vweird.f32 %v692_v18 }
 0x6e7   :  { %4071 = vtanh.f32 %v688_v29 }
 0x6e8   :  { %v705_v48 = vor.u32 1.1754944e-38, %v704_v33  ;;  %vm703_vm6 = vcmp.eq.f32.partialorder %v702_v54, 8.507059e+37  ;;  %4073 = vpow2.f32 %v3804_v1 }
 0x6ec   :  { %v4070_v27 = vpop.eup %4069 }
 0x6ed   :  { %v694_v30 = vmul.f32 %v4070_v27, %v692_v18  ;;  %vm699_vm3 = vweird.f32 %v4070_v27  ;;  %v4072_v28 = vpop.eup %4071  ;;  %v159_v18 = vadd.f32 %v4812_v59, %v4814_v61 }
 0x6ee   :  { %vm700_vm5 = vmor %vm698_vm4, %vm699_vm3  ;;  %v4074_v5 = vpop.eup %4073 }
 0x6ef   :  { %v695_v32 = vsub.f32 1.0, %v694_v30  ;;  %v712_v51 = vadd.f32 1.0, %v4074_v5  ;;  %v223_v30 = vpop.f32.mrf.mxu1 }
 0x6f1   :  { %v696_v38 = vmul.f32 %v4070_v27, %v695_v32  ;;  %4075 = vrcp.f32 %v712_v51  ;;  %v724_v42 = vand.u32 2147483648, %v712_v51  ;;  %vm718_vm8 = vweird.f32 %v712_v51 }
 0x6f2   :  { %v722_v21 = vand.u32 2147483647, %v712_v51 }
 0x6f3   :  { %v697_v60 = vadd.f32 %v4070_v27, %v696_v38  ;;  %v725_v44 = vor.u32 1.1754944e-38, %v724_v42 }
 0x6f4   :  { %vm723_vm10 = vcmp.eq.f32.partialorder %v722_v21, 8.507059e+37 }
 0x6f5   :  { %v701_v63 = vsel %vm700_vm5, %v4070_v27, %v697_v60 }
 0x6f6   :  { %v706_v0 = vsel %vm703_vm6, %v705_v48, %v701_v63 }
 0x6f7   :  { %v729_v57 = vmul.f32 %v4072_v28, %v706_v0  ;;  %v4076_v47 = vpop.eup %4075  ;;  %v728_v26 = vmul.f32 %v706_v0, %v4943_v45 }
 0x6f8   :  { %v714_v4 = vmul.f32 %v4076_v47, %v712_v51  ;;  %vm719_vm7 = vweird.f32 %v4076_v47 }
 0x6f9   :  { %731 = vrot.lane.b32.xlu2 %v729_v57, %s4436_s21  ;;  %vm720_vm9 = vmor %vm718_vm8, %vm719_vm7 }
 0x6fa   :  { %v715_v11 = vsub.f32 1.0, %v714_v4 }
 0x6fc   :  { %v716_v22 = vmul.f32 %v4076_v47, %v715_v11 }
 0x6fe   :  { %v717_v39 = vadd.f32 %v4076_v47, %v716_v22 }
 0x700   :  { %v721_v36 = vsel %vm720_vm9, %v4076_v47, %v717_v39 }
 0x701   :  { %v726_v43 = vsel %vm723_vm10, %v725_v44, %v721_v36 }
 0x753   :  { %v732_v35 = vpop.permute.xlu2 %731 }
 0x754   :  { %v4971_v9 = vadd.f32 %v732_v35, %v728_v26 }
 0x756   :  { %4077 = vtanh.f32 %v4971_v9 }
 0x75c   :  { %v4078_v46 = vpop.eup %4077 }
 0x75d   :  { %v736_v3 = vmul.f32 %v4078_v46, %v726_v43 }
 0x75f   :  { %738 = vrot.lane.b32.xlu0 %v736_v3, %s4436_s21 }
 0x7d1   :  { %v739_v45 = vpop.permute.xlu0 %738 }
 0x7d2   :  { %741 = vst.msk [vmem:[#allocation2 + $0x20] sm:$0xff] %vm77_vm0, %v739_v45  ;;  %3805 = vmatmul.msk.f32.vlgmr.msra.gmra.mxu2 %vm77_vm0, %v739_v45  ;;  %3806 = vmatmul.msk.f32.vlgmr.msra.gmra.mxu3 %vm77_vm0, %v739_v45 }
 0x7d3   :  { %946 = vmatpush.msra.mxu2 %v4981_v14  ;;  %966 = vmatpush.msra.mxu3 %v4987_v8 }
 0x7d5   :  { %947 = vmatpush.msra.mxu2 %v4993_v17  ;;  %967 = vmatpush.msra.mxu3 %v4999_v19 }
 0x7d7   :  { %948 = vmatpush.msra.mxu2 %v5005_v31  ;;  %968 = vmatpush.msra.mxu3 %v5011_v34 }
 0x7d9   :  { %949 = vmatpush.msra.mxu2 %v5017_v41  ;;  %969 = vmatpush.msra.mxu3 %v5023_v6 }
 0x7db   :  { %950 = vmatpush.msra.mxu2 %v5029_v23  ;;  %970 = vmatpush.msra.mxu3 %v5035_v10 }
 0x7dd   :  { %951 = vmatpush.msra.mxu2 %v5041_v12  ;;  %971 = vmatpush.msra.mxu3 %v5047_v13 }
 0x7df   :  { %952 = vmatpush.msra.mxu2 %v5053_v15  ;;  %972 = vmatpush.msra.mxu3 %v4661_v37  ;;  %v224_v37 = vadd.f32 %v223_v30, %v4823_v7 }
 0x7e1   :  { %953 = vmatpush.msra.mxu2 %v5060_v16  ;;  %973 = vmatpush.msra.mxu3 %v4680_v40 }
 0x855   :  { %v761_v20 = vpop.f32.mrf.mxu2  ;;  %v781_v32 = vpop.f32.mrf.mxu3 }
 0x856   :  { %v784_v24 = vadd.f32 %v761_v20, %v159_v18  ;;  %v785_v38 = vadd.f32 %v781_v32, %v224_v37 }
 0x858   :  { %v3807_v25 = vmul.f32 -1.442695, %v784_v24  ;;  %v3808_v51 = vmul.f32 -1.442695, %v785_v38  ;;  %v5092_v24 = vld [vmem:[%s6145_s2 + $0x18] sm:$0xff] }
 0x85a   :  { %4079 = vpow2.f32 %v3807_v25  ;;  %v5099_v25 = vld [vmem:[%s6145_s2 + $0x8] sm:$0xff] }
 0x860   :  { %v4080_v27 = vpop.eup %4079 }
 0x861   :  { %v789_v29 = vadd.f32 1.0, %v4080_v27  ;;  %v162_v27 = vadd.f32 %v4819_v2, %v4814_v61 }
 0x863   :  { %4081 = vrcp.f32 %v789_v29  ;;  %v801_v40 = vand.u32 2147483648, %v789_v29  ;;  %v799_v59 = vand.u32 2147483647, %v789_v29  ;;  %vm795_vm12 = vweird.f32 %v789_v29 }
 0x864   :  { %4083 = vtanh.f32 %v785_v38  ;;  %v226_v38 = vpop.f32.mrf.mxu1 }
 0x865   :  { %v802_v28 = vor.u32 1.1754944e-38, %v801_v40  ;;  %vm800_vm14 = vcmp.eq.f32.partialorder %v799_v59, 8.507059e+37  ;;  %4085 = vpow2.f32 %v3808_v51 }
 0x869   :  { %v4082_v33 = vpop.eup %4081 }
 0x86a   :  { %v791_v54 = vmul.f32 %v4082_v33, %v789_v29  ;;  %vm796_vm11 = vweird.f32 %v4082_v33  ;;  %v4084_v57 = vpop.eup %4083 }
 0x86b   :  { %vm797_vm13 = vmor %vm795_vm12, %vm796_vm11  ;;  %v4086_v47 = vpop.eup %4085 }
 0x86c   :  { %v792_v60 = vsub.f32 1.0, %v791_v54  ;;  %v809_v4 = vadd.f32 1.0, %v4086_v47  ;;  %v227_v54 = vadd.f32 %v226_v38, %v4823_v7 }
 0x86e   :  { %v793_v48 = vmul.f32 %v4082_v33, %v792_v60  ;;  %4087 = vrcp.f32 %v809_v4  ;;  %v821_v44 = vand.u32 2147483648, %v809_v4  ;;  %vm815_vm1 = vweird.f32 %v809_v4 }
 0x86f   :  { %v819_v46 = vand.u32 2147483647, %v809_v4 }
 0x870   :  { %v794_v63 = vadd.f32 %v4082_v33, %v793_v48  ;;  %v822_v3 = vor.u32 1.1754944e-38, %v821_v44 }
 0x871   :  { %vm820_vm3 = vcmp.eq.f32.partialorder %v819_v46, 8.507059e+37 }
 0x872   :  { %v798_v0 = vsel %vm797_vm13, %v4082_v33, %v794_v63 }
 0x873   :  { %v803_v1 = vsel %vm800_vm14, %v802_v28, %v798_v0 }
 0x874   :  { %v826_v5 = vmul.f32 %v4084_v57, %v803_v1  ;;  %v4088_v11 = vpop.eup %4087  ;;  %v825_v39 = vmul.f32 %v803_v1, %v4971_v9 }
 0x875   :  { %v811_v22 = vmul.f32 %v4088_v11, %v809_v4  ;;  %vm816_vm15 = vweird.f32 %v4088_v11 }
 0x876   :  { %828 = vrot.lane.b32.xlu1 %v826_v5, %s4436_s21  ;;  %vm817_vm2 = vmor %vm815_vm1, %vm816_vm15 }
 0x877   :  { %v812_v26 = vsub.f32 1.0, %v811_v22 }
 0x879   :  { %v813_v35 = vmul.f32 %v4088_v11, %v812_v26 }
 0x87b   :  { %v814_v36 = vadd.f32 %v4088_v11, %v813_v35 }
 0x87d   :  { %v818_v43 = vsel %vm817_vm2, %v4088_v11, %v814_v36 }
 0x87e   :  { %v823_v18 = vsel %vm820_vm3, %v822_v3, %v818_v43 }
 0x8e8   :  { %v829_v42 = vpop.permute.xlu1 %828 }
 0x8e9   :  { %v5069_v21 = vadd.f32 %v829_v42, %v825_v39 }
 0x8eb   :  { %4089 = vtanh.f32 %v5069_v21 }
 0x8f1   :  { %v4090_v45 = vpop.eup %4089 }
 0x8f2   :  { %v833_v20 = vmul.f32 %v4090_v45, %v823_v18 }
 0x8f4   :  { %835 = vrot.lane.b32.xlu2 %v833_v20, %s4436_s21 }
 0x94e   :  { %v836_v9 = vpop.permute.xlu2 %835 }
 0x94f   :  { %838 = vst.msk [vmem:[#allocation2 + $0x28] sm:$0xff] %vm77_vm0, %v836_v9  ;;  %3809 = vmatmul.msk.f32.vlgmr.msrb.gmra.mxu2 %vm77_vm0, %v836_v9  ;;  %3810 = vmatmul.msk.f32.vlgmr.msrb.gmra.mxu3 %vm77_vm0, %v836_v9 }
 0x950   :  { %1140 = vmatpush.msrb.mxu2 %v4981_v14  ;;  %1160 = vmatpush.msrb.mxu3 %v4987_v8 }
 0x952   :  { %1141 = vmatpush.msrb.mxu2 %v4993_v17  ;;  %1161 = vmatpush.msrb.mxu3 %v4999_v19 }
 0x954   :  { %1142 = vmatpush.msrb.mxu2 %v5005_v31  ;;  %1162 = vmatpush.msrb.mxu3 %v5011_v34 }
 0x956   :  { %1143 = vmatpush.msrb.mxu2 %v5017_v41  ;;  %1163 = vmatpush.msrb.mxu3 %v5023_v6 }
 0x958   :  { %1144 = vmatpush.msrb.mxu2 %v5029_v23  ;;  %1164 = vmatpush.msrb.mxu3 %v5035_v10 }
 0x95a   :  { %1145 = vmatpush.msrb.mxu2 %v5041_v12  ;;  %1165 = vmatpush.msrb.mxu3 %v5047_v13 }
 0x95c   :  { %1146 = vmatpush.msrb.mxu2 %v5053_v15  ;;  %1166 = vmatpush.msrb.mxu3 %v5092_v24 }
 0x95e   :  { %1147 = vmatpush.msrb.mxu2 %v5060_v16  ;;  %1167 = vmatpush.msrb.mxu3 %v5099_v25 }
 0x9d2   :  { %v858_v29 = vpop.f32.mrf.mxu2  ;;  %v878_v60 = vpop.f32.mrf.mxu3 }
 0x9d3   :  { %v881_v30 = vadd.f32 %v858_v29, %v162_v27  ;;  %v882_v48 = vadd.f32 %v878_v60, %v227_v54 }
 0x9d5   :  { %v3811_v37 = vmul.f32 -1.442695, %v881_v30  ;;  %v3812_v11 = vmul.f32 -1.442695, %v882_v48 }
 0x9d7   :  { %4091 = vpow2.f32 %v3811_v37  ;;  %v165_v37 = vadd.f32 %v4791_v49, %v4814_v61 }
 0x9dd   :  { %v4092_v32 = vpop.eup %4091 }
 0x9de   :  { %v886_v33 = vadd.f32 1.0, %v4092_v32 }
 0x9e0   :  { %4093 = vrcp.f32 %v886_v33  ;;  %v898_v28 = vand.u32 2147483648, %v886_v33  ;;  %v896_v2 = vand.u32 2147483647, %v886_v33  ;;  %vm892_vm5 = vweird.f32 %v886_v33 }
 0x9e1   :  { %4095 = vtanh.f32 %v882_v48 }
 0x9e2   :  { %v899_v1 = vor.u32 1.1754944e-38, %v898_v28  ;;  %vm897_vm7 = vcmp.eq.f32.partialorder %v896_v2, 8.507059e+37  ;;  %4097 = vpow2.f32 %v3812_v11 }
 0x9e6   :  { %v4094_v40 = vpop.eup %4093 }
 0x9e7   :  { %v888_v59 = vmul.f32 %v4094_v40, %v886_v33  ;;  %vm893_vm4 = vweird.f32 %v4094_v40  ;;  %v4096_v51 = vpop.eup %4095 }
 0x9e8   :  { %vm894_vm6 = vmor %vm892_vm5, %vm893_vm4  ;;  %v4098_v22 = vpop.eup %4097 }
 0x9e9   :  { %v889_v63 = vsub.f32 1.0, %v888_v59  ;;  %v906_v26 = vadd.f32 1.0, %v4098_v22 }
 0x9eb   :  { %v890_v0 = vmul.f32 %v4094_v40, %v889_v63  ;;  %4099 = vrcp.f32 %v906_v26  ;;  %v918_v45 = vand.u32 2147483648, %v906_v26  ;;  %vm912_vm9 = vweird.f32 %v906_v26 }
 0x9ec   :  { %v916_v18 = vand.u32 2147483647, %v906_v26 }
 0x9ed   :  { %v891_v57 = vadd.f32 %v4094_v40, %v890_v0  ;;  %v919_v9 = vor.u32 1.1754944e-38, %v918_v45 }
 0x9ee   :  { %vm917_vm11 = vcmp.eq.f32.partialorder %v916_v18, 8.507059e+37 }
 0x9ef   :  { %v895_v5 = vsel %vm894_vm6, %v4094_v40, %v891_v57  ;;  %v229_v40 = vpop.f32.mrf.mxu1 }
 0x9f0   :  { %v900_v47 = vsel %vm897_vm7, %v899_v1, %v895_v5  ;;  %v230_v48 = vadd.f32 %v229_v40, %v4823_v7 }
 0x9f1   :  { %v923_v4 = vmul.f32 %v4096_v51, %v900_v47  ;;  %v4100_v35 = vpop.eup %4099  ;;  %v922_v44 = vmul.f32 %v900_v47, %v5069_v21 }
 0x9f2   :  { %v908_v39 = vmul.f32 %v4100_v35, %v906_v26  ;;  %vm913_vm8 = vweird.f32 %v4100_v35 }
 0x9f3   :  { %925 = vrot.lane.b32.xlu0 %v923_v4, %s4436_s21  ;;  %vm914_vm10 = vmor %vm912_vm9, %vm913_vm8 }
 0x9f4   :  { %v909_v42 = vsub.f32 1.0, %v908_v39 }
 0x9f6   :  { %v910_v36 = vmul.f32 %v4100_v35, %v909_v42 }
 0x9f8   :  { %v911_v3 = vadd.f32 %v4100_v35, %v910_v36 }
 0x9fa   :  { %v915_v20 = vsel %vm914_vm10, %v4100_v35, %v911_v3 }
 0x9fb   :  { %v920_v29 = vsel %vm917_vm11, %v919_v9, %v915_v20 }
 0xa65   :  { %v926_v46 = vpop.permute.xlu0 %925 }
 0xa66   :  { %v5107_v43 = vadd.f32 %v926_v46, %v922_v44 }
 0xa68   :  { %4101 = vtanh.f32 %v5107_v43 }
 0xa6e   :  { %v4102_v27 = vpop.eup %4101 }
 0xa6f   :  { %v930_v30 = vmul.f32 %v4102_v27, %v920_v29 }
 0xa71   :  { %932 = vrot.lane.b32.xlu1 %v930_v30, %s4436_s21 }
 0xae3   :  { %v933_v21 = vpop.permute.xlu1 %932 }
 0xae4   :  { %935 = vst.msk [vmem:[#allocation2 + $0x30] sm:$0xff] %vm77_vm0, %v933_v21  ;;  %3813 = vmatmul.msk.f32.vlgmr.msra.gmra.mxu2 %vm77_vm0, %v933_v21  ;;  %3814 = vmatmul.msk.f32.vlgmr.msra.gmra.mxu3 %vm77_vm0, %v933_v21 }
 0xae5   :  { %1334 = vmatpush.msra.mxu2 %v4981_v14  ;;  %1354 = vmatpush.msra.mxu3 %v4987_v8 }
 0xae7   :  { %1335 = vmatpush.msra.mxu2 %v4993_v17  ;;  %1355 = vmatpush.msra.mxu3 %v4999_v19 }
 0xae9   :  { %1336 = vmatpush.msra.mxu2 %v5005_v31  ;;  %1356 = vmatpush.msra.mxu3 %v5011_v34 }
 0xaeb   :  { %1337 = vmatpush.msra.mxu2 %v5017_v41  ;;  %1357 = vmatpush.msra.mxu3 %v5023_v6 }
 0xaed   :  { %1338 = vmatpush.msra.mxu2 %v5029_v23  ;;  %1358 = vmatpush.msra.mxu3 %v5035_v10 }
 0xaef   :  { %1339 = vmatpush.msra.mxu2 %v5041_v12  ;;  %1359 = vmatpush.msra.mxu3 %v5047_v13 }
 0xaf1   :  { %1340 = vmatpush.msra.mxu2 %v5053_v15  ;;  %1360 = vmatpush.msra.mxu3 %v5092_v24 }
 0xaf3   :  { %1341 = vmatpush.msra.mxu2 %v5060_v16  ;;  %1361 = vmatpush.msra.mxu3 %v5099_v25 }
 0xb67   :  { %v955_v32 = vpop.f32.mrf.mxu2  ;;  %v975_v59 = vpop.f32.mrf.mxu3 }
 0xb68   :  { %v978_v33 = vadd.f32 %v955_v32, %v165_v37  ;;  %v979_v28 = vadd.f32 %v975_v59, %v230_v48 }
 0xb6a   :  { %v3815_v38 = vmul.f32 -1.442695, %v978_v33  ;;  %v3816_v26 = vmul.f32 -1.442695, %v979_v28  ;;  %v232_v33 = vpop.f32.mrf.mxu1 }
 0xb6c   :  { %4103 = vpow2.f32 %v3815_v38 }
 0xb72   :  { %v4104_v54 = vpop.eup %4103  ;;  %v5158_v38 = vpop.f32.mrf.mxu1 }
 0xb73   :  { %v983_v60 = vadd.f32 1.0, %v4104_v54 }
 0xb75   :  { %4105 = vrcp.f32 %v983_v60  ;;  %v995_v57 = vand.u32 2147483648, %v983_v60  ;;  %v993_v49 = vand.u32 2147483647, %v983_v60  ;;  %vm989_vm13 = vweird.f32 %v983_v60 }
 0xb76   :  { %4107 = vtanh.f32 %v979_v28 }
 0xb77   :  { %v996_v51 = vor.u32 1.1754944e-38, %v995_v57  ;;  %vm994_vm15 = vcmp.eq.f32.partialorder %v993_v49, 8.507059e+37  ;;  %4109 = vpow2.f32 %v3816_v26 }
 0xb7a   :  { %v5160_v54 = vpop.f32.mrf.mxu1 }
 0xb7b   :  { %v4106_v63 = vpop.eup %4105 }
 0xb7c   :  { %v985_v0 = vmul.f32 %v4106_v63, %v983_v60  ;;  %vm990_vm12 = vweird.f32 %v4106_v63  ;;  %v4108_v4 = vpop.eup %4107 }
 0xb7d   :  { %vm991_vm14 = vmor %vm989_vm13, %vm990_vm12  ;;  %v4110_v35 = vpop.eup %4109 }
 0xb7e   :  { %v986_v2 = vsub.f32 1.0, %v985_v0  ;;  %v1003_v39 = vadd.f32 1.0, %v4110_v35 }
 0xb80   :  { %v987_v1 = vmul.f32 %v4106_v63, %v986_v2  ;;  %4111 = vrcp.f32 %v1003_v39  ;;  %v1015_v9 = vand.u32 2147483648, %v1003_v39  ;;  %vm1009_vm2 = vweird.f32 %v1003_v39 }
 0xb81   :  { %v1013_v27 = vand.u32 2147483647, %v1003_v39 }
 0xb82   :  { %v988_v5 = vadd.f32 %v4106_v63, %v987_v1  ;;  %v1016_v30 = vor.u32 1.1754944e-38, %v1015_v9  ;;  %v5162_v60 = vpop.f32.mrf.mxu1 }
 0xb83   :  { %vm1014_vm4 = vcmp.eq.f32.partialorder %v1013_v27, 8.507059e+37 }
 0xb84   :  { %v992_v47 = vsel %vm991_vm14, %v4106_v63, %v988_v5  ;;  %v168_v63 = vadd.f32 %v4797_v52, %v4814_v61 }
 0xb85   :  { %v997_v11 = vsel %vm994_vm15, %v996_v51, %v992_v47  ;;  %v233_v51 = vadd.f32 %v232_v33, %v4823_v7 }
 0xb86   :  { %v1020_v22 = vmul.f32 %v4108_v4, %v997_v11  ;;  %v4112_v42 = vpop.eup %4111  ;;  %v1019_v3 = vmul.f32 %v997_v11, %v5107_v43 }
 0xb87   :  { %v1005_v36 = vmul.f32 %v4112_v42, %v1003_v39  ;;  %vm1010_vm1 = vweird.f32 %v4112_v42 }
 0xb88   :  { %1022 = vrot.lane.b32.xlu2 %v1020_v22, %s4436_s21  ;;  %vm1011_vm3 = vmor %vm1009_vm2, %vm1010_vm1 }
 0xb89   :  { %v1006_v44 = vsub.f32 1.0, %v1005_v36 }
 0xb8a   :  { %v5164_v40 = vpop.f32.mrf.mxu1 }
 0xb8b   :  { %v1007_v46 = vmul.f32 %v4112_v42, %v1006_v44 }
 0xb8d   :  { %v1008_v20 = vadd.f32 %v4112_v42, %v1007_v46 }
 0xb8f   :  { %v1012_v29 = vsel %vm1011_vm3, %v4112_v42, %v1008_v20 }
 0xb90   :  { %v1017_v37 = vsel %vm1014_vm4, %v1016_v30, %v1012_v29 }
 0xb92   :  { %v5166_v48 = vpop.f32.mrf.mxu1 }
 0xb9a   :  { %v5168_v59 = vpop.f32.mrf.mxu1 }
 0xba2   :  { %v5172_v57 = vpop.f32.mrf.mxu1 }
 0xbe2   :  { %v1023_v45 = vpop.permute.xlu2 %1022 }
 0xbe3   :  { %v5135_v18 = vadd.f32 %v1023_v45, %v1019_v3 }
 0xbe5   :  { %4113 = vtanh.f32 %v5135_v18 }
 0xbeb   :  { %v4114_v21 = vpop.eup %4113 }
 0xbec   :  { %v1027_v32 = vmul.f32 %v4114_v21, %v1017_v37 }
 0xbee   :  { %1029 = vrot.lane.b32.xlu0 %v1027_v32, %s4436_s21 }
 0xc60   :  { %v1030_v43 = vpop.permute.xlu0 %1029 }
 0xc61   :  { %1032 = vst.msk [vmem:[#allocation2 + $0x38] sm:$0xff] %vm77_vm0, %v1030_v43  ;;  %3817 = vmatmul.msk.f32.vlgmr.msrb.gmra.mxu0 %vm77_vm0, %v1030_v43  ;;  %3818 = vmatmul.msk.f32.vlgmr.msra.gmra.mxu1 %vm77_vm0, %v1030_v43 }
 0xc62   :  { %1431 = vmatpush.msrb.mxu0 %v4981_v14  ;;  %1451 = vmatpush.msra.mxu1 %v4987_v8 }
 0xc64   :  { %1432 = vmatpush.msrb.mxu0 %v4993_v17  ;;  %1452 = vmatpush.msra.mxu1 %v4999_v19 }
 0xc66   :  { %1433 = vmatpush.msrb.mxu0 %v5005_v31  ;;  %1453 = vmatpush.msra.mxu1 %v5011_v34 }
 0xc68   :  { %1434 = vmatpush.msrb.mxu0 %v5017_v41  ;;  %1454 = vmatpush.msra.mxu1 %v5023_v6 }
 0xc6a   :  { %1435 = vmatpush.msrb.mxu0 %v5029_v23  ;;  %1455 = vmatpush.msra.mxu1 %v5035_v10 }
 0xc6c   :  { %1436 = vmatpush.msrb.mxu0 %v5041_v12  ;;  %1456 = vmatpush.msra.mxu1 %v5047_v13 }
 0xc6e   :  { %1437 = vmatpush.msrb.mxu0 %v5053_v15  ;;  %1457 = vmatpush.msra.mxu1 %v5092_v24 }
 0xc70   :  { %1438 = vmatpush.msrb.mxu0 %v5060_v16  ;;  %1458 = vmatpush.msra.mxu1 %v5099_v25 }
 0xcde   :  { %v1052_v28 = vpop.f32.mrf.mxu0  ;;  %v1072_v5 = vpop.f32.mrf.mxu1 }
 0xcdf   :  { %v1075_v0 = vadd.f32 %v1052_v28, %v168_v63  ;;  %v1076_v4 = vadd.f32 %v1072_v5, %v233_v51  ;;  %v171_v51 = vadd.f32 %v4803_v55, %v4814_v61 }
 0xce1   :  { %v3819_v2 = vmul.f32 -1.442695, %v1075_v0  ;;  %v3820_v45 = vmul.f32 -1.442695, %v1076_v4 }
 0xce3   :  { %4115 = vpow2.f32 %v3819_v2 }
 0xce9   :  { %v4116_v1 = vpop.eup %4115 }
 0xcea   :  { %v1080_v49 = vadd.f32 1.0, %v4116_v1 }
 0xcec   :  { %4117 = vrcp.f32 %v1080_v49  ;;  %v1092_v26 = vand.u32 2147483648, %v1080_v49  ;;  %v1090_v52 = vand.u32 2147483647, %v1080_v49  ;;  %vm1086_vm6 = vweird.f32 %v1080_v49 }
 0xced   :  { %4119 = vtanh.f32 %v1076_v4 }
 0xcee   :  { %v1093_v42 = vor.u32 1.1754944e-38, %v1092_v26  ;;  %vm1091_vm8 = vcmp.eq.f32.partialorder %v1090_v52, 8.507059e+37  ;;  %4121 = vpow2.f32 %v3820_v45  ;;  %v236_v52 = vadd.f32 %v5158_v38, %v4823_v7 }
 0xcf2   :  { %v4118_v47 = vpop.eup %4117 }
 0xcf3   :  { %v1082_v11 = vmul.f32 %v4118_v47, %v1080_v49  ;;  %vm1087_vm5 = vweird.f32 %v4118_v47  ;;  %v4120_v44 = vpop.eup %4119 }
 0xcf4   :  { %vm1088_vm7 = vmor %vm1086_vm6, %vm1087_vm5  ;;  %v4122_v20 = vpop.eup %4121 }
 0xcf5   :  { %v1083_v22 = vsub.f32 1.0, %v1082_v11  ;;  %v1100_v9 = vadd.f32 1.0, %v4122_v20 }
 0xcf7   :  { %v1084_v35 = vmul.f32 %v4118_v47, %v1083_v22  ;;  %4123 = vrcp.f32 %v1100_v9  ;;  %v1112_v63 = vand.u32 2147483648, %v1100_v9  ;;  %vm1106_vm10 = vweird.f32 %v1100_v9 }
 0xcf8   :  { %v1110_v28 = vand.u32 2147483647, %v1100_v9 }
 0xcf9   :  { %v1085_v39 = vadd.f32 %v4118_v47, %v1084_v35  ;;  %v1113_v2 = vor.u32 1.1754944e-38, %v1112_v63 }
 0xcfa   :  { %vm1111_vm12 = vcmp.eq.f32.partialorder %v1110_v28, 8.507059e+37 }
 0xcfb   :  { %v1089_v36 = vsel %vm1088_vm7, %v4118_v47, %v1085_v39 }
 0xcfc   :  { %v1094_v46 = vsel %vm1091_vm8, %v1093_v42, %v1089_v36 }
 0xcfd   :  { %v1117_v3 = vmul.f32 %v4120_v44, %v1094_v46  ;;  %v4124_v27 = vpop.eup %4123  ;;  %v1116_v37 = vmul.f32 %v1094_v46, %v5135_v18 }
 0xcfe   :  { %v1102_v29 = vmul.f32 %v4124_v27, %v1100_v9  ;;  %vm1107_vm9 = vweird.f32 %v4124_v27 }
 0xcff   :  { %1119 = vrot.lane.b32.xlu1 %v1117_v3, %s4436_s21  ;;  %vm1108_vm11 = vmor %vm1106_vm10, %vm1107_vm9 }
 0xd00   :  { %v1103_v30 = vsub.f32 1.0, %v1102_v29 }
 0xd02   :  { %v1104_v21 = vmul.f32 %v4124_v27, %v1103_v30 }
 0xd04   :  { %v1105_v33 = vadd.f32 %v4124_v27, %v1104_v21 }
 0xd06   :  { %v1109_v0 = vsel %vm1108_vm11, %v4124_v27, %v1105_v33 }
 0xd07   :  { %v1114_v49 = vsel %vm1111_vm12, %v1113_v2, %v1109_v0 }
 0xd71   :  { %v1120_v32 = vpop.permute.xlu1 %1119 }
 0xd72   :  { %v5177_v43 = vadd.f32 %v1120_v32, %v1116_v37 }
 0xd74   :  { %4125 = vtanh.f32 %v5177_v43 }
 0xd7a   :  { %v4126_v1 = vpop.eup %4125 }
 0xd7b   :  { %v1124_v5 = vmul.f32 %v4126_v1, %v1114_v49 }
 0xd7d   :  { %1126 = vrot.lane.b32.xlu2 %v1124_v5, %s4436_s21 }
 0xdd7   :  { %v1127_v18 = vpop.permute.xlu2 %1126 }
 0xdd8   :  { %1129 = vst.msk [vmem:[#allocation2 + $0x40] sm:$0xff] %vm77_vm0, %v1127_v18  ;;  %3821 = vmatmul.msk.f32.vlgmr.msrb.gmra.mxu2 %vm77_vm0, %v1127_v18  ;;  %3822 = vmatmul.msk.f32.vlgmr.msrb.gmra.mxu3 %vm77_vm0, %v1127_v18 }
 0xdd9   :  { %1528 = vmatpush.msrb.mxu2 %v4981_v14  ;;  %1548 = vmatpush.msrb.mxu3 %v4987_v8 }
 0xddb   :  { %1529 = vmatpush.msrb.mxu2 %v4993_v17  ;;  %1549 = vmatpush.msrb.mxu3 %v4999_v19 }
 0xddd   :  { %1530 = vmatpush.msrb.mxu2 %v5005_v31  ;;  %1550 = vmatpush.msrb.mxu3 %v5011_v34 }
 0xddf   :  { %1531 = vmatpush.msrb.mxu2 %v5017_v41  ;;  %1551 = vmatpush.msrb.mxu3 %v5023_v6 }
 0xde1   :  { %1532 = vmatpush.msrb.mxu2 %v5029_v23  ;;  %1552 = vmatpush.msrb.mxu3 %v5035_v10 }
 0xde3   :  { %1533 = vmatpush.msrb.mxu2 %v5041_v12  ;;  %1553 = vmatpush.msrb.mxu3 %v5047_v13 }
 0xde5   :  { %1534 = vmatpush.msrb.mxu2 %v5053_v15  ;;  %1554 = vmatpush.msrb.mxu3 %v5092_v24 }
 0xde7   :  { %1535 = vmatpush.msrb.mxu2 %v5060_v16  ;;  %1555 = vmatpush.msrb.mxu3 %v5099_v25 }
 0xe5b   :  { %v1149_v47 = vpop.f32.mrf.mxu2  ;;  %v1169_v35 = vpop.f32.mrf.mxu3 }
 0xe5c   :  { %v1172_v4 = vadd.f32 %v1149_v47, %v171_v51  ;;  %v1173_v42 = vadd.f32 %v1169_v35, %v236_v52 }
 0xe5e   :  { %v3823_v11 = vmul.f32 -1.442695, %v1172_v4  ;;  %v3824_v38 = vmul.f32 -1.442695, %v1173_v42 }
 0xe60   :  { %4127 = vpow2.f32 %v3823_v11 }
 0xe66   :  { %v4128_v22 = vpop.eup %4127 }
 0xe67   :  { %v1177_v26 = vadd.f32 1.0, %v4128_v22 }
 0xe69   :  { %4129 = vrcp.f32 %v1177_v26  ;;  %v1189_v46 = vand.u32 2147483648, %v1177_v26  ;;  %v1187_v55 = vand.u32 2147483647, %v1177_v26  ;;  %vm1183_vm14 = vweird.f32 %v1177_v26 }
 0xe6a   :  { %4131 = vtanh.f32 %v1173_v42 }
 0xe6b   :  { %v1190_v20 = vor.u32 1.1754944e-38, %v1189_v46  ;;  %vm1188_vm1 = vcmp.eq.f32.partialorder %v1187_v55, 8.507059e+37  ;;  %4133 = vpow2.f32 %v3824_v38  ;;  %v239_v46 = vadd.f32 %v5160_v54, %v4823_v7 }
 0xe6f   :  { %v4130_v39 = vpop.eup %4129 }
 0xe70   :  { %v1179_v36 = vmul.f32 %v4130_v39, %v1177_v26  ;;  %vm1184_vm13 = vweird.f32 %v4130_v39  ;;  %v4132_v27 = vpop.eup %4131  ;;  %v174_v26 = vadd.f32 %v4810_v58, %v4814_v61 }
 0xe71   :  { %vm1185_vm15 = vmor %vm1183_vm14, %vm1184_vm13  ;;  %v4134_v21 = vpop.eup %4133 }
 0xe72   :  { %v1180_v44 = vsub.f32 1.0, %v1179_v36  ;;  %v1197_v37 = vadd.f32 1.0, %v4134_v21 }
 0xe74   :  { %v1181_v3 = vmul.f32 %v4130_v39, %v1180_v44  ;;  %4135 = vrcp.f32 %v1197_v37  ;;  %v1209_v5 = vand.u32 2147483648, %v1197_v37  ;;  %vm1203_vm3 = vweird.f32 %v1197_v37 }
 0xe75   :  { %v1207_v18 = vand.u32 2147483647, %v1197_v37 }
 0xe76   :  { %v1182_v45 = vadd.f32 %v4130_v39, %v1181_v3  ;;  %v1210_v47 = vor.u32 1.1754944e-38, %v1209_v5 }
 0xe77   :  { %vm1208_vm5 = vcmp.eq.f32.partialorder %v1207_v18, 8.507059e+37 }
 0xe78   :  { %v1186_v9 = vsel %vm1185_vm15, %v4130_v39, %v1182_v45 }
 0xe79   :  { %v1191_v29 = vsel %vm1188_vm1, %v1190_v20, %v1186_v9 }
 0xe7a   :  { %v1214_v30 = vmul.f32 %v4132_v27, %v1191_v29  ;;  %v4136_v32 = vpop.eup %4135  ;;  %v1213_v0 = vmul.f32 %v1191_v29, %v5177_v43 }
 0xe7b   :  { %v1199_v33 = vmul.f32 %v4136_v32, %v1197_v37  ;;  %vm1204_vm2 = vweird.f32 %v4136_v32 }
 0xe7c   :  { %1216 = vrot.lane.b32.xlu0 %v1214_v30, %s4436_s21  ;;  %vm1205_vm4 = vmor %vm1203_vm3, %vm1204_vm2 }
 0xe7d   :  { %v1200_v63 = vsub.f32 1.0, %v1199_v33 }
 0xe7f   :  { %v1201_v28 = vmul.f32 %v4136_v32, %v1200_v63 }
 0xe81   :  { %v1202_v49 = vadd.f32 %v4136_v32, %v1201_v28 }
 0xe83   :  { %v1206_v51 = vsel %vm1205_vm4, %v4136_v32, %v1202_v49 }
 0xe84   :  { %v1211_v11 = vsel %vm1208_vm5, %v1210_v47, %v1206_v51 }
 0xeee   :  { %v1217_v2 = vpop.permute.xlu0 %1216 }
 0xeef   :  { %v5206_v1 = vadd.f32 %v1217_v2, %v1213_v0 }
 0xef1   :  { %4137 = vtanh.f32 %v5206_v1 }
 0xef7   :  { %v4138_v4 = vpop.eup %4137 }
 0xef8   :  { %v1221_v22 = vmul.f32 %v4138_v4, %v1211_v11 }
 0xefa   :  { %1223 = vrot.lane.b32.xlu1 %v1221_v22, %s4436_s21 }
 0xf6c   :  { %v1224_v43 = vpop.permute.xlu1 %1223 }
 0xf6d   :  { %1226 = vst.msk [vmem:[#allocation2 + $0x48] sm:$0xff] %vm77_vm0, %v1224_v43  ;;  %3825 = vmatmul.msk.f32.vlgmr.msra.gmra.mxu0 %vm77_vm0, %v1224_v43  ;;  %3826 = vmatmul.msk.f32.vlgmr.msrb.gmra.mxu1 %vm77_vm0, %v1224_v43 }
 0xf6e   :  { %1625 = vmatpush.msra.mxu0 %v4981_v14  ;;  %1645 = vmatpush.msrb.mxu1 %v4987_v8 }
 0xf70   :  { %1626 = vmatpush.msra.mxu0 %v4993_v17  ;;  %1646 = vmatpush.msrb.mxu1 %v4999_v19 }
 0xf72   :  { %1627 = vmatpush.msra.mxu0 %v5005_v31  ;;  %1647 = vmatpush.msrb.mxu1 %v5011_v34 }
 0xf74   :  { %1628 = vmatpush.msra.mxu0 %v5017_v41  ;;  %1648 = vmatpush.msrb.mxu1 %v5023_v6 }
 0xf76   :  { %1629 = vmatpush.msra.mxu0 %v5029_v23  ;;  %1649 = vmatpush.msrb.mxu1 %v5035_v10 }
 0xf78   :  { %1630 = vmatpush.msra.mxu0 %v5041_v12  ;;  %1650 = vmatpush.msrb.mxu1 %v5047_v13 }
 0xf7a   :  { %1631 = vmatpush.msra.mxu0 %v5053_v15  ;;  %1651 = vmatpush.msrb.mxu1 %v5092_v24 }
 0xf7c   :  { %1632 = vmatpush.msra.mxu0 %v5060_v16  ;;  %1652 = vmatpush.msrb.mxu1 %v5099_v25 }
 0xfea   :  { %v1246_v35 = vpop.f32.mrf.mxu0  ;;  %v1266_v44 = vpop.f32.mrf.mxu1 }
 0xfeb   :  { %v1269_v52 = vadd.f32 %v1246_v35, %v174_v26  ;;  %v1270_v55 = vadd.f32 %v1266_v44, %v239_v46 }
 0xfed   :  { %v3827_v39 = vmul.f32 -1.442695, %v1269_v52  ;;  %v3828_v54 = vmul.f32 -1.442695, %v1270_v55 }
 0xfef   :  { %4139 = vpow2.f32 %v3827_v39 }
 0xff5   :  { %v4140_v42 = vpop.eup %4139 }
 0xff6   :  { %v1274_v36 = vadd.f32 1.0, %v4140_v42 }
 0xff8   :  { %4141 = vrcp.f32 %v1274_v36  ;;  %v1286_v9 = vand.u32 2147483648, %v1274_v36  ;;  %v1284_v58 = vand.u32 2147483647, %v1274_v36  ;;  %vm1280_vm7 = vweird.f32 %v1274_v36 }
 0xff9   :  { %4143 = vtanh.f32 %v1270_v55 }
 0xffa   :  { %v1287_v30 = vor.u32 1.1754944e-38, %v1286_v9  ;;  %vm1285_vm9 = vcmp.eq.f32.partialorder %v1284_v58, 8.507059e+37  ;;  %4145 = vpow2.f32 %v3828_v54 }
 0xffe   :  { %v4142_v3 = vpop.eup %4141 }
 0xfff   :  { %v1276_v45 = vmul.f32 %v4142_v3, %v1274_v36  ;;  %vm1281_vm6 = vweird.f32 %v4142_v3  ;;  %v4144_v21 = vpop.eup %4143 }
0x1000   :  { %vm1282_vm8 = vmor %vm1280_vm7, %vm1281_vm6  ;;  %v4146_v33 = vpop.eup %4145 }
0x1001   :  { %v1277_v20 = vsub.f32 1.0, %v1276_v45  ;;  %v1294_v63 = vadd.f32 1.0, %v4146_v33 }
0x1003   :  { %v1278_v27 = vmul.f32 %v4142_v3, %v1277_v20  ;;  %4147 = vrcp.f32 %v1294_v63  ;;  %v1306_v4 = vand.u32 2147483648, %v1294_v63  ;;  %vm1300_vm11 = vweird.f32 %v1294_v63 }
0x1004   :  { %v1304_v11 = vand.u32 2147483647, %v1294_v63 }
0x1005   :  { %v1279_v29 = vadd.f32 %v4142_v3, %v1278_v27  ;;  %v1307_v43 = vor.u32 1.1754944e-38, %v1306_v4  ;;  %v245_v4 = vadd.f32 %v5164_v40, %v4823_v7 }
0x1006   :  { %vm1305_vm13 = vcmp.eq.f32.partialorder %v1304_v11, 8.507059e+37 }
0x1007   :  { %v1283_v38 = vsel %vm1282_vm8, %v4142_v3, %v1279_v29 }
0x1008   :  { %v1288_v37 = vsel %vm1285_vm9, %v1287_v30, %v1283_v38 }
0x1009   :  { %v1311_v32 = vmul.f32 %v4144_v21, %v1288_v37  ;;  %v4148_v28 = vpop.eup %4147  ;;  %v1310_v5 = vmul.f32 %v1288_v37, %v5206_v1 }
0x100a   :  { %v1296_v0 = vmul.f32 %v4148_v28, %v1294_v63  ;;  %vm1301_vm10 = vweird.f32 %v4148_v28 }
0x100b   :  { %1313 = vrot.lane.b32.xlu2 %v1311_v32, %s4436_s21  ;;  %vm1302_vm12 = vmor %vm1300_vm11, %vm1301_vm10 }
0x100c   :  { %v1297_v2 = vsub.f32 1.0, %v1296_v0  ;;  %v180_v0 = vadd.f32 %v4799_v53, %v4814_v61 }
0x100e   :  { %v1298_v49 = vmul.f32 %v4148_v28, %v1297_v2 }
0x1010   :  { %v1299_v47 = vadd.f32 %v4148_v28, %v1298_v49 }
0x1012   :  { %v1303_v22 = vsel %vm1302_vm12, %v4148_v28, %v1299_v47 }
0x1013   :  { %v1308_v35 = vsel %vm1305_vm13, %v1307_v43, %v1303_v22 }
0x1065   :  { %v1314_v18 = vpop.permute.xlu2 %1313 }
0x1066   :  { %v5235_v51 = vadd.f32 %v1314_v18, %v1310_v5 }
0x1068   :  { %4149 = vtanh.f32 %v5235_v51 }
0x106e   :  { %v4150_v26 = vpop.eup %4149 }
0x106f   :  { %v1318_v52 = vmul.f32 %v4150_v26, %v1308_v35 }
0x1071   :  { %1320 = vrot.lane.b32.xlu0 %v1318_v52, %s4436_s21 }
0x10e3   :  { %v1321_v1 = vpop.permute.xlu0 %1320 }
0x10e4   :  { %1323 = vst.msk [vmem:[#allocation2 + $0x50] sm:$0xff] %vm77_vm0, %v1321_v1  ;;  %3829 = vmatmul.msk.f32.vlgmr.msra.gmra.mxu2 %vm77_vm0, %v1321_v1  ;;  %3830 = vmatmul.msk.f32.vlgmr.msra.gmra.mxu3 %vm77_vm0, %v1321_v1 }
0x10e5   :  { %1722 = vmatpush.msra.mxu2 %v4981_v14  ;;  %1742 = vmatpush.msra.mxu3 %v4987_v8  ;;  %v177_v14 = vadd.f32 %v4793_v50, %v4814_v61 }
0x10e7   :  { %1723 = vmatpush.msra.mxu2 %v4993_v17  ;;  %1743 = vmatpush.msra.mxu3 %v4999_v19 }
0x10e9   :  { %1724 = vmatpush.msra.mxu2 %v5005_v31  ;;  %1744 = vmatpush.msra.mxu3 %v5011_v34 }
0x10eb   :  { %1725 = vmatpush.msra.mxu2 %v5017_v41  ;;  %1745 = vmatpush.msra.mxu3 %v5023_v6  ;;  %v242_v6 = vadd.f32 %v5162_v60, %v4823_v7 }
0x10ed   :  { %1726 = vmatpush.msra.mxu2 %v5029_v23  ;;  %1746 = vmatpush.msra.mxu3 %v5035_v10 }
0x10ef   :  { %1727 = vmatpush.msra.mxu2 %v5041_v12  ;;  %1747 = vmatpush.msra.mxu3 %v5047_v13 }
0x10f1   :  { %1728 = vmatpush.msra.mxu2 %v5053_v15  ;;  %1748 = vmatpush.msra.mxu3 %v5092_v24 }
0x10f3   :  { %1729 = vmatpush.msra.mxu2 %v5060_v16  ;;  %1749 = vmatpush.msra.mxu3 %v5099_v25 }
0x1167   :  { %v1343_v8 = vpop.f32.mrf.mxu2  ;;  %v1363_v41 = vpop.f32.mrf.mxu3 }
0x1168   :  { %v1366_v17 = vadd.f32 %v1343_v8, %v177_v14  ;;  %v1367_v10 = vadd.f32 %v1363_v41, %v242_v6 }
0x116a   :  { %v3831_v19 = vmul.f32 -1.442695, %v1366_v17  ;;  %v3832_v60 = vmul.f32 -1.442695, %v1367_v10 }
0x116c   :  { %4151 = vpow2.f32 %v3831_v19 }
0x1172   :  { %v4152_v31 = vpop.eup %4151 }
0x1173   :  { %v1371_v34 = vadd.f32 1.0, %v4152_v31 }
0x1175   :  { %4153 = vrcp.f32 %v1371_v34  ;;  %v1383_v15 = vand.u32 2147483648, %v1371_v34  ;;  %v1381_v50 = vand.u32 2147483647, %v1371_v34  ;;  %vm1377_vm15 = vweird.f32 %v1371_v34 }
0x1176   :  { %4155 = vtanh.f32 %v1367_v10 }
0x1177   :  { %v1384_v25 = vor.u32 1.1754944e-38, %v1383_v15  ;;  %vm1382_vm2 = vcmp.eq.f32.partialorder %v1381_v50, 8.507059e+37  ;;  %4157 = vpow2.f32 %v3832_v60 }
0x117b   :  { %v4154_v23 = vpop.eup %4153 }
0x117c   :  { %v1373_v12 = vmul.f32 %v4154_v23, %v1371_v34  ;;  %vm1378_vm14 = vweird.f32 %v4154_v23  ;;  %v4156_v42 = vpop.eup %4155 }
0x117d   :  { %vm1379_vm1 = vmor %vm1377_vm15, %vm1378_vm14  ;;  %v4158_v46 = vpop.eup %4157 }
0x117e   :  { %v1374_v13 = vsub.f32 1.0, %v1373_v12  ;;  %v1391_v3 = vadd.f32 1.0, %v4158_v46 }
0x1180   :  { %v1375_v16 = vmul.f32 %v4154_v23, %v1374_v13  ;;  %4159 = vrcp.f32 %v1391_v3  ;;  %v1403_v38 = vand.u32 2147483648, %v1391_v3  ;;  %vm1397_vm4 = vweird.f32 %v1391_v3 }
0x1181   :  { %v1401_v21 = vand.u32 2147483647, %v1391_v3 }
0x1182   :  { %v1376_v24 = vadd.f32 %v4154_v23, %v1375_v16  ;;  %v1404_v32 = vor.u32 1.1754944e-38, %v1403_v38 }
0x1183   :  { %vm1402_vm6 = vcmp.eq.f32.partialorder %v1401_v21, 8.507059e+37 }
0x1184   :  { %v1380_v39 = vsel %vm1379_vm1, %v4154_v23, %v1376_v24 }
0x1185   :  { %v1385_v36 = vsel %vm1382_vm2, %v1384_v25, %v1380_v39 }
0x1186   :  { %v1408_v44 = vmul.f32 %v4156_v42, %v1385_v36  ;;  %v4160_v55 = vpop.eup %4159  ;;  %v1407_v27 = vmul.f32 %v1385_v36, %v5235_v51 }
0x1187   :  { %v1393_v45 = vmul.f32 %v4160_v55, %v1391_v3  ;;  %vm1398_vm3 = vweird.f32 %v4160_v55  ;;  %v183_v3 = vadd.f32 %v4805_v56, %v4814_v61 }
0x1188   :  { %1410 = vrot.lane.b32.xlu1 %v1408_v44, %s4436_s21  ;;  %vm1399_vm5 = vmor %vm1397_vm4, %vm1398_vm3 }
0x1189   :  { %v1394_v20 = vsub.f32 1.0, %v1393_v45 }
0x118b   :  { %v1395_v9 = vmul.f32 %v4160_v55, %v1394_v20 }
0x118d   :  { %v1396_v30 = vadd.f32 %v4160_v55, %v1395_v9 }
0x118f   :  { %v1400_v37 = vsel %vm1399_vm5, %v4160_v55, %v1396_v30 }
0x1190   :  { %v1405_v33 = vsel %vm1402_vm6, %v1404_v32, %v1400_v37 }
0x11fa   :  { %v1411_v58 = vpop.permute.xlu1 %1410 }
0x11fb   :  { %v1413_v29 = vadd.f32 %v1411_v58, %v1407_v27 }
0x11fd   :  { %4161 = vtanh.f32 %v1413_v29 }
0x1203   :  { %v4162_v54 = vpop.eup %4161 }
0x1204   :  { %v1415_v63 = vmul.f32 %v4162_v54, %v1405_v33 }
0x1206   :  { %1417 = vrot.lane.b32.xlu2 %v1415_v63, %s4436_s21 }
0x1260   :  { %v1418_v28 = vpop.permute.xlu2 %1417 }
0x1261   :  { %1420 = vst.msk [vmem:[#allocation2 + $0x58] sm:$0xff] %vm77_vm0, %v1418_v28  ;;  %3833 = vmatmul.msk.f32.vlgmr.msrb.gmra.mxu0 %vm77_vm0, %v1418_v28  ;;  %3834 = vmatmul.msk.f32.vlgmr.msra.gmra.mxu1 %vm77_vm0, %v1418_v28 }
0x12de   :  { %v1440_v2 = vpop.f32.mrf.mxu0  ;;  %v1460_v47 = vpop.f32.mrf.mxu1 }
0x12df   :  { %v1463_v49 = vadd.f32 %v1440_v2, %v180_v0  ;;  %v1464_v22 = vadd.f32 %v1460_v47, %v245_v4  ;;  %v3864_v47 = vld [vmem:[%s6143_s1 + $0xf8] sm:$0xff]  ;;  %v3861_v4 = vld [vmem:[%s6143_s1 + $0xe0] sm:$0xff] }
0x12e0   :  { %1987 = vmatpush.msra.mxu1 %v3864_v47 }
0x12e1   :  { %v3835_v5 = vmul.f32 -1.442695, %v1463_v49  ;;  %v3836_v40 = vmul.f32 -1.442695, %v1464_v22 }
0x12e3   :  { %4163 = vpow2.f32 %v3835_v5 }
0x12e9   :  { %v4164_v18 = vpop.eup %4163 }
0x12ea   :  { %v1468_v51 = vadd.f32 1.0, %v4164_v18 }
0x12ec   :  { %4165 = vrcp.f32 %v1468_v51  ;;  %v1480_v35 = vand.u32 2147483648, %v1468_v51  ;;  %v1478_v53 = vand.u32 2147483647, %v1468_v51  ;;  %vm1474_vm8 = vweird.f32 %v1468_v51 }
0x12ed   :  { %4167 = vtanh.f32 %v1464_v22  ;;  %v3859_v22 = vld [vmem:[%s6143_s1 + $0xd0] sm:$0xff] }
0x12ee   :  { %v1481_v14 = vor.u32 1.1754944e-38, %v1480_v35  ;;  %vm1479_vm10 = vcmp.eq.f32.partialorder %v1478_v53, 8.507059e+37  ;;  %4169 = vpow2.f32 %v3836_v40  ;;  %v3858_v35 = vld [vmem:[%s6143_s1 + $0xc8] sm:$0xff] }
0x12f2   :  { %v4166_v11 = vpop.eup %4165 }
0x12f3   :  { %v1470_v43 = vmul.f32 %v4166_v11, %v1468_v51  ;;  %vm1475_vm7 = vweird.f32 %v4166_v11  ;;  %v4168_v17 = vpop.eup %4167  ;;  %v3863_v51 = vld [vmem:[%s6143_s1 + $0xf0] sm:$0xff] }
0x12f4   :  { %vm1476_vm9 = vmor %vm1474_vm8, %vm1475_vm7  ;;  %v4170_v34 = vpop.eup %4169  ;;  %1922 = vmatpush.msrb.mxu0 %v3863_v51 }
0x12f5   :  { %v1471_v26 = vsub.f32 1.0, %v1470_v43  ;;  %v1488_v41 = vadd.f32 1.0, %v4170_v34  ;;  %v3860_v43 = vld [vmem:[%s6143_s1 + $0xd8] sm:$0xff] }
0x12f6   :  { %1923 = vmatpush.msrb.mxu0 %v3861_v4 }
0x12f7   :  { %v1472_v52 = vmul.f32 %v4166_v11, %v1471_v26  ;;  %4171 = vrcp.f32 %v1488_v41  ;;  %v1500_v24 = vand.u32 2147483648, %v1488_v41  ;;  %vm1494_vm12 = vweird.f32 %v1488_v41  ;;  %v3857_v26 = vld [vmem:[%s6143_s1 + $0xc0] sm:$0xff] }
0x12f8   :  { %v1498_v25 = vand.u32 2147483647, %v1488_v41  ;;  %1924 = vmatpush.msrb.mxu0 %v3859_v22 }
0x12f9   :  { %v1473_v1 = vadd.f32 %v4166_v11, %v1472_v52  ;;  %v1501_v42 = vor.u32 1.1754944e-38, %v1500_v24  ;;  %v3851_v24 = vld [vmem:[%s6143_s1 + $0x90] sm:$0xff] }
0x12fa   :  { %vm1499_vm14 = vcmp.eq.f32.partialorder %v1498_v25, 8.507059e+37  ;;  %1925 = vmatpush.msrb.mxu0 %v3857_v26  ;;  %v3852_v25 = vld [vmem:[%s6143_s1 + $0x98] sm:$0xff] }
0x12fb   :  { %v1477_v8 = vsel %vm1476_vm9, %v4166_v11, %v1473_v1  ;;  %v3862_v11 = vld [vmem:[%s6143_s1 + $0xe8] sm:$0xff] }
0x12fc   :  { %v1482_v19 = vsel %vm1479_vm10, %v1481_v14, %v1477_v8  ;;  %1988 = vmatpush.msra.mxu1 %v3862_v11 }
0x12fd   :  { %v1505_v31 = vmul.f32 %v4168_v17, %v1482_v19  ;;  %v4172_v6 = vpop.eup %4171  ;;  %v1504_v13 = vmul.f32 %v1482_v19, %v1413_v29  ;;  %v248_v29 = vadd.f32 %v5166_v48, %v4823_v7 }
0x12fe   :  { %v1490_v23 = vmul.f32 %v4172_v6, %v1488_v41  ;;  %vm1495_vm11 = vweird.f32 %v4172_v6  ;;  %1989 = vmatpush.msra.mxu1 %v3860_v43 }
0x12ff   :  { %1507 = vrot.lane.b32.xlu0 %v1505_v31, %s4436_s21  ;;  %vm1496_vm13 = vmor %vm1494_vm12, %vm1495_vm11 }
0x1300   :  { %v1491_v10 = vsub.f32 1.0, %v1490_v23  ;;  %1990 = vmatpush.msra.mxu1 %v3858_v35 }
0x1302   :  { %v1492_v12 = vmul.f32 %v4172_v6, %v1491_v10 }
0x1304   :  { %v1493_v50 = vadd.f32 %v4172_v6, %v1492_v12 }
0x1306   :  { %v1497_v39 = vsel %vm1496_vm13, %v4172_v6, %v1493_v50  ;;  %v3854_v50 = vld [vmem:[%s6143_s1 + $0xa8] sm:$0xff] }
0x1307   :  { %v1502_v44 = vsel %vm1499_vm14, %v1501_v42, %v1497_v39  ;;  %v3849_v39 = vld [vmem:[%s6143_s1 + $0x80] sm:$0xff]  ;;  %v3850_v42 = vld [vmem:[%s6143_s1 + $0x88] sm:$0xff] }
0x1371   :  { %v1508_v15 = vpop.permute.xlu0 %1507 }
0x1372   :  { %v5273_v16 = vadd.f32 %v1508_v15, %v1504_v13  ;;  %v3855_v13 = vld [vmem:[%s6143_s1 + $0xb0] sm:$0xff]  ;;  %v3856_v15 = vld [vmem:[%s6143_s1 + $0xb8] sm:$0xff] }
0x1373   :  { %1926 = vmatpush.msrb.mxu0 %v3855_v13  ;;  %1991 = vmatpush.msra.mxu1 %v3856_v15 }
0x1374   :  { %4173 = vtanh.f32 %v5273_v16 }
0x1375   :  { %1992 = vmatpush.msra.mxu1 %v3854_v50 }
0x1377   :  { %1993 = vmatpush.msra.mxu1 %v3852_v25 }
0x1379   :  { %1994 = vmatpush.msra.mxu1 %v3850_v42 }
0x137a   :  { %v4174_v36 = vpop.eup %4173 }
0x137b   :  { %v1512_v60 = vmul.f32 %v4174_v36, %v1502_v44  ;;  %v1809_v44 = vld [vmem:[#allocation2] sm:$0xff] }
0x137d   :  { %1514 = vrot.lane.b32.xlu1 %v1512_v60, %s4436_s21  ;;  %v1810_v60 = vld [vmem:[#allocation2 + $0x8] sm:$0xff] }
0x13ef   :  { %v1515_v46 = vpop.permute.xlu1 %1514 }
0x13f0   :  { %1517 = vst.msk [vmem:[#allocation2 + $0x60] sm:$0xff] %vm77_vm0, %v1515_v46  ;;  %3837 = vmatmul.msk.f32.vlgmr.msrb.gmra.mxu2 %vm77_vm0, %v1515_v46  ;;  %3838 = vmatmul.msk.f32.vlgmr.msrb.gmra.mxu3 %vm77_vm0, %v1515_v46  ;;  %v1811_v46 = vld [vmem:[#allocation2 + $0x10] sm:$0xff] }
0x1473   :  { %v1537_v55 = vpop.f32.mrf.mxu2  ;;  %v1557_v58 = vpop.f32.mrf.mxu3 }
0x1474   :  { %v1560_v45 = vadd.f32 %v1537_v55, %v183_v3  ;;  %v1561_v38 = vadd.f32 %v1557_v58, %v248_v29  ;;  %v1812_v3 = vld [vmem:[#allocation2 + $0x18] sm:$0xff]  ;;  %v1813_v55 = vld [vmem:[#allocation2 + $0x20] sm:$0xff]  ;;  %v1818_v58 = vld [vmem:[#allocation2 + $0x48] sm:$0xff] }
0x1475   :  { %v1819_v29 = vld [vmem:[#allocation2 + $0x50] sm:$0xff] }
0x1476   :  { %v3839_v20 = vmul.f32 -1.442695, %v1560_v45  ;;  %v3840_v48 = vmul.f32 -1.442695, %v1561_v38  ;;  %v1814_v45 = vld [vmem:[#allocation2 + $0x28] sm:$0xff] }
0x1478   :  { %4175 = vpow2.f32 %v3839_v20  ;;  %v1815_v20 = vld [vmem:[#allocation2 + $0x30] sm:$0xff] }
0x147e   :  { %v4176_v9 = vpop.eup %4175 }
0x147f   :  { %v1565_v27 = vadd.f32 1.0, %v4176_v9  ;;  %v1816_v9 = vld [vmem:[#allocation2 + $0x38] sm:$0xff] }
0x1481   :  { %4177 = vrcp.f32 %v1565_v27  ;;  %v1577_v32 = vand.u32 2147483648, %v1565_v27  ;;  %v1575_v56 = vand.u32 2147483647, %v1565_v27  ;;  %vm1571_vm1 = vweird.f32 %v1565_v27 }
0x1482   :  { %4179 = vtanh.f32 %v1561_v38  ;;  %v1821_v38 = vld [vmem:[#allocation2 + $0x60] sm:$0xff] }
0x1483   :  { %v1578_v63 = vor.u32 1.1754944e-38, %v1577_v32  ;;  %vm1576_vm3 = vcmp.eq.f32.partialorder %v1575_v56, 8.507059e+37  ;;  %4181 = vpow2.f32 %v3840_v48 }
0x1487   :  { %v4178_v30 = vpop.eup %4177 }
0x1488   :  { %v1567_v21 = vmul.f32 %v4178_v30, %v1565_v27  ;;  %vm1572_vm15 = vweird.f32 %v4178_v30  ;;  %v4180_v0 = vpop.eup %4179  ;;  %v1817_v27 = vld [vmem:[#allocation2 + $0x40] sm:$0xff] }
0x1489   :  { %vm1573_vm2 = vmor %vm1571_vm1, %vm1572_vm15  ;;  %v4182_v5 = vpop.eup %4181 }
0x148a   :  { %v1568_v37 = vsub.f32 1.0, %v1567_v21  ;;  %v1585_v18 = vadd.f32 1.0, %v4182_v5 }
0x148c   :  { %v1569_v54 = vmul.f32 %v4178_v30, %v1568_v37  ;;  %4183 = vrcp.f32 %v1585_v18  ;;  %v1597_v40 = vand.u32 2147483648, %v1585_v18  ;;  %vm1591_vm5 = vweird.f32 %v1585_v18 }
0x148d   :  { %v1595_v34 = vand.u32 2147483647, %v1585_v18  ;;  %v186_v37 = vadd.f32 %v4816_v62, %v4814_v61 }
0x148e   :  { %v1570_v33 = vadd.f32 %v4178_v30, %v1569_v54  ;;  %v1598_v6 = vor.u32 1.1754944e-38, %v1597_v40  ;;  %v5413_v40 = vld [vmem:[%s6145_s2 + $0xc0] sm:$0xff] }
0x148f   :  { %vm1596_vm7 = vcmp.eq.f32.partialorder %v1595_v34, 8.507059e+37  ;;  %v5418_v34 = vld [vmem:[%s6145_s2 + $0xc8] sm:$0xff] }
0x1490   :  { %v1574_v28 = vsel %vm1573_vm2, %v4178_v30, %v1570_v33  ;;  %v1820_v30 = vld [vmem:[#allocation2 + $0x58] sm:$0xff] }
0x1491   :  { %v1579_v2 = vsel %vm1576_vm3, %v1578_v63, %v1574_v28 }
0x1492   :  { %v1602_v49 = vmul.f32 %v4180_v0, %v1579_v2  ;;  %v4184_v52 = vpop.eup %4183  ;;  %v1601_v8 = vmul.f32 %v1579_v2, %v5273_v16  ;;  %v3853_v16 = vld [vmem:[%s6143_s1 + $0xa0] sm:$0xff]  ;;  %v251_v0 = vadd.f32 %v5168_v59, %v4823_v7 }
0x1493   :  { %v1587_v53 = vmul.f32 %v4184_v52, %v1585_v18  ;;  %vm1592_vm4 = vweird.f32 %v4184_v52  ;;  %1927 = vmatpush.msrb.mxu0 %v3853_v16 }
0x1494   :  { %1604 = vrot.lane.b32.xlu2 %v1602_v49, %s4436_s21  ;;  %vm1593_vm6 = vmor %vm1591_vm5, %vm1592_vm4 }
0x1495   :  { %v1588_v1 = vsub.f32 1.0, %v1587_v53  ;;  %1928 = vmatpush.msrb.mxu0 %v3851_v24  ;;  %v5377_v53 = vld [vmem:[%s6145_s2 + $0xf0] sm:$0xff] }
0x1496   :  { %2052 = vmatpush.msrb.mxu2 %v5377_v53 }
0x1497   :  { %v1589_v14 = vmul.f32 %v4184_v52, %v1588_v1  ;;  %1929 = vmatpush.msrb.mxu0 %v3849_v39  ;;  %v5382_v1 = vld [vmem:[%s6145_s2 + $0xf8] sm:$0xff] }
0x1498   :  { %2072 = vmatpush.msrb.mxu3 %v5382_v1 }
0x1499   :  { %v1590_v31 = vadd.f32 %v4184_v52, %v1589_v14  ;;  %v5387_v14 = vld [vmem:[%s6145_s2 + $0xe0] sm:$0xff] }
0x149a   :  { %2053 = vmatpush.msrb.mxu2 %v5387_v14 }
0x149b   :  { %v1594_v41 = vsel %vm1593_vm6, %v4184_v52, %v1590_v31  ;;  %v5404_v31 = vld [vmem:[%s6145_s2 + $0xd8] sm:$0xff] }
0x149c   :  { %v1599_v10 = vsel %vm1596_vm7, %v1598_v6, %v1594_v41 }
0x14ee   :  { %v1605_v17 = vpop.permute.xlu2 %1604 }
0x14ef   :  { %v5310_v19 = vadd.f32 %v1605_v17, %v1601_v8  ;;  %v5394_v8 = vld [vmem:[%s6145_s2 + $0xe8] sm:$0xff]  ;;  %v5399_v17 = vld [vmem:[%s6145_s2 + $0xd0] sm:$0xff] }
0x14f0   :  { %2073 = vmatpush.msrb.mxu3 %v5394_v8  ;;  %2054 = vmatpush.msrb.mxu2 %v5399_v17 }
0x14f1   :  { %4185 = vtanh.f32 %v5310_v19 }
0x14f2   :  { %2074 = vmatpush.msrb.mxu3 %v5404_v31  ;;  %2055 = vmatpush.msrb.mxu2 %v5413_v40 }
0x14f4   :  { %2075 = vmatpush.msrb.mxu3 %v5418_v34 }
0x14f7   :  { %v4186_v23 = vpop.eup %4185 }
0x14f8   :  { %v1609_v12 = vmul.f32 %v4186_v23, %v1599_v10 }
0x14fa   :  { %1611 = vrot.lane.b32.xlu0 %v1609_v12, %s4436_s21 }
0x156c   :  { %v1612_v36 = vpop.permute.xlu0 %1611 }
0x156d   :  { %1614 = vst.msk [vmem:[#allocation2 + $0x68] sm:$0xff] %vm77_vm0, %v1612_v36  ;;  %3841 = vmatmul.msk.f32.vlgmr.msra.gmra.mxu0 %vm77_vm0, %v1612_v36  ;;  %3842 = vmatmul.msk.f32.vlgmr.msrb.gmra.mxu1 %vm77_vm0, %v1612_v36 }
0x156e   :  { %2828 = vmatpush.msra.mxu0 %v5377_v53  ;;  %2848 = vmatpush.msrb.mxu1 %v5382_v1 }
0x1570   :  { %2829 = vmatpush.msra.mxu0 %v5387_v14  ;;  %2849 = vmatpush.msrb.mxu1 %v5394_v8 }
0x1572   :  { %2830 = vmatpush.msra.mxu0 %v5399_v17  ;;  %2850 = vmatpush.msrb.mxu1 %v5404_v31 }
0x1574   :  { %v1822_v21 = vld [vmem:[#allocation2 + $0x68] sm:$0xff]  ;;  %2831 = vmatpush.msra.mxu0 %v5413_v40  ;;  %2851 = vmatpush.msrb.mxu1 %v5418_v34 }
0x1575   :  { %3882 = vmatmul.msk.f32.vlgmr.msrb.gmra.mxu0 %vm77_vm0, %v1809_v44  ;;  %3898 = vmatmul.msk.f32.vlgmr.msra.gmra.mxu1 %vm77_vm0, %v1809_v44 }
0x157d   :  { %3883 = vmatmul.msk.f32.gmra.mxu0 %vm77_vm0, %v1810_v60  ;;  %3899 = vmatmul.msk.f32.gmra.mxu1 %vm77_vm0, %v1810_v60  ;;  %v5443_v60 = vld [vmem:[%s6145_s2 + $0xb8] sm:$0xff] }
0x157e   :  { %2076 = vmatpush.msrb.mxu3 %v5443_v60  ;;  %2852 = vmatpush.msrb.mxu1 %v5443_v60 }
0x1585   :  { %3884 = vmatmul.msk.f32.gmra.mxu0 %vm77_vm0, %v1811_v46  ;;  %3900 = vmatmul.msk.f32.gmra.mxu1 %vm77_vm0, %v1811_v46  ;;  %v5448_v46 = vld [vmem:[%s6145_s2 + $0xa0] sm:$0xff] }
0x158d   :  { %3885 = vmatmul.msk.f32.gmra.mxu0 %vm77_vm0, %v1812_v3  ;;  %3901 = vmatmul.msk.f32.gmra.mxu1 %vm77_vm0, %v1812_v3  ;;  %v5455_v3 = vld [vmem:[%s6145_s2 + $0xa8] sm:$0xff] }
0x158e   :  { %2077 = vmatpush.msrb.mxu3 %v5455_v3  ;;  %2853 = vmatpush.msrb.mxu1 %v5455_v3 }
0x1595   :  { %3886 = vmatmul.msk.f32.gmra.mxu0 %vm77_vm0, %v1813_v55  ;;  %3902 = vmatmul.msk.f32.gmra.mxu1 %vm77_vm0, %v1813_v55  ;;  %v5460_v55 = vld [vmem:[%s6145_s2 + $0x90] sm:$0xff] }
0x159d   :  { %3887 = vmatmul.msk.f32.gmra.mxu0 %vm77_vm0, %v1814_v45  ;;  %3903 = vmatmul.msk.f32.gmra.mxu1 %vm77_vm0, %v1814_v45  ;;  %v5465_v45 = vld [vmem:[%s6145_s2 + $0x98] sm:$0xff] }
0x159e   :  { %2078 = vmatpush.msrb.mxu3 %v5465_v45  ;;  %2854 = vmatpush.msrb.mxu1 %v5465_v45 }
0x15a5   :  { %3888 = vmatmul.msk.f32.gmra.mxu0 %vm77_vm0, %v1815_v20  ;;  %3904 = vmatmul.msk.f32.gmra.mxu1 %vm77_vm0, %v1815_v20  ;;  %v5474_v20 = vld [vmem:[%s6145_s2 + $0x80] sm:$0xff] }
0x15ad   :  { %3889 = vmatmul.msk.f32.gmra.mxu0 %vm77_vm0, %v1816_v9  ;;  %3905 = vmatmul.msk.f32.gmra.mxu1 %vm77_vm0, %v1816_v9  ;;  %v5479_v9 = vld [vmem:[%s6145_s2 + $0x88] sm:$0xff] }
0x15ae   :  { %2079 = vmatpush.msrb.mxu3 %v5479_v9  ;;  %2855 = vmatpush.msrb.mxu1 %v5479_v9 }
0x15b0   :  { %3042 = vmatpush.msra.mxu1 %v5382_v1 }
0x15b2   :  { %3043 = vmatpush.msra.mxu1 %v5394_v8 }
0x15b4   :  { %3044 = vmatpush.msra.mxu1 %v5404_v31 }
0x15b5   :  { %3890 = vmatmul.msk.f32.gmra.mxu0 %vm77_vm0, %v1817_v27  ;;  %3906 = vmatmul.msk.f32.gmra.mxu1 %vm77_vm0, %v1817_v27 }
0x15b6   :  { %3045 = vmatpush.msra.mxu1 %v5418_v34 }
0x15b8   :  { %3046 = vmatpush.msra.mxu1 %v5443_v60 }
0x15ba   :  { %3047 = vmatpush.msra.mxu1 %v5455_v3 }
0x15bc   :  { %3048 = vmatpush.msra.mxu1 %v5465_v45 }
0x15bd   :  { %3891 = vmatmul.msk.f32.gmra.mxu0 %vm77_vm0, %v1818_v58  ;;  %3907 = vmatmul.msk.f32.gmra.mxu1 %vm77_vm0, %v1818_v58 }
0x15be   :  { %3049 = vmatpush.msra.mxu1 %v5479_v9 }
0x15c5   :  { %3892 = vmatmul.msk.f32.gmra.mxu0 %vm77_vm0, %v1819_v29  ;;  %3908 = vmatmul.msk.f32.gmra.mxu1 %vm77_vm0, %v1819_v29  ;;  %v6153_v29 = vmov 0.0  }
0x15cd   :  { %3893 = vmatmul.msk.f32.gmra.mxu0 %vm77_vm0, %v1820_v30  ;;  %3909 = vmatmul.msk.f32.gmra.mxu1 %vm77_vm0, %v1820_v30  ;;  %v6154_v30 = vld [vmem:[#allocation3_spill] sm:$0xff] }
0x15d5   :  { %3894 = vmatmul.msk.f32.gmra.mxu0 %vm77_vm0, %v1821_v38  ;;  %3910 = vmatmul.msk.f32.gmra.mxu1 %vm77_vm0, %v1821_v38  ;;  %v189_v38 = vadd.f32 %v6154_v30, %v4814_v61 }
0x15dd   :  { %3895 = vmatmul.msk.f32.gmra.mxu0 %vm77_vm0, %v1822_v21  ;;  %3911 = vmatmul.msk.f32.gmra.mxu1 %vm77_vm0, %v1822_v21 }
0x15ea   :  { %v1634_v32 = vpop.f32.mrf.mxu0  ;;  %v1654_v28 = vpop.f32.mrf.mxu1 }
0x15eb   :  { %v1657_v54 = vadd.f32 %v1634_v32, %v186_v37  ;;  %v1658_v49 = vadd.f32 %v1654_v28, %v251_v0  ;;  %v3881_v37 = vld [vmem:[%s6146_s3 + $0x2] sm:$0x3] }
0x15ed   :  { %v3843_v56 = vmul.f32 -1.442695, %v1657_v54  ;;  %v3844_v59 = vmul.f32 -1.442695, %v1658_v49 }
0x15ef   :  { %4187 = vpow2.f32 %v3843_v56  ;;  %v5551_v56 = vperm.slane %v3881_v37, 0 }
0x15f5   :  { %v4188_v33 = vpop.eup %4187 }
0x15f6   :  { %v1662_v63 = vadd.f32 1.0, %v4188_v33  ;;  %v1931_v33 = vpop.f32.mrf.mxu0 }
0x15f8   :  { %4189 = vrcp.f32 %v1662_v63  ;;  %v1674_v18 = vand.u32 2147483648, %v1662_v63  ;;  %v1672_v62 = vand.u32 2147483647, %v1662_v63  ;;  %vm1668_vm9 = vweird.f32 %v1662_v63 }
0x15f9   :  { %4191 = vtanh.f32 %v1658_v49 }
0x15fa   :  { %v1675_v4 = vor.u32 1.1754944e-38, %v1674_v18  ;;  %vm1673_vm11 = vcmp.eq.f32.partialorder %v1672_v62, 8.507059e+37  ;;  %4193 = vpow2.f32 %v3844_v59  ;;  %v254_v18 = vadd.f32 %v5172_v57, %v4823_v7 }
0x15fe   :  { %v4190_v2 = vpop.eup %4189 }
0x15ff   :  { %v1664_v48 = vmul.f32 %v4190_v2, %v1662_v63  ;;  %vm1669_vm8 = vweird.f32 %v4190_v2  ;;  %v4192_v22 = vpop.eup %4191  ;;  %v1932_v63 = vadd.f32 %v1931_v33, %v5551_v56 }
0x1600   :  { %vm1670_vm10 = vmor %vm1668_vm9, %vm1669_vm8  ;;  %v4194_v35 = vpop.eup %4193 }
0x1601   :  { %v1665_v5 = vsub.f32 1.0, %v1664_v48  ;;  %v1682_v52 = vadd.f32 1.0, %v4194_v35 }
0x1603   :  { %v1666_v51 = vmul.f32 %v4190_v2, %v1665_v5  ;;  %4195 = vrcp.f32 %v1682_v52  ;;  %v1694_v50 = vand.u32 2147483648, %v1682_v52  ;;  %vm1688_vm13 = vweird.f32 %v1682_v52 }
0x1604   :  { %v1692_v24 = vand.u32 2147483647, %v1682_v52 }
0x1605   :  { %v1667_v47 = vadd.f32 %v4190_v2, %v1666_v51  ;;  %v1695_v39 = vor.u32 1.1754944e-38, %v1694_v50 }
0x1606   :  { %vm1693_vm15 = vcmp.eq.f32.partialorder %v1692_v24, 8.507059e+37 }
0x1607   :  { %v1671_v11 = vsel %vm1670_vm10, %v4190_v2, %v1667_v47 }
0x1608   :  { %v1676_v43 = vsel %vm1673_vm11, %v1675_v4, %v1671_v11 }
0x1609   :  { %v1699_v26 = vmul.f32 %v4192_v22, %v1676_v43  ;;  %v4196_v41 = vpop.eup %4195  ;;  %v1698_v12 = vmul.f32 %v1676_v43, %v5310_v19  ;;  %v5438_v19 = vld [vmem:[%s6145_s2 + $0xb0] sm:$0xff]  ;;  %v5558_v22 = vperm.slane %v3881_v37, 1  ;;  %v1996_v43 = vpop.f32.mrf.mxu1 }
0x160a   :  { %v1684_v6 = vmul.f32 %v4196_v41, %v1682_v52  ;;  %vm1689_vm12 = vweird.f32 %v4196_v41  ;;  %2056 = vmatpush.msrb.mxu2 %v5438_v19  ;;  %2832 = vmatpush.msra.mxu0 %v5438_v19 }
0x160b   :  { %1701 = vrot.lane.b32.xlu1 %v1699_v26, %s4436_s21  ;;  %vm1690_vm14 = vmor %vm1688_vm13, %vm1689_vm12 }
0x160c   :  { %v1685_v23 = vsub.f32 1.0, %v1684_v6  ;;  %2057 = vmatpush.msrb.mxu2 %v5448_v46  ;;  %2833 = vmatpush.msra.mxu0 %v5448_v46 }
0x160e   :  { %v1686_v10 = vmul.f32 %v4196_v41, %v1685_v23  ;;  %2058 = vmatpush.msrb.mxu2 %v5460_v55  ;;  %2834 = vmatpush.msra.mxu0 %v5460_v55 }
0x1610   :  { %v1687_v16 = vadd.f32 %v4196_v41, %v1686_v10  ;;  %2059 = vmatpush.msrb.mxu2 %v5474_v20  ;;  %2835 = vmatpush.msra.mxu0 %v5474_v20 }
0x1612   :  { %v1691_v25 = vsel %vm1690_vm14, %v4196_v41, %v1687_v16  ;;  %3022 = vmatpush.msrb.mxu0 %v5377_v53  ;;  %v1997_v41 = vadd.f32 %v1996_v43, %v5558_v22  ;;  %v1934_v43 = vpop.f32.mrf.mxu0 }
0x1613   :  { %v1696_v36 = vsel %vm1693_vm15, %v1695_v39, %v1691_v25 }
0x1614   :  { %3023 = vmatpush.msrb.mxu0 %v5387_v14 }
0x1616   :  { %3024 = vmatpush.msrb.mxu0 %v5399_v17 }
0x1618   :  { %3025 = vmatpush.msrb.mxu0 %v5413_v40 }
0x161a   :  { %3026 = vmatpush.msrb.mxu0 %v5438_v19 }
0x161c   :  { %3027 = vmatpush.msrb.mxu0 %v5448_v46 }
0x161e   :  { %3028 = vmatpush.msrb.mxu0 %v5460_v55 }
0x1620   :  { %3029 = vmatpush.msrb.mxu0 %v5474_v20 }
0x167d   :  { %v1702_v13 = vpop.permute.xlu1 %1701 }
0x167e   :  { %v5431_v15 = vadd.f32 %v1702_v13, %v1698_v12 }
0x1680   :  { %4197 = vtanh.f32 %v5431_v15 }
0x1686   :  { %v4198_v42 = vpop.eup %4197 }
0x1687   :  { %v1706_v44 = vmul.f32 %v4198_v42, %v1696_v36 }
0x1689   :  { %1708 = vrot.lane.b32.xlu2 %v1706_v44, %s4436_s21 }
0x16e3   :  { %v1709_v27 = vpop.permute.xlu2 %1708 }
0x16e4   :  { %1711 = vst.msk [vmem:[#allocation2 + $0x70] sm:$0xff] %vm77_vm0, %v1709_v27  ;;  %3845 = vmatmul.msk.f32.vlgmr.msra.gmra.mxu2 %vm77_vm0, %v1709_v27  ;;  %3846 = vmatmul.msk.f32.vlgmr.msra.gmra.mxu3 %vm77_vm0, %v1709_v27 }
0x16e5   :  { %2149 = vmatpush.msra.mxu2 %v5377_v53  ;;  %2169 = vmatpush.msra.mxu3 %v5382_v1 }
0x16e7   :  { %2150 = vmatpush.msra.mxu2 %v5387_v14  ;;  %2170 = vmatpush.msra.mxu3 %v5394_v8 }
0x16e9   :  { %2151 = vmatpush.msra.mxu2 %v5399_v17  ;;  %2171 = vmatpush.msra.mxu3 %v5404_v31 }
0x16eb   :  { %v1823_v58 = vld [vmem:[#allocation2 + $0x70] sm:$0xff]  ;;  %2152 = vmatpush.msra.mxu2 %v5413_v40  ;;  %2172 = vmatpush.msra.mxu3 %v5418_v34 }
0x16ec   :  { %3896 = vmatmul.msk.f32.gmra.mxu0 %vm77_vm0, %v1823_v58  ;;  %3912 = vmatmul.msk.f32.gmra.mxu1 %vm77_vm0, %v1823_v58 }
0x16ed   :  { %2060 = vmatmul.f32.vlgmr.msrb.gmra.mxu2 %v6153_v29  ;;  %2080 = vmatmul.f32.vlgmr.msrb.gmra.mxu3 %v6153_v29 }
0x16ee   :  { %2153 = vmatpush.msra.mxu2 %v5438_v19  ;;  %2173 = vmatpush.msra.mxu3 %v5443_v60 }
0x16f0   :  { %2154 = vmatpush.msra.mxu2 %v5448_v46  ;;  %2174 = vmatpush.msra.mxu3 %v5455_v3 }
0x16f2   :  { %2155 = vmatpush.msra.mxu2 %v5460_v55  ;;  %2175 = vmatpush.msra.mxu3 %v5465_v45 }
0x16f4   :  { %2156 = vmatpush.msra.mxu2 %v5474_v20  ;;  %2176 = vmatpush.msra.mxu3 %v5479_v9 }
0x16f6   :  { %2246 = vmatpush.msrb.mxu2 %v5377_v53  ;;  %2266 = vmatpush.msrb.mxu3 %v5382_v1 }
0x16f8   :  { %2247 = vmatpush.msrb.mxu2 %v5387_v14  ;;  %2267 = vmatpush.msrb.mxu3 %v5394_v8 }
0x16fa   :  { %2248 = vmatpush.msrb.mxu2 %v5399_v17  ;;  %2268 = vmatpush.msrb.mxu3 %v5404_v31 }
0x16fc   :  { %2249 = vmatpush.msrb.mxu2 %v5413_v40  ;;  %2269 = vmatpush.msrb.mxu3 %v5418_v34 }
0x16fe   :  { %2250 = vmatpush.msrb.mxu2 %v5438_v19  ;;  %2270 = vmatpush.msrb.mxu3 %v5443_v60 }
0x1700   :  { %2251 = vmatpush.msrb.mxu2 %v5448_v46  ;;  %2271 = vmatpush.msrb.mxu3 %v5455_v3 }
0x1702   :  { %2252 = vmatpush.msrb.mxu2 %v5460_v55  ;;  %2272 = vmatpush.msrb.mxu3 %v5465_v45 }
0x1704   :  { %2253 = vmatpush.msrb.mxu2 %v5474_v20  ;;  %2273 = vmatpush.msrb.mxu3 %v5479_v9 }
0x1767   :  { %v1731_v21 = vpop.f32.mrf.mxu2  ;;  %v1751_v61 = vpop.f32.mrf.mxu3 }
0x1768   :  { %v1754_v32 = vadd.f32 %v1731_v21, %v189_v38  ;;  %v5556_v47 = vadd.f32 %v1751_v61, %v254_v18 }
0x176a   :  { %v3847_v54 = vmul.f32 -1.442695, %v1754_v32 }
0x176c   :  { %4199 = vpow2.f32 %v3847_v54 }
0x1770   :  { %v2061_v28 = vpop.f32.mrf.mxu2  ;;  %v2081_v52 = vpop.f32.mrf.mxu3 }
0x1771   :  { %v2084_v0 = vadd.f32 %v2061_v28, %v1932_v63  ;;  %v2085_v23 = vadd.f32 %v2081_v52, %v1997_v41 }
0x1772   :  { %v4200_v2 = vpop.eup %4199 }
0x1773   :  { %v1759_v49 = vadd.f32 1.0, %v4200_v2  ;;  %v3914_v48 = vmul.f32 -1.442695, %v2084_v0  ;;  %v3915_v38 = vmul.f32 -1.442695, %v2085_v23 }
0x1775   :  { %4201 = vrcp.f32 %v1759_v49  ;;  %v1771_v26 = vand.u32 2147483648, %v1759_v49  ;;  %v1769_v35 = vand.u32 2147483647, %v1759_v49  ;;  %vm1765_vm2 = vweird.f32 %v1759_v49 }
0x1776   :  { %4203 = vpow2.f32 %v3914_v48 }
0x1777   :  { %v1772_v57 = vor.u32 1.1754944e-38, %v1771_v26  ;;  %vm1770_vm4 = vcmp.eq.f32.partialorder %v1769_v35, 8.507059e+37  ;;  %v1935_v26 = vadd.f32 %v1934_v43, %v5551_v56  ;;  %v1937_v43 = vpop.f32.mrf.mxu0 }
0x177b   :  { %v4202_v5 = vpop.eup %4201 }
0x177c   :  { %v1761_v51 = vmul.f32 %v4202_v5, %v1759_v49  ;;  %v4204_v62 = vpop.eup %4203  ;;  %vm1766_vm1 = vweird.f32 %v4202_v5 }
0x177d   :  { %v2089_v4 = vadd.f32 1.0, %v4204_v62  ;;  %vm1767_vm3 = vmor %vm1765_vm2, %vm1766_vm1 }
0x177e   :  { %v1762_v11 = vsub.f32 1.0, %v1761_v51 }
0x177f   :  { %4205 = vrcp.f32 %v2089_v4  ;;  %v2101_v25 = vand.u32 2147483648, %v2089_v4  ;;  %v2099_v42 = vand.u32 2147483647, %v2089_v4  ;;  %vm2095_vm6 = vweird.f32 %v2089_v4 }
0x1780   :  { %4207 = vtanh.f32 %v5556_v47  ;;  %v1763_v59 = vmul.f32 %v4202_v5, %v1762_v11 }
0x1781   :  { %4209 = vtanh.f32 %v2085_v23  ;;  %v2102_v44 = vor.u32 1.1754944e-38, %v2101_v25  ;;  %vm2100_vm8 = vcmp.eq.f32.partialorder %v2099_v42, 8.507059e+37 }
0x1782   :  { %v1764_v7 = vadd.f32 %v4202_v5, %v1763_v59  ;;  %4211 = vpow2.f32 %v3915_v38 }
0x1784   :  { %v1768_v10 = vsel %vm1767_vm3, %v4202_v5, %v1764_v7 }
0x1785   :  { %v4206_v6 = vpop.eup %4205  ;;  %v5562_v16 = vsel %vm1770_vm4, %v1772_v57, %v1768_v10  ;;  %v1999_v57 = vpop.f32.mrf.mxu1 }
0x1786   :  { %v4208_v12 = vpop.eup %4207  ;;  %v2091_v13 = vmul.f32 %v4206_v6, %v2089_v4  ;;  %vm2096_vm5 = vweird.f32 %v4206_v6  ;;  %v2000_v23 = vadd.f32 %v1999_v57, %v5558_v22 }
0x1787   :  { %v5565_v50 = vmul.f32 %v4208_v12, %v5562_v16  ;;  %vm2097_vm7 = vmor %vm2095_vm6, %vm2096_vm5  ;;  %v4210_v58 = vpop.eup %4209 }
0x1788   :  { %v2092_v24 = vsub.f32 1.0, %v2091_v13  ;;  %v4212_v21 = vpop.eup %4211 }
0x1789   :  { %v2109_v37 = vadd.f32 1.0, %v4212_v21 }
0x178a   :  { %v2093_v39 = vmul.f32 %v4206_v6, %v2092_v24 }
0x178b   :  { %4213 = vrcp.f32 %v2109_v37  ;;  %v2121_v48 = vand.u32 2147483648, %v2109_v37  ;;  %vm2115_vm10 = vweird.f32 %v2109_v37  ;;  %v2119_v61 = vand.u32 2147483647, %v2109_v37 }
0x178c   :  { %v2094_v36 = vadd.f32 %v4206_v6, %v2093_v39 }
0x178d   :  { %v2122_v18 = vor.u32 1.1754944e-38, %v2121_v48  ;;  %vm2120_vm12 = vcmp.eq.f32.partialorder %v2119_v61, 8.507059e+37  ;;  %v2002_v57 = vpop.f32.mrf.mxu1 }
0x178e   :  { %v2098_v27 = vsel %vm2097_vm7, %v4206_v6, %v2094_v36 }
0x178f   :  { %v2103_v29 = vsel %vm2100_vm8, %v2102_v44, %v2098_v27 }
0x1790   :  { %v2126_v30 = vmul.f32 %v4210_v58, %v2103_v29  ;;  %v2125_v28 = vmul.f32 0.0, %v2103_v29 }
0x1791   :  { %v4214_v32 = vpop.eup %4213 }
0x1792   :  { %2128 = vrot.lane.b32.xlu0 %v2126_v30, %s4436_s21  ;;  %v2111_v54 = vmul.f32 %v4214_v32, %v2109_v37  ;;  %vm2116_vm9 = vweird.f32 %v4214_v32 }
0x1793   :  { %vm2117_vm11 = vmor %vm2115_vm10, %vm2116_vm9 }
0x1794   :  { %v2112_v33 = vsub.f32 1.0, %v2111_v54 }
0x1796   :  { %v2113_v63 = vmul.f32 %v4214_v32, %v2112_v33 }
0x1798   :  { %v2114_v49 = vadd.f32 %v4214_v32, %v2113_v63 }
0x179a   :  { %v2118_v5 = vsel %vm2117_vm11, %v4214_v32, %v2114_v49 }
0x179b   :  { %v2123_v62 = vsel %vm2120_vm12, %v2122_v18, %v2118_v5 }
0x1804   :  { %v2129_v0 = vpop.permute.xlu0 %2128 }
0x1805   :  { %v5568_v2 = vadd.f32 %v2129_v0, %v2125_v28 }
0x1807   :  { %4215 = vtanh.f32 %v5568_v2 }
0x180d   :  { %v4216_v51 = vpop.eup %4215 }
0x180e   :  { %v2133_v4 = vmul.f32 %v4216_v51, %v2123_v62 }
0x1810   :  { %2135 = vrot.lane.b32.xlu1 %v2133_v4, %s4436_s21 }
0x1882   :  { %v2136_v11 = vpop.permute.xlu1 %2135 }
0x1883   :  { %2138 = vst.msk [vmem:[#allocation2] sm:$0xff] %vm77_vm0, %v2136_v11  ;;  %3916 = vmatmul.msk.f32.vlgmr.msra.gmra.mxu2 %vm77_vm0, %v2136_v11  ;;  %3917 = vmatmul.msk.f32.vlgmr.msra.gmra.mxu3 %vm77_vm0, %v2136_v11 }
0x1884   :  { %2343 = vmatpush.msra.mxu2 %v5377_v53  ;;  %2363 = vmatpush.msra.mxu3 %v5382_v1 }
0x1886   :  { %2344 = vmatpush.msra.mxu2 %v5387_v14  ;;  %2364 = vmatpush.msra.mxu3 %v5394_v8 }
0x1888   :  { %2345 = vmatpush.msra.mxu2 %v5399_v17  ;;  %2365 = vmatpush.msra.mxu3 %v5404_v31 }
0x188a   :  { %2346 = vmatpush.msra.mxu2 %v5413_v40  ;;  %2366 = vmatpush.msra.mxu3 %v5418_v34 }
0x188c   :  { %2347 = vmatpush.msra.mxu2 %v5438_v19  ;;  %2367 = vmatpush.msra.mxu3 %v5443_v60 }
0x188e   :  { %2348 = vmatpush.msra.mxu2 %v5448_v46  ;;  %2368 = vmatpush.msra.mxu3 %v5455_v3 }
0x1890   :  { %2349 = vmatpush.msra.mxu2 %v5460_v55  ;;  %2369 = vmatpush.msra.mxu3 %v5465_v45 }
0x1892   :  { %2350 = vmatpush.msra.mxu2 %v5474_v20  ;;  %2370 = vmatpush.msra.mxu3 %v5479_v9 }
0x1906   :  { %v2158_v59 = vpop.f32.mrf.mxu2  ;;  %v2178_v6 = vpop.f32.mrf.mxu3 }
0x1907   :  { %v2181_v35 = vadd.f32 %v2158_v59, %v1935_v26  ;;  %v2182_v12 = vadd.f32 %v2178_v6, %v2000_v23  ;;  %v1938_v26 = vadd.f32 %v1937_v43, %v5551_v56  ;;  %v2003_v23 = vadd.f32 %v2002_v57, %v5558_v22  ;;  %v1940_v43 = vpop.f32.mrf.mxu0  ;;  %v2005_v57 = vpop.f32.mrf.mxu1 }
0x1909   :  { %v3918_v52 = vmul.f32 -1.442695, %v2181_v35  ;;  %v3919_v38 = vmul.f32 -1.442695, %v2182_v12 }
0x190b   :  { %4217 = vpow2.f32 %v3918_v52 }
0x1911   :  { %v4218_v41 = vpop.eup %4217 }
0x1912   :  { %v2186_v7 = vadd.f32 1.0, %v4218_v41 }
0x1914   :  { %4219 = vrcp.f32 %v2186_v7  ;;  %v2198_v25 = vand.u32 2147483648, %v2186_v7  ;;  %v2196_v42 = vand.u32 2147483647, %v2186_v7  ;;  %vm2192_vm14 = vweird.f32 %v2186_v7 }
0x1915   :  { %4221 = vtanh.f32 %v2182_v12 }
0x1916   :  { %v2199_v44 = vor.u32 1.1754944e-38, %v2198_v25  ;;  %vm2197_vm1 = vcmp.eq.f32.partialorder %v2196_v42, 8.507059e+37  ;;  %4223 = vpow2.f32 %v3919_v38 }
0x191a   :  { %v4220_v10 = vpop.eup %4219 }
0x191b   :  { %v2188_v13 = vmul.f32 %v4220_v10, %v2186_v7  ;;  %vm2193_vm13 = vweird.f32 %v4220_v10  ;;  %v4222_v58 = vpop.eup %4221 }
0x191c   :  { %vm2194_vm15 = vmor %vm2192_vm14, %vm2193_vm13  ;;  %v4224_v21 = vpop.eup %4223 }
0x191d   :  { %v2189_v24 = vsub.f32 1.0, %v2188_v13  ;;  %v2206_v37 = vadd.f32 1.0, %v4224_v21 }
0x191f   :  { %v2190_v39 = vmul.f32 %v4220_v10, %v2189_v24  ;;  %4225 = vrcp.f32 %v2206_v37  ;;  %v2218_v61 = vand.u32 2147483648, %v2206_v37  ;;  %vm2212_vm3 = vweird.f32 %v2206_v37 }
0x1920   :  { %v2216_v5 = vand.u32 2147483647, %v2206_v37 }
0x1921   :  { %v2191_v36 = vadd.f32 %v4220_v10, %v2190_v39  ;;  %v2219_v51 = vor.u32 1.1754944e-38, %v2218_v61 }
0x1922   :  { %vm2217_vm5 = vcmp.eq.f32.partialorder %v2216_v5, 8.507059e+37 }
0x1923   :  { %v2195_v27 = vsel %vm2194_vm15, %v4220_v10, %v2191_v36 }
0x1924   :  { %v2200_v29 = vsel %vm2197_vm1, %v2199_v44, %v2195_v27 }
0x1925   :  { %v2223_v30 = vmul.f32 %v4222_v58, %v2200_v29  ;;  %v4226_v32 = vpop.eup %4225  ;;  %v2222_v28 = vmul.f32 %v2200_v29, %v5568_v2 }
0x1926   :  { %v2208_v54 = vmul.f32 %v4226_v32, %v2206_v37  ;;  %vm2213_vm2 = vweird.f32 %v4226_v32 }
0x1927   :  { %2225 = vrot.lane.b32.xlu2 %v2223_v30, %s4436_s21  ;;  %vm2214_vm4 = vmor %vm2212_vm3, %vm2213_vm2 }
0x1928   :  { %v2209_v33 = vsub.f32 1.0, %v2208_v54 }
0x192a   :  { %v2210_v63 = vmul.f32 %v4226_v32, %v2209_v33 }
0x192c   :  { %v2211_v48 = vadd.f32 %v4226_v32, %v2210_v63 }
0x192e   :  { %v2215_v18 = vsel %vm2214_vm4, %v4226_v32, %v2211_v48 }
0x192f   :  { %v2220_v4 = vsel %vm2217_vm5, %v2219_v51, %v2215_v18 }
0x1981   :  { %v2226_v0 = vpop.permute.xlu2 %2225 }
0x1982   :  { %v5595_v49 = vadd.f32 %v2226_v0, %v2222_v28 }
0x1984   :  { %4227 = vtanh.f32 %v5595_v49 }
0x198a   :  { %v4228_v62 = vpop.eup %4227 }
0x198b   :  { %v2230_v11 = vmul.f32 %v4228_v62, %v2220_v4 }
0x198d   :  { %2232 = vrot.lane.b32.xlu0 %v2230_v11, %s4436_s21 }
0x19ff   :  { %v2233_v2 = vpop.permute.xlu0 %2232 }
0x1a00   :  { %2235 = vst.msk [vmem:[#allocation2 + $0x8] sm:$0xff] %vm77_vm0, %v2233_v2  ;;  %3920 = vmatmul.msk.f32.vlgmr.msrb.gmra.mxu2 %vm77_vm0, %v2233_v2  ;;  %3921 = vmatmul.msk.f32.vlgmr.msrb.gmra.mxu3 %vm77_vm0, %v2233_v2 }
0x1a01   :  { %2440 = vmatpush.msrb.mxu2 %v5377_v53  ;;  %2460 = vmatpush.msrb.mxu3 %v5382_v1 }
0x1a03   :  { %2441 = vmatpush.msrb.mxu2 %v5387_v14  ;;  %2461 = vmatpush.msrb.mxu3 %v5394_v8 }
0x1a05   :  { %2442 = vmatpush.msrb.mxu2 %v5399_v17  ;;  %2462 = vmatpush.msrb.mxu3 %v5404_v31 }
0x1a07   :  { %2443 = vmatpush.msrb.mxu2 %v5413_v40  ;;  %2463 = vmatpush.msrb.mxu3 %v5418_v34 }
0x1a09   :  { %2444 = vmatpush.msrb.mxu2 %v5438_v19  ;;  %2464 = vmatpush.msrb.mxu3 %v5443_v60 }
0x1a0b   :  { %2445 = vmatpush.msrb.mxu2 %v5448_v46  ;;  %2465 = vmatpush.msrb.mxu3 %v5455_v3 }
0x1a0d   :  { %2446 = vmatpush.msrb.mxu2 %v5460_v55  ;;  %2466 = vmatpush.msrb.mxu3 %v5465_v45 }
0x1a0f   :  { %2447 = vmatpush.msrb.mxu2 %v5474_v20  ;;  %2467 = vmatpush.msrb.mxu3 %v5479_v9 }
0x1a83   :  { %v2255_v59 = vpop.f32.mrf.mxu2  ;;  %v2275_v6 = vpop.f32.mrf.mxu3 }
0x1a84   :  { %v2278_v35 = vadd.f32 %v2255_v59, %v1938_v26  ;;  %v2279_v12 = vadd.f32 %v2275_v6, %v2003_v23  ;;  %v1941_v26 = vadd.f32 %v1940_v43, %v5551_v56  ;;  %v2006_v23 = vadd.f32 %v2005_v57, %v5558_v22 }
0x1a86   :  { %v3922_v52 = vmul.f32 -1.442695, %v2278_v35  ;;  %v3923_v38 = vmul.f32 -1.442695, %v2279_v12 }
0x1a88   :  { %4229 = vpow2.f32 %v3922_v52 }
0x1a8e   :  { %v4230_v41 = vpop.eup %4229 }
0x1a8f   :  { %v2283_v7 = vadd.f32 1.0, %v4230_v41 }
0x1a91   :  { %4231 = vrcp.f32 %v2283_v7  ;;  %v2295_v25 = vand.u32 2147483648, %v2283_v7  ;;  %v2293_v42 = vand.u32 2147483647, %v2283_v7  ;;  %vm2289_vm7 = vweird.f32 %v2283_v7 }
0x1a92   :  { %4233 = vtanh.f32 %v2279_v12 }
0x1a93   :  { %v2296_v44 = vor.u32 1.1754944e-38, %v2295_v25  ;;  %vm2294_vm9 = vcmp.eq.f32.partialorder %v2293_v42, 8.507059e+37  ;;  %4235 = vpow2.f32 %v3923_v38 }
0x1a97   :  { %v4232_v10 = vpop.eup %4231 }
0x1a98   :  { %v2285_v13 = vmul.f32 %v4232_v10, %v2283_v7  ;;  %vm2290_vm6 = vweird.f32 %v4232_v10  ;;  %v4234_v58 = vpop.eup %4233 }
0x1a99   :  { %vm2291_vm8 = vmor %vm2289_vm7, %vm2290_vm6  ;;  %v4236_v21 = vpop.eup %4235 }
0x1a9a   :  { %v2286_v24 = vsub.f32 1.0, %v2285_v13  ;;  %v2303_v37 = vadd.f32 1.0, %v4236_v21 }
0x1a9c   :  { %v2287_v39 = vmul.f32 %v4232_v10, %v2286_v24  ;;  %4237 = vrcp.f32 %v2303_v37  ;;  %v2315_v5 = vand.u32 2147483648, %v2303_v37  ;;  %vm2309_vm11 = vweird.f32 %v2303_v37 }
0x1a9d   :  { %v2313_v18 = vand.u32 2147483647, %v2303_v37 }
0x1a9e   :  { %v2288_v36 = vadd.f32 %v4232_v10, %v2287_v39  ;;  %v2316_v62 = vor.u32 1.1754944e-38, %v2315_v5 }
0x1a9f   :  { %vm2314_vm13 = vcmp.eq.f32.partialorder %v2313_v18, 8.507059e+37 }
0x1aa0   :  { %v2292_v27 = vsel %vm2291_vm8, %v4232_v10, %v2288_v36 }
0x1aa1   :  { %v2297_v29 = vsel %vm2294_vm9, %v2296_v44, %v2292_v27 }
0x1aa2   :  { %v2320_v30 = vmul.f32 %v4234_v58, %v2297_v29  ;;  %v4238_v32 = vpop.eup %4237  ;;  %v2319_v28 = vmul.f32 %v2297_v29, %v5595_v49 }
0x1aa3   :  { %v2305_v54 = vmul.f32 %v4238_v32, %v2303_v37  ;;  %vm2310_vm10 = vweird.f32 %v4238_v32 }
0x1aa4   :  { %2322 = vrot.lane.b32.xlu1 %v2320_v30, %s4436_s21  ;;  %vm2311_vm12 = vmor %vm2309_vm11, %vm2310_vm10 }
0x1aa5   :  { %v2306_v33 = vsub.f32 1.0, %v2305_v54 }
0x1aa7   :  { %v2307_v63 = vmul.f32 %v4238_v32, %v2306_v33 }
0x1aa9   :  { %v2308_v61 = vadd.f32 %v4238_v32, %v2307_v63 }
0x1aab   :  { %v2312_v51 = vsel %vm2311_vm12, %v4238_v32, %v2308_v61 }
0x1aac   :  { %v2317_v11 = vsel %vm2314_vm13, %v2316_v62, %v2312_v51 }
0x1b16   :  { %v2323_v0 = vpop.permute.xlu1 %2322 }
0x1b17   :  { %v5622_v48 = vadd.f32 %v2323_v0, %v2319_v28 }
0x1b19   :  { %4239 = vtanh.f32 %v5622_v48 }
0x1b1f   :  { %v4240_v4 = vpop.eup %4239 }
0x1b20   :  { %v2327_v2 = vmul.f32 %v4240_v4, %v2317_v11 }
0x1b22   :  { %2329 = vrot.lane.b32.xlu2 %v2327_v2, %s4436_s21 }
0x1b7c   :  { %v2330_v49 = vpop.permute.xlu2 %2329 }
0x1b7d   :  { %2332 = vst.msk [vmem:[#allocation2 + $0x10] sm:$0xff] %vm77_vm0, %v2330_v49  ;;  %3924 = vmatmul.msk.f32.vlgmr.msra.gmra.mxu2 %vm77_vm0, %v2330_v49  ;;  %3925 = vmatmul.msk.f32.vlgmr.msra.gmra.mxu3 %vm77_vm0, %v2330_v49 }
0x1b7e   :  { %2537 = vmatpush.msra.mxu2 %v5377_v53  ;;  %2557 = vmatpush.msra.mxu3 %v5382_v1 }
0x1b80   :  { %2538 = vmatpush.msra.mxu2 %v5387_v14  ;;  %2558 = vmatpush.msra.mxu3 %v5394_v8 }
0x1b82   :  { %2539 = vmatpush.msra.mxu2 %v5399_v17  ;;  %2559 = vmatpush.msra.mxu3 %v5404_v31 }
0x1b84   :  { %2540 = vmatpush.msra.mxu2 %v5413_v40  ;;  %2560 = vmatpush.msra.mxu3 %v5418_v34 }
0x1b86   :  { %2541 = vmatpush.msra.mxu2 %v5438_v19  ;;  %2561 = vmatpush.msra.mxu3 %v5443_v60 }
0x1b88   :  { %2542 = vmatpush.msra.mxu2 %v5448_v46  ;;  %2562 = vmatpush.msra.mxu3 %v5455_v3 }
0x1b8a   :  { %2543 = vmatpush.msra.mxu2 %v5460_v55  ;;  %2563 = vmatpush.msra.mxu3 %v5465_v45 }
0x1b8c   :  { %2544 = vmatpush.msra.mxu2 %v5474_v20  ;;  %2564 = vmatpush.msra.mxu3 %v5479_v9 }
0x1c00   :  { %v2352_v59 = vpop.f32.mrf.mxu2  ;;  %v2372_v6 = vpop.f32.mrf.mxu3 }
0x1c01   :  { %v2375_v35 = vadd.f32 %v2352_v59, %v1941_v26  ;;  %v2376_v12 = vadd.f32 %v2372_v6, %v2006_v23 }
0x1c03   :  { %v3926_v52 = vmul.f32 -1.442695, %v2375_v35  ;;  %v3927_v38 = vmul.f32 -1.442695, %v2376_v12 }
0x1c05   :  { %4241 = vpow2.f32 %v3926_v52 }
0x1c0b   :  { %v4242_v41 = vpop.eup %4241 }
0x1c0c   :  { %v2380_v7 = vadd.f32 1.0, %v4242_v41 }
0x1c0e   :  { %4243 = vrcp.f32 %v2380_v7  ;;  %v2392_v25 = vand.u32 2147483648, %v2380_v7  ;;  %v2390_v42 = vand.u32 2147483647, %v2380_v7  ;;  %vm2386_vm15 = vweird.f32 %v2380_v7 }
0x1c0f   :  { %4245 = vtanh.f32 %v2376_v12 }
0x1c10   :  { %v2393_v44 = vor.u32 1.1754944e-38, %v2392_v25  ;;  %vm2391_vm2 = vcmp.eq.f32.partialorder %v2390_v42, 8.507059e+37  ;;  %4247 = vpow2.f32 %v3927_v38 }
0x1c14   :  { %v4244_v10 = vpop.eup %4243 }
0x1c15   :  { %v2382_v13 = vmul.f32 %v4244_v10, %v2380_v7  ;;  %vm2387_vm14 = vweird.f32 %v4244_v10  ;;  %v4246_v58 = vpop.eup %4245 }
0x1c16   :  { %vm2388_vm1 = vmor %vm2386_vm15, %vm2387_vm14  ;;  %v4248_v21 = vpop.eup %4247 }
0x1c17   :  { %v2383_v24 = vsub.f32 1.0, %v2382_v13  ;;  %v2400_v37 = vadd.f32 1.0, %v4248_v21 }
0x1c19   :  { %v2384_v39 = vmul.f32 %v4244_v10, %v2383_v24  ;;  %4249 = vrcp.f32 %v2400_v37  ;;  %v2412_v18 = vand.u32 2147483648, %v2400_v37  ;;  %vm2406_vm4 = vweird.f32 %v2400_v37 }
0x1c1a   :  { %v2410_v51 = vand.u32 2147483647, %v2400_v37 }
0x1c1b   :  { %v2385_v36 = vadd.f32 %v4244_v10, %v2384_v39  ;;  %v2413_v4 = vor.u32 1.1754944e-38, %v2412_v18  ;;  %v5686_v18 = vld [vmem:[%s6145_s2 + $0xf0] sm:$0xff] }
0x1c1c   :  { %vm2411_vm6 = vcmp.eq.f32.partialorder %v2410_v51, 8.507059e+37  ;;  %v5692_v51 = vld [vmem:[%s6145_s2 + $0xf8] sm:$0xff] }
0x1c1d   :  { %v2389_v27 = vsel %vm2388_vm1, %v4244_v10, %v2385_v36 }
0x1c1e   :  { %v2394_v29 = vsel %vm2391_vm2, %v2393_v44, %v2389_v27 }
0x1c1f   :  { %v2417_v30 = vmul.f32 %v4246_v58, %v2394_v29  ;;  %v4250_v32 = vpop.eup %4249  ;;  %v2416_v28 = vmul.f32 %v2394_v29, %v5622_v48 }
0x1c20   :  { %v2402_v54 = vmul.f32 %v4250_v32, %v2400_v37  ;;  %vm2407_vm3 = vweird.f32 %v4250_v32 }
0x1c21   :  { %2419 = vrot.lane.b32.xlu0 %v2417_v30, %s4436_s21  ;;  %vm2408_vm5 = vmor %vm2406_vm4, %vm2407_vm3 }
0x1c22   :  { %v2403_v33 = vsub.f32 1.0, %v2402_v54 }
0x1c24   :  { %v2404_v63 = vmul.f32 %v4250_v32, %v2403_v33 }
0x1c26   :  { %v2405_v5 = vadd.f32 %v4250_v32, %v2404_v63 }
0x1c28   :  { %v2409_v62 = vsel %vm2408_vm5, %v4250_v32, %v2405_v5 }
0x1c29   :  { %v2414_v2 = vsel %vm2411_vm6, %v2413_v4, %v2409_v62  ;;  %v5698_v62 = vld [vmem:[%s6145_s2 + $0xe0] sm:$0xff]  ;;  %v5704_v4 = vld [vmem:[%s6145_s2 + $0xe8] sm:$0xff] }
0x1c93   :  { %v2420_v0 = vpop.permute.xlu0 %2419 }
0x1c94   :  { %v5649_v61 = vadd.f32 %v2420_v0, %v2416_v28 }
0x1c96   :  { %4251 = vtanh.f32 %v5649_v61 }
0x1c9c   :  { %v4252_v11 = vpop.eup %4251 }
0x1c9d   :  { %v2424_v49 = vmul.f32 %v4252_v11, %v2414_v2  ;;  %v5710_v11 = vld [vmem:[%s6145_s2 + $0xd0] sm:$0xff]  ;;  %v5716_v2 = vld [vmem:[%s6145_s2 + $0xd8] sm:$0xff] }
0x1c9f   :  { %2426 = vrot.lane.b32.xlu1 %v2424_v49, %s4436_s21  ;;  %v5722_v49 = vld [vmem:[%s6145_s2 + $0xc0] sm:$0xff] }
0x1d11   :  { %v2427_v48 = vpop.permute.xlu1 %2426 }
0x1d12   :  { %2429 = vst.msk [vmem:[#allocation2 + $0x18] sm:$0xff] %vm77_vm0, %v2427_v48  ;;  %3928 = vmatmul.msk.f32.vlgmr.msrb.gmra.mxu2 %vm77_vm0, %v2427_v48  ;;  %3929 = vmatmul.msk.f32.vlgmr.msrb.gmra.mxu3 %vm77_vm0, %v2427_v48  ;;  %v5728_v48 = vld [vmem:[%s6145_s2 + $0xc8] sm:$0xff] }
0x1d13   :  { %2634 = vmatpush.msrb.mxu2 %v5377_v53  ;;  %2654 = vmatpush.msrb.mxu3 %v5382_v1  ;;  %v1943_v53 = vpop.f32.mrf.mxu0 }
0x1d14   :  { %v1944_v1 = vadd.f32 %v1943_v53, %v5551_v56 }
0x1d15   :  { %2635 = vmatpush.msrb.mxu2 %v5387_v14  ;;  %2655 = vmatpush.msrb.mxu3 %v5394_v8 }
0x1d17   :  { %2636 = vmatpush.msrb.mxu2 %v5399_v17  ;;  %2656 = vmatpush.msrb.mxu3 %v5404_v31 }
0x1d19   :  { %2637 = vmatpush.msrb.mxu2 %v5413_v40  ;;  %2657 = vmatpush.msrb.mxu3 %v5418_v34  ;;  %v2008_v34 = vpop.f32.mrf.mxu1 }
0x1d1a   :  { %v2009_v26 = vadd.f32 %v2008_v34, %v5558_v22 }
0x1d1b   :  { %2638 = vmatpush.msrb.mxu2 %v5438_v19  ;;  %2658 = vmatpush.msrb.mxu3 %v5443_v60  ;;  %v1946_v53 = vpop.f32.mrf.mxu0 }
0x1d1d   :  { %2639 = vmatpush.msrb.mxu2 %v5448_v46  ;;  %2659 = vmatpush.msrb.mxu3 %v5455_v3 }
0x1d1f   :  { %2640 = vmatpush.msrb.mxu2 %v5460_v55  ;;  %2660 = vmatpush.msrb.mxu3 %v5465_v45 }
0x1d21   :  { %2641 = vmatpush.msrb.mxu2 %v5474_v20  ;;  %2661 = vmatpush.msrb.mxu3 %v5479_v9 }
0x1d95   :  { %v2449_v14 = vpop.f32.mrf.mxu2  ;;  %v2469_v43 = vpop.f32.mrf.mxu3 }
0x1d96   :  { %v2472_v8 = vadd.f32 %v2449_v14, %v1944_v1  ;;  %v2473_v35 = vadd.f32 %v2469_v43, %v2009_v26  ;;  %v1947_v1 = vadd.f32 %v1946_v53, %v5551_v56 }
0x1d98   :  { %v3930_v17 = vmul.f32 -1.442695, %v2472_v8  ;;  %v3931_v39 = vmul.f32 -1.442695, %v2473_v35 }
0x1d9a   :  { %4253 = vpow2.f32 %v3930_v17 }
0x1da0   :  { %v4254_v31 = vpop.eup %4253 }
0x1da1   :  { %v2477_v40 = vadd.f32 1.0, %v4254_v31 }
0x1da3   :  { %4255 = vrcp.f32 %v2477_v40  ;;  %v2489_v7 = vand.u32 2147483648, %v2477_v40  ;;  %v2487_v6 = vand.u32 2147483647, %v2477_v40  ;;  %vm2483_vm8 = vweird.f32 %v2477_v40 }
0x1da4   :  { %4257 = vtanh.f32 %v2473_v35 }
0x1da5   :  { %v2490_v10 = vor.u32 1.1754944e-38, %v2489_v7  ;;  %vm2488_vm10 = vcmp.eq.f32.partialorder %v2487_v6, 8.507059e+37  ;;  %4259 = vpow2.f32 %v3931_v39 }
0x1da9   :  { %v4256_v59 = vpop.eup %4255 }
0x1daa   :  { %v2479_v52 = vmul.f32 %v4256_v59, %v2477_v40  ;;  %vm2484_vm7 = vweird.f32 %v4256_v59  ;;  %v4258_v13 = vpop.eup %4257 }
0x1dab   :  { %vm2485_vm9 = vmor %vm2483_vm8, %vm2484_vm7  ;;  %v4260_v42 = vpop.eup %4259 }
0x1dac   :  { %v2480_v41 = vsub.f32 1.0, %v2479_v52  ;;  %v2497_v36 = vadd.f32 1.0, %v4260_v42 }
0x1dae   :  { %v2481_v57 = vmul.f32 %v4256_v59, %v2480_v41  ;;  %4261 = vrcp.f32 %v2497_v36  ;;  %v2509_v32 = vand.u32 2147483648, %v2497_v36  ;;  %vm2503_vm12 = vweird.f32 %v2497_v36 }
0x1daf   :  { %v2507_v54 = vand.u32 2147483647, %v2497_v36 }
0x1db0   :  { %v2482_v23 = vadd.f32 %v4256_v59, %v2481_v57  ;;  %v2510_v63 = vor.u32 1.1754944e-38, %v2509_v32 }
0x1db1   :  { %vm2508_vm14 = vcmp.eq.f32.partialorder %v2507_v54, 8.507059e+37 }
0x1db2   :  { %v2486_v12 = vsel %vm2485_vm9, %v4256_v59, %v2482_v23 }
0x1db3   :  { %v2491_v24 = vsel %vm2488_vm10, %v2490_v10, %v2486_v12 }
0x1db4   :  { %v2514_v25 = vmul.f32 %v4258_v13, %v2491_v24  ;;  %v4262_v44 = vpop.eup %4261  ;;  %v2513_v30 = vmul.f32 %v2491_v24, %v5649_v61 }
0x1db5   :  { %v2499_v27 = vmul.f32 %v4262_v44, %v2497_v36  ;;  %vm2504_vm11 = vweird.f32 %v4262_v44 }
0x1db6   :  { %2516 = vrot.lane.b32.xlu2 %v2514_v25, %s4436_s21  ;;  %vm2505_vm13 = vmor %vm2503_vm12, %vm2504_vm11 }
0x1db7   :  { %v2500_v58 = vsub.f32 1.0, %v2499_v27 }
0x1db9   :  { %v2501_v29 = vmul.f32 %v4262_v44, %v2500_v58 }
0x1dbb   :  { %v2502_v37 = vadd.f32 %v4262_v44, %v2501_v29 }
0x1dbd   :  { %v2506_v33 = vsel %vm2505_vm13, %v4262_v44, %v2502_v37 }
0x1dbe   :  { %v2511_v0 = vsel %vm2508_vm14, %v2510_v63, %v2506_v33 }
0x1e10   :  { %v2517_v38 = vpop.permute.xlu2 %2516 }
0x1e11   :  { %v5676_v21 = vadd.f32 %v2517_v38, %v2513_v30 }
0x1e13   :  { %4263 = vtanh.f32 %v5676_v21 }
0x1e19   :  { %v4264_v28 = vpop.eup %4263 }
0x1e1a   :  { %v2521_v5 = vmul.f32 %v4264_v28, %v2511_v0 }
0x1e1c   :  { %2523 = vrot.lane.b32.xlu0 %v2521_v5, %s4436_s21 }
0x1e8e   :  { %v2524_v61 = vpop.permute.xlu0 %2523 }
0x1e8f   :  { %2526 = vst.msk [vmem:[#allocation2 + $0x20] sm:$0xff] %vm77_vm0, %v2524_v61  ;;  %3932 = vmatmul.msk.f32.vlgmr.msra.gmra.mxu2 %vm77_vm0, %v2524_v61  ;;  %3933 = vmatmul.msk.f32.vlgmr.msra.gmra.mxu3 %vm77_vm0, %v2524_v61 }
0x1e90   :  { %2731 = vmatpush.msra.mxu2 %v5686_v18  ;;  %2751 = vmatpush.msra.mxu3 %v5692_v51 }
0x1e92   :  { %2732 = vmatpush.msra.mxu2 %v5698_v62  ;;  %2752 = vmatpush.msra.mxu3 %v5704_v4 }
0x1e94   :  { %2733 = vmatpush.msra.mxu2 %v5710_v11  ;;  %2753 = vmatpush.msra.mxu3 %v5716_v2 }
0x1e96   :  { %2734 = vmatpush.msra.mxu2 %v5722_v49  ;;  %2754 = vmatpush.msra.mxu3 %v5728_v48 }
0x1e98   :  { %2735 = vmatpush.msra.mxu2 %v5438_v19  ;;  %2755 = vmatpush.msra.mxu3 %v5443_v60 }
0x1e9a   :  { %2736 = vmatpush.msra.mxu2 %v5448_v46  ;;  %2756 = vmatpush.msra.mxu3 %v5455_v3  ;;  %v2011_v46 = vpop.f32.mrf.mxu1 }
0x1e9c   :  { %2737 = vmatpush.msra.mxu2 %v5460_v55  ;;  %2757 = vmatpush.msra.mxu3 %v5465_v45  ;;  %v2012_v55 = vadd.f32 %v2011_v46, %v5558_v22  ;;  %v5796_v46 = vld [vmem:[%s6145_s2 + $0x98] sm:$0xff] }
0x1e9e   :  { %2738 = vmatpush.msra.mxu2 %v5474_v20  ;;  %2758 = vmatpush.msra.mxu3 %v5479_v9 }
0x1f12   :  { %v2546_v14 = vpop.f32.mrf.mxu2  ;;  %v2566_v3 = vpop.f32.mrf.mxu3 }
0x1f13   :  { %v2569_v8 = vadd.f32 %v2546_v14, %v1947_v1  ;;  %v2570_v45 = vadd.f32 %v2566_v3, %v2012_v55  ;;  %v5766_v1 = vld [vmem:[%s6145_s2 + $0xb0] sm:$0xff]  ;;  %v5772_v14 = vld [vmem:[%s6145_s2 + $0xb8] sm:$0xff]  ;;  %v5802_v55 = vld [vmem:[%s6145_s2 + $0x80] sm:$0xff] }
0x1f15   :  { %v3934_v19 = vmul.f32 -1.442695, %v2569_v8  ;;  %v3935_v57 = vmul.f32 -1.442695, %v2570_v45  ;;  %v5778_v8 = vld [vmem:[%s6145_s2 + $0xa0] sm:$0xff] }
0x1f17   :  { %4265 = vpow2.f32 %v3934_v19  ;;  %v5784_v19 = vld [vmem:[%s6145_s2 + $0xa8] sm:$0xff] }
0x1f1d   :  { %v4266_v60 = vpop.eup %4265 }
0x1f1e   :  { %v2574_v17 = vadd.f32 1.0, %v4266_v60 }
0x1f20   :  { %4267 = vrcp.f32 %v2574_v17  ;;  %v2586_v9 = vand.u32 2147483648, %v2574_v17  ;;  %v2584_v43 = vand.u32 2147483647, %v2574_v17  ;;  %vm2580_vm1 = vweird.f32 %v2574_v17 }
0x1f21   :  { %4269 = vtanh.f32 %v2570_v45 }
0x1f22   :  { %v2587_v59 = vor.u32 1.1754944e-38, %v2586_v9  ;;  %vm2585_vm3 = vcmp.eq.f32.partialorder %v2584_v43, 8.507059e+37  ;;  %4271 = vpow2.f32 %v3935_v57  ;;  %v1949_v9 = vpop.f32.mrf.mxu0 }
0x1f26   :  { %v4268_v31 = vpop.eup %4267 }
0x1f27   :  { %v2576_v40 = vmul.f32 %v4268_v31, %v2574_v17  ;;  %vm2581_vm15 = vweird.f32 %v4268_v31  ;;  %v4270_v52 = vpop.eup %4269  ;;  %v5790_v17 = vld [vmem:[%s6145_s2 + $0x90] sm:$0xff] }
0x1f28   :  { %vm2582_vm2 = vmor %vm2580_vm1, %vm2581_vm15  ;;  %v4272_v6 = vpop.eup %4271 }
0x1f29   :  { %v2577_v20 = vsub.f32 1.0, %v2576_v40  ;;  %v2594_v23 = vadd.f32 1.0, %v4272_v6 }
0x1f2b   :  { %v2578_v34 = vmul.f32 %v4268_v31, %v2577_v20  ;;  %4273 = vrcp.f32 %v2594_v23  ;;  %v2606_v44 = vand.u32 2147483648, %v2594_v23  ;;  %vm2600_vm5 = vweird.f32 %v2594_v23 }
0x1f2c   :  { %v2604_v27 = vand.u32 2147483647, %v2594_v23 }
0x1f2d   :  { %v2579_v26 = vadd.f32 %v4268_v31, %v2578_v34  ;;  %v2607_v29 = vor.u32 1.1754944e-38, %v2606_v44  ;;  %v1950_v34 = vadd.f32 %v1949_v9, %v5551_v56 }
0x1f2e   :  { %vm2605_vm7 = vcmp.eq.f32.partialorder %v2604_v27, 8.507059e+37 }
0x1f2f   :  { %v2583_v35 = vsel %vm2582_vm2, %v4268_v31, %v2579_v26  ;;  %v5808_v31 = vld [vmem:[%s6145_s2 + $0x88] sm:$0xff] }
0x1f30   :  { %v2588_v41 = vsel %vm2585_vm3, %v2587_v59, %v2583_v35 }
0x1f31   :  { %v2611_v7 = vmul.f32 %v4270_v52, %v2588_v41  ;;  %v4274_v10 = vpop.eup %4273  ;;  %v2610_v25 = vmul.f32 %v2588_v41, %v5676_v21  ;;  %v3848_v21 = vmul.f32 -1.442695, %v5556_v47  ;;  %v2014_v41 = vpop.f32.mrf.mxu1 }
0x1f32   :  { %v2596_v12 = vmul.f32 %v4274_v10, %v2594_v23  ;;  %vm2601_vm4 = vweird.f32 %v4274_v10  ;;  %v2015_v57 = vadd.f32 %v2014_v41, %v5558_v22 }
0x1f33   :  { %2613 = vrot.lane.b32.xlu1 %v2611_v7, %s4436_s21  ;;  %vm2602_vm6 = vmor %vm2600_vm5, %vm2601_vm4 }
0x1f34   :  { %v2597_v13 = vsub.f32 1.0, %v2596_v12 }
0x1f36   :  { %v2598_v24 = vmul.f32 %v4274_v10, %v2597_v13 }
0x1f38   :  { %v2599_v36 = vadd.f32 %v4274_v10, %v2598_v24 }
0x1f3a   :  { %v2603_v58 = vsel %vm2602_vm6, %v4274_v10, %v2599_v36 }
0x1f3b   :  { %v2608_v38 = vsel %vm2605_vm7, %v2607_v29, %v2603_v58 }
0x1fa5   :  { %v2614_v39 = vpop.permute.xlu1 %2613 }
0x1fa6   :  { %v5743_v42 = vadd.f32 %v2614_v39, %v2610_v25 }
0x1fa8   :  { %4275 = vtanh.f32 %v5743_v42 }
0x1fa9   :  { %4277 = vpow2.f32 %v3848_v21 }
0x1fae   :  { %v4276_v30 = vpop.eup %4275 }
0x1faf   :  { %v2618_v37 = vmul.f32 %v4276_v30, %v2608_v38  ;;  %v4278_v32 = vpop.eup %4277 }
0x1fb0   :  { %v1779_v54 = vadd.f32 1.0, %v4278_v32 }
0x1fb1   :  { %2620 = vrot.lane.b32.xlu2 %v2618_v37, %s4436_s21 }
0x1fb2   :  { %4279 = vrcp.f32 %v1779_v54  ;;  %vm1785_vm9 = vweird.f32 %v1779_v54 }
0x1fb8   :  { %v4280_v33 = vpop.eup %4279 }
0x1fb9   :  { %1798 = vrot.lane.b32.xlu2 %v5565_v50, %s4436_s21  ;;  %v1781_v63 = vmul.f32 %v4280_v33, %v1779_v54  ;;  %v1795_v50 = vmul.f32 %v5562_v16, %v5431_v15  ;;  %vm1786_vm8 = vweird.f32 %v4280_v33  ;;  %v1791_v15 = vand.u32 2147483648, %v1779_v54 }
0x1fba   :  { %v1789_v16 = vand.u32 2147483647, %v1779_v54  ;;  %vm1787_vm10 = vmor %vm1785_vm9, %vm1786_vm8 }
0x1fbb   :  { %v1782_v0 = vsub.f32 1.0, %v1781_v63  ;;  %v1792_v3 = vor.u32 1.1754944e-38, %v1791_v15 }
0x1fbc   :  { %vm1790_vm11 = vcmp.eq.f32.partialorder %v1789_v16, 8.507059e+37 }
0x1fbd   :  { %v1783_v47 = vmul.f32 %v4280_v33, %v1782_v0 }
0x1fbf   :  { %v1784_v53 = vadd.f32 %v4280_v33, %v1783_v47 }
0x1fc1   :  { %v1788_v60 = vsel %vm1787_vm10, %v4280_v33, %v1784_v53 }
0x1fc2   :  { %v1793_v40 = vsel %vm1790_vm11, %v1792_v3, %v1788_v60 }
0x200b   :  { %v2621_v28 = vpop.permute.xlu2 %2620 }
0x200c   :  { %2623 = vst.msk [vmem:[#allocation2 + $0x28] sm:$0xff] %vm77_vm0, %v2621_v28  ;;  %3936 = vmatmul.msk.f32.vlgmr.msrb.gmra.mxu2 %vm77_vm0, %v2621_v28  ;;  %3937 = vmatmul.msk.f32.vlgmr.msrb.gmra.mxu3 %vm77_vm0, %v2621_v28 }
0x200d   :  { %2925 = vmatpush.msrb.mxu2 %v5686_v18  ;;  %2945 = vmatpush.msrb.mxu3 %v5692_v51 }
0x200f   :  { %2926 = vmatpush.msrb.mxu2 %v5698_v62  ;;  %2946 = vmatpush.msrb.mxu3 %v5704_v4 }
0x2011   :  { %2927 = vmatpush.msrb.mxu2 %v5710_v11  ;;  %2947 = vmatpush.msrb.mxu3 %v5716_v2 }
0x2013   :  { %v1799_v5 = vpop.permute.xlu2 %1798  ;;  %2928 = vmatpush.msrb.mxu2 %v5722_v49  ;;  %2948 = vmatpush.msrb.mxu3 %v5728_v48 }
0x2014   :  { %v1801_v61 = vadd.f32 %v1799_v5, %v1795_v50 }
0x2015   :  { %2929 = vmatpush.msrb.mxu2 %v5766_v1  ;;  %2949 = vmatpush.msrb.mxu3 %v5772_v14 }
0x2016   :  { %4281 = vtanh.f32 %v1801_v61 }
0x2017   :  { %2930 = vmatpush.msrb.mxu2 %v5778_v8  ;;  %2950 = vmatpush.msrb.mxu3 %v5784_v19 }
0x2019   :  { %2931 = vmatpush.msrb.mxu2 %v5790_v17  ;;  %2951 = vmatpush.msrb.mxu3 %v5796_v46 }
0x201b   :  { %2932 = vmatpush.msrb.mxu2 %v5802_v55  ;;  %2952 = vmatpush.msrb.mxu3 %v5808_v31 }
0x201c   :  { %v4282_v45 = vpop.eup %4281 }
0x201d   :  { %v1803_v20 = vmul.f32 %v4282_v45, %v1793_v40  ;;  %v1952_v40 = vpop.f32.mrf.mxu0 }
0x208f   :  { %v2643_v43 = vpop.f32.mrf.mxu2  ;;  %v2663_v7 = vpop.f32.mrf.mxu3 }
0x2090   :  { %v2666_v26 = vadd.f32 %v2643_v43, %v1950_v34  ;;  %v2667_v23 = vadd.f32 %v2663_v7, %v2015_v57 }
0x2092   :  { %v3938_v59 = vmul.f32 -1.442695, %v2666_v26  ;;  %v3939_v30 = vmul.f32 -1.442695, %v2667_v23 }
0x2094   :  { %4283 = vpow2.f32 %v3938_v59 }
0x209a   :  { %v4284_v35 = vpop.eup %4283 }
0x209b   :  { %v2671_v52 = vadd.f32 1.0, %v4284_v35  ;;  %v2017_v35 = vpop.f32.mrf.mxu1 }
0x209c   :  { %v2018_v41 = vadd.f32 %v2017_v35, %v5558_v22 }
0x209d   :  { %4285 = vrcp.f32 %v2671_v52  ;;  %v2683_v13 = vand.u32 2147483648, %v2671_v52  ;;  %v2681_v25 = vand.u32 2147483647, %v2671_v52  ;;  %vm2677_vm13 = vweird.f32 %v2671_v52 }
0x209e   :  { %4287 = vtanh.f32 %v2667_v23 }
0x209f   :  { %v2684_v36 = vor.u32 1.1754944e-38, %v2683_v13  ;;  %vm2682_vm15 = vcmp.eq.f32.partialorder %v2681_v25, 8.507059e+37  ;;  %4289 = vpow2.f32 %v3939_v30 }
0x20a3   :  { %v4286_v6 = vpop.eup %4285 }
0x20a4   :  { %v2673_v10 = vmul.f32 %v4286_v6, %v2671_v52  ;;  %vm2678_vm12 = vweird.f32 %v4286_v6  ;;  %v4288_v27 = vpop.eup %4287 }
0x20a5   :  { %vm2679_vm14 = vmor %vm2677_vm13, %vm2678_vm12  ;;  %v4290_v38 = vpop.eup %4289 }
0x20a6   :  { %v2674_v12 = vsub.f32 1.0, %v2673_v10  ;;  %v2691_v37 = vadd.f32 1.0, %v4290_v38 }
0x20a8   :  { %v2675_v24 = vmul.f32 %v4286_v6, %v2674_v12  ;;  %4291 = vrcp.f32 %v2691_v37  ;;  %v2703_v50 = vand.u32 2147483648, %v2691_v37  ;;  %vm2697_vm2 = vweird.f32 %v2691_v37 }
0x20a9   :  { %v2701_v5 = vand.u32 2147483647, %v2691_v37 }
0x20aa   :  { %v2676_v39 = vadd.f32 %v4286_v6, %v2675_v24  ;;  %v2704_v53 = vor.u32 1.1754944e-38, %v2703_v50 }
0x20ab   :  { %vm2702_vm4 = vcmp.eq.f32.partialorder %v2701_v5, 8.507059e+37 }
0x20ac   :  { %v2680_v44 = vsel %vm2679_vm14, %v4286_v6, %v2676_v39 }
0x20ad   :  { %v2685_v58 = vsel %vm2682_vm15, %v2684_v36, %v2680_v44 }
0x20ae   :  { %v2708_v29 = vmul.f32 %v4288_v27, %v2685_v58  ;;  %v4292_v21 = vpop.eup %4291  ;;  %v2707_v63 = vmul.f32 %v2685_v58, %v5743_v42 }
0x20af   :  { %v2693_v32 = vmul.f32 %v4292_v21, %v2691_v37  ;;  %vm2698_vm1 = vweird.f32 %v4292_v21 }
0x20b0   :  { %2710 = vrot.lane.b32.xlu0 %v2708_v29, %s4436_s21  ;;  %vm2699_vm3 = vmor %vm2697_vm2, %vm2698_vm1 }
0x20b1   :  { %v2694_v54 = vsub.f32 1.0, %v2693_v32 }
0x20b3   :  { %v2695_v33 = vmul.f32 %v4292_v21, %v2694_v54 }
0x20b5   :  { %v2696_v47 = vadd.f32 %v4292_v21, %v2695_v33 }
0x20b7   :  { %v2700_v61 = vsel %vm2699_vm3, %v4292_v21, %v2696_v47 }
0x20b8   :  { %v2705_v16 = vsel %vm2702_vm4, %v2704_v53, %v2700_v61 }
0x2122   :  { %v2711_v28 = vpop.permute.xlu0 %2710 }
0x2123   :  { %v5815_v0 = vadd.f32 %v2711_v28, %v2707_v63 }
0x2125   :  { %4293 = vtanh.f32 %v5815_v0 }
0x212b   :  { %v4294_v15 = vpop.eup %4293 }
0x212c   :  { %v2715_v60 = vmul.f32 %v4294_v15, %v2705_v16 }
0x212e   :  { %2717 = vrot.lane.b32.xlu1 %v2715_v60, %s4436_s21  ;;  %v1955_v60 = vpop.f32.mrf.mxu0 }
0x2136   :  { %1805 = vrot.lane.b32.xlu1 %v1803_v20, %s4436_s21  ;;  %v1953_v20 = vadd.f32 %v1952_v40, %v5551_v56 }
0x21a0   :  { %v2718_v42 = vpop.permute.xlu1 %2717 }
0x21a1   :  { %2720 = vst.msk [vmem:[#allocation2 + $0x30] sm:$0xff] %vm77_vm0, %v2718_v42  ;;  %3940 = vmatmul.msk.f32.vlgmr.msra.gmra.mxu2 %vm77_vm0, %v2718_v42  ;;  %3941 = vmatmul.msk.f32.vlgmr.msra.gmra.mxu3 %vm77_vm0, %v2718_v42  ;;  %v5869_v42 = vpop.f32.mrf.mxu0 }
0x21a2   :  { %3119 = vmatpush.msra.mxu2 %v5686_v18  ;;  %3139 = vmatpush.msra.mxu3 %v5692_v51 }
0x21a4   :  { %3120 = vmatpush.msra.mxu2 %v5698_v62  ;;  %3140 = vmatpush.msra.mxu3 %v5704_v4 }
0x21a6   :  { %3121 = vmatpush.msra.mxu2 %v5710_v11  ;;  %3141 = vmatpush.msra.mxu3 %v5716_v2 }
0x21a8   :  { %v1806_v3 = vpop.permute.xlu1 %1805  ;;  %3122 = vmatpush.msra.mxu2 %v5722_v49  ;;  %3142 = vmatpush.msra.mxu3 %v5728_v48 }
0x21a9   :  { %1808 = vst.msk [vmem:[#allocation2 + $0x78] sm:$0xff] %vm77_vm0, %v1806_v3  ;;  %v2020_v3 = vpop.f32.mrf.mxu1 }
0x21aa   :  { %3123 = vmatpush.msra.mxu2 %v5766_v1  ;;  %3143 = vmatpush.msra.mxu3 %v5772_v14 }
0x21ac   :  { %3124 = vmatpush.msra.mxu2 %v5778_v8  ;;  %3144 = vmatpush.msra.mxu3 %v5784_v19 }
0x21ae   :  { %3125 = vmatpush.msra.mxu2 %v5790_v17  ;;  %3145 = vmatpush.msra.mxu3 %v5796_v46 }
0x21b0   :  { %v1824_v45 = vld [vmem:[#allocation2 + $0x78] sm:$0xff]  ;;  %3126 = vmatpush.msra.mxu2 %v5802_v55  ;;  %3146 = vmatpush.msra.mxu3 %v5808_v31 }
0x21b1   :  { %3897 = vmatmul.msk.f32.gmra.mxu0 %vm77_vm0, %v1824_v45  ;;  %3913 = vmatmul.msk.f32.gmra.mxu1 %vm77_vm0, %v1824_v45  ;;  %v5871_v45 = vpop.f32.mrf.mxu0  ;;  %v5873_v40 = vpop.f32.mrf.mxu1 }
0x2224   :  { %v2740_v9 = vpop.f32.mrf.mxu2  ;;  %v2760_v52 = vpop.f32.mrf.mxu3 }
0x2225   :  { %v2763_v34 = vadd.f32 %v2740_v9, %v1953_v20  ;;  %v2764_v57 = vadd.f32 %v2760_v52, %v2018_v41  ;;  %v5875_v20 = vpop.f32.mrf.mxu0  ;;  %v5877_v9 = vpop.f32.mrf.mxu1 }
0x2227   :  { %v3942_v43 = vmul.f32 -1.442695, %v2763_v34  ;;  %v3943_v58 = vmul.f32 -1.442695, %v2764_v57 }
0x2229   :  { %4295 = vpow2.f32 %v3942_v43 }
0x222d   :  { %v5879_v34 = vpop.f32.mrf.mxu0  ;;  %v5881_v43 = vpop.f32.mrf.mxu1 }
0x222f   :  { %v4296_v26 = vpop.eup %4295 }
0x2230   :  { %v2768_v59 = vadd.f32 1.0, %v4296_v26 }
0x2232   :  { %4297 = vrcp.f32 %v2768_v59  ;;  %v2780_v10 = vand.u32 2147483648, %v2768_v59  ;;  %v2778_v13 = vand.u32 2147483647, %v2768_v59  ;;  %vm2774_vm6 = vweird.f32 %v2768_v59 }
0x2233   :  { %4299 = vtanh.f32 %v2764_v57 }
0x2234   :  { %v2781_v25 = vor.u32 1.1754944e-38, %v2780_v10  ;;  %vm2779_vm8 = vcmp.eq.f32.partialorder %v2778_v13, 8.507059e+37  ;;  %4301 = vpow2.f32 %v3943_v58 }
0x2235   :  { %v5883_v26 = vpop.f32.mrf.mxu0 }
0x2238   :  { %v4298_v7 = vpop.eup %4297 }
0x2239   :  { %v2770_v6 = vmul.f32 %v4298_v7, %v2768_v59  ;;  %vm2775_vm5 = vweird.f32 %v4298_v7  ;;  %v4300_v36 = vpop.eup %4299  ;;  %v5885_v59 = vpop.f32.mrf.mxu1 }
0x223a   :  { %vm2776_vm7 = vmor %vm2774_vm6, %vm2775_vm5  ;;  %v4302_v29 = vpop.eup %4301 }
0x223b   :  { %v2771_v23 = vsub.f32 1.0, %v2770_v6  ;;  %v2788_v30 = vadd.f32 1.0, %v4302_v29 }
0x223d   :  { %v2772_v12 = vmul.f32 %v4298_v7, %v2771_v23  ;;  %4303 = vrcp.f32 %v2788_v30  ;;  %v2800_v47 = vand.u32 2147483648, %v2788_v30  ;;  %vm2794_vm10 = vweird.f32 %v2788_v30  ;;  %v5887_v35 = vpop.f32.mrf.mxu0 }
0x223e   :  { %v2798_v50 = vand.u32 2147483647, %v2788_v30 }
0x223f   :  { %v2773_v24 = vadd.f32 %v4298_v7, %v2772_v12  ;;  %v2801_v61 = vor.u32 1.1754944e-38, %v2800_v47 }
0x2240   :  { %vm2799_vm12 = vcmp.eq.f32.partialorder %v2798_v50, 8.507059e+37 }
0x2241   :  { %v2777_v39 = vsel %vm2776_vm7, %v4298_v7, %v2773_v24  ;;  %v5891_v41 = vpop.f32.mrf.mxu1  ;;  %v1956_v7 = vadd.f32 %v1955_v60, %v5551_v56 }
0x2242   :  { %v2782_v44 = vsel %vm2779_vm8, %v2781_v25, %v2777_v39  ;;  %v2021_v39 = vadd.f32 %v2020_v3, %v5558_v22 }
0x2243   :  { %v2805_v27 = vmul.f32 %v4300_v36, %v2782_v44  ;;  %v4304_v38 = vpop.eup %4303  ;;  %v2804_v54 = vmul.f32 %v2782_v44, %v5815_v0 }
0x2244   :  { %v2790_v37 = vmul.f32 %v4304_v38, %v2788_v30  ;;  %vm2795_vm9 = vweird.f32 %v4304_v38 }
0x2245   :  { %2807 = vrot.lane.b32.xlu0 %v2805_v27, %s4436_s21  ;;  %vm2796_vm11 = vmor %vm2794_vm10, %vm2795_vm9  ;;  %v5889_v52 = vpop.f32.mrf.mxu0 }
0x2246   :  { %v2791_v21 = vsub.f32 1.0, %v2790_v37 }
0x2248   :  { %v2792_v32 = vmul.f32 %v4304_v38, %v2791_v21 }
0x2249   :  { %v5894_v6 = vpop.f32.mrf.mxu1 }
0x224a   :  { %v2793_v28 = vadd.f32 %v4304_v38, %v2792_v32 }
0x224c   :  { %v2797_v5 = vsel %vm2796_vm11, %v4304_v38, %v2793_v28 }
0x224d   :  { %v2802_v15 = vsel %vm2799_vm12, %v2801_v61, %v2797_v5 }
0x2251   :  { %v5896_v12 = vpop.f32.mrf.mxu1 }
0x22b7   :  { %v2808_v33 = vpop.permute.xlu0 %2807 }
0x22b8   :  { %v5846_v63 = vadd.f32 %v2808_v33, %v2804_v54 }
0x22ba   :  { %4305 = vtanh.f32 %v5846_v63 }
0x22c0   :  { %v4306_v53 = vpop.eup %4305 }
0x22c1   :  { %v2812_v16 = vmul.f32 %v4306_v53, %v2802_v15 }
0x22c3   :  { %2814 = vrot.lane.b32.xlu2 %v2812_v16, %s4436_s21 }
0x231d   :  { %v2815_v0 = vpop.permute.xlu2 %2814 }
0x231e   :  { %2817 = vst.msk [vmem:[#allocation2 + $0x38] sm:$0xff] %vm77_vm0, %v2815_v0  ;;  %3944 = vmatmul.msk.f32.vlgmr.msra.gmra.mxu0 %vm77_vm0, %v2815_v0  ;;  %3945 = vmatmul.msk.f32.vlgmr.msrb.gmra.mxu1 %vm77_vm0, %v2815_v0 }
0x231f   :  { %3216 = vmatpush.msra.mxu0 %v5686_v18  ;;  %3236 = vmatpush.msrb.mxu1 %v5692_v51 }
0x2321   :  { %3217 = vmatpush.msra.mxu0 %v5698_v62  ;;  %3237 = vmatpush.msrb.mxu1 %v5704_v4 }
0x2323   :  { %3218 = vmatpush.msra.mxu0 %v5710_v11  ;;  %3238 = vmatpush.msrb.mxu1 %v5716_v2 }
0x2325   :  { %3219 = vmatpush.msra.mxu0 %v5722_v49  ;;  %3239 = vmatpush.msrb.mxu1 %v5728_v48 }
0x2327   :  { %3220 = vmatpush.msra.mxu0 %v5766_v1  ;;  %3240 = vmatpush.msrb.mxu1 %v5772_v14 }
0x2329   :  { %3221 = vmatpush.msra.mxu0 %v5778_v8  ;;  %3241 = vmatpush.msrb.mxu1 %v5784_v19 }
0x232b   :  { %3222 = vmatpush.msra.mxu0 %v5790_v17  ;;  %3242 = vmatpush.msrb.mxu1 %v5796_v46 }
0x232d   :  { %3223 = vmatpush.msra.mxu0 %v5802_v55  ;;  %3243 = vmatpush.msrb.mxu1 %v5808_v31 }
0x239b   :  { %v2837_v57 = vpop.f32.mrf.mxu0  ;;  %v2857_v25 = vpop.f32.mrf.mxu1 }
0x239c   :  { %v2860_v23 = vadd.f32 %v2837_v57, %v1956_v7  ;;  %v2861_v44 = vadd.f32 %v2857_v25, %v2021_v39 }
0x239e   :  { %v3946_v10 = vmul.f32 -1.442695, %v2860_v23  ;;  %v3947_v47 = vmul.f32 -1.442695, %v2861_v44 }
0x23a0   :  { %4307 = vpow2.f32 %v3946_v10 }
0x23a6   :  { %v4308_v13 = vpop.eup %4307 }
0x23a7   :  { %v2865_v24 = vadd.f32 1.0, %v4308_v13 }
0x23a9   :  { %4309 = vrcp.f32 %v2865_v24  ;;  %v2877_v29 = vand.u32 2147483648, %v2865_v24  ;;  %v2875_v38 = vand.u32 2147483647, %v2865_v24  ;;  %vm2871_vm14 = vweird.f32 %v2865_v24 }
0x23aa   :  { %4311 = vtanh.f32 %v2861_v44 }
0x23ab   :  { %v2878_v21 = vor.u32 1.1754944e-38, %v2877_v29  ;;  %vm2876_vm1 = vcmp.eq.f32.partialorder %v2875_v38, 8.507059e+37  ;;  %4313 = vpow2.f32 %v3947_v47 }
0x23af   :  { %v4310_v36 = vpop.eup %4309 }
0x23b0   :  { %v2867_v27 = vmul.f32 %v4310_v36, %v2865_v24  ;;  %vm2872_vm13 = vweird.f32 %v4310_v36  ;;  %v4312_v54 = vpop.eup %4311 }
0x23b1   :  { %vm2873_vm15 = vmor %vm2871_vm14, %vm2872_vm13  ;;  %v4314_v50 = vpop.eup %4313 }
0x23b2   :  { %v2868_v58 = vsub.f32 1.0, %v2867_v27  ;;  %v2885_v5 = vadd.f32 1.0, %v4314_v50 }
0x23b4   :  { %v2869_v30 = vmul.f32 %v4310_v36, %v2868_v58  ;;  %4315 = vrcp.f32 %v2885_v5  ;;  %v2897_v57 = vand.u32 2147483648, %v2885_v5  ;;  %vm2891_vm3 = vweird.f32 %v2885_v5 }
0x23b5   :  { %v2895_v23 = vand.u32 2147483647, %v2885_v5 }
0x23b6   :  { %v2870_v37 = vadd.f32 %v4310_v36, %v2869_v30  ;;  %v2898_v13 = vor.u32 1.1754944e-38, %v2897_v57 }
0x23b7   :  { %vm2896_vm5 = vcmp.eq.f32.partialorder %v2895_v23, 8.507059e+37 }
0x23b8   :  { %v2874_v32 = vsel %vm2873_vm15, %v4310_v36, %v2870_v37  ;;  %v1959_v36 = vadd.f32 %v5869_v42, %v5551_v56  ;;  %v2024_v37 = vadd.f32 %v5873_v40, %v5558_v22 }
0x23b9   :  { %v2879_v33 = vsel %vm2876_vm1, %v2878_v21, %v2874_v32 }
0x23ba   :  { %v2902_v28 = vmul.f32 %v4312_v54, %v2879_v33  ;;  %v4316_v61 = vpop.eup %4315  ;;  %v2901_v0 = vmul.f32 %v2879_v33, %v5846_v63 }
0x23bb   :  { %v2887_v53 = vmul.f32 %v4316_v61, %v2885_v5  ;;  %vm2892_vm2 = vweird.f32 %v4316_v61 }
0x23bc   :  { %2904 = vrot.lane.b32.xlu0 %v2902_v28, %s4436_s21  ;;  %vm2893_vm4 = vmor %vm2891_vm3, %vm2892_vm2 }
0x23bd   :  { %v2888_v15 = vsub.f32 1.0, %v2887_v53 }
0x23bf   :  { %v2889_v16 = vmul.f32 %v4316_v61, %v2888_v15 }
0x23c1   :  { %v2890_v7 = vadd.f32 %v4316_v61, %v2889_v16 }
0x23c3   :  { %v2894_v10 = vsel %vm2893_vm4, %v4316_v61, %v2890_v7 }
0x23c4   :  { %v2899_v25 = vsel %vm2896_vm5, %v2898_v13, %v2894_v10 }
0x242e   :  { %v2905_v60 = vpop.permute.xlu0 %2904 }
0x242f   :  { %v5901_v3 = vadd.f32 %v2905_v60, %v2901_v0 }
0x2431   :  { %4317 = vtanh.f32 %v5901_v3 }
0x2437   :  { %v4318_v24 = vpop.eup %4317 }
0x2438   :  { %v2909_v39 = vmul.f32 %v4318_v24, %v2899_v25 }
0x243a   :  { %2911 = vrot.lane.b32.xlu1 %v2909_v39, %s4436_s21 }
0x24ac   :  { %v2912_v63 = vpop.permute.xlu1 %2911 }
0x24ad   :  { %2914 = vst.msk [vmem:[#allocation2 + $0x40] sm:$0xff] %vm77_vm0, %v2912_v63  ;;  %3948 = vmatmul.msk.f32.vlgmr.msrb.gmra.mxu2 %vm77_vm0, %v2912_v63  ;;  %3949 = vmatmul.msk.f32.vlgmr.msrb.gmra.mxu3 %vm77_vm0, %v2912_v63 }
0x24ae   :  { %3313 = vmatpush.msrb.mxu2 %v5686_v18  ;;  %3333 = vmatpush.msrb.mxu3 %v5692_v51 }
0x24b0   :  { %3314 = vmatpush.msrb.mxu2 %v5698_v62  ;;  %3334 = vmatpush.msrb.mxu3 %v5704_v4 }
0x24b2   :  { %3315 = vmatpush.msrb.mxu2 %v5710_v11  ;;  %3335 = vmatpush.msrb.mxu3 %v5716_v2 }
0x24b4   :  { %3316 = vmatpush.msrb.mxu2 %v5722_v49  ;;  %3336 = vmatpush.msrb.mxu3 %v5728_v48 }
0x24b6   :  { %3317 = vmatpush.msrb.mxu2 %v5766_v1  ;;  %3337 = vmatpush.msrb.mxu3 %v5772_v14 }
0x24b8   :  { %3318 = vmatpush.msrb.mxu2 %v5778_v8  ;;  %3338 = vmatpush.msrb.mxu3 %v5784_v19 }
0x24ba   :  { %3319 = vmatpush.msrb.mxu2 %v5790_v17  ;;  %3339 = vmatpush.msrb.mxu3 %v5796_v46 }
0x24bc   :  { %3320 = vmatpush.msrb.mxu2 %v5802_v55  ;;  %3340 = vmatpush.msrb.mxu3 %v5808_v31 }
0x2530   :  { %v2934_v44 = vpop.f32.mrf.mxu2  ;;  %v2954_v38 = vpop.f32.mrf.mxu3 }
0x2531   :  { %v2957_v27 = vadd.f32 %v2934_v44, %v1959_v36  ;;  %v2958_v32 = vadd.f32 %v2954_v38, %v2024_v37  ;;  %v1962_v38 = vadd.f32 %v5871_v45, %v5551_v56 }
0x2533   :  { %v3950_v58 = vmul.f32 -1.442695, %v2957_v27  ;;  %v3951_v40 = vmul.f32 -1.442695, %v2958_v32 }
0x2535   :  { %4319 = vpow2.f32 %v3950_v58 }
0x253b   :  { %v4320_v29 = vpop.eup %4319 }
0x253c   :  { %v2962_v30 = vadd.f32 1.0, %v4320_v29 }
0x253e   :  { %4321 = vrcp.f32 %v2962_v30  ;;  %v2974_v28 = vand.u32 2147483648, %v2962_v30  ;;  %v2972_v42 = vand.u32 2147483647, %v2962_v30  ;;  %vm2968_vm7 = vweird.f32 %v2962_v30 }
0x253f   :  { %4323 = vtanh.f32 %v2958_v32 }
0x2540   :  { %v2975_v5 = vor.u32 1.1754944e-38, %v2974_v28  ;;  %vm2973_vm9 = vcmp.eq.f32.partialorder %v2972_v42, 8.507059e+37  ;;  %4325 = vpow2.f32 %v3951_v40 }
0x2544   :  { %v4322_v21 = vpop.eup %4321 }
0x2545   :  { %v2964_v54 = vmul.f32 %v4322_v21, %v2962_v30  ;;  %vm2969_vm6 = vweird.f32 %v4322_v21  ;;  %v4324_v53 = vpop.eup %4323 }
0x2546   :  { %vm2970_vm8 = vmor %vm2968_vm7, %vm2969_vm6  ;;  %v4326_v0 = vpop.eup %4325 }
0x2547   :  { %v2965_v33 = vsub.f32 1.0, %v2964_v54  ;;  %v2982_v60 = vadd.f32 1.0, %v4326_v0 }
0x2549   :  { %v2966_v47 = vmul.f32 %v4322_v21, %v2965_v33  ;;  %4327 = vrcp.f32 %v2982_v60  ;;  %v2994_v63 = vand.u32 2147483648, %v2982_v60  ;;  %vm2988_vm11 = vweird.f32 %v2982_v60 }
0x254a   :  { %v2992_v36 = vand.u32 2147483647, %v2982_v60 }
0x254b   :  { %v2967_v50 = vadd.f32 %v4322_v21, %v2966_v47  ;;  %v2995_v27 = vor.u32 1.1754944e-38, %v2994_v63  ;;  %v2027_v47 = vadd.f32 %v5877_v9, %v5558_v22 }
0x254c   :  { %vm2993_vm13 = vcmp.eq.f32.partialorder %v2992_v36, 8.507059e+37 }
0x254d   :  { %v2971_v61 = vsel %vm2970_vm8, %v4322_v21, %v2967_v50 }
0x254e   :  { %v2976_v15 = vsel %vm2973_vm9, %v2975_v5, %v2971_v61 }
0x254f   :  { %v2999_v16 = vmul.f32 %v4324_v53, %v2976_v15  ;;  %v4328_v7 = vpop.eup %4327  ;;  %v2998_v13 = vmul.f32 %v2976_v15, %v5901_v3 }
0x2550   :  { %v2984_v57 = vmul.f32 %v4328_v7, %v2982_v60  ;;  %vm2989_vm10 = vweird.f32 %v4328_v7 }
0x2551   :  { %3001 = vrot.lane.b32.xlu2 %v2999_v16, %s4436_s21  ;;  %vm2990_vm12 = vmor %vm2988_vm11, %vm2989_vm10 }
0x2552   :  { %v2985_v23 = vsub.f32 1.0, %v2984_v57 }
0x2554   :  { %v2986_v10 = vmul.f32 %v4328_v7, %v2985_v23 }
0x2556   :  { %v2987_v39 = vadd.f32 %v4328_v7, %v2986_v10 }
0x2558   :  { %v2991_v44 = vsel %vm2990_vm12, %v4328_v7, %v2987_v39 }
0x2559   :  { %v2996_v29 = vsel %vm2993_vm13, %v2995_v27, %v2991_v44 }
0x25ab   :  { %v3002_v24 = vpop.permute.xlu2 %3001 }
0x25ac   :  { %v5930_v25 = vadd.f32 %v3002_v24, %v2998_v13 }
0x25ae   :  { %4329 = vtanh.f32 %v5930_v25 }
0x25b4   :  { %v4330_v58 = vpop.eup %4329 }
0x25b5   :  { %v3006_v30 = vmul.f32 %v4330_v58, %v2996_v29 }
0x25b7   :  { %3008 = vrot.lane.b32.xlu0 %v3006_v30, %s4436_s21 }
0x2629   :  { %v3009_v3 = vpop.permute.xlu0 %3008 }
0x262a   :  { %3011 = vst.msk [vmem:[#allocation2 + $0x48] sm:$0xff] %vm77_vm0, %v3009_v3  ;;  %3952 = vmatmul.msk.f32.vlgmr.msrb.gmra.mxu0 %vm77_vm0, %v3009_v3  ;;  %3953 = vmatmul.msk.f32.vlgmr.msra.gmra.mxu1 %vm77_vm0, %v3009_v3 }
0x262b   :  { %3410 = vmatpush.msrb.mxu0 %v5686_v18  ;;  %3430 = vmatpush.msra.mxu1 %v5692_v51 }
0x262d   :  { %3411 = vmatpush.msrb.mxu0 %v5698_v62  ;;  %3431 = vmatpush.msra.mxu1 %v5704_v4 }
0x262f   :  { %3412 = vmatpush.msrb.mxu0 %v5710_v11  ;;  %3432 = vmatpush.msra.mxu1 %v5716_v2 }
0x2631   :  { %3413 = vmatpush.msrb.mxu0 %v5722_v49  ;;  %3433 = vmatpush.msra.mxu1 %v5728_v48 }
0x2633   :  { %3414 = vmatpush.msrb.mxu0 %v5766_v1  ;;  %3434 = vmatpush.msra.mxu1 %v5772_v14 }
0x2635   :  { %3415 = vmatpush.msrb.mxu0 %v5778_v8  ;;  %3435 = vmatpush.msra.mxu1 %v5784_v19 }
0x2637   :  { %3416 = vmatpush.msrb.mxu0 %v5790_v17  ;;  %3436 = vmatpush.msra.mxu1 %v5796_v46 }
0x2639   :  { %3417 = vmatpush.msrb.mxu0 %v5802_v55  ;;  %3437 = vmatpush.msra.mxu1 %v5808_v31 }
0x26a7   :  { %v3031_v37 = vpop.f32.mrf.mxu0  ;;  %v3051_v28 = vpop.f32.mrf.mxu1 }
0x26a8   :  { %v3054_v21 = vadd.f32 %v3031_v37, %v1962_v38  ;;  %v3055_v50 = vadd.f32 %v3051_v28, %v2027_v47 }
0x26aa   :  { %v3954_v32 = vmul.f32 -1.442695, %v3054_v21  ;;  %v3955_v9 = vmul.f32 -1.442695, %v3055_v50 }
0x26ac   :  { %4331 = vpow2.f32 %v3954_v32 }
0x26b2   :  { %v4332_v54 = vpop.eup %4331 }
0x26b3   :  { %v3059_v33 = vadd.f32 1.0, %v4332_v54 }
0x26b5   :  { %4333 = vrcp.f32 %v3059_v33  ;;  %v3071_v53 = vand.u32 2147483648, %v3059_v33  ;;  %v3069_v45 = vand.u32 2147483647, %v3059_v33  ;;  %vm3065_vm15 = vweird.f32 %v3059_v33 }
0x26b6   :  { %4335 = vtanh.f32 %v3055_v50 }
0x26b7   :  { %v3072_v40 = vor.u32 1.1754944e-38, %v3071_v53  ;;  %vm3070_vm2 = vcmp.eq.f32.partialorder %v3069_v45, 8.507059e+37  ;;  %4337 = vpow2.f32 %v3955_v9 }
0x26bb   :  { %v4334_v42 = vpop.eup %4333 }
0x26bc   :  { %v3061_v5 = vmul.f32 %v4334_v42, %v3059_v33  ;;  %vm3066_vm14 = vweird.f32 %v4334_v42  ;;  %v4336_v60 = vpop.eup %4335 }
0x26bd   :  { %vm3067_vm1 = vmor %vm3065_vm15, %vm3066_vm14  ;;  %v4338_v23 = vpop.eup %4337 }
0x26be   :  { %v3062_v61 = vsub.f32 1.0, %v3061_v5  ;;  %v3079_v10 = vadd.f32 1.0, %v4338_v23 }
0x26c0   :  { %v3063_v15 = vmul.f32 %v4334_v42, %v3062_v61  ;;  %4339 = vrcp.f32 %v3079_v10  ;;  %v3091_v29 = vand.u32 2147483648, %v3079_v10  ;;  %vm3085_vm4 = vweird.f32 %v3079_v10 }
0x26c1   :  { %v3089_v30 = vand.u32 2147483647, %v3079_v10 }
0x26c2   :  { %v3064_v16 = vadd.f32 %v4334_v42, %v3063_v15  ;;  %v3092_v38 = vor.u32 1.1754944e-38, %v3091_v29 }
0x26c3   :  { %vm3090_vm6 = vcmp.eq.f32.partialorder %v3089_v30, 8.507059e+37  ;;  %v2033_v30 = vadd.f32 %v5885_v59, %v5558_v22 }
0x26c4   :  { %v3068_v0 = vsel %vm3067_vm1, %v4334_v42, %v3064_v16 }
0x26c5   :  { %v3073_v7 = vsel %vm3070_vm2, %v3072_v40, %v3068_v0 }
0x26c6   :  { %v3096_v57 = vmul.f32 %v4336_v60, %v3073_v7  ;;  %v4340_v13 = vpop.eup %4339  ;;  %v3095_v36 = vmul.f32 %v3073_v7, %v5930_v25 }
0x26c7   :  { %v3081_v24 = vmul.f32 %v4340_v13, %v3079_v10  ;;  %vm3086_vm3 = vweird.f32 %v4340_v13 }
0x26c8   :  { %3098 = vrot.lane.b32.xlu1 %v3096_v57, %s4436_s21  ;;  %vm3087_vm5 = vmor %vm3085_vm4, %vm3086_vm3 }
0x26c9   :  { %v3082_v39 = vsub.f32 1.0, %v3081_v24 }
0x26cb   :  { %v3083_v63 = vmul.f32 %v4340_v13, %v3082_v39  ;;  %v1968_v39 = vadd.f32 %v5879_v34, %v5551_v56 }
0x26cd   :  { %v3084_v58 = vadd.f32 %v4340_v13, %v3083_v63 }
0x26cf   :  { %v3088_v3 = vsel %vm3087_vm5, %v4340_v13, %v3084_v58 }
0x26d0   :  { %v3093_v21 = vsel %vm3090_vm6, %v3092_v38, %v3088_v3 }
0x273a   :  { %v3099_v44 = vpop.permute.xlu1 %3098 }
0x273b   :  { %v5959_v27 = vadd.f32 %v3099_v44, %v3095_v36 }
0x273d   :  { %4341 = vtanh.f32 %v5959_v27 }
0x2743   :  { %v4342_v37 = vpop.eup %4341 }
0x2744   :  { %v3103_v32 = vmul.f32 %v4342_v37, %v3093_v21 }
0x2746   :  { %3105 = vrot.lane.b32.xlu2 %v3103_v32, %s4436_s21 }
0x27a0   :  { %v3106_v25 = vpop.permute.xlu2 %3105 }
0x27a1   :  { %3108 = vst.msk [vmem:[#allocation2 + $0x50] sm:$0xff] %vm77_vm0, %v3106_v25  ;;  %3956 = vmatmul.msk.f32.vlgmr.msra.gmra.mxu2 %vm77_vm0, %v3106_v25  ;;  %3957 = vmatmul.msk.f32.vlgmr.msra.gmra.mxu3 %vm77_vm0, %v3106_v25 }
0x27a2   :  { %3507 = vmatpush.msra.mxu2 %v5686_v18  ;;  %3527 = vmatpush.msra.mxu3 %v5692_v51  ;;  %v1965_v18 = vadd.f32 %v5875_v20, %v5551_v56 }
0x27a4   :  { %3508 = vmatpush.msra.mxu2 %v5698_v62  ;;  %3528 = vmatpush.msra.mxu3 %v5704_v4 }
0x27a6   :  { %3509 = vmatpush.msra.mxu2 %v5710_v11  ;;  %3529 = vmatpush.msra.mxu3 %v5716_v2 }
0x27a8   :  { %3510 = vmatpush.msra.mxu2 %v5722_v49  ;;  %3530 = vmatpush.msra.mxu3 %v5728_v48  ;;  %v2030_v48 = vadd.f32 %v5881_v43, %v5558_v22 }
0x27aa   :  { %3511 = vmatpush.msra.mxu2 %v5766_v1  ;;  %3531 = vmatpush.msra.mxu3 %v5772_v14 }
0x27ac   :  { %3512 = vmatpush.msra.mxu2 %v5778_v8  ;;  %3532 = vmatpush.msra.mxu3 %v5784_v19 }
0x27ae   :  { %3513 = vmatpush.msra.mxu2 %v5790_v17  ;;  %3533 = vmatpush.msra.mxu3 %v5796_v46 }
0x27b0   :  { %3514 = vmatpush.msra.mxu2 %v5802_v55  ;;  %3534 = vmatpush.msra.mxu3 %v5808_v31 }
0x2824   :  { %v3128_v51 = vpop.f32.mrf.mxu2  ;;  %v3148_v49 = vpop.f32.mrf.mxu3 }
0x2825   :  { %v3151_v62 = vadd.f32 %v3128_v51, %v1965_v18  ;;  %v3152_v14 = vadd.f32 %v3148_v49, %v2030_v48 }
0x2827   :  { %v3958_v4 = vmul.f32 -1.442695, %v3151_v62  ;;  %v3959_v43 = vmul.f32 -1.442695, %v3152_v14 }
0x2829   :  { %4343 = vpow2.f32 %v3958_v4 }
0x282f   :  { %v4344_v11 = vpop.eup %4343 }
0x2830   :  { %v3156_v2 = vadd.f32 1.0, %v4344_v11 }
0x2832   :  { %4345 = vrcp.f32 %v3156_v2  ;;  %v3168_v17 = vand.u32 2147483648, %v3156_v2  ;;  %v3166_v55 = vand.u32 2147483647, %v3156_v2  ;;  %vm3162_vm8 = vweird.f32 %v3156_v2 }
0x2833   :  { %4347 = vtanh.f32 %v3152_v14 }
0x2834   :  { %v3169_v20 = vor.u32 1.1754944e-38, %v3168_v17  ;;  %vm3167_vm10 = vcmp.eq.f32.partialorder %v3166_v55, 8.507059e+37  ;;  %4349 = vpow2.f32 %v3959_v43 }
0x2838   :  { %v4346_v1 = vpop.eup %4345 }
0x2839   :  { %v3158_v8 = vmul.f32 %v4346_v1, %v3156_v2  ;;  %vm3163_vm7 = vweird.f32 %v4346_v1  ;;  %v4348_v33 = vpop.eup %4347 }
0x283a   :  { %vm3164_vm9 = vmor %vm3162_vm8, %vm3163_vm7  ;;  %v4350_v42 = vpop.eup %4349 }
0x283b   :  { %v3159_v19 = vsub.f32 1.0, %v3158_v8  ;;  %v3176_v50 = vadd.f32 1.0, %v4350_v42 }
0x283d   :  { %v3160_v46 = vmul.f32 %v4346_v1, %v3159_v19  ;;  %4351 = vrcp.f32 %v3176_v50  ;;  %v3188_v60 = vand.u32 2147483648, %v3176_v50  ;;  %vm3182_vm12 = vweird.f32 %v3176_v50 }
0x283e   :  { %v3186_v7 = vand.u32 2147483647, %v3176_v50 }
0x283f   :  { %v3161_v31 = vadd.f32 %v4346_v1, %v3160_v46  ;;  %v3189_v9 = vor.u32 1.1754944e-38, %v3188_v60 }
0x2840   :  { %vm3187_vm14 = vcmp.eq.f32.partialorder %v3186_v7, 8.507059e+37 }
0x2841   :  { %v3165_v54 = vsel %vm3164_vm9, %v4346_v1, %v3161_v31 }
0x2842   :  { %v3170_v28 = vsel %vm3167_vm10, %v3169_v20, %v3165_v54 }
0x2843   :  { %v3193_v47 = vmul.f32 %v4348_v33, %v3170_v28  ;;  %v4352_v5 = vpop.eup %4351  ;;  %v3192_v45 = vmul.f32 %v3170_v28, %v5959_v27 }
0x2844   :  { %v3178_v61 = vmul.f32 %v4352_v5, %v3176_v50  ;;  %vm3183_vm11 = vweird.f32 %v4352_v5 }
0x2845   :  { %3195 = vrot.lane.b32.xlu0 %v3193_v47, %s4436_s21  ;;  %vm3184_vm13 = vmor %vm3182_vm12, %vm3183_vm11 }
0x2846   :  { %v3179_v53 = vsub.f32 1.0, %v3178_v61 }
0x2848   :  { %v3180_v15 = vmul.f32 %v4352_v5, %v3179_v53 }
0x284a   :  { %v3181_v0 = vadd.f32 %v4352_v5, %v3180_v15 }
0x284c   :  { %v3185_v57 = vsel %vm3184_vm13, %v4352_v5, %v3181_v0  ;;  %v1971_v5 = vadd.f32 %v5883_v26, %v5551_v56  ;;  %v2036_v0 = vadd.f32 %v5891_v41, %v5558_v22 }
0x284d   :  { %v3190_v10 = vsel %vm3187_vm14, %v3189_v9, %v3185_v57 }
0x28b7   :  { %v3196_v16 = vpop.permute.xlu0 %3195 }
0x28b8   :  { %v3198_v40 = vadd.f32 %v3196_v16, %v3192_v45 }
0x28ba   :  { %4353 = vtanh.f32 %v3198_v40 }
0x28c0   :  { %v4354_v23 = vpop.eup %4353 }
0x28c1   :  { %v3200_v13 = vmul.f32 %v4354_v23, %v3190_v10 }
0x28c3   :  { %3202 = vrot.lane.b32.xlu1 %v3200_v13, %s4436_s21 }
0x2935   :  { %v3203_v24 = vpop.permute.xlu1 %3202 }
0x2936   :  { %3205 = vst.msk [vmem:[#allocation2 + $0x58] sm:$0xff] %vm77_vm0, %v3203_v24  ;;  %3960 = vmatmul.msk.f32.vlgmr.msra.gmra.mxu0 %vm77_vm0, %v3203_v24  ;;  %3961 = vmatmul.msk.f32.vlgmr.msrb.gmra.mxu1 %vm77_vm0, %v3203_v24 }
0x29b3   :  { %v3225_v63 = vpop.f32.mrf.mxu0  ;;  %v3245_v29 = vpop.f32.mrf.mxu1 }
0x29b4   :  { %v3248_v36 = vadd.f32 %v3225_v63, %v1968_v39  ;;  %v3249_v38 = vadd.f32 %v3245_v29, %v2033_v30  ;;  %v3617_v29 = vld [vmem:[%s6147_s4 + $0x38] sm:$0xff]  ;;  %v3616_v30 = vld [vmem:[%s6147_s4 + $0x30] sm:$0xff] }
0x29b5   :  { %3678 = vmatpush.msra.mxu0 %v3617_v29 }
0x29b6   :  { %v3962_v44 = vmul.f32 -1.442695, %v3248_v36  ;;  %v3963_v59 = vmul.f32 -1.442695, %v3249_v38 }
0x29b7   :  { %3679 = vmatpush.msra.mxu0 %v3616_v30 }
0x29b8   :  { %4355 = vpow2.f32 %v3962_v44 }
0x29be   :  { %v4356_v27 = vpop.eup %4355 }
0x29bf   :  { %v3253_v58 = vadd.f32 1.0, %v4356_v27 }
0x29c1   :  { %4357 = vrcp.f32 %v3253_v58  ;;  %v3265_v32 = vand.u32 2147483648, %v3253_v58  ;;  %v3263_v34 = vand.u32 2147483647, %v3253_v58  ;;  %vm3259_vm1 = vweird.f32 %v3253_v58 }
0x29c2   :  { %4359 = vtanh.f32 %v3249_v38  ;;  %v3614_v38 = vld [vmem:[%s6147_s4 + $0x20] sm:$0xff] }
0x29c3   :  { %v3266_v51 = vor.u32 1.1754944e-38, %v3265_v32  ;;  %vm3264_vm3 = vcmp.eq.f32.partialorder %v3263_v34, 8.507059e+37  ;;  %4361 = vpow2.f32 %v3963_v59 }
0x29c7   :  { %v4358_v3 = vpop.eup %4357 }
0x29c8   :  { %v3255_v37 = vmul.f32 %v4358_v3, %v3253_v58  ;;  %vm3260_vm15 = vweird.f32 %v4358_v3  ;;  %v4360_v4 = vpop.eup %4359 }
0x29c9   :  { %vm3261_vm2 = vmor %vm3259_vm1, %vm3260_vm15  ;;  %v4362_v49 = vpop.eup %4361 }
0x29ca   :  { %v3256_v21 = vsub.f32 1.0, %v3255_v37  ;;  %v3273_v48 = vadd.f32 1.0, %v4362_v49 }
0x29cc   :  { %v3257_v25 = vmul.f32 %v4358_v3, %v3256_v21  ;;  %4363 = vrcp.f32 %v3273_v48  ;;  %v3285_v20 = vand.u32 2147483648, %v3273_v48  ;;  %vm3279_vm5 = vweird.f32 %v3273_v48 }
0x29cd   :  { %v3283_v54 = vand.u32 2147483647, %v3273_v48 }
0x29ce   :  { %v3258_v18 = vadd.f32 %v4358_v3, %v3257_v25  ;;  %v3286_v28 = vor.u32 1.1754944e-38, %v3285_v20  ;;  %v3596_v20 = vld [vmem:[#allocation2 + $0x10] sm:$0xff] }
0x29cf   :  { %vm3284_vm7 = vcmp.eq.f32.partialorder %v3283_v54, 8.507059e+37  ;;  %v3597_v54 = vld [vmem:[#allocation2 + $0x18] sm:$0xff] }
0x29d0   :  { %v3262_v62 = vsel %vm3261_vm2, %v4358_v3, %v3258_v18  ;;  %v3615_v3 = vld [vmem:[%s6147_s4 + $0x28] sm:$0xff] }
0x29d1   :  { %v3267_v11 = vsel %vm3264_vm3, %v3266_v51, %v3262_v62  ;;  %3680 = vmatpush.msra.mxu0 %v3615_v3 }
0x29d2   :  { %v3290_v2 = vmul.f32 %v4360_v4, %v3267_v11  ;;  %v4364_v1 = vpop.eup %4363  ;;  %v3289_v17 = vmul.f32 %v3267_v11, %v3198_v40 }
0x29d3   :  { %v3275_v14 = vmul.f32 %v4364_v1, %v3273_v48  ;;  %vm3280_vm4 = vweird.f32 %v4364_v1  ;;  %3681 = vmatpush.msra.mxu0 %v3614_v38 }
0x29d4   :  { %3292 = vrot.lane.b32.xlu2 %v3290_v2, %s4436_s21  ;;  %vm3281_vm6 = vmor %vm3279_vm5, %vm3280_vm4 }
0x29d5   :  { %v3276_v8 = vsub.f32 1.0, %v3275_v14  ;;  %v3613_v14 = vld [vmem:[%s6147_s4 + $0x18] sm:$0xff] }
0x29d6   :  { %3682 = vmatpush.msra.mxu0 %v3613_v14 }
0x29d7   :  { %v3277_v19 = vmul.f32 %v4364_v1, %v3276_v8  ;;  %v3612_v8 = vld [vmem:[%s6147_s4 + $0x10] sm:$0xff] }
0x29d8   :  { %3683 = vmatpush.msra.mxu0 %v3612_v8 }
0x29d9   :  { %v3278_v31 = vadd.f32 %v4364_v1, %v3277_v19  ;;  %v3611_v19 = vld [vmem:[%s6147_s4 + $0x8] sm:$0xff] }
0x29da   :  { %3684 = vmatpush.msra.mxu0 %v3611_v19 }
0x29db   :  { %v3282_v33 = vsel %vm3281_vm6, %v4364_v1, %v3278_v31  ;;  %v3595_v31 = vld [vmem:[#allocation2 + $0x8] sm:$0xff] }
0x29dc   :  { %v3287_v43 = vsel %vm3284_vm7, %v3286_v28, %v3282_v33  ;;  %v3598_v33 = vld [vmem:[#allocation2 + $0x20] sm:$0xff]  ;;  %v3599_v28 = vld [vmem:[#allocation2 + $0x28] sm:$0xff] }
0x2a2e   :  { %v3293_v46 = vpop.permute.xlu2 %3292 }
0x2a2f   :  { %v5997_v55 = vadd.f32 %v3293_v46, %v3289_v17  ;;  %v3610_v17 = vld [vmem:[%s6147_s4] sm:$0xff] }
0x2a30   :  { %3685 = vmatpush.msra.mxu0 %v3610_v17 }
0x2a31   :  { %4365 = vtanh.f32 %v5997_v55 }
0x2a37   :  { %v4366_v47 = vpop.eup %4365 }
0x2a38   :  { %v3297_v42 = vmul.f32 %v4366_v47, %v3287_v43  ;;  %v3600_v47 = vld [vmem:[#allocation2 + $0x30] sm:$0xff]  ;;  %v3601_v43 = vld [vmem:[#allocation2 + $0x38] sm:$0xff] }
0x2a3a   :  { %3299 = vrot.lane.b32.xlu0 %v3297_v42, %s4436_s21  ;;  %v3602_v42 = vld [vmem:[#allocation2 + $0x40] sm:$0xff] }
0x2aac   :  { %v3300_v50 = vpop.permute.xlu0 %3299 }
0x2aad   :  { %3302 = vst.msk [vmem:[#allocation2 + $0x60] sm:$0xff] %vm77_vm0, %v3300_v50  ;;  %3964 = vmatmul.msk.f32.vlgmr.msrb.gmra.mxu2 %vm77_vm0, %v3300_v50  ;;  %3965 = vmatmul.msk.f32.vlgmr.msrb.gmra.mxu3 %vm77_vm0, %v3300_v50  ;;  %v3603_v50 = vld [vmem:[#allocation2 + $0x48] sm:$0xff] }
0x2b30   :  { %v3322_v61 = vpop.f32.mrf.mxu2  ;;  %v3342_v40 = vpop.f32.mrf.mxu3 }
0x2b31   :  { %v3345_v53 = vadd.f32 %v3322_v61, %v1971_v5  ;;  %v3346_v7 = vadd.f32 %v3342_v40, %v2036_v0  ;;  %v3604_v5 = vld [vmem:[#allocation2 + $0x50] sm:$0xff]  ;;  %v3605_v61 = vld [vmem:[#allocation2 + $0x58] sm:$0xff] }
0x2b33   :  { %v3966_v15 = vmul.f32 -1.442695, %v3345_v53  ;;  %v3967_v41 = vmul.f32 -1.442695, %v3346_v7  ;;  %v3606_v53 = vld [vmem:[#allocation2 + $0x60] sm:$0xff] }
0x2b35   :  { %4367 = vpow2.f32 %v3966_v15 }
0x2b3b   :  { %v4368_v45 = vpop.eup %4367 }
0x2b3c   :  { %v3350_v16 = vadd.f32 1.0, %v4368_v45  ;;  %v1974_v45 = vadd.f32 %v5887_v35, %v5551_v56 }
0x2b3e   :  { %4369 = vrcp.f32 %v3350_v16  ;;  %v3362_v23 = vand.u32 2147483648, %v3350_v16  ;;  %v3360_v26 = vand.u32 2147483647, %v3350_v16  ;;  %vm3356_vm9 = vweird.f32 %v3350_v16 }
0x2b3f   :  { %4371 = vtanh.f32 %v3346_v7 }
0x2b40   :  { %v3363_v24 = vor.u32 1.1754944e-38, %v3362_v23  ;;  %vm3361_vm11 = vcmp.eq.f32.partialorder %v3360_v26, 8.507059e+37  ;;  %4373 = vpow2.f32 %v3967_v41 }
0x2b44   :  { %v4370_v60 = vpop.eup %4369 }
0x2b45   :  { %v3352_v57 = vmul.f32 %v4370_v60, %v3350_v16  ;;  %vm3357_vm8 = vweird.f32 %v4370_v60  ;;  %v4372_v63 = vpop.eup %4371 }
0x2b46   :  { %vm3358_vm10 = vmor %vm3356_vm9, %vm3357_vm8  ;;  %v4374_v27 = vpop.eup %4373 }
0x2b47   :  { %v3353_v9 = vsub.f32 1.0, %v3352_v57  ;;  %v3370_v58 = vadd.f32 1.0, %v4374_v27 }
0x2b49   :  { %v3354_v10 = vmul.f32 %v4370_v60, %v3353_v9  ;;  %4375 = vrcp.f32 %v3370_v58  ;;  %v3382_v4 = vand.u32 2147483648, %v3370_v58  ;;  %vm3376_vm13 = vweird.f32 %v3370_v58 }
0x2b4a   :  { %v3380_v11 = vand.u32 2147483647, %v3370_v58 }
0x2b4b   :  { %v3355_v13 = vadd.f32 %v4370_v60, %v3354_v10  ;;  %v3383_v59 = vor.u32 1.1754944e-38, %v3382_v4 }
0x2b4c   :  { %vm3381_vm15 = vcmp.eq.f32.partialorder %v3380_v11, 8.507059e+37 }
0x2b4d   :  { %v3359_v39 = vsel %vm3358_vm10, %v4370_v60, %v3355_v13  ;;  %v6060_v60 = vld [vmem:[%s6148_s5] ss:$0 sm:$0xff]  ;;  %v2039_v13 = vadd.f32 %v5894_v6, %v5558_v22 }
0x2b4e   :  { %v3364_v36 = vsel %vm3361_vm11, %v3363_v24, %v3359_v39 }
0x2b4f   :  { %v3387_v44 = vmul.f32 %v4372_v63, %v3364_v36  ;;  %v4376_v37 = vpop.eup %4375  ;;  %v3386_v34 = vmul.f32 %v3364_v36, %v5997_v55  ;;  %v3594_v55 = vld [vmem:[#allocation2] sm:$0xff] }
0x2b50   :  { %v3372_v21 = vmul.f32 %v4376_v37, %v3370_v58  ;;  %vm3377_vm12 = vweird.f32 %v4376_v37 }
0x2b51   :  { %3389 = vrot.lane.b32.xlu1 %v3387_v44, %s4436_s21  ;;  %vm3378_vm14 = vmor %vm3376_vm13, %vm3377_vm12 }
0x2b52   :  { %v3373_v32 = vsub.f32 1.0, %v3372_v21 }
0x2b54   :  { %v3374_v25 = vmul.f32 %v4376_v37, %v3373_v32 }
0x2b56   :  { %v3375_v62 = vadd.f32 %v4376_v37, %v3374_v25 }
0x2b58   :  { %v3379_v2 = vsel %vm3378_vm14, %v4376_v37, %v3375_v62 }
0x2b59   :  { %v3384_v48 = vsel %vm3381_vm15, %v3383_v59, %v3379_v2 }
0x2bc3   :  { %v3390_v18 = vpop.permute.xlu1 %3389 }
0x2bc4   :  { %v6022_v51 = vadd.f32 %v3390_v18, %v3386_v34 }
0x2bc6   :  { %4377 = vtanh.f32 %v6022_v51 }
0x2bcc   :  { %v4378_v49 = vpop.eup %4377 }
0x2bcd   :  { %v3394_v1 = vmul.f32 %v4378_v49, %v3384_v48 }
0x2bcf   :  { %3396 = vrot.lane.b32.xlu2 %v3394_v1, %s4436_s21 }
0x2c29   :  { %v3397_v46 = vpop.permute.xlu2 %3396 }
0x2c2a   :  { %3399 = vst.msk [vmem:[#allocation2 + $0x68] sm:$0xff] %vm77_vm0, %v3397_v46  ;;  %3968 = vmatmul.msk.f32.vlgmr.msrb.gmra.mxu0 %vm77_vm0, %v3397_v46  ;;  %3969 = vmatmul.msk.f32.vlgmr.msra.gmra.mxu1 %vm77_vm0, %v3397_v46 }
0x2c31   :  { %v3607_v15 = vld [vmem:[#allocation2 + $0x68] sm:$0xff] }
0x2c32   :  { %3976 = vmatmul.msk.f32.vlgmr.msra.gmra.mxu0 %vm77_vm0, %v3594_v55 }
0x2c3a   :  { %3977 = vmatmul.msk.f32.gmra.mxu0 %vm77_vm0, %v3595_v31 }
0x2c42   :  { %3978 = vmatmul.msk.f32.gmra.mxu0 %vm77_vm0, %v3596_v20 }
0x2c4a   :  { %3979 = vmatmul.msk.f32.gmra.mxu0 %vm77_vm0, %v3597_v54 }
0x2c52   :  { %3980 = vmatmul.msk.f32.gmra.mxu0 %vm77_vm0, %v3598_v33 }
0x2c5a   :  { %3981 = vmatmul.msk.f32.gmra.mxu0 %vm77_vm0, %v3599_v28 }
0x2c62   :  { %3982 = vmatmul.msk.f32.gmra.mxu0 %vm77_vm0, %v3600_v47 }
0x2c6a   :  { %3983 = vmatmul.msk.f32.gmra.mxu0 %vm77_vm0, %v3601_v43 }
0x2c72   :  { %3984 = vmatmul.msk.f32.gmra.mxu0 %vm77_vm0, %v3602_v42 }
0x2c7a   :  { %3985 = vmatmul.msk.f32.gmra.mxu0 %vm77_vm0, %v3603_v50 }
0x2c82   :  { %3986 = vmatmul.msk.f32.gmra.mxu0 %vm77_vm0, %v3604_v5 }
0x2c8a   :  { %3987 = vmatmul.msk.f32.gmra.mxu0 %vm77_vm0, %v3605_v61 }
0x2c92   :  { %3988 = vmatmul.msk.f32.gmra.mxu0 %vm77_vm0, %v3606_v53 }
0x2c9a   :  { %3989 = vmatmul.msk.f32.gmra.mxu0 %vm77_vm0, %v3607_v15 }
0x2ca7   :  { %v3419_v16 = vpop.f32.mrf.mxu0  ;;  %v3439_v10 = vpop.f32.mrf.mxu1 }
0x2ca8   :  { %v3442_v40 = vadd.f32 %v3419_v16, %v1974_v45  ;;  %v3443_v39 = vadd.f32 %v3439_v10, %v2039_v13 }
0x2caa   :  { %v3970_v0 = vmul.f32 -1.442695, %v3442_v40  ;;  %v3971_v54 = vmul.f32 -1.442695, %v3443_v39 }
0x2cac   :  { %4379 = vpow2.f32 %v3970_v0 }
0x2caf   :  { %v3687_v7 = vpop.f32.mrf.mxu0 }
0x2cb0   :  { %v3688_v57 = vadd.f32 %v6060_v60, %v3687_v7 }
0x2cb2   :  { %v4380_v9 = vpop.eup %4379  ;;  %3735 = vst [vmem:[%s6149_s6] sm:$0xff] %v3688_v57 }
0x2cb3   :  { %v3447_v23 = vadd.f32 1.0, %v4380_v9 }
0x2cb5   :  { %4381 = vrcp.f32 %v3447_v23  ;;  %v3459_v41 = vand.u32 2147483648, %v3447_v23  ;;  %v3457_v29 = vand.u32 2147483647, %v3447_v23  ;;  %vm3453_vm2 = vweird.f32 %v3447_v23 }
0x2cb6   :  { %4383 = vtanh.f32 %v3443_v39 }
0x2cb7   :  { %v3690_v35 = vpop.f32.mrf.mxu0  ;;  %v3460_v30 = vor.u32 1.1754944e-38, %v3459_v41  ;;  %vm3458_vm4 = vcmp.eq.f32.partialorder %v3457_v29, 8.507059e+37  ;;  %4385 = vpow2.f32 %v3971_v54 }
0x2cb8   :  { %v3691_v26 = vadd.f32 %v6060_v60, %v3690_v35 }
0x2cba   :  { %3736 = vst [vmem:[%s6149_s6 + $0x8] sm:$0xff] %v3691_v26  ;;  %v1977_v26 = vadd.f32 %v5889_v52, %v5551_v56 }
0x2cbb   :  { %v4382_v24 = vpop.eup %4381 }
0x2cbc   :  { %v3449_v63 = vmul.f32 %v4382_v24, %v3447_v23  ;;  %vm3454_vm1 = vweird.f32 %v4382_v24  ;;  %v4384_v38 = vpop.eup %4383 }
0x2cbd   :  { %vm3455_vm3 = vmor %vm3453_vm2, %vm3454_vm1  ;;  %v4386_v47 = vpop.eup %4385 }
0x2cbe   :  { %v3450_v36 = vsub.f32 1.0, %v3449_v63  ;;  %v3467_v43 = vadd.f32 1.0, %v4386_v47 }
0x2cbf   :  { %v3693_v44 = vpop.f32.mrf.mxu0 }
0x2cc0   :  { %v3694_v27 = vadd.f32 %v6060_v60, %v3693_v44  ;;  %v3451_v58 = vmul.f32 %v4382_v24, %v3450_v36  ;;  %4387 = vrcp.f32 %v3467_v43  ;;  %v3479_v40 = vand.u32 2147483648, %v3467_v43 }
0x2cc1   :  { %vm3473_vm6 = vweird.f32 %v3467_v43  ;;  %v3477_v0 = vand.u32 2147483647, %v3467_v43 }
0x2cc2   :  { %3737 = vst [vmem:[%s6149_s6 + $0x10] sm:$0xff] %v3694_v27  ;;  %v3452_v6 = vadd.f32 %v4382_v24, %v3451_v58  ;;  %v3480_v57 = vor.u32 1.1754944e-38, %v3479_v40  ;;  %v2042_v58 = vadd.f32 %v5896_v12, %v5558_v22 }
0x2cc3   :  { %vm3478_vm8 = vcmp.eq.f32.partialorder %v3477_v0, 8.507059e+37 }
0x2cc4   :  { %v3456_v3 = vsel %vm3455_vm3, %v4382_v24, %v3452_v6 }
0x2cc5   :  { %v3461_v37 = vsel %vm3458_vm4, %v3460_v30, %v3456_v3 }
0x2cc6   :  { %v3484_v21 = vmul.f32 %v4384_v38, %v3461_v37  ;;  %v4388_v42 = vpop.eup %4387  ;;  %v3483_v53 = vmul.f32 %v3461_v37, %v6022_v51 }
0x2cc7   :  { %v3696_v32 = vpop.f32.mrf.mxu0  ;;  %v3469_v50 = vmul.f32 %v4388_v42, %v3467_v43  ;;  %vm3474_vm5 = vweird.f32 %v4388_v42 }
0x2cc8   :  { %v3697_v25 = vadd.f32 %v6060_v60, %v3696_v32  ;;  %3486 = vrot.lane.b32.xlu0 %v3484_v21, %s4436_s21  ;;  %vm3475_vm7 = vmor %vm3473_vm6, %vm3474_vm5 }
0x2cc9   :  { %v3470_v5 = vsub.f32 1.0, %v3469_v50 }
0x2cca   :  { %3738 = vst [vmem:[%s6149_s6 + $0x18] sm:$0xff] %v3697_v25 }
0x2ccb   :  { %v3471_v61 = vmul.f32 %v4388_v42, %v3470_v5 }
0x2ccd   :  { %v3472_v16 = vadd.f32 %v4388_v42, %v3471_v61 }
0x2ccf   :  { %v3699_v34 = vpop.f32.mrf.mxu0  ;;  %v3476_v7 = vsel %vm3475_vm7, %v4388_v42, %v3472_v16 }
0x2cd0   :  { %v3700_v18 = vadd.f32 %v6060_v60, %v3699_v34  ;;  %v3481_v23 = vsel %vm3478_vm8, %v3480_v57, %v3476_v7 }
0x2cd2   :  { %3739 = vst [vmem:[%s6149_s6 + $0x20] sm:$0xff] %v3700_v18 }
0x2cd7   :  { %v3702_v62 = vpop.f32.mrf.mxu0 }
0x2cd8   :  { %v3703_v4 = vadd.f32 %v6060_v60, %v3702_v62 }
0x2cda   :  { %3740 = vst [vmem:[%s6149_s6 + $0x28] sm:$0xff] %v3703_v4 }
0x2cdf   :  { %v3705_v11 = vpop.f32.mrf.mxu0 }
0x2ce0   :  { %v3706_v2 = vadd.f32 %v6060_v60, %v3705_v11 }
0x2ce2   :  { %3741 = vst [vmem:[%s6149_s6 + $0x30] sm:$0xff] %v3706_v2 }
0x2ce7   :  { %v3708_v59 = vpop.f32.mrf.mxu0 }
0x2ce8   :  { %v3709_v49 = vadd.f32 %v6060_v60, %v3708_v59 }
0x2cea   :  { %3742 = vst [vmem:[%s6149_s6 + $0x38] sm:$0xff] %v3709_v49 }
0x2cef   :  { %v3711_v48 = vpop.f32.mrf.mxu0 }
0x2cf0   :  { %v3712_v1 = vadd.f32 %v6060_v60, %v3711_v48 }
0x2cf2   :  { %3743 = vst [vmem:[%s6149_s6 + $0x40] sm:$0xff] %v3712_v1 }
0x2cf7   :  { %v3714_v14 = vpop.f32.mrf.mxu0 }
0x2cf8   :  { %v3715_v8 = vadd.f32 %v6060_v60, %v3714_v14 }
0x2cfa   :  { %3744 = vst [vmem:[%s6149_s6 + $0x48] sm:$0xff] %v3715_v8 }
0x2cff   :  { %v3717_v19 = vpop.f32.mrf.mxu0 }
0x2d00   :  { %v3718_v17 = vadd.f32 %v6060_v60, %v3717_v19 }
0x2d02   :  { %3745 = vst [vmem:[%s6149_s6 + $0x50] sm:$0xff] %v3718_v17 }
0x2d07   :  { %v3720_v46 = vpop.f32.mrf.mxu0 }
0x2d08   :  { %v3721_v55 = vadd.f32 %v6060_v60, %v3720_v46 }
0x2d0a   :  { %3746 = vst [vmem:[%s6149_s6 + $0x58] sm:$0xff] %v3721_v55 }
0x2d0f   :  { %v3723_v31 = vpop.f32.mrf.mxu0 }
0x2d10   :  { %v3724_v20 = vadd.f32 %v6060_v60, %v3723_v31 }
0x2d12   :  { %3747 = vst [vmem:[%s6149_s6 + $0x60] sm:$0xff] %v3724_v20 }
0x2d17   :  { %v3726_v33 = vpop.f32.mrf.mxu0 }
0x2d18   :  { %v3727_v28 = vadd.f32 %v6060_v60, %v3726_v33 }
0x2d1a   :  { %3748 = vst [vmem:[%s6149_s6 + $0x68] sm:$0xff] %v3727_v28 }
0x2d3a   :  { %v3487_v15 = vpop.permute.xlu0 %3486 }
0x2d3b   :  { %v3489_v45 = vadd.f32 %v3487_v15, %v3483_v53 }
0x2d3d   :  { %4389 = vtanh.f32 %v3489_v45 }
0x2d43   :  { %v4390_v9 = vpop.eup %4389 }
0x2d44   :  { %v3491_v35 = vmul.f32 %v4390_v9, %v3481_v23 }
0x2d46   :  { %3493 = vrot.lane.b32.xlu1 %v3491_v35, %s4436_s21 }
0x2db8   :  { %v3494_v10 = vpop.permute.xlu1 %3493 }
0x2db9   :  { %3496 = vst.msk [vmem:[#allocation2 + $0x70] sm:$0xff] %vm77_vm0, %v3494_v10  ;;  %3972 = vmatmul.msk.f32.vlgmr.msra.gmra.mxu2 %vm77_vm0, %v3494_v10  ;;  %3973 = vmatmul.msk.f32.vlgmr.msra.gmra.mxu3 %vm77_vm0, %v3494_v10 }
0x2dc0   :  { %v3608_v51 = vld [vmem:[#allocation2 + $0x70] sm:$0xff] }
0x2dc1   :  { %3990 = vmatmul.msk.f32.gmra.mxu0 %vm77_vm0, %v3608_v51 }
0x2e3c   :  { %v3516_v13 = vpop.f32.mrf.mxu2  ;;  %v3536_v27 = vpop.f32.mrf.mxu3 }
0x2e3d   :  { %v3539_v24 = vadd.f32 %v3516_v13, %v1977_v26  ;;  %v3540_v56 = vadd.f32 %v3536_v27, %v2042_v58 }
0x2e3e   :  { %v3729_v39 = vpop.f32.mrf.mxu0 }
0x2e3f   :  { %v3974_v63 = vmul.f32 -1.442695, %v3539_v24  ;;  %v3730_v36 = vadd.f32 %v6060_v60, %v3729_v39  ;;  %v3975_v22 = vmul.f32 -1.442695, %v3540_v56 }
0x2e41   :  { %4391 = vpow2.f32 %v3974_v63  ;;  %3749 = vst [vmem:[%s6149_s6 + $0x70] sm:$0xff] %v3730_v36 }
0x2e47   :  { %v4392_v44 = vpop.eup %4391 }
0x2e48   :  { %v3544_v41 = vadd.f32 1.0, %v4392_v44 }
0x2e4a   :  { %4393 = vrcp.f32 %v3544_v41  ;;  %v3556_v30 = vand.u32 2147483648, %v3544_v41  ;;  %v3554_v38 = vand.u32 2147483647, %v3544_v41  ;;  %vm3550_vm10 = vweird.f32 %v3544_v41 }
0x2e4b   :  { %4395 = vtanh.f32 %v3540_v56 }
0x2e4c   :  { %v3557_v21 = vor.u32 1.1754944e-38, %v3556_v30  ;;  %vm3555_vm12 = vcmp.eq.f32.partialorder %v3554_v38, 8.507059e+37  ;;  %4397 = vpow2.f32 %v3975_v22 }
0x2e50   :  { %v4394_v29 = vpop.eup %4393 }
0x2e51   :  { %v3546_v52 = vmul.f32 %v4394_v29, %v3544_v41  ;;  %vm3551_vm9 = vweird.f32 %v4394_v29  ;;  %v4396_v25 = vpop.eup %4395 }
0x2e52   :  { %vm3552_vm11 = vmor %vm3550_vm10, %vm3551_vm9  ;;  %v4398_v12 = vpop.eup %4397 }
0x2e53   :  { %v3547_v6 = vsub.f32 1.0, %v3546_v52  ;;  %v3564_v62 = vadd.f32 1.0, %v4398_v12 }
0x2e55   :  { %v3548_v3 = vmul.f32 %v4394_v29, %v3547_v6  ;;  %4399 = vrcp.f32 %v3564_v62  ;;  %v3576_v8 = vand.u32 2147483648, %v3564_v62  ;;  %vm3570_vm14 = vweird.f32 %v3564_v62 }
0x2e56   :  { %v3574_v19 = vand.u32 2147483647, %v3564_v62 }
0x2e57   :  { %v3549_v37 = vadd.f32 %v4394_v29, %v3548_v3  ;;  %v3577_v46 = vor.u32 1.1754944e-38, %v3576_v8 }
0x2e58   :  { %vm3575_vm1 = vcmp.eq.f32.partialorder %v3574_v19, 8.507059e+37 }
0x2e59   :  { %v3553_v32 = vsel %vm3552_vm11, %v4394_v29, %v3549_v37 }
0x2e5a   :  { %v3558_v34 = vsel %vm3555_vm12, %v3557_v21, %v3553_v32 }
0x2e5b   :  { %v3581_v18 = vmul.f32 %v4396_v25, %v3558_v34  ;;  %v4400_v4 = vpop.eup %4399  ;;  %v3580_v49 = vmul.f32 %v3558_v34, %v3489_v45 }
0x2e5c   :  { %v3566_v11 = vmul.f32 %v4400_v4, %v3564_v62  ;;  %vm3571_vm13 = vweird.f32 %v4400_v4 }
0x2e5d   :  { %3583 = vrot.lane.b32.xlu2 %v3581_v18, %s4436_s21  ;;  %vm3572_vm15 = vmor %vm3570_vm14, %vm3571_vm13 }
0x2e5e   :  { %v3567_v2 = vsub.f32 1.0, %v3566_v11 }
0x2e60   :  { %v3568_v59 = vmul.f32 %v4400_v4, %v3567_v2 }
0x2e62   :  { %v3569_v14 = vadd.f32 %v4400_v4, %v3568_v59 }
0x2e64   :  { %v3573_v17 = vsel %vm3572_vm15, %v4400_v4, %v3569_v14 }
0x2e65   :  { %v3578_v31 = vsel %vm3575_vm1, %v3577_v46, %v3573_v17 }
0x2eb7   :  { %v3584_v48 = vpop.permute.xlu2 %3583 }
0x2eb8   :  { %v3586_v1 = vadd.f32 %v3584_v48, %v3580_v49 }
0x2eba   :  { %4401 = vtanh.f32 %v3586_v1 }
0x2ec0   :  { %v4402_v55 = vpop.eup %4401 }
0x2ec1   :  { %v3588_v20 = vmul.f32 %v4402_v55, %v3578_v31 }
0x2ec3   :  { %3590 = vrot.lane.b32.xlu0 %v3588_v20, %s4436_s21 }
0x2f35   :  { %v3591_v54 = vpop.permute.xlu0 %3590 }
0x2f36   :  { %3593 = vst.msk [vmem:[#allocation2 + $0x78] sm:$0xff] %vm77_vm0, %v3591_v54 }
0x2f3d   :  { %v3609_v33 = vld [vmem:[#allocation2 + $0x78] sm:$0xff] }
0x2f3e   :  { %3991 = vmatmul.msk.f32.gmra.mxu0 %vm77_vm0, %v3609_v33 }
0x2fbb   :  { %v3732_v28 = vpop.f32.mrf.mxu0 }
0x2fbc   :  { %v3733_v47 = vadd.f32 %v6060_v60, %v3732_v28 }
0x2fbe   :  { %3750 = vst [vmem:[%s6149_s6 + $0x78] sm:$0xff] %v3733_v47 }

</bundles_post_ra>
